<compile_context>
chip_gen: v5e
topology: v5e:2x2
jax: 0.10.0
libtpu: 0.0.40
codegen_flags: <defaults>
</compile_context>

<pallas_src>
import functools
import math

import jax
import jax.numpy as jnp
from jax.experimental import pallas as pl
from jax.experimental.pallas import tpu as pltpu


def _layernorm(x, gamma, beta, eps=1e-5):
    # PyTorch nn.LayerNorm: biased variance, eps inside sqrt, affine.
    mu = jnp.mean(x, axis=-1, keepdims=True)
    xc = x - mu
    var = jnp.mean(xc * xc, axis=-1, keepdims=True)
    return xc * jax.lax.rsqrt(var + eps) * gamma + beta


def _gelu_tanh(x):
    # tanh-approximate GELU: moves the transcendental to the EUP slot instead
    # of burning ~10 VALU multiplies on an erf polynomial over the (TQ, F) slab.
    # TODO(synk): restore an exact erf-based GELU if bit-exact torch.nn.GELU()
    # is required (tanh form max abs error ~3e-3).
    c = 0.7978845608028654  # sqrt(2/pi)
    return 0.5 * x * (1.0 + jnp.tanh(c * (x + 0.044715 * x * x * x)))


def cross_transformer_kernel(
    src1_ref, src2_ref,
    wproj_ref, bproj_ref,
    g13_ref, b13_ref,
    wq_ref, bq_ref,
    wkv_ref, bkv_ref,
    wo_ref, bo_ref,
    g12_ref, b12_ref,
    w11_ref, b11_ref,
    w12_ref, b12ff_ref,
    out_ref,
    kv_scratch,
    *, nhead):
    qi = pl.program_id(1)
    co = wq_ref.shape[1]
    dh = co // nhead
    scale = 1.0 / math.sqrt(dh)
    bf16 = jnp.bfloat16
    f32 = jnp.float32

    # ---- per-batch K/V: computed only at the first query tile of each batch ----
    @pl.when(qi == 0)
    def _compute_kv():
        x2 = src2_ref[0].T                                   # (N2, Cin), f32
        # input_proj (Conv1d, kernel_size=1) == per-point linear projection
        x2p = jnp.dot(x2.astype(bf16), wproj_ref[...],
                      preferred_element_type=f32) + bproj_ref[...]
        x2n = _layernorm(x2p, g13_ref[...], b13_ref[...])    # norm13(src2)
        kv = jnp.dot(x2n.astype(bf16), wkv_ref[...],
                     preferred_element_type=f32) + bkv_ref[...]   # (N2, 2*Co)
        kv_scratch[...] = kv.astype(bf16)

    # ---- query-side tile ----
    x1 = src1_ref[0].T                                       # (TQ, Cin), f32
    x1p = jnp.dot(x1.astype(bf16), wproj_ref[...],
                  preferred_element_type=f32) + bproj_ref[...]
    x1n = _layernorm(x1p, g13_ref[...], b13_ref[...])        # norm13(src1), (TQ, Co)

    q = jnp.dot(x1n.astype(bf16), wq_ref[...],
                preferred_element_type=f32) + bq_ref[...]
    q_bf = (q * scale).astype(bf16)                          # (TQ, Co)

    # ---- multi-head cross attention (query <- src1, key/value <- src2) ----
    # Output projection is fused into the head loop: attn = sum_h o_h @ Wo_h.
    acc = jnp.zeros((x1n.shape[0], co), f32)
    for h in range(nhead):                                   # nhead small & static
        lo = h * dh
        qh = q_bf[:, lo:lo + dh]                             # (TQ, dh)  bf16
        kh = kv_scratch[:, lo:lo + dh]                       # (N2, dh)  bf16
        vh = kv_scratch[:, co + lo:co + lo + dh]             # (N2, dh)  bf16
        # QK^T as an NT matmul (contract both on their last dim; no explicit .T)
        s = jax.lax.dot_general(qh, kh, (((1,), (1,)), ((), ())),
                                preferred_element_type=f32)  # (TQ, N2) f32
        s = s - jnp.max(s, axis=-1, keepdims=True)
        p = jnp.exp(s)
        p = p * pl.reciprocal(jnp.sum(p, axis=-1, keepdims=True), approx=True)
        o = jnp.dot(p.astype(bf16), vh, preferred_element_type=f32)   # (TQ, dh)
        acc = acc + jnp.dot(o.astype(bf16), wo_ref[h],
                            preferred_element_type=f32)               # (TQ, Co)
    attn = acc + bo_ref[...]

    # ---- residual + norm12 (dropout12 identity in eval) ----
    y = _layernorm(x1n + attn, g12_ref[...], b12_ref[...])

    # ---- feed-forward: linear11 -> GELU -> linear12, residual ----
    h1 = jnp.dot(y.astype(bf16), w11_ref[...],
                 preferred_element_type=f32) + b11_ref[...]
    h1 = _gelu_tanh(h1)
    h2 = jnp.dot(h1.astype(bf16), w12_ref[...],
                 preferred_element_type=f32) + b12ff_ref[...]

    out = y + h2                                             # (TQ, Co)
    # Store in native NCW layout (Co on sublanes, TQ=128-multiple on lanes):
    # lane-dense stores and no output transpose pass in the wrapper.
    out_ref[0] = out.T.astype(out_ref.dtype)


def make_params(key, d_model, d_model_out, dim_feedforward):
    C, Co, F = d_model, d_model_out, dim_feedforward
    keys = jax.random.split(key, 10)
    s = 0.05
    return dict(
        w_proj=jax.random.normal(keys[0], (Co, C), jnp.float32) * s,    # Conv1d weight (out,in)
        b_proj=jax.random.normal(keys[1], (Co,), jnp.float32) * s,
        g13=jnp.ones((Co,), jnp.float32),
        beta13=jnp.zeros((Co,), jnp.float32),
        in_proj_w=jax.random.normal(keys[2], (3 * Co, Co), jnp.float32) * s,  # MHA in_proj
        in_proj_b=jax.random.normal(keys[3], (3 * Co,), jnp.float32) * s,
        w_out=jax.random.normal(keys[4], (Co, Co), jnp.float32) * s,          # MHA out_proj
        b_out=jax.random.normal(keys[5], (Co,), jnp.float32) * s,
        g12=jnp.ones((Co,), jnp.float32),
        beta12=jnp.zeros((Co,), jnp.float32),
        w11=jax.random.normal(keys[6], (F, Co), jnp.float32) * s,
        b11=jax.random.normal(keys[7], (F,), jnp.float32) * s,
        w12=jax.random.normal(keys[8], (Co, F), jnp.float32) * s,
        b12=jax.random.normal(keys[9], (Co,), jnp.float32) * s,
    )


def cross_transformer_forward(src1, src2, params, nhead=4, tq=128):
    B, Cin, N1 = src1.shape
    _, _, N2 = src2.shape
    Co = params["w_proj"].shape[0]
    F = params["w11"].shape[0]
    assert Co % nhead == 0
    dh = Co // nhead

    tq = min(tq, N1)
    assert N1 % tq == 0, "N1 must be a multiple of the query tile size"

    f32, bf16 = jnp.float32, jnp.bfloat16
    src1 = src1.astype(f32)
    src2 = src2.astype(f32)

    # Weights pre-transposed to (in, out) and cast to bf16 for the MXU;
    # biases / LayerNorm params stay f32.
    wproj_t = params["w_proj"].T.astype(bf16)                       # (Cin, Co)
    bproj = params["b_proj"].reshape(1, Co).astype(f32)
    g13 = params["g13"].reshape(1, Co).astype(f32)
    b13 = params["beta13"].reshape(1, Co).astype(f32)
    wq_t = params["in_proj_w"][:Co].T.astype(bf16)                  # (Co, Co)
    bq = params["in_proj_b"][:Co].reshape(1, Co).astype(f32)
    # Fused K|V projection: one (Co, 2*Co) matmul with a lane-dense output.
    wkv_t = jnp.concatenate(
        [params["in_proj_w"][Co:2 * Co].T, params["in_proj_w"][2 * Co:].T],
        axis=1).astype(bf16)                                        # (Co, 2*Co)
    bkv = params["in_proj_b"][Co:].reshape(1, 2 * Co).astype(f32)
    # Output projection split per head so it can be fused into the head loop.
    wo_heads = params["w_out"].T.reshape(nhead, dh, Co).astype(bf16)  # (H, dh, Co)
    bo = params["b_out"].reshape(1, Co).astype(f32)
    g12 = params["g12"].reshape(1, Co).astype(f32)
    b12 = params["beta12"].reshape(1, Co).astype(f32)
    w11_t = params["w11"].T.astype(bf16)                            # (Co, F)
    b11 = params["b11"].reshape(1, F).astype(f32)
    w12_t = params["w12"].T.astype(bf16)                            # (F, Co)
    b12ff = params["b12"].reshape(1, Co).astype(f32)

    def _const_spec(arr):
        zero = (0,) * arr.ndim
        return pl.BlockSpec(arr.shape, lambda b, qi, _z=zero: _z)

    in_specs = [
        pl.BlockSpec((1, Cin, tq), lambda b, qi: (b, 0, qi)),   # src1 tile (NCW)
        pl.BlockSpec((1, Cin, N2), lambda b, qi: (b, 0, 0)),    # src2 (resident per batch)
        _const_spec(wproj_t), _const_spec(bproj),
        _const_spec(g13), _const_spec(b13),
        _const_spec(wq_t), _const_spec(bq),
        _const_spec(wkv_t), _const_spec(bkv),
        _const_spec(wo_heads), _const_spec(bo),
        _const_spec(g12), _const_spec(b12),
        _const_spec(w11_t), _const_spec(b11),
        _const_spec(w12_t), _const_spec(b12ff),
    ]
    out_spec = pl.BlockSpec((1, Co, tq), lambda b, qi: (b, 0, qi))

    kernel = functools.partial(cross_transformer_kernel, nhead=nhead)
    out = pl.pallas_call(
        kernel,
        grid=(B, N1 // tq),
        in_specs=in_specs,
        out_specs=out_spec,
        out_shape=jax.ShapeDtypeStruct((B, Co, N1), jnp.float32),
        scratch_shapes=[pltpu.VMEM((N2, 2 * Co), jnp.bfloat16)],   # per-batch K|V
        compiler_params=pltpu.CompilerParams(
            dimension_semantics=("parallel", "arbitrary"),
            vmem_limit_bytes=48 * 1024 * 1024),
    )(src1, src2, wproj_t, bproj, g13, b13, wq_t, bq, wkv_t, bkv,
      wo_heads, bo, g12, b12, w11_t, b11, w12_t, b12ff)

    # Output already in PyTorch layout (B, C_out, N1) — no wrapper transpose.
    return out


if __name__ == "__main__":
    key = jax.random.PRNGKey(0)
    k1, k2, kp = jax.random.split(key, 3)

    # Small, TPU-friendly shapes consistent with the module
    # (d_model_out a multiple of 128 for lane-dense stores, nhead divides it).
    B, d_model, d_model_out, nhead, dim_feedforward = 2, 64, 128, 4, 256
    N1, N2 = 256, 256

    src1 = jax.random.normal(k1, (B, d_model, N1), jnp.float32)
    src2 = jax.random.normal(k2, (B, d_model, N2), jnp.float32)
    params = make_params(kp, d_model, d_model_out, dim_feedforward)

    out = cross_transformer_forward(src1, src2, params, nhead=nhead)
    jax.block_until_ready(out)
    assert out.shape == (B, d_model_out, N1), out.shape
    assert bool(jnp.all(jnp.isfinite(out)))
    print("KERNEL_OK")
</pallas_src>

<mosaic_0001>
module attributes {stable_mosaic.version = 11 : i64} {
  func.func @cross_transformer_kernel(%arg0: i32, %arg1: i32, %arg2: memref<1x64x128xf32, #tpu.memory_space<vmem>>, %arg3: memref<1x64x256xf32, #tpu.memory_space<vmem>>, %arg4: memref<64x128xbf16, #tpu.memory_space<vmem>>, %arg5: memref<1x128xf32, #tpu.memory_space<vmem>>, %arg6: memref<1x128xf32, #tpu.memory_space<vmem>>, %arg7: memref<1x128xf32, #tpu.memory_space<vmem>>, %arg8: memref<128x128xbf16, #tpu.memory_space<vmem>>, %arg9: memref<1x128xf32, #tpu.memory_space<vmem>>, %arg10: memref<128x256xbf16, #tpu.memory_space<vmem>>, %arg11: memref<1x256xf32, #tpu.memory_space<vmem>>, %arg12: memref<4x32x128xbf16, #tpu.memory_space<vmem>>, %arg13: memref<1x128xf32, #tpu.memory_space<vmem>>, %arg14: memref<1x128xf32, #tpu.memory_space<vmem>>, %arg15: memref<1x128xf32, #tpu.memory_space<vmem>>, %arg16: memref<128x256xbf16, #tpu.memory_space<vmem>>, %arg17: memref<1x256xf32, #tpu.memory_space<vmem>>, %arg18: memref<256x128xbf16, #tpu.memory_space<vmem>>, %arg19: memref<1x128xf32, #tpu.memory_space<vmem>>, %arg20: memref<1x128x128xf32, #tpu.memory_space<vmem>>, %arg21: memref<256x256xbf16, #tpu.memory_space<vmem>>) attributes {dimension_semantics = [#tpu.dimension_semantics<parallel>, #tpu.dimension_semantics<arbitrary>], iteration_bounds = array<i64: 2, 2>, scalar_prefetch = 0 : i64, scratch_operands = 1 : i64, tpu.core_type = #tpu.core_type<tc>, window_params = [{transform_indices = @transform_0, window_bounds = array<i64: 1, 64, 128>}, {transform_indices = @transform_1, window_bounds = array<i64: 1, 64, 256>}, {pipeline_mode = #tpu.pipeline_mode<synchronous>, transform_indices = @transform_2, window_bounds = array<i64: 64, 128>}, {pipeline_mode = #tpu.pipeline_mode<synchronous>, transform_indices = @transform_3, window_bounds = array<i64: 1, 128>}, {pipeline_mode = #tpu.pipeline_mode<synchronous>, transform_indices = @transform_4, window_bounds = array<i64: 1, 128>}, {pipeline_mode = #tpu.pipeline_mode<synchronous>, transform_indices = @transform_5, window_bounds = array<i64: 1, 128>}, {pipeline_mode = #tpu.pipeline_mode<synchronous>, transform_indices = @transform_6, window_bounds = array<i64: 128, 128>}, {pipeline_mode = #tpu.pipeline_mode<synchronous>, transform_indices = @transform_7, window_bounds = array<i64: 1, 128>}, {pipeline_mode = #tpu.pipeline_mode<synchronous>, transform_indices = @transform_8, window_bounds = array<i64: 128, 256>}, {pipeline_mode = #tpu.pipeline_mode<synchronous>, transform_indices = @transform_9, window_bounds = array<i64: 1, 256>}, {pipeline_mode = #tpu.pipeline_mode<synchronous>, transform_indices = @transform_10, window_bounds = array<i64: 4, 32, 128>}, {pipeline_mode = #tpu.pipeline_mode<synchronous>, transform_indices = @transform_11, window_bounds = array<i64: 1, 128>}, {pipeline_mode = #tpu.pipeline_mode<synchronous>, transform_indices = @transform_12, window_bounds = array<i64: 1, 128>}, {pipeline_mode = #tpu.pipeline_mode<synchronous>, transform_indices = @transform_13, window_bounds = array<i64: 1, 128>}, {pipeline_mode = #tpu.pipeline_mode<synchronous>, transform_indices = @transform_14, window_bounds = array<i64: 128, 256>}, {pipeline_mode = #tpu.pipeline_mode<synchronous>, transform_indices = @transform_15, window_bounds = array<i64: 1, 256>}, {pipeline_mode = #tpu.pipeline_mode<synchronous>, transform_indices = @transform_16, window_bounds = array<i64: 256, 128>}, {pipeline_mode = #tpu.pipeline_mode<synchronous>, transform_indices = @transform_17, window_bounds = array<i64: 1, 128>}, {transform_indices = @transform_18, window_bounds = array<i64: 1, 128, 128>}]} {
    %c0_i32 = arith.constant 0 : i32
    %0 = arith.cmpi eq, %arg1, %c0_i32 : i32
    %1 = arith.extui %0 : i1 to i32
    %c0_i32_0 = arith.constant 0 : i32
    %2 = arith.cmpi ne, %1, %c0_i32_0 : i32
    scf.if %2 {
      %c0_89 = arith.constant 0 : index
      %c0_90 = arith.constant 0 : index
      %c0_91 = arith.constant 0 : index
      %184 = vector.load %arg3[%c0_89, %c0_90, %c0_91] : memref<1x64x256xf32, #tpu.memory_space<vmem>>, vector<1x64x256xf32>
      %185 = vector.shape_cast %184 : vector<1x64x256xf32> to vector<64x256xf32>
      %186 = tpu.transpose %185, [1, 0] : vector<64x256xf32> -> vector<256x64xf32>
      %187 = arith.truncf %186 : vector<256x64xf32> to vector<256x64xbf16>
      %c0_92 = arith.constant 0 : index
      %c0_93 = arith.constant 0 : index
      %188 = vector.load %arg4[%c0_92, %c0_93] : memref<64x128xbf16, #tpu.memory_space<vmem>>, vector<64x128xbf16>
      %cst_94 = arith.constant dense<0.000000e+00> : vector<256x128xf32>
      %189 = tpu.matmul %187, %188, %cst_94 {dimension_numbers = #tpu.dot_dimension_numbers<[1], [0], [0], [1], [0, 0, 1, 1], [], []>} : vector<256x64xbf16>, vector<64x128xbf16>, vector<256x128xf32> -> vector<256x128xf32>
      %c0_95 = arith.constant 0 : index
      %c0_96 = arith.constant 0 : index
      %190 = vector.load %arg5[%c0_95, %c0_96] : memref<1x128xf32, #tpu.memory_space<vmem>>, vector<1x128xf32>
      %191 = vector.broadcast %190 : vector<1x128xf32> to vector<256x128xf32>
      %192 = arith.addf %189, %191 : vector<256x128xf32>
      %c0_97 = arith.constant 0 : index
      %c0_98 = arith.constant 0 : index
      %193 = vector.load %arg6[%c0_97, %c0_98] : memref<1x128xf32, #tpu.memory_space<vmem>>, vector<1x128xf32>
      %c0_99 = arith.constant 0 : index
      %c0_100 = arith.constant 0 : index
      %194 = vector.load %arg7[%c0_99, %c0_100] : memref<1x128xf32, #tpu.memory_space<vmem>>, vector<1x128xf32>
      %cst_101 = arith.constant dense<0.000000e+00> : vector<256xf32>
      %195 = vector.multi_reduction <add>, %192, %cst_101 [1] : vector<256x128xf32> to vector<256xf32>
      %196 = vector.shape_cast %195 : vector<256xf32> to vector<256x1xf32>
      %cst_102 = arith.constant 1.280000e+02 : f32
      %197 = vector.broadcast %cst_102 : f32 to vector<256x1xf32>
      %198 = arith.divf %196, %197 : vector<256x1xf32>
      %199 = vector.broadcast %198 : vector<256x1xf32> to vector<256x128xf32>
      %200 = arith.subf %192, %199 : vector<256x128xf32>
      %201 = arith.mulf %200, %200 : vector<256x128xf32>
      %cst_103 = arith.constant dense<0.000000e+00> : vector<256xf32>
      %202 = vector.multi_reduction <add>, %201, %cst_103 [1] : vector<256x128xf32> to vector<256xf32>
      %203 = vector.shape_cast %202 : vector<256xf32> to vector<256x1xf32>
      %cst_104 = arith.constant 1.280000e+02 : f32
      %204 = vector.broadcast %cst_104 : f32 to vector<256x1xf32>
      %205 = arith.divf %203, %204 : vector<256x1xf32>
      %cst_105 = arith.constant 9.99999974E-6 : f32
      %206 = vector.broadcast %cst_105 : f32 to vector<256x1xf32>
      %207 = arith.addf %205, %206 : vector<256x1xf32>
      %208 = math.rsqrt %207 : vector<256x1xf32>
      %209 = vector.broadcast %208 : vector<256x1xf32> to vector<256x128xf32>
      %210 = arith.mulf %200, %209 : vector<256x128xf32>
      %211 = vector.broadcast %193 : vector<1x128xf32> to vector<256x128xf32>
      %212 = arith.mulf %210, %211 : vector<256x128xf32>
      %213 = vector.broadcast %194 : vector<1x128xf32> to vector<256x128xf32>
      %214 = arith.addf %212, %213 : vector<256x128xf32>
      %215 = arith.truncf %214 : vector<256x128xf32> to vector<256x128xbf16>
      %c0_106 = arith.constant 0 : index
      %c0_107 = arith.constant 0 : index
      %216 = vector.load %arg10[%c0_106, %c0_107] : memref<128x256xbf16, #tpu.memory_space<vmem>>, vector<128x256xbf16>
      %cst_108 = arith.constant dense<0.000000e+00> : vector<256x256xf32>
      %217 = tpu.matmul %215, %216, %cst_108 {dimension_numbers = #tpu.dot_dimension_numbers<[1], [0], [0], [1], [0, 0, 1, 1], [], []>} : vector<256x128xbf16>, vector<128x256xbf16>, vector<256x256xf32> -> vector<256x256xf32>
      %c0_109 = arith.constant 0 : index
      %c0_110 = arith.constant 0 : index
      %218 = vector.load %arg11[%c0_109, %c0_110] : memref<1x256xf32, #tpu.memory_space<vmem>>, vector<1x256xf32>
      %219 = vector.broadcast %218 : vector<1x256xf32> to vector<256x256xf32>
      %220 = arith.addf %217, %219 : vector<256x256xf32>
      %221 = arith.truncf %220 : vector<256x256xf32> to vector<256x256xbf16>
      %c0_111 = arith.constant 0 : index
      %c0_112 = arith.constant 0 : index
      %222 = vector.load %arg21[%c0_111, %c0_112] : memref<256x256xbf16, #tpu.memory_space<vmem>>, vector<256x256xbf16>
      tpu.vector_store %arg21[%c0_111, %c0_112], %221 {strides = array<i32>} : memref<256x256xbf16, #tpu.memory_space<vmem>>, vector<256x256xbf16>,
    } else {
    }
    %c0 = arith.constant 0 : index
    %c0_1 = arith.constant 0 : index
    %c0_2 = arith.constant 0 : index
    %3 = vector.load %arg2[%c0, %c0_1, %c0_2] : memref<1x64x128xf32, #tpu.memory_space<vmem>>, vector<1x64x128xf32>
    %4 = vector.shape_cast %3 : vector<1x64x128xf32> to vector<64x128xf32>
    %5 = tpu.transpose %4, [1, 0] : vector<64x128xf32> -> vector<128x64xf32>
    %6 = arith.truncf %5 : vector<128x64xf32> to vector<128x64xbf16>
    %c0_3 = arith.constant 0 : index
    %c0_4 = arith.constant 0 : index
    %7 = vector.load %arg4[%c0_3, %c0_4] : memref<64x128xbf16, #tpu.memory_space<vmem>>, vector<64x128xbf16>
    %cst = arith.constant dense<0.000000e+00> : vector<128x128xf32>
    %8 = tpu.matmul %6, %7, %cst {dimension_numbers = #tpu.dot_dimension_numbers<[1], [0], [0], [1], [0, 0, 1, 1], [], []>} : vector<128x64xbf16>, vector<64x128xbf16>, vector<128x128xf32> -> vector<128x128xf32>
    %c0_5 = arith.constant 0 : index
    %c0_6 = arith.constant 0 : index
    %9 = vector.load %arg5[%c0_5, %c0_6] : memref<1x128xf32, #tpu.memory_space<vmem>>, vector<1x128xf32>
    %10 = vector.broadcast %9 : vector<1x128xf32> to vector<128x128xf32>
    %11 = arith.addf %8, %10 : vector<128x128xf32>
    %c0_7 = arith.constant 0 : index
    %c0_8 = arith.constant 0 : index
    %12 = vector.load %arg6[%c0_7, %c0_8] : memref<1x128xf32, #tpu.memory_space<vmem>>, vector<1x128xf32>
    %c0_9 = arith.constant 0 : index
    %c0_10 = arith.constant 0 : index
    %13 = vector.load %arg7[%c0_9, %c0_10] : memref<1x128xf32, #tpu.memory_space<vmem>>, vector<1x128xf32>
    %cst_11 = arith.constant dense<0.000000e+00> : vector<128xf32>
    %14 = vector.multi_reduction <add>, %11, %cst_11 [1] : vector<128x128xf32> to vector<128xf32>
    %15 = vector.shape_cast %14 : vector<128xf32> to vector<128x1xf32>
    %cst_12 = arith.constant 1.280000e+02 : f32
    %16 = vector.broadcast %cst_12 : f32 to vector<128x1xf32>
    %17 = arith.divf %15, %16 : vector<128x1xf32>
    %18 = vector.broadcast %17 : vector<128x1xf32> to vector<128x128xf32>
    %19 = arith.subf %11, %18 : vector<128x128xf32>
    %20 = arith.mulf %19, %19 : vector<128x128xf32>
    %cst_13 = arith.constant dense<0.000000e+00> : vector<128xf32>
    %21 = vector.multi_reduction <add>, %20, %cst_13 [1] : vector<128x128xf32> to vector<128xf32>
    %22 = vector.shape_cast %21 : vector<128xf32> to vector<128x1xf32>
    %cst_14 = arith.constant 1.280000e+02 : f32
    %23 = vector.broadcast %cst_14 : f32 to vector<128x1xf32>
    %24 = arith.divf %22, %23 : vector<128x1xf32>
    %cst_15 = arith.constant 9.99999974E-6 : f32
    %25 = vector.broadcast %cst_15 : f32 to vector<128x1xf32>
    %26 = arith.addf %24, %25 : vector<128x1xf32>
    %27 = math.rsqrt %26 : vector<128x1xf32>
    %28 = vector.broadcast %27 : vector<128x1xf32> to vector<128x128xf32>
    %29 = arith.mulf %19, %28 : vector<128x128xf32>
    %30 = vector.broadcast %12 : vector<1x128xf32> to vector<128x128xf32>
    %31 = arith.mulf %29, %30 : vector<128x128xf32>
    %32 = vector.broadcast %13 : vector<1x128xf32> to vector<128x128xf32>
    %33 = arith.addf %31, %32 : vector<128x128xf32>
    %34 = arith.truncf %33 : vector<128x128xf32> to vector<128x128xbf16>
    %c0_16 = arith.constant 0 : index
    %c0_17 = arith.constant 0 : index
    %35 = vector.load %arg8[%c0_16, %c0_17] : memref<128x128xbf16, #tpu.memory_space<vmem>>, vector<128x128xbf16>
    %cst_18 = arith.constant dense<0.000000e+00> : vector<128x128xf32>
    %36 = tpu.matmul %34, %35, %cst_18 {dimension_numbers = #tpu.dot_dimension_numbers<[1], [0], [0], [1], [0, 0, 1, 1], [], []>} : vector<128x128xbf16>, vector<128x128xbf16>, vector<128x128xf32> -> vector<128x128xf32>
    %c0_19 = arith.constant 0 : index
    %c0_20 = arith.constant 0 : index
    %37 = vector.load %arg9[%c0_19, %c0_20] : memref<1x128xf32, #tpu.memory_space<vmem>>, vector<1x128xf32>
    %38 = vector.broadcast %37 : vector<1x128xf32> to vector<128x128xf32>
    %39 = arith.addf %36, %38 : vector<128x128xf32>
    %cst_21 = arith.constant 0.176776692 : f32
    %40 = vector.broadcast %cst_21 : f32 to vector<128x128xf32>
    %41 = arith.mulf %39, %40 : vector<128x128xf32>
    %42 = arith.truncf %41 : vector<128x128xf32> to vector<128x128xbf16>
    %cst_22 = arith.constant 0.000000e+00 : f32
    %43 = vector.broadcast %cst_22 : f32 to vector<128x128xf32>
    %44 = vector.extract_strided_slice %42 {offsets = [0, 0], sizes = [128, 32], strides = [1, 1]} : vector<128x128xbf16> to vector<128x32xbf16>
    %c0_23 = arith.constant 0 : index
    %c0_24 = arith.constant 0 : index
    %45 = vector.load %arg21[%c0_23, %c0_24] : memref<256x256xbf16, #tpu.memory_space<vmem>>, vector<256x32xbf16>
    %c0_25 = arith.constant 0 : index
    %c128 = arith.constant 128 : index
    %46 = vector.load %arg21[%c0_25, %c128] : memref<256x256xbf16, #tpu.memory_space<vmem>>, vector<256x32xbf16>
    %cst_26 = arith.constant dense<0.000000e+00> : vector<128x256xf32>
    %47 = tpu.matmul %44, %45, %cst_26 {dimension_numbers = #tpu.dot_dimension_numbers<[1], [1], [0], [0], [0, 0, 1, 0], [], []>} : vector<128x32xbf16>, vector<256x32xbf16>, vector<128x256xf32> -> vector<128x256xf32>
    %cst_27 = arith.constant dense<0xFF800000> : vector<128xf32>
    %48 = vector.multi_reduction <maximumf>, %47, %cst_27 [1] : vector<128x256xf32> to vector<128xf32>
    %49 = vector.shape_cast %48 : vector<128xf32> to vector<128x1xf32>
    %50 = vector.broadcast %49 : vector<128x1xf32> to vector<128x256xf32>
    %51 = arith.subf %47, %50 : vector<128x256xf32>
    %52 = math.exp %51 : vector<128x256xf32>
    %cst_28 = arith.constant dense<0.000000e+00> : vector<128xf32>
    %53 = vector.multi_reduction <add>, %52, %cst_28 [1] : vector<128x256xf32> to vector<128xf32>
    %54 = vector.shape_cast %53 : vector<128xf32> to vector<128x1xf32>
    %55 = tpu.reciprocal %54 {approx = true} : vector<128x1xf32> -> vector<128x1xf32>
    %56 = vector.broadcast %55 : vector<128x1xf32> to vector<128x256xf32>
    %57 = arith.mulf %52, %56 : vector<128x256xf32>
    %58 = arith.truncf %57 : vector<128x256xf32> to vector<128x256xbf16>
    %cst_29 = arith.constant dense<0.000000e+00> : vector<128x32xf32>
    %59 = tpu.matmul %58, %46, %cst_29 {dimension_numbers = #tpu.dot_dimension_numbers<[1], [0], [0], [1], [0, 0, 1, 1], [], []>} : vector<128x256xbf16>, vector<256x32xbf16>, vector<128x32xf32> -> vector<128x32xf32>
    %60 = arith.truncf %59 : vector<128x32xf32> to vector<128x32xbf16>
    %c0_30 = arith.constant 0 : index
    %c0_31 = arith.constant 0 : index
    %c0_32 = arith.constant 0 : index
    %61 = vector.load %arg12[%c0_30, %c0_31, %c0_32] : memref<4x32x128xbf16, #tpu.memory_space<vmem>>, vector<1x32x128xbf16>
    %62 = vector.shape_cast %61 : vector<1x32x128xbf16> to vector<32x128xbf16>
    %cst_33 = arith.constant dense<0.000000e+00> : vector<128x128xf32>
    %63 = tpu.matmul %60, %62, %cst_33 {dimension_numbers = #tpu.dot_dimension_numbers<[1], [0], [0], [1], [0, 0, 1, 1], [], []>} : vector<128x32xbf16>, vector<32x128xbf16>, vector<128x128xf32> -> vector<128x128xf32>
    %64 = arith.addf %43, %63 : vector<128x128xf32>
    %65 = vector.extract_strided_slice %42 {offsets = [0, 32], sizes = [128, 32], strides = [1, 1]} : vector<128x128xbf16> to vector<128x32xbf16>
    %c0_34 = arith.constant 0 : index
    %c32 = arith.constant 32 : index
    %66 = vector.load %arg21[%c0_34, %c32] : memref<256x256xbf16, #tpu.memory_space<vmem>>, vector<256x32xbf16>
    %c0_35 = arith.constant 0 : index
    %c160 = arith.constant 160 : index
    %67 = vector.load %arg21[%c0_35, %c160] : memref<256x256xbf16, #tpu.memory_space<vmem>>, vector<256x32xbf16>
    %cst_36 = arith.constant dense<0.000000e+00> : vector<128x256xf32>
    %68 = tpu.matmul %65, %66, %cst_36 {dimension_numbers = #tpu.dot_dimension_numbers<[1], [1], [0], [0], [0, 0, 1, 0], [], []>} : vector<128x32xbf16>, vector<256x32xbf16>, vector<128x256xf32> -> vector<128x256xf32>
    %cst_37 = arith.constant dense<0xFF800000> : vector<128xf32>
    %69 = vector.multi_reduction <maximumf>, %68, %cst_37 [1] : vector<128x256xf32> to vector<128xf32>
    %70 = vector.shape_cast %69 : vector<128xf32> to vector<128x1xf32>
    %71 = vector.broadcast %70 : vector<128x1xf32> to vector<128x256xf32>
    %72 = arith.subf %68, %71 : vector<128x256xf32>
    %73 = math.exp %72 : vector<128x256xf32>
    %cst_38 = arith.constant dense<0.000000e+00> : vector<128xf32>
    %74 = vector.multi_reduction <add>, %73, %cst_38 [1] : vector<128x256xf32> to vector<128xf32>
    %75 = vector.shape_cast %74 : vector<128xf32> to vector<128x1xf32>
    %76 = tpu.reciprocal %75 {approx = true} : vector<128x1xf32> -> vector<128x1xf32>
    %77 = vector.broadcast %76 : vector<128x1xf32> to vector<128x256xf32>
    %78 = arith.mulf %73, %77 : vector<128x256xf32>
    %79 = arith.truncf %78 : vector<128x256xf32> to vector<128x256xbf16>
    %cst_39 = arith.constant dense<0.000000e+00> : vector<128x32xf32>
    %80 = tpu.matmul %79, %67, %cst_39 {dimension_numbers = #tpu.dot_dimension_numbers<[1], [0], [0], [1], [0, 0, 1, 1], [], []>} : vector<128x256xbf16>, vector<256x32xbf16>, vector<128x32xf32> -> vector<128x32xf32>
    %81 = arith.truncf %80 : vector<128x32xf32> to vector<128x32xbf16>
    %c1 = arith.constant 1 : index
    %c0_40 = arith.constant 0 : index
    %c0_41 = arith.constant 0 : index
    %82 = vector.load %arg12[%c1, %c0_40, %c0_41] : memref<4x32x128xbf16, #tpu.memory_space<vmem>>, vector<1x32x128xbf16>
    %83 = vector.shape_cast %82 : vector<1x32x128xbf16> to vector<32x128xbf16>
    %cst_42 = arith.constant dense<0.000000e+00> : vector<128x128xf32>
    %84 = tpu.matmul %81, %83, %cst_42 {dimension_numbers = #tpu.dot_dimension_numbers<[1], [0], [0], [1], [0, 0, 1, 1], [], []>} : vector<128x32xbf16>, vector<32x128xbf16>, vector<128x128xf32> -> vector<128x128xf32>
    %85 = arith.addf %64, %84 : vector<128x128xf32>
    %86 = vector.extract_strided_slice %42 {offsets = [0, 64], sizes = [128, 32], strides = [1, 1]} : vector<128x128xbf16> to vector<128x32xbf16>
    %c0_43 = arith.constant 0 : index
    %c64 = arith.constant 64 : index
    %87 = vector.load %arg21[%c0_43, %c64] : memref<256x256xbf16, #tpu.memory_space<vmem>>, vector<256x32xbf16>
    %c0_44 = arith.constant 0 : index
    %c192 = arith.constant 192 : index
    %88 = vector.load %arg21[%c0_44, %c192] : memref<256x256xbf16, #tpu.memory_space<vmem>>, vector<256x32xbf16>
    %cst_45 = arith.constant dense<0.000000e+00> : vector<128x256xf32>
    %89 = tpu.matmul %86, %87, %cst_45 {dimension_numbers = #tpu.dot_dimension_numbers<[1], [1], [0], [0], [0, 0, 1, 0], [], []>} : vector<128x32xbf16>, vector<256x32xbf16>, vector<128x256xf32> -> vector<128x256xf32>
    %cst_46 = arith.constant dense<0xFF800000> : vector<128xf32>
    %90 = vector.multi_reduction <maximumf>, %89, %cst_46 [1] : vector<128x256xf32> to vector<128xf32>
    %91 = vector.shape_cast %90 : vector<128xf32> to vector<128x1xf32>
    %92 = vector.broadcast %91 : vector<128x1xf32> to vector<128x256xf32>
    %93 = arith.subf %89, %92 : vector<128x256xf32>
    %94 = math.exp %93 : vector<128x256xf32>
    %cst_47 = arith.constant dense<0.000000e+00> : vector<128xf32>
    %95 = vector.multi_reduction <add>, %94, %cst_47 [1] : vector<128x256xf32> to vector<128xf32>
    %96 = vector.shape_cast %95 : vector<128xf32> to vector<128x1xf32>
    %97 = tpu.reciprocal %96 {approx = true} : vector<128x1xf32> -> vector<128x1xf32>
    %98 = vector.broadcast %97 : vector<128x1xf32> to vector<128x256xf32>
    %99 = arith.mulf %94, %98 : vector<128x256xf32>
    %100 = arith.truncf %99 : vector<128x256xf32> to vector<128x256xbf16>
    %cst_48 = arith.constant dense<0.000000e+00> : vector<128x32xf32>
    %101 = tpu.matmul %100, %88, %cst_48 {dimension_numbers = #tpu.dot_dimension_numbers<[1], [0], [0], [1], [0, 0, 1, 1], [], []>} : vector<128x256xbf16>, vector<256x32xbf16>, vector<128x32xf32> -> vector<128x32xf32>
    %102 = arith.truncf %101 : vector<128x32xf32> to vector<128x32xbf16>
    %c2 = arith.constant 2 : index
    %c0_49 = arith.constant 0 : index
    %c0_50 = arith.constant 0 : index
    %103 = vector.load %arg12[%c2, %c0_49, %c0_50] : memref<4x32x128xbf16, #tpu.memory_space<vmem>>, vector<1x32x128xbf16>
    %104 = vector.shape_cast %103 : vector<1x32x128xbf16> to vector<32x128xbf16>
    %cst_51 = arith.constant dense<0.000000e+00> : vector<128x128xf32>
    %105 = tpu.matmul %102, %104, %cst_51 {dimension_numbers = #tpu.dot_dimension_numbers<[1], [0], [0], [1], [0, 0, 1, 1], [], []>} : vector<128x32xbf16>, vector<32x128xbf16>, vector<128x128xf32> -> vector<128x128xf32>
    %106 = arith.addf %85, %105 : vector<128x128xf32>
    %107 = vector.extract_strided_slice %42 {offsets = [0, 96], sizes = [128, 32], strides = [1, 1]} : vector<128x128xbf16> to vector<128x32xbf16>
    %c0_52 = arith.constant 0 : index
    %c96 = arith.constant 96 : index
    %108 = vector.load %arg21[%c0_52, %c96] : memref<256x256xbf16, #tpu.memory_space<vmem>>, vector<256x32xbf16>
    %c0_53 = arith.constant 0 : index
    %c224 = arith.constant 224 : index
    %109 = vector.load %arg21[%c0_53, %c224] : memref<256x256xbf16, #tpu.memory_space<vmem>>, vector<256x32xbf16>
    %cst_54 = arith.constant dense<0.000000e+00> : vector<128x256xf32>
    %110 = tpu.matmul %107, %108, %cst_54 {dimension_numbers = #tpu.dot_dimension_numbers<[1], [1], [0], [0], [0, 0, 1, 0], [], []>} : vector<128x32xbf16>, vector<256x32xbf16>, vector<128x256xf32> -> vector<128x256xf32>
    %cst_55 = arith.constant dense<0xFF800000> : vector<128xf32>
    %111 = vector.multi_reduction <maximumf>, %110, %cst_55 [1] : vector<128x256xf32> to vector<128xf32>
    %112 = vector.shape_cast %111 : vector<128xf32> to vector<128x1xf32>
    %113 = vector.broadcast %112 : vector<128x1xf32> to vector<128x256xf32>
    %114 = arith.subf %110, %113 : vector<128x256xf32>
    %115 = math.exp %114 : vector<128x256xf32>
    %cst_56 = arith.constant dense<0.000000e+00> : vector<128xf32>
    %116 = vector.multi_reduction <add>, %115, %cst_56 [1] : vector<128x256xf32> to vector<128xf32>
    %117 = vector.shape_cast %116 : vector<128xf32> to vector<128x1xf32>
    %118 = tpu.reciprocal %117 {approx = true} : vector<128x1xf32> -> vector<128x1xf32>
    %119 = vector.broadcast %118 : vector<128x1xf32> to vector<128x256xf32>
    %120 = arith.mulf %115, %119 : vector<128x256xf32>
    %121 = arith.truncf %120 : vector<128x256xf32> to vector<128x256xbf16>
    %cst_57 = arith.constant dense<0.000000e+00> : vector<128x32xf32>
    %122 = tpu.matmul %121, %109, %cst_57 {dimension_numbers = #tpu.dot_dimension_numbers<[1], [0], [0], [1], [0, 0, 1, 1], [], []>} : vector<128x256xbf16>, vector<256x32xbf16>, vector<128x32xf32> -> vector<128x32xf32>
    %123 = arith.truncf %122 : vector<128x32xf32> to vector<128x32xbf16>
    %c3 = arith.constant 3 : index
    %c0_58 = arith.constant 0 : index
    %c0_59 = arith.constant 0 : index
    %124 = vector.load %arg12[%c3, %c0_58, %c0_59] : memref<4x32x128xbf16, #tpu.memory_space<vmem>>, vector<1x32x128xbf16>
    %125 = vector.shape_cast %124 : vector<1x32x128xbf16> to vector<32x128xbf16>
    %cst_60 = arith.constant dense<0.000000e+00> : vector<128x128xf32>
    %126 = tpu.matmul %123, %125, %cst_60 {dimension_numbers = #tpu.dot_dimension_numbers<[1], [0], [0], [1], [0, 0, 1, 1], [], []>} : vector<128x32xbf16>, vector<32x128xbf16>, vector<128x128xf32> -> vector<128x128xf32>
    %127 = arith.addf %106, %126 : vector<128x128xf32>
    %c0_61 = arith.constant 0 : index
    %c0_62 = arith.constant 0 : index
    %128 = vector.load %arg13[%c0_61, %c0_62] : memref<1x128xf32, #tpu.memory_space<vmem>>, vector<1x128xf32>
    %129 = vector.broadcast %128 : vector<1x128xf32> to vector<128x128xf32>
    %130 = arith.addf %127, %129 : vector<128x128xf32>
    %131 = arith.addf %33, %130 : vector<128x128xf32>
    %c0_63 = arith.constant 0 : index
    %c0_64 = arith.constant 0 : index
    %132 = vector.load %arg14[%c0_63, %c0_64] : memref<1x128xf32, #tpu.memory_space<vmem>>, vector<1x128xf32>
    %c0_65 = arith.constant 0 : index
    %c0_66 = arith.constant 0 : index
    %133 = vector.load %arg15[%c0_65, %c0_66] : memref<1x128xf32, #tpu.memory_space<vmem>>, vector<1x128xf32>
    %cst_67 = arith.constant dense<0.000000e+00> : vector<128xf32>
    %134 = vector.multi_reduction <add>, %131, %cst_67 [1] : vector<128x128xf32> to vector<128xf32>
    %135 = vector.shape_cast %134 : vector<128xf32> to vector<128x1xf32>
    %cst_68 = arith.constant 1.280000e+02 : f32
    %136 = vector.broadcast %cst_68 : f32 to vector<128x1xf32>
    %137 = arith.divf %135, %136 : vector<128x1xf32>
    %138 = vector.broadcast %137 : vector<128x1xf32> to vector<128x128xf32>
    %139 = arith.subf %131, %138 : vector<128x128xf32>
    %140 = arith.mulf %139, %139 : vector<128x128xf32>
    %cst_69 = arith.constant dense<0.000000e+00> : vector<128xf32>
    %141 = vector.multi_reduction <add>, %140, %cst_69 [1] : vector<128x128xf32> to vector<128xf32>
    %142 = vector.shape_cast %141 : vector<128xf32> to vector<128x1xf32>
    %cst_70 = arith.constant 1.280000e+02 : f32
    %143 = vector.broadcast %cst_70 : f32 to vector<128x1xf32>
    %144 = arith.divf %142, %143 : vector<128x1xf32>
    %cst_71 = arith.constant 9.99999974E-6 : f32
    %145 = vector.broadcast %cst_71 : f32 to vector<128x1xf32>
    %146 = arith.addf %144, %145 : vector<128x1xf32>
    %147 = math.rsqrt %146 : vector<128x1xf32>
    %148 = vector.broadcast %147 : vector<128x1xf32> to vector<128x128xf32>
    %149 = arith.mulf %139, %148 : vector<128x128xf32>
    %150 = vector.broadcast %132 : vector<1x128xf32> to vector<128x128xf32>
    %151 = arith.mulf %149, %150 : vector<128x128xf32>
    %152 = vector.broadcast %133 : vector<1x128xf32> to vector<128x128xf32>
    %153 = arith.addf %151, %152 : vector<128x128xf32>
    %154 = arith.truncf %153 : vector<128x128xf32> to vector<128x128xbf16>
    %c0_72 = arith.constant 0 : index
    %c0_73 = arith.constant 0 : index
    %155 = vector.load %arg16[%c0_72, %c0_73] : memref<128x256xbf16, #tpu.memory_space<vmem>>, vector<128x256xbf16>
    %cst_74 = arith.constant dense<0.000000e+00> : vector<128x256xf32>
    %156 = tpu.matmul %154, %155, %cst_74 {dimension_numbers = #tpu.dot_dimension_numbers<[1], [0], [0], [1], [0, 0, 1, 1], [], []>} : vector<128x128xbf16>, vector<128x256xbf16>, vector<128x256xf32> -> vector<128x256xf32>
    %c0_75 = arith.constant 0 : index
    %c0_76 = arith.constant 0 : index
    %157 = vector.load %arg17[%c0_75, %c0_76] : memref<1x256xf32, #tpu.memory_space<vmem>>, vector<1x256xf32>
    %158 = vector.broadcast %157 : vector<1x256xf32> to vector<128x256xf32>
    %159 = arith.addf %156, %158 : vector<128x256xf32>
    %cst_77 = arith.constant 5.000000e-01 : f32
    %160 = vector.broadcast %cst_77 : f32 to vector<128x256xf32>
    %161 = arith.mulf %160, %159 : vector<128x256xf32>
    %cst_78 = arith.constant 4.471500e-02 : f32
    %162 = vector.broadcast %cst_78 : f32 to vector<128x256xf32>
    %163 = arith.mulf %162, %159 : vector<128x256xf32>
    %164 = arith.mulf %163, %159 : vector<128x256xf32>
    %165 = arith.mulf %164, %159 : vector<128x256xf32>
    %166 = arith.addf %159, %165 : vector<128x256xf32>
    %cst_79 = arith.constant 0.797884583 : f32
    %167 = vector.broadcast %cst_79 : f32 to vector<128x256xf32>
    %168 = arith.mulf %167, %166 : vector<128x256xf32>
    %169 = math.tanh %168 : vector<128x256xf32>
    %cst_80 = arith.constant 1.000000e+00 : f32
    %170 = vector.broadcast %cst_80 : f32 to vector<128x256xf32>
    %171 = arith.addf %170, %169 : vector<128x256xf32>
    %172 = arith.mulf %161, %171 : vector<128x256xf32>
    %173 = arith.truncf %172 : vector<128x256xf32> to vector<128x256xbf16>
    %c0_81 = arith.constant 0 : index
    %c0_82 = arith.constant 0 : index
    %174 = vector.load %arg18[%c0_81, %c0_82] : memref<256x128xbf16, #tpu.memory_space<vmem>>, vector<256x128xbf16>
    %cst_83 = arith.constant dense<0.000000e+00> : vector<128x128xf32>
    %175 = tpu.matmul %173, %174, %cst_83 {dimension_numbers = #tpu.dot_dimension_numbers<[1], [0], [0], [1], [0, 0, 1, 1], [], []>} : vector<128x256xbf16>, vector<256x128xbf16>, vector<128x128xf32> -> vector<128x128xf32>
    %c0_84 = arith.constant 0 : index
    %c0_85 = arith.constant 0 : index
    %176 = vector.load %arg19[%c0_84, %c0_85] : memref<1x128xf32, #tpu.memory_space<vmem>>, vector<1x128xf32>
    %177 = vector.broadcast %176 : vector<1x128xf32> to vector<128x128xf32>
    %178 = arith.addf %175, %177 : vector<128x128xf32>
    %179 = arith.addf %153, %178 : vector<128x128xf32>
    %180 = tpu.transpose %179, [1, 0] : vector<128x128xf32> -> vector<128x128xf32>
    %c0_86 = arith.constant 0 : index
    %c0_87 = arith.constant 0 : index
    %c0_88 = arith.constant 0 : index
    %181 = vector.load %arg20[%c0_86, %c0_87, %c0_88] : memref<1x128x128xf32, #tpu.memory_space<vmem>>, vector<1x128x128xf32>
    %182 = vector.shape_cast %181 : vector<1x128x128xf32> to vector<128x128xf32>
    %183 = vector.shape_cast %180 : vector<128x128xf32> to vector<1x128x128xf32>
    tpu.vector_store %arg20[%c0_86, %c0_87, %c0_88], %183 {strides = array<i32>} : memref<1x128x128xf32, #tpu.memory_space<vmem>>, vector<1x128x128xf32>,
    return
  }
  func.func @transform_0(%arg0: i32, %arg1: i32) -> (i32, i32, i32) {
    %c0_i32 = arith.constant 0 : i32
    %c0_i32_0 = arith.constant 0 : i32
    return %arg0, %c0_i32, %arg1 : i32, i32, i32
  }
  func.func @transform_1(%arg0: i32, %arg1: i32) -> (i32, i32, i32) {
    %c0_i32 = arith.constant 0 : i32
    %c0_i32_0 = arith.constant 0 : i32
    %c0_i32_1 = arith.constant 0 : i32
    return %arg0, %c0_i32, %c0_i32_0 : i32, i32, i32
  }
  func.func @transform_2(%arg0: i32, %arg1: i32) -> (i32, i32) {
    %c0_i32 = arith.constant 0 : i32
    %c0_i32_0 = arith.constant 0 : i32
    %c0_i32_1 = arith.constant 0 : i32
    return %c0_i32, %c0_i32_0 : i32, i32
  }
  func.func @transform_3(%arg0: i32, %arg1: i32) -> (i32, i32) {
    %c0_i32 = arith.constant 0 : i32
    %c0_i32_0 = arith.constant 0 : i32
    %c0_i32_1 = arith.constant 0 : i32
    return %c0_i32, %c0_i32_0 : i32, i32
  }
  func.func @transform_4(%arg0: i32, %arg1: i32) -> (i32, i32) {
    %c0_i32 = arith.constant 0 : i32
    %c0_i32_0 = arith.constant 0 : i32
    %c0_i32_1 = arith.constant 0 : i32
    return %c0_i32, %c0_i32_0 : i32, i32
  }
  func.func @transform_5(%arg0: i32, %arg1: i32) -> (i32, i32) {
    %c0_i32 = arith.constant 0 : i32
    %c0_i32_0 = arith.constant 0 : i32
    %c0_i32_1 = arith.constant 0 : i32
    return %c0_i32, %c0_i32_0 : i32, i32
  }
  func.func @transform_6(%arg0: i32, %arg1: i32) -> (i32, i32) {
    %c0_i32 = arith.constant 0 : i32
    %c0_i32_0 = arith.constant 0 : i32
    %c0_i32_1 = arith.constant 0 : i32
    return %c0_i32, %c0_i32_0 : i32, i32
  }
  func.func @transform_7(%arg0: i32, %arg1: i32) -> (i32, i32) {
    %c0_i32 = arith.constant 0 : i32
    %c0_i32_0 = arith.constant 0 : i32
    %c0_i32_1 = arith.constant 0 : i32
    return %c0_i32, %c0_i32_0 : i32, i32
  }
  func.func @transform_8(%arg0: i32, %arg1: i32) -> (i32, i32) {
    %c0_i32 = arith.constant 0 : i32
    %c0_i32_0 = arith.constant 0 : i32
    %c0_i32_1 = arith.constant 0 : i32
    return %c0_i32, %c0_i32_0 : i32, i32
  }
  func.func @transform_9(%arg0: i32, %arg1: i32) -> (i32, i32) {
    %c0_i32 = arith.constant 0 : i32
    %c0_i32_0 = arith.constant 0 : i32
    %c0_i32_1 = arith.constant 0 : i32
    return %c0_i32, %c0_i32_0 : i32, i32
  }
  func.func @transform_10(%arg0: i32, %arg1: i32) -> (i32, i32, i32) {
    %c0_i32 = arith.constant 0 : i32
    %c0_i32_0 = arith.constant 0 : i32
    %c0_i32_1 = arith.constant 0 : i32
    %c0_i32_2 = arith.constant 0 : i32
    return %c0_i32, %c0_i32_0, %c0_i32_1 : i32, i32, i32
  }
  func.func @transform_11(%arg0: i32, %arg1: i32) -> (i32, i32) {
    %c0_i32 = arith.constant 0 : i32
    %c0_i32_0 = arith.constant 0 : i32
    %c0_i32_1 = arith.constant 0 : i32
    return %c0_i32, %c0_i32_0 : i32, i32
  }
  func.func @transform_12(%arg0: i32, %arg1: i32) -> (i32, i32) {
    %c0_i32 = arith.constant 0 : i32
    %c0_i32_0 = arith.constant 0 : i32
    %c0_i32_1 = arith.constant 0 : i32
    return %c0_i32, %c0_i32_0 : i32, i32
  }
  func.func @transform_13(%arg0: i32, %arg1: i32) -> (i32, i32) {
    %c0_i32 = arith.constant 0 : i32
    %c0_i32_0 = arith.constant 0 : i32
    %c0_i32_1 = arith.constant 0 : i32
    return %c0_i32, %c0_i32_0 : i32, i32
  }
  func.func @transform_14(%arg0: i32, %arg1: i32) -> (i32, i32) {
    %c0_i32 = arith.constant 0 : i32
    %c0_i32_0 = arith.constant 0 : i32
    %c0_i32_1 = arith.constant 0 : i32
    return %c0_i32, %c0_i32_0 : i32, i32
  }
  func.func @transform_15(%arg0: i32, %arg1: i32) -> (i32, i32) {
    %c0_i32 = arith.constant 0 : i32
    %c0_i32_0 = arith.constant 0 : i32
    %c0_i32_1 = arith.constant 0 : i32
    return %c0_i32, %c0_i32_0 : i32, i32
  }
  func.func @transform_16(%arg0: i32, %arg1: i32) -> (i32, i32) {
    %c0_i32 = arith.constant 0 : i32
    %c0_i32_0 = arith.constant 0 : i32
    %c0_i32_1 = arith.constant 0 : i32
    return %c0_i32, %c0_i32_0 : i32, i32
  }
  func.func @transform_17(%arg0: i32, %arg1: i32) -> (i32, i32) {
    %c0_i32 = arith.constant 0 : i32
    %c0_i32_0 = arith.constant 0 : i32
    %c0_i32_1 = arith.constant 0 : i32
    return %c0_i32, %c0_i32_0 : i32, i32
  }
  func.func @transform_18(%arg0: i32, %arg1: i32) -> (i32, i32, i32) {
    %c0_i32 = arith.constant 0 : i32
    %c0_i32_0 = arith.constant 0 : i32
    return %arg0, %c0_i32, %arg1 : i32, i32, i32
  }
}

</mosaic_0001>

<bundles_post_ra>
// kernel: tpu_custom_call.1
= control target key start
LH: loop header
LB: loop body
LE: loop exit
PB: predicated region body
PF: predicated region fallthrough
CT: control target
= control target key end

     0   :  { %s13267_s0 = inlined_call_operand.hbm [shape: f32[2,64,256], index: 0, kind: input, shape index: {}]   ;;  %s13268_s1 = inlined_call_operand.hbm [shape: f32[2,64,256], index: 1, kind: input, shape index: {}]   ;;  %s13269_s2 = inlined_call_operand.hbm [shape: bf16[64,128], index: 2, kind: input, shape index: {}]   ;;  %s13270_s3 = inlined_call_operand.hbm [shape: f32[1,128], index: 3, kind: input, shape index: {}]   ;;  %s13271_s4 = inlined_call_operand.hbm [shape: f32[1,128], index: 4, kind: input, shape index: {}]   ;;  %s13272_s5 = inlined_call_operand.hbm [shape: f32[1,128], index: 5, kind: input, shape index: {}]   ;;  %s13273_s6 = inlined_call_operand.hbm [shape: bf16[128,128], index: 6, kind: input, shape index: {}]   ;;  %s13274_s7 = inlined_call_operand.vmem [shape: f32[1,128], index: 7, kind: input, shape index: {}]   ;;  %s13275_s8 = inlined_call_operand.hbm [shape: bf16[128,256], index: 8, kind: input, shape index: {}]   ;;  %s13276_s9 = inlined_call_operand.vmem [shape: f32[1,256], index: 9, kind: input, shape index: {}]   ;;  %s13277_s10 = inlined_call_operand.hbm [shape: bf16[4,32,128], index: 10, kind: input, shape index: {}]   ;;  %s13278_s11 = inlined_call_operand.vmem [shape: f32[1,128], index: 11, kind: input, shape index: {}]   ;;  %s13279_s12 = inlined_call_operand.vmem [shape: f32[1,128], index: 12, kind: input, shape index: {}]   ;;  %s13280_s13 = inlined_call_operand.vmem [shape: f32[1,128], index: 13, kind: input, shape index: {}]   ;;  %s13281_s14 = inlined_call_operand.hbm [shape: bf16[128,256], index: 14, kind: input, shape index: {}]   ;;  %s13282_s15 = inlined_call_operand.vmem [shape: f32[1,256], index: 15, kind: input, shape index: {}]   ;;  %s13283_s16 = inlined_call_operand.hbm [shape: bf16[256,128], index: 16, kind: input, shape index: {}]   ;;  %s13284_s17 = inlined_call_operand.vmem [shape: f32[1,128], index: 17, kind: input, shape index: {}]   ;;  %s13285_s18 = inlined_call_operand.hbm [shape: f32[2,128,256], index: 18, kind: output, shape index: {}]  }
   0x1   :  { %13410 = sst [smem:[#allocation108_spill]] %s13267_s0 }
   0x2   :  { %13411 = sst [smem:[#allocation109_spill]] %s13268_s1 }
   0x3   :  { %13412 = sst [smem:[#allocation110_spill]] %s13269_s2 }
   0x4   :  { %13413 = sst [smem:[#allocation111_spill]] %s13270_s3 }
   0x5   :  { %13414 = sst [smem:[#allocation112_spill]] %s13271_s4 }
   0x6   :  { %13415 = sst [smem:[#allocation113_spill]] %s13272_s5 }
   0x7   :  { %13416 = sst [smem:[#allocation114_spill]] %s13273_s6 }
   0x8   :  { %13417 = sst [smem:[#allocation115_spill]] %s13274_s7 }
   0x9   :  { %13418 = sst [smem:[#allocation116_spill]] %s13275_s8 }
   0xa   :  { %13419 = sst [smem:[#allocation117_spill]] %s13276_s9 }
   0xb   :  { %13420 = sst [smem:[#allocation118_spill]] %s13277_s10 }
   0xc   :  { %13421 = sst [smem:[#allocation119_spill]] %s13278_s11 }
   0xd   :  { %13422 = sst [smem:[#allocation120_spill]] %s13279_s12 }
   0xe   :  { %13423 = sst [smem:[#allocation121_spill]] %s13280_s13 }
   0xf   :  { %13424 = sst [smem:[#allocation122_spill]] %s13281_s14 }
  0x10   :  { %13425 = sst [smem:[#allocation123_spill]] %s13282_s15 }
  0x11   :  { %13426 = sst [smem:[#allocation124_spill]] %s13283_s16 }
  0x12   :  { %13427 = sst [smem:[#allocation125_spill]] %s13284_s17 }
  0x13   :  { %13428 = sst [smem:[#allocation126_spill]] %s13285_s18 }
  0x14   :  { %23 = vsyncpa [#allocation4], 0 }
  0x15   :  { %25 = vsyncpa [#allocation4 + $0x1], 0 }
  0x16   :  { %26 = vsyncpa [#allocation7], 0 }
  0x17   :  { %28 = vsyncpa [#allocation7 + $0x1], 0 }
  0x18   :  { %29 = vsyncpa [#allocation10], 0 }
  0x19   :  { %30 = vsyncpa [#allocation13], 0 }
  0x1a   :  { %31 = vsyncpa [#allocation16], 0 }
  0x1b   :  { %32 = vsyncpa [#allocation19], 0 }
  0x1c   :  { %33 = vsyncpa [#allocation5], 0 }
  0x1d   :  { %35 = vsyncpa [#allocation5 + $0x1], 0  ;;  %s9461_s27 = smov 0   ;;  %s9463_s28 = smov 0  }
  0x1e   :  { %s9465_s29 = smov 0   ;;  %s9467_s30 = smov 0  }
  0x1f   :  { %s9469_s0 = smov 0   ;;  %s9471_s19 = smov 0  }
  0x20   :  { %s9473_s1 = smov 0   ;;  %s9475_s20 = smov 0  }
  0x21   :  { %s9477_s21 = smov 0   ;;  %s9479_s22 = smov 0  }
  0x22   :  { %s9481_s2 = smov 0  }
  0x23 LB: > { %13429 = sst [smem:[#allocation30_spill]] %s9301_s27  ;;  %s9517_s23 = sadd.s32 4294967295, %s9341_s2   ;;  %s9341_s2 = sphi %s9481_s2, %s41_s2   ;;  %s9337_s22 = sphi %s9479_s22, %s13694_s22   ;;  %s9333_s21 = sphi %s9477_s21, %s13693_s21   ;;  %s9329_s20 = sphi %s9475_s20, %s13692_s20   ;;  %s9325_s1 = sphi %s9473_s1, %s13691_s1   ;;  %s9321_s19 = sphi %s9471_s19, %s13690_s19   ;;  %s9317_s0 = sphi %s9469_s0, %s13689_s0   ;;  %s9313_s30 = sphi %s9467_s30, %s13688_s30   ;;  %s9309_s29 = sphi %s9465_s29, %s13687_s29   ;;  %s9305_s28 = sphi %s9463_s28, %s13686_s28   ;;  %s9301_s27 = sphi %s9461_s27, %s13683_s27  }
  0x24   : > { %13430 = sst [smem:[#allocation31_spill]] %s9305_s28  ;;  %p7338_p0 = scmp.ge.s32.totalorder %s9341_s2, 1 }
  0x25   : > { %13431 = sst [smem:[#allocation32_spill]] %s9325_s1  ;;  %p76_p1 = scmp.eq.s32.totalorder %s9517_s23, 0 }
  0x26   : > { %13432 = sst [smem:[#allocation33_spill]] %s9329_s20  ;;  %p476_p2 = scmp.lt.s32.totalorder %s9341_s2, 5 }
  0x27   : > { %s13433_s26 = sld [smem:[#allocation110_spill]]  ;;  %s9343_s17 = smov [#allocation8]  }
  0x28   : > { %p9525_p3 = pnand %p7338_p0, %p476_p2  ;;  %s489_s15 = sshll.u32 %s9343_s17, 4  ;;  %s490_s15 = int_to_ptr.vmem [resolvable:$true] %s489_s15 }
  0x29   : > { %s13437_s3 = sld [smem:[#allocation111_spill]]  ;;  %s13291_s25 = smov 64  }
  0x2a   : > { %s13434_s20 = scalar_select %p9525_p3, 1, 0 }
  0x2b   : > { %p8097_p4 = pneg %p9525_p3  ;;  %s9346_s17 = smov [#allocation9]  }
  0x2c   : > { %13435 = sst [smem:[#allocation34_spill]] %s13434_s20  ;;  %s504_s7 = sshll.u32 %s9346_s17, 4  ;;  %s505_s7 = int_to_ptr.vmem [resolvable:$true] %s504_s7 }
  0x2d   : > { %s487_s18 = sshll.u32 %s13433_s26, 4  ;;  %p9533_p5 = pnand %p8097_p4, %p76_p1  ;;  %s488_s18 = int_to_ptr.hbm [resolvable:$true] %s487_s18 }
  0x2e   : > { %s9345_s26 = smov 4   ;;  %s13438_s5 = sld [smem:[#allocation113_spill]] }
  0x2f   : > { %s502_s24 = sshll.u32 %s13437_s3, 4  ;;  %s13439_s8 = sld [smem:[#allocation116_spill]]  ;;  %s503_s24 = int_to_ptr.hbm [resolvable:$true] %s502_s24 }
  0x30   : > { %8100 = dma.hbm_to_vmem [thread:$0]  (!%p9533_p5), %s488_s18, 512, %s490_s15, [#allocation7], %s13291_s25, %s13291_s25, %s9345_s26  }
  0x31   : > { %8103 = dma.hbm_to_vmem [thread:$0]  (!%p9533_p5), %s503_s24, 16, %s505_s7, [#allocation10]  }
  0x32   : > { %s9347_s27 = smov [#allocation12]   ;;  %s9348_s15 = smov [#allocation15]  }
  0x33   : > { %s528_s28 = sshll.u32 %s9347_s27, 4  ;;  %s556_s18 = sshll.u32 %s9348_s15, 4  ;;  %s529_s28 = int_to_ptr.vmem [resolvable:$true] %s528_s28  ;;  %s557_s18 = int_to_ptr.vmem [resolvable:$true] %s556_s18 }
  0x34   : > { %s526_s20 = sshll.u32 %s13438_s5, 4  ;;  %s13293_s9 = smov 128   ;;  %s527_s20 = int_to_ptr.hbm [resolvable:$true] %s526_s20 }
  0x35   : > { %s554_s3 = sshll.u32 %s13439_s8, 4  ;;  %s13294_s1 = smov 8   ;;  %s555_s3 = int_to_ptr.hbm [resolvable:$true] %s554_s3 }
  0x36   : > { %8109 = dma.hbm_to_vmem [thread:$0]  (!%p9533_p5), %s527_s20, 16, %s529_s28, [#allocation13]  }
  0x37   : > { %8115 = dma.hbm_to_vmem [thread:$0]  (!%p9533_p5), %s555_s3, 2048, %s557_s18, [#allocation16], %s13293_s9, %s13293_s9, %s13294_s1  }
  0x38   : > { %s13440_s14 = sld [smem:[#allocation122_spill]]  ;;  %s9351_s17 = smov [#allocation18]  }
  0x39   : > { %s596_s11 = sshll.u32 %s9351_s17, 4  ;;  %s13441_s4 = sld [smem:[#allocation112_spill]]  ;;  %s597_s11 = int_to_ptr.vmem [resolvable:$true] %s596_s11 }
  0x3a   : > { %s9352_s3 = smov [#allocation11]   ;;  %s13442_s6 = sld [smem:[#allocation114_spill]] }
  0x3b   : > { %s516_s15 = sshll.u32 %s9352_s3, 4  ;;  %s13443_s10 = sld [smem:[#allocation118_spill]]  ;;  %s517_s15 = int_to_ptr.vmem [resolvable:$true] %s516_s15 }
  0x3c   : > { %s9353_s25 = smov [#allocation14]   ;;  %s13445_s16 = sld [smem:[#allocation124_spill]] }
  0x3d   : > { %s7337_s17 = sadd.s32 4294967294, %s9341_s2   ;;  %s50_s28 = sadd.s32 1, %s9333_s21 }
  0x3e   : > { %s594_s27 = sshll.u32 %s13440_s14, 4  ;;  %p51_p6 = scmp.ge.s32.totalorder %s50_s28, 2  ;;  %s595_s27 = int_to_ptr.hbm [resolvable:$true] %s594_s27 }
  0x3f   : > { %s514_s12 = sshll.u32 %s13441_s4, 4  ;;  %p69_p7 = scmp.ne.s32.totalorder %s9321_s19, %s9317_s0  ;;  %s515_s12 = int_to_ptr.hbm [resolvable:$true] %s514_s12 }
  0x40   : > { %8121 = dma.hbm_to_vmem [thread:$0]  (!%p9533_p5), %s595_s27, 2048, %s597_s11, [#allocation19], %s13293_s9, %s13293_s9, %s13294_s1  }
  0x41   : > { %s537_s24 = sshll.u32 %s13442_s6, 4  ;;  %s571_s20 = sshll.u32 %s13443_s10, 4  ;;  %s538_s24 = int_to_ptr.hbm [resolvable:$true] %s537_s24  ;;  %s572_s20 = int_to_ptr.hbm [resolvable:$true] %s571_s20 }
  0x42   : > { %8106 = dma.hbm_to_vmem [thread:$0]  (!%p9533_p5), %s515_s12, 16, %s517_s15, [#allocation10]  }
  0x43   : > { %s539_s27 = sshll.u32 %s9353_s25, 4  ;;  %s13444_s11 = smov 64   ;;  %s540_s27 = int_to_ptr.vmem [resolvable:$true] %s539_s27 }
  0x44   : > { %8112 = dma.hbm_to_vmem [thread:$0]  (!%p9533_p5), %s538_s24, 1024, %s540_s27, [#allocation13], %s13444_s11, %s13444_s11, %s9345_s26  }
  0x45   : > { %s9354_s12 = smov [#allocation17]   ;;  %s611_s7 = sshll.u32 %s13445_s16, 4  ;;  %s612_s7 = int_to_ptr.hbm [resolvable:$true] %s611_s7 }
  0x46   : > { %s573_s3 = sshll.u32 %s9354_s12, 4  ;;  %s9355_s25 = smov [#allocation20]   ;;  %s574_s3 = int_to_ptr.vmem [resolvable:$true] %s573_s3 }
  0x47   : > { %8118 = dma.hbm_to_vmem [thread:$0]  (!%p9533_p5), %s572_s20, 1024, %s574_s3, [#allocation16], %s13444_s11, %s13444_s11, %s9345_s26  }
  0x48   : > { %s613_s24 = sshll.u32 %s9355_s25, 4  ;;  %s53_s27 = sadd.s32 1, %s9337_s22  ;;  %s614_s24 = int_to_ptr.vmem [resolvable:$true] %s613_s24 }
  0x49   : > { %8124 = dma.hbm_to_vmem [thread:$0]  (!%p9533_p5), %s612_s7, 2048, %s614_s24, [#allocation19], %s13444_s11, %s13444_s11, %s9345_s26  }
  0x4a   : > { %s62_s12 = sadd.s32 1, %s9321_s19  ;;  %p70_p8 = scmp.eq.s32.totalorder %s9341_s2, 0 }
  0x4b   : > { %s13696_s28 = smov (%p51_p6, %s50_s28), 0  ;;  %s13698_s27 = smov (!%p51_p6, %s53_s27), %s9337_s22 }
  0x4c   : > { %s58_s13 = ssub.s32 %s9333_s21, %s13696_s28  ;;  %p9611_p9 = por %p70_p8, %p69_p7 }
  0x4d   : > { %p55_p10 = scmp.ge.s32.totalorder %s13698_s27, 2  ;;  %p75_p11 = scmp.ne.s32.totalorder %s9317_s0, %s9313_s30 }
  0x4e   : > { %p463_p12 = scmp.eq.s32.totalorder %s9517_s23, 3  ;;  %p469_p13 = scmp.eq.s32.totalorder %s7337_s17, 3 }
  0x4f   : > { %s13700_s27 = smov (%p55_p10, %s13698_s27), 0  ;;  %p9622_p0 = por %p76_p1, %p75_p11 }
  0x50   : > { %13447 = sst [smem:[#allocation35_spill]] %s13700_s27  ;;  %p9626_p2 = por %p463_p12, %p69_p7 }
  0x51   : > { %s57_s3 = ssub.s32 %s9337_s22, %s13700_s27  ;;  %p9632_p4 = por %p469_p13, %p75_p11 }
  0x52   : > { %s59_s18 = sor.u32 %s58_s13, %s57_s3  ;;  %p86_p5 = scmp.eq.s32.totalorder %s57_s3, 0 }
  0x53   : > { %p60_p6 = scmp.eq.s32.totalorder %s59_s18, 0  ;;  %p8145_p10 = scmp.lt.s32.totalorder %s9341_s2, 4 }
  0x54   : > { %s630_s7 = sand.u32 1, %s9321_s19   ;;  %s7350_s25 = sshll.u32 %s9337_s22, 4 }
  0x55   : > { %s9640_s24 = scalar_select %p60_p6, %s9321_s19, %s62_s12  }
  0x56   : > { %s13451_s17 = sld [smem:[#allocation31_spill]]  ;;  %s7349_s9 = sshll.u32 %s630_s7, 6 }
  0x57   : > { %s13452_s1 = sld [smem:[#allocation30_spill]]  ;;  %s638_s4 = sadd.s32 %s9333_s21, %s7350_s25 }
  0x58   : > { %s7351_s5 = sshll.u32 %s638_s4, 3  ;;  %s634_s6 = scalar_lea.vmem [#allocation3], %s7349_s9 }
  0x59   : > { %s643_s13 = sshll.u32 %s634_s6, 4  ;;  %s13453_s10 = sld [smem:[#allocation108_spill]]  ;;  %s644_s13 = int_to_ptr.vmem [resolvable:$true] %s643_s13 }
  0x5a   : > { %p8126_p7 = pnand %p8145_p10, %p9611_p9  ;;  %s631_s16 = scalar_lea.sflag [#allocation4], %s630_s7 }
  0x5b   : > { %s9356_s25 = smov 256   ;;  %s13454_s27 = smov 8  }
  0x5c   : > { %s13455_s4 = smov 128   ;;  %s88_s9 = sadd.s32 1, %s9309_s29 }
  0x5d   : > { %s9655_s6 = scalar_select %p86_p5, %s9309_s29, %s88_s9  }
  0x5e   : > { %p95_p11 = scmp.ne.s32.totalorder %s9309_s29, %s13451_s17  ;;  %p101_p12 = scmp.ne.s32.totalorder %s13451_s17, %s13452_s1 }
  0x5f   : > { %s640_s14 = scalar_lea.hbm %s13453_s10, %s7351_s5  ;;  %s653_s5 = sand.u32 1, %s9341_s2  }
  0x60   : > { %s641_s12 = sshll.u32 %s640_s14, 4  ;;  %s655_s8 = sand.u32 1, %s9309_s29   ;;  %s642_s12 = int_to_ptr.hbm [resolvable:$true] %s641_s12 }
  0x61   : > { %8128 = dma.hbm_to_vmem [thread:$0]  (!%p8126_p7), %s642_s12, 1024, %s644_s13, %s631_s16, %s9356_s25, %s13455_s4, %s13454_s27  }
  0x62   : > { %p97_p13 = por %p95_p11, %p70_p8  ;;  %p9667_p6 = por %p101_p12, %p76_p1 }
  0x63   : > { %s7352_s14 = sshll.u32 %s655_s8, 7  ;;  %s7910_s26 = sshll.u32 %s9337_s22, 7 }
  0x64   : > { %s13457_s27 = sld [smem:[#allocation109_spill]]  ;;  %s657_s13 = scalar_lea.vmem [#allocation6], %s7352_s14 }
  0x65   : > { %s665_s18 = sshll.u32 %s657_s13, 4  ;;  %p8129_p9 = pnand %p8145_p10, %p97_p13  ;;  %s666_s18 = int_to_ptr.vmem [resolvable:$true] %s665_s18 }
  0x66   : > { %s654_s1 = scalar_lea.sflag [#allocation7], %s653_s5  ;;  %s9357_s17 = smov 16  }
  0x68   : > { %677 = sbr.rel (%p9525_p3) target bundleno = 5468 (0x155c), region = 92 }
  0x6a   : > { %s662_s3 = scalar_lea.hbm %s13457_s27, %s7910_s26 }
  0x6b   : > { %s663_s12 = sshll.u32 %s662_s3, 4  ;;  %s664_s12 = int_to_ptr.hbm [resolvable:$true] %s663_s12 }
  0x6c   : > { %8131 = dma.hbm_to_vmem [thread:$0]  (!%p8129_p9), %s664_s12, 2048, %s666_s18, %s654_s1, %s9356_s25, %s9356_s25, %s9357_s17  }
  0x6d   : > { %s9680_s9 = sand.u32 1, %s9317_s0  }
  0x6e   : > { %s7356_s8 = sshll.u32 %s9680_s9, 6  ;;  %s680_s14 = scalar_lea.sflag [#allocation4], %s9680_s9 }
  0x6f   : > { %s9684_s26 = scalar_lea.vmem [#allocation3], %s7356_s8 }
  0x70   : > { %9268 = dma.done.wait (%p9622_p0), %s680_s14, 1024  }
  0x71   : > { %9270 = vsyncadd (%p9622_p0), %s680_s14, 4294966272  ;;  %s13459_s25 = sld [smem:[#allocation31_spill]]  ;;  %s689_s5 = sand.u32 1, %s9517_s23  }
  0x72   : > { %s690_s27 = scalar_lea.sflag [#allocation7], %s689_s5 }
  0x77   : > { %s691_s7 = sand.u32 1, %s13459_s25  }
  0x78   : > { %s7357_s16 = sshll.u32 %s691_s7, 7 }
  0x79   : > { %s9692_s3 = scalar_lea.vmem [#allocation6], %s7357_s16 }
  0x7a   : > { %9272 = dma.done.wait (%p9667_p6), %s690_s27, 2048  }
  0x7b   : > { %9274 = vsyncadd (%p9667_p6), %s690_s27, 4294965248 }
  0x7c   : > { %9276 = dma.done.wait (%p76_p1), [#allocation7], 512  }
  0x7d   : > { %9278 = vsyncadd (%p76_p1), [#allocation7], 4294966784 }
  0x7e   : > { %9280 = dma.done.wait (%p76_p1), [#allocation10], 32  }
  0x7f   : > { %9282 = vsyncadd (%p76_p1), [#allocation10], 4294967264 }
  0x80   : > { %9284 = dma.done.wait (%p76_p1), [#allocation13], 1040  }
  0x81   : > { %9286 = vsyncadd (%p76_p1), [#allocation13], 4294966256 }
  0x82   : > { %9288 = dma.done.wait (%p76_p1), [#allocation16], 3072  }
  0x83   : > { %9290 = vsyncadd (%p76_p1), [#allocation16], 4294964224 }
  0x84   : > { %9292 = dma.done.wait (%p76_p1), [#allocation19], 4096  }
  0x85   : > { %9294 = vsyncadd (%p76_p1), [#allocation19], 4294963200  ;;  %s7367_s20 = sshll.u32 %s9680_s9, 7  ;;  %s13460_s13 = sld [smem:[#allocation32_spill]] }
  0x86   : > { %s9719_s10 = scalar_lea.vmem [#allocation21], %s7367_s20 }
  0x8b   : > { %p7368_p3 = scmp.ne.s32.totalorder %s13460_s13, 0 }
  0x8c   : > { %s13461_s12 = sld [smem:[#allocation117_spill]] (!%p7368_p3) }
  0x8d   : > { %801 = sbr.rel (%p7368_p3) target bundleno = 1340 (0x53c), region = 140 }
  0x92   : > { %v803_v0 = vld [vmem:[%s9692_s3 + $0x8] sm:$0xff]  ;;  %v802_v1 = vld [vmem:[%s9692_s3] sm:$0xff]  ;;  %v805_v2 = vld [vmem:[%s9692_s3 + $0x18] sm:$0xff]  ;;  %vm934_vm0 = vcmask 523264  }
  0x93   : > { %850 = vxpose.xlu1.b32.start [1/8] (short) %v803_v0, 128  ;;  %818 = vxpose.xlu0.b32.start [1/8] (short) %v802_v1, 128  ;;  %v804_v3 = vld [vmem:[%s9692_s3 + $0x10] sm:$0xff]  ;;  %v807_v4 = vld [vmem:[%s9692_s3 + $0x28] sm:$0xff]  ;;  %v806_v5 = vld [vmem:[%s9692_s3 + $0x20] sm:$0xff] }
  0x94   : > { %v809_v6 = vld [vmem:[%s9692_s3 + $0x38] sm:$0xff]  ;;  %v808_v7 = vld [vmem:[%s9692_s3 + $0x30] sm:$0xff]  ;;  %v811_v10 = vld [vmem:[%s9692_s3 + $0x48] sm:$0xff] }
  0x95   : > { %v7914_v8 = vld [vmem:[#allocation8 + $0x18] sm:$0xff]  ;;  %v7913_v9 = vld [vmem:[#allocation8 + $0x10] sm:$0xff]  ;;  %v810_v11 = vld [vmem:[%s9692_s3 + $0x40] sm:$0xff] }
  0x96   : > { %987 = vmatpush.bf16.msra.mxu0 %v7914_v8  ;;  %8015 = vmatpush.bf16.msra.mxu3 %v7914_v8  ;;  %v813_v12 = vld [vmem:[%s9692_s3 + $0x58] sm:$0xff]  ;;  %v812_v13 = vld [vmem:[%s9692_s3 + $0x50] sm:$0xff]  ;;  %v815_v14 = vld [vmem:[%s9692_s3 + $0x68] sm:$0xff] }
  0x97   : > { %v814_v15 = vld [vmem:[%s9692_s3 + $0x60] sm:$0xff]  ;;  %v817_v16 = vld [vmem:[%s9692_s3 + $0x78] sm:$0xff]  ;;  %v816_v17 = vld [vmem:[%s9692_s3 + $0x70] sm:$0xff] }
  0x98   : > { %v7912_v18 = vld [vmem:[#allocation8 + $0x8] sm:$0xff]  ;;  %v7911_v19 = vld [vmem:[#allocation8] sm:$0xff] }
  0x99   : > { %v9748_v1 = vld [vmem:[#allocation9] ss:$0 sm:$0xff] }
  0x9a   : > { %988 = vmatpush.bf16.msra.mxu0 %v7913_v9  ;;  %8016 = vmatpush.bf16.msra.mxu3 %v7913_v9 }
  0x9b   : > { %851 = vxpose.xlu1.b32.cont [2/8] (short) %v805_v2, 128  ;;  %819 = vxpose.xlu0.b32.cont [2/8] (short) %v804_v3, 128 }
  0x9e   : > { %989 = vmatpush.bf16.msra.mxu0 %v7912_v18  ;;  %8017 = vmatpush.bf16.msra.mxu3 %v7912_v18 }
  0xa2   : > { %990 = vmatpush.bf16.msra.mxu0 %v7911_v19  ;;  %8018 = vmatpush.bf16.msra.mxu3 %v7911_v19 }
  0xa3   : > { %852 = vxpose.xlu1.b32.cont [3/8] (short) %v807_v4, 128  ;;  %820 = vxpose.xlu0.b32.cont [3/8] (short) %v806_v5, 128 }
  0xab   : > { %853 = vxpose.xlu1.b32.cont [4/8] (short) %v809_v6, 128  ;;  %821 = vxpose.xlu0.b32.cont [4/8] (short) %v808_v7, 128 }
  0xb3   : > { %854 = vxpose.xlu1.b32.cont [5/8] (short) %v811_v10, 128  ;;  %822 = vxpose.xlu0.b32.cont [5/8] (short) %v810_v11, 128 }
  0xbb   : > { %855 = vxpose.xlu1.b32.cont [6/8] (short) %v813_v12, 128  ;;  %823 = vxpose.xlu0.b32.cont [6/8] (short) %v812_v13, 128 }
  0xc3   : > { %856 = vxpose.xlu1.b32.cont [7/8] (short) %v815_v14, 128  ;;  %824 = vxpose.xlu0.b32.cont [7/8] (short) %v814_v15, 128 }
  0xcb   : > { %857 = vxpose.xlu1.b32.end [8/8] (short) %v817_v16, 128  ;;  %825 = vxpose.xlu0.b32.end [8/8] (short) %v816_v17, 128 }
 0x137   : > { %v866_v20 = vpop.trf.xlu1  ;;  %v834_v21 = vpop.trf.xlu0 }
 0x13f   : > { %v867_v22 = vpop.trf.xlu1  ;;  %v835_v23 = vpop.trf.xlu0 }
 0x140   : > { %v890_v24 = vpack.c.bf16 %v867_v22, %v866_v20  ;;  %v882_v25 = vpack.c.bf16 %v835_v23, %v834_v21 }
 0x142   : > { %7385 = vmatmul.msk.bf16.vlgmr.msra.gmra.mxu0 %vm934_vm0, %v882_v25 }
 0x147   : > { %v868_v26 = vpop.trf.xlu1  ;;  %v836_v27 = vpop.trf.xlu0 }
 0x14f   : > { %v869_v28 = vpop.trf.xlu1  ;;  %v837_v29 = vpop.trf.xlu0 }
 0x150   : > { %v891_v30 = vpack.c.bf16 %v869_v28, %v868_v26  ;;  %v883_v31 = vpack.c.bf16 %v837_v29, %v836_v27  ;;  %v9358_v29 = vmov 128.0  }
 0x151   : > { %8272 = vrcp.f32 %v9358_v29 }
 0x152   : > { %7386 = vmatmul.msk.bf16.gmra.mxu0 %vm934_vm0, %v883_v31 }
 0x157   : > { %v870_v32 = vpop.trf.xlu1  ;;  %v838_v33 = vpop.trf.xlu0 }
 0x15f   : > { %v871_v34 = vpop.trf.xlu1  ;;  %v839_v35 = vpop.trf.xlu0 }
 0x160   : > { %v892_v36 = vpack.c.bf16 %v871_v34, %v870_v32  ;;  %v884_v37 = vpack.c.bf16 %v839_v35, %v838_v33  ;;  %v8273_v33 = vpop.eup %8272 }
 0x161   : > { %v1139_v34 = vmul.f32 128.0, %v8273_v33  ;;  %vm1143_vm1 = vweird.f32 %v8273_v33 }
 0x162   : > { %7387 = vmatmul.msk.bf16.gmra.mxu0 %vm934_vm0, %v884_v37 }
 0x167   : > { %v872_v38 = vpop.trf.xlu1  ;;  %v840_v39 = vpop.trf.xlu0 }
 0x16f   : > { %v873_v40 = vpop.trf.xlu1  ;;  %v841_v41 = vpop.trf.xlu0 }
 0x170   : > { %v893_v42 = vpack.c.bf16 %v873_v40, %v872_v38  ;;  %v885_v43 = vpack.c.bf16 %v841_v41, %v840_v39  ;;  %v1140_v38 = vsub.f32 1.0, %v1139_v34 }
 0x172   : > { %7388 = vmatmul.msk.bf16.gmra.mxu0 %vm934_vm0, %v885_v43  ;;  %v1141_v39 = vmul.f32 %v8273_v33, %v1140_v38 }
 0x177   : > { %v874_v44 = vpop.trf.xlu1  ;;  %v842_v45 = vpop.trf.xlu0 }
 0x17f   : > { %v875_v46 = vpop.trf.xlu1  ;;  %v843_v47 = vpop.trf.xlu0 }
 0x180   : > { %v894_v48 = vpack.c.bf16 %v875_v46, %v874_v44  ;;  %v886_v49 = vpack.c.bf16 %v843_v47, %v842_v45  ;;  %v1142_v44 = vadd.f32 %v8273_v33, %v1141_v39 }
 0x182   : > { %7389 = vmatmul.msk.bf16.gmra.mxu0 %vm934_vm0, %v886_v49  ;;  %v9825_v46 = vsel %vm1143_vm1, %v8273_v33, %v1142_v44 }
 0x187   : > { %v876_v50 = vpop.trf.xlu1  ;;  %v844_v51 = vpop.trf.xlu0 }
 0x18f   : > { %v877_v52 = vpop.trf.xlu1  ;;  %v845_v53 = vpop.trf.xlu0 }
 0x190   : > { %v895_v54 = vpack.c.bf16 %v877_v52, %v876_v50  ;;  %v887_v55 = vpack.c.bf16 %v845_v53, %v844_v51 }
 0x192   : > { %7390 = vmatmul.msk.bf16.gmra.mxu0 %vm934_vm0, %v887_v55  ;;  %7398 = vmatmul.msk.bf16.vlgmr.msra.gmra.mxu3 %vm934_vm0, %v895_v54 }
 0x197   : > { %v846_v56 = vpop.trf.xlu0  ;;  %v878_v57 = vpop.trf.xlu1 }
 0x19f   : > { %v847_v58 = vpop.trf.xlu0  ;;  %v879_v59 = vpop.trf.xlu1 }
 0x1a0   : > { %v888_v60 = vpack.c.bf16 %v847_v58, %v846_v56  ;;  %v896_v61 = vpack.c.bf16 %v879_v59, %v878_v57 }
 0x1a2   : > { %7391 = vmatmul.msk.bf16.gmra.mxu0 %vm934_vm0, %v888_v60  ;;  %7399 = vmatmul.msk.bf16.gmra.mxu3 %vm934_vm0, %v896_v61 }
 0x1a7   : > { %v848_v62 = vpop.trf.xlu0  ;;  %v880_v45 = vpop.trf.xlu1 }
 0x1af   : > { %v849_v63 = vpop.trf.xlu0  ;;  %v881_v51 = vpop.trf.xlu1 }
 0x1b0   : > { %v889_v0 = vpack.c.bf16 %v849_v63, %v848_v62  ;;  %v897_v52 = vpack.c.bf16 %v881_v51, %v880_v45 }
 0x1b2   : > { %7392 = vmatmul.msk.bf16.gmra.mxu0 %vm934_vm0, %v889_v0  ;;  %7400 = vmatmul.msk.bf16.gmra.mxu3 %vm934_vm0, %v897_v52 }
 0x1bf   : > { %v992_v2 = vpop.f32.mrf.mxu0 }
 0x1c0   : > { %v9751_v3 = vadd.f32 %v9748_v1, %v992_v2 }
 0x1c2   : > { %1074 = vadd.xlane.f32.xlu2 %v9751_v3  ;;  %7393 = vmatmul.msk.bf16.gmra.mxu0 %vm934_vm0, %v890_v24 }
 0x1c7   : > { %v994_v4 = vpop.f32.mrf.mxu0 }
 0x1c8   : > { %v9756_v5 = vadd.f32 %v9748_v1, %v994_v4 }
 0x1ca   : > { %1076 = vadd.xlane.f32.xlu2 %v9756_v5 }
 0x1cf   : > { %v997_v6 = vpop.f32.mrf.mxu0 }
 0x1d0   : > { %v9760_v7 = vadd.f32 %v9748_v1, %v997_v6 }
 0x1d2   : > { %1078 = vadd.xlane.f32.xlu2 %v9760_v7  ;;  %7394 = vmatmul.msk.bf16.gmra.mxu0 %vm934_vm0, %v891_v30 }
 0x1d7   : > { %v999_v8 = vpop.f32.mrf.mxu0 }
 0x1d8   : > { %v9765_v9 = vadd.f32 %v9748_v1, %v999_v8 }
 0x1da   : > { %1080 = vadd.xlane.f32.xlu2 %v9765_v9 }
 0x1df   : > { %v1002_v10 = vpop.f32.mrf.mxu0 }
 0x1e0   : > { %v9769_v11 = vadd.f32 %v9748_v1, %v1002_v10 }
 0x1e2   : > { %1082 = vadd.xlane.f32.xlu2 %v9769_v11  ;;  %7395 = vmatmul.msk.bf16.gmra.mxu0 %vm934_vm0, %v892_v36 }
 0x1e7   : > { %v1004_v12 = vpop.f32.mrf.mxu0 }
 0x1e8   : > { %v9774_v13 = vadd.f32 %v9748_v1, %v1004_v12 }
 0x1ea   : > { %1084 = vadd.xlane.f32.xlu2 %v9774_v13 }
 0x1ef   : > { %v1007_v14 = vpop.f32.mrf.mxu0 }
 0x1f0   : > { %v9778_v15 = vadd.f32 %v9748_v1, %v1007_v14 }
 0x1f2   : > { %1086 = vadd.xlane.f32.xlu0 %v9778_v15  ;;  %7396 = vmatmul.msk.bf16.gmra.mxu0 %vm934_vm0, %v893_v42 }
 0x1f7   : > { %v1009_v16 = vpop.f32.mrf.mxu0 }
 0x1f8   : > { %v9783_v17 = vadd.f32 %v9748_v1, %v1009_v16 }
 0x1fa   : > { %1088 = vadd.xlane.f32.xlu1 %v9783_v17 }
 0x1ff   : > { %v1012_v18 = vpop.f32.mrf.mxu0 }
 0x200   : > { %v9787_v19 = vadd.f32 %v9748_v1, %v1012_v18 }
 0x202   : > { %1090 = vadd.xlane.f32.xlu2 %v9787_v19  ;;  %7397 = vmatmul.msk.bf16.gmra.mxu0 %vm934_vm0, %v894_v48 }
 0x207   : > { %v1014_v20 = vpop.f32.mrf.mxu0 }
 0x208   : > { %v9792_v21 = vadd.f32 %v9748_v1, %v1014_v20 }
 0x20a   : > { %1092 = vadd.xlane.f32.xlu2 %v9792_v21 }
 0x20f   : > { %v1017_v22 = vpop.f32.mrf.mxu0 }
 0x210   : > { %v9796_v23 = vadd.f32 %v9748_v1, %v1017_v22 }
 0x212   : > { %1094 = vadd.xlane.f32.xlu2 %v9796_v23 }
 0x215   : > { %v1057_v24 = vpop.f32.mrf.mxu3 }
 0x216   : > { %v9800_v26 = vadd.f32 %v9748_v1, %v1057_v24 }
 0x217   : > { %v1019_v25 = vpop.f32.mrf.mxu0 }
 0x218   : > { %v9804_v28 = vadd.f32 %v9748_v1, %v1019_v25 }
 0x21a   : > { %1126 = vadd.xlane.f32.xlu2 %v9800_v26 }
 0x21d   : > { %v1059_v30 = vpop.f32.mrf.mxu3 }
 0x21e   : > { %v9808_v32 = vadd.f32 %v9748_v1, %v1059_v30 }
 0x21f   : > { %v1022_v27 = vpop.f32.mrf.mxu0 }
 0x220   : > { %v9812_v36 = vadd.f32 %v9748_v1, %v1022_v27 }
 0x222   : > { %1096 = vadd.xlane.f32.xlu2 %v9804_v28 }
 0x225   : > { %v1062_v41 = vpop.f32.mrf.mxu3 }
 0x226   : > { %v9822_v43 = vadd.f32 %v9748_v1, %v1062_v41 }
 0x227   : > { %v1024_v31 = vpop.f32.mrf.mxu0 }
 0x228   : > { %v9830_v49 = vadd.f32 %v9748_v1, %v1024_v31 }
 0x22a   : > { %1128 = vadd.xlane.f32.xlu2 %v9808_v32 }
 0x22f   : > { %v1027_v35 = vpop.f32.mrf.mxu0 }
 0x230   : > { %v9815_v37 = vadd.f32 %v9748_v1, %v1027_v35 }
 0x232   : > { %1098 = vadd.xlane.f32.xlu2 %v9812_v36  ;;  %1102 = vadd.xlane.f32.xlu1 %v9815_v37 }
 0x235   : > { %v1075_v40 = vpop.xlane.xlu2 %1074 }
 0x236   : > { %v1145_v50 = vmul.f32 %v9825_v46, %v1075_v40 }
 0x237   : > { %v9819_v42 = vpop.f32.mrf.mxu0 }
 0x238   : > { %v9835_v53 = vsub.f32 %v9751_v3, %v1145_v50  ;;  %v1064_v50 = vpop.f32.mrf.mxu3 }
 0x23a   : > { %1130 = vadd.xlane.f32.xlu2 %v9822_v43  ;;  %v1209_v57 = vmul.f32 %v9835_v53, %v9835_v53 }
 0x23d   : > { %v1077_v47 = vpop.xlane.xlu2 %1076 }
 0x23e   : > { %v1146_v56 = vmul.f32 %v9825_v46, %v1077_v47 }
 0x23f   : > { %v9827_v48 = vpop.f32.mrf.mxu0 }
 0x240   : > { %v9844_v58 = vsub.f32 %v9756_v5, %v1146_v56 }
 0x242   : > { %1100 = vadd.xlane.f32.xlu2 %v9830_v49  ;;  %v1210_v61 = vmul.f32 %v9844_v58, %v9844_v58 }
 0x245   : > { %v1079_v54 = vpop.xlane.xlu2 %1078 }
 0x246   : > { %v1147_v60 = vmul.f32 %v9825_v46, %v1079_v54 }
 0x247   : > { %v9838_v55 = vpop.f32.mrf.mxu0 }
 0x248   : > { %v9852_v63 = vsub.f32 %v9760_v7, %v1147_v60 }
 0x24a   : > { %1241 = vadd.xlane.f32.xlu2 %v1209_v57  ;;  %v1211_v3 = vmul.f32 %v9852_v63, %v9852_v63 }
 0x24d   : > { %v1081_v62 = vpop.xlane.xlu2 %1080 }
 0x24e   : > { %v1148_v2 = vmul.f32 %v9825_v46, %v1081_v62 }
 0x24f   : > { %v9846_v59 = vpop.f32.mrf.mxu0 }
 0x250   : > { %v9860_v5 = vsub.f32 %v9765_v9, %v1148_v2 }
 0x252   : > { %1243 = vadd.xlane.f32.xlu2 %v1210_v61  ;;  %v1212_v7 = vmul.f32 %v9860_v5, %v9860_v5 }
 0x255   : > { %v1083_v4 = vpop.xlane.xlu2 %1082 }
 0x256   : > { %v1149_v8 = vmul.f32 %v9825_v46, %v1083_v4  ;;  %v7930_v4 = vld [vmem:[#allocation15 + $0x74] sm:$0xf0] }
 0x257   : > { %v9854_v0 = vpop.f32.mrf.mxu0 }
 0x258   : > { %v9868_v10 = vsub.f32 %v9769_v11, %v1149_v8  ;;  %v7929_v8 = vld [vmem:[#allocation15 + $0x74] sm:$0xf] }
 0x25a   : > { %1245 = vadd.xlane.f32.xlu2 %v1211_v3  ;;  %v1213_v9 = vmul.f32 %v9868_v10, %v9868_v10  ;;  %v7459_v3 = vld [vmem:[#allocation15 + $0x70] sm:$0xf] }
 0x25d   : > { %v1085_v12 = vpop.xlane.xlu2 %1084 }
 0x25e   : > { %v1150_v16 = vmul.f32 %v9825_v46, %v1085_v12 }
 0x25f   : > { %v9862_v6 = vpop.f32.mrf.mxu0 }
 0x260   : > { %v9876_v18 = vsub.f32 %v9774_v13, %v1150_v16 }
 0x262   : > { %1247 = vadd.xlane.f32.xlu2 %v1212_v7  ;;  %v1214_v11 = vmul.f32 %v9876_v18, %v9876_v18  ;;  %v7461_v7 = vld [vmem:[#allocation15 + $0x78] sm:$0xf0] }
 0x263   : > { %v9934_v16 = vor.u32 %v7929_v8, %v7461_v7  ;;  %v7921_v8 = vld [vmem:[#allocation15 + $0x34] sm:$0xf]  ;;  %v7429_v7 = vld [vmem:[#allocation15 + $0x38] sm:$0xf0] }
 0x265   : > { %v1087_v20 = vpop.xlane.xlu0 %1086  ;;  %1998 = vmatpush.bf16.msra.mxu2 %v9934_v16 }
 0x266   : > { %v1151_v24 = vmul.f32 %v9825_v46, %v1087_v20  ;;  %v7451_v20 = vld [vmem:[#allocation15 + $0x60] sm:$0xf] }
 0x267   : > { %v9870_v14 = vpop.f32.mrf.mxu0 }
 0x268   : > { %v9884_v25 = vsub.f32 %v9778_v15, %v1151_v24  ;;  %v7928_v24 = vld [vmem:[#allocation15 + $0x64] sm:$0xf0] }
 0x26a   : > { %1249 = vadd.xlane.f32.xlu2 %v1213_v9  ;;  %v1215_v13 = vmul.f32 %v9884_v25, %v9884_v25 }
 0x26d   : > { %v1089_v27 = vpop.xlane.xlu1 %1088 }
 0x26e   : > { %v1152_v30 = vmul.f32 %v9825_v46, %v1089_v27  ;;  %v7452_v27 = vor.u32 %v7928_v24, %v7451_v20  ;;  %v7419_v20 = vld [vmem:[#allocation15 + $0x20] sm:$0xf]  ;;  %v7919_v24 = vld [vmem:[#allocation15 + $0x24] sm:$0xf] }
 0x26f   : > { %v9878_v22 = vpop.f32.mrf.mxu0 }
 0x270   : > { %v9892_v33 = vsub.f32 %v9783_v17, %v1152_v30 }
 0x272   : > { %1251 = vadd.xlane.f32.xlu2 %v1214_v11  ;;  %v1216_v35 = vmul.f32 %v9892_v33, %v9892_v33  ;;  %v7927_v11 = vld [vmem:[#allocation15 + $0x64] sm:$0xf] }
 0x275   : > { %v1091_v29 = vpop.xlane.xlu2 %1090 }
 0x276   : > { %v1153_v52 = vmul.f32 %v9825_v46, %v1091_v29  ;;  %v7453_v29 = vld [vmem:[#allocation15 + $0x68] sm:$0xf0] }
 0x277   : > { %v9889_v31 = vpop.f32.mrf.mxu0 }
 0x278   : > { %v9920_v54 = vsub.f32 %v9787_v19, %v1153_v52  ;;  %v7460_v19 = vor.u32 %v7930_v4, %v7459_v3  ;;  %v7924_v52 = vld [vmem:[#allocation15 + $0x44] sm:$0xf0]  ;;  %v7427_v3 = vld [vmem:[#allocation15 + $0x30] sm:$0xf]  ;;  %v7922_v4 = vld [vmem:[#allocation15 + $0x34] sm:$0xf0] }
 0x27a   : > { %1253 = vadd.xlane.f32.xlu2 %v1215_v13  ;;  %v1217_v62 = vmul.f32 %v9920_v54, %v9920_v54  ;;  %1909 = vmatpush.bf16.msra.mxu1 %v7460_v19  ;;  %v9943_v13 = vor.u32 %v7927_v11, %v7453_v29 }
 0x27b   : > { %8019 = vmatpush.bf16.msrb.mxu3 %v7460_v19  ;;  %v7428_v19 = vor.u32 %v7922_v4, %v7427_v3  ;;  %v7405_v3 = vld [vmem:[#allocation15 + $0x8] sm:$0xf0] }
 0x27c   : > { %1999 = vmatpush.bf16.msra.mxu2 %v9943_v13 }
 0x27d   : > { %v1093_v34 = vpop.xlane.xlu2 %1092 }
 0x27e   : > { %v1154_v60 = vmul.f32 %v9825_v46, %v1093_v34  ;;  %1910 = vmatpush.bf16.msra.mxu1 %v7452_v27 }
 0x27f   : > { %v1052_v15 = vpop.f32.mrf.mxu0  ;;  %8020 = vmatpush.bf16.msrb.mxu3 %v7452_v27  ;;  %v7421_v27 = vld [vmem:[#allocation15 + $0x28] sm:$0xf0] }
 0x280   : > { %v9898_v40 = vadd.f32 %v9748_v1, %v1052_v15  ;;  %v9932_v12 = vsub.f32 %v9792_v21, %v1154_v60  ;;  %v7926_v15 = vld [vmem:[#allocation15 + $0x54] sm:$0xf0]  ;;  %v7437_v60 = vld [vmem:[#allocation15 + $0x48] sm:$0xf0]  ;;  %v7424_v29 = vor.u32 %v7919_v24, %v7421_v27 }
 0x282   : > { %1255 = vadd.xlane.f32.xlu2 %v1216_v35  ;;  %v1218_v21 = vmul.f32 %v9932_v12, %v9932_v12  ;;  %v7443_v35 = vld [vmem:[#allocation15 + $0x50] sm:$0xf] }
 0x285   : > { %v1095_v38 = vpop.xlane.xlu2 %1094 }
 0x286   : > { %v1155_v39 = vmul.f32 %v9825_v46, %v1095_v38  ;;  %v7925_v38 = vld [vmem:[#allocation15 + $0x54] sm:$0xf] }
 0x287   : > { %v1054_v44 = vpop.f32.mrf.mxu0 }
 0x288   : > { %v9901_v41 = vsub.f32 %v9796_v23, %v1155_v39  ;;  %v9909_v47 = vadd.f32 %v9748_v1, %v1054_v44  ;;  %v9915_v23 = vadd.f32 %v9748_v1, %v1064_v50  ;;  %v7444_v39 = vor.u32 %v7926_v15, %v7443_v35  ;;  %v7435_v50 = vld [vmem:[#allocation15 + $0x40] sm:$0xf]  ;;  %v7917_v35 = vld [vmem:[#allocation15 + $0x14] sm:$0xf] }
 0x28a   : > { %1122 = vadd.xlane.f32.xlu2 %v9898_v40  ;;  %v1219_v17 = vmul.f32 %v9901_v41, %v9901_v41  ;;  %1911 = vmatpush.bf16.msra.mxu1 %v7444_v39 }
 0x28b   : > { %8021 = vmatpush.bf16.msrb.mxu3 %v7444_v39 }
 0x28c   : > { %1261 = vadd.xlane.f32.xlu0 %v1219_v17  ;;  %v7445_v17 = vld [vmem:[#allocation15 + $0x58] sm:$0xf0] }
 0x28d   : > { %v9906_v45 = vpop.xlane.xlu2 %1126 }
 0x292   : > { %1124 = vadd.xlane.f32.xlu2 %v9909_v47 }
 0x295   : > { %v9912_v51 = vpop.xlane.xlu2 %1096 }
 0x29a   : > { %1132 = vadd.xlane.f32.xlu2 %v9915_v23 }
 0x29d   : > { %v1129_v56 = vpop.xlane.xlu2 %1128 }
 0x29e   : > { %v1172_v57 = vmul.f32 %v9825_v46, %v1129_v56  ;;  %v7923_v56 = vld [vmem:[#allocation15 + $0x44] sm:$0xf] }
 0x2a0   : > { %v9925_v61 = vsub.f32 %v9808_v32, %v1172_v57  ;;  %v7436_v57 = vor.u32 %v7924_v52, %v7435_v50  ;;  %v7403_v52 = vld [vmem:[#allocation15] sm:$0xf] }
 0x2a2   : > { %1257 = vadd.xlane.f32.xlu2 %v1217_v62  ;;  %v1236_v2 = vmul.f32 %v9925_v61, %v9925_v61  ;;  %v9955_v62 = vadd.f32 %v9748_v1, %v9819_v42  ;;  %1912 = vmatpush.bf16.msra.mxu1 %v7436_v57  ;;  %v7920_v42 = vld [vmem:[#allocation15 + $0x24] sm:$0xf0] }
 0x2a3   : > { %8022 = vmatpush.bf16.msrb.mxu3 %v7436_v57  ;;  %v7420_v11 = vor.u32 %v7920_v42, %v7419_v20  ;;  %v7915_v57 = vld [vmem:[#allocation15 + $0x4] sm:$0xf] }
 0x2a4   : > { %1295 = vadd.xlane.f32.xlu0 %v1236_v2  ;;  %v7440_v2 = vor.u32 %v7923_v56, %v7437_v60  ;;  %v7916_v56 = vld [vmem:[#allocation15 + $0x4] sm:$0xf0] }
 0x2a5   : > { %v1099_v32 = vpop.xlane.xlu2 %1098  ;;  %v7404_v60 = vor.u32 %v7916_v56, %v7403_v52 }
 0x2a6   : > { %v1157_v9 = vmul.f32 %v9825_v46, %v1099_v32  ;;  %v7432_v32 = vor.u32 %v7921_v8, %v7429_v7  ;;  %1913 = vmatpush.bf16.msra.mxu1 %v7428_v19  ;;  %v7408_v8 = vor.u32 %v7915_v57, %v7405_v3 }
 0x2a7   : > { %8023 = vmatpush.bf16.msrb.mxu3 %v7428_v19 }
 0x2a8   : > { %v9939_v30 = vsub.f32 %v9812_v36, %v1157_v9  ;;  %v9948_v36 = vor.u32 %v7925_v38, %v7445_v17  ;;  %v7413_v38 = vld [vmem:[#allocation15 + $0x18] sm:$0xf0] }
 0x2a9   : > { %v7416_v39 = vor.u32 %v7917_v35, %v7413_v38 }
 0x2aa   : > { %1259 = vadd.xlane.f32.xlu2 %v1218_v21  ;;  %v1221_v34 = vmul.f32 %v9939_v30, %v9939_v30  ;;  %2000 = vmatpush.bf16.msra.mxu2 %v9948_v36  ;;  %v7411_v21 = vld [vmem:[#allocation15 + $0x10] sm:$0xf] }
 0x2ab   : > { %1914 = vmatpush.bf16.msra.mxu1 %v7420_v11  ;;  %8024 = vmatpush.bf16.msrb.mxu3 %v7420_v11 }
 0x2ac   : > { %1265 = vadd.xlane.f32.xlu0 %v1221_v34  ;;  %v7918_v34 = vld [vmem:[#allocation15 + $0x14] sm:$0xf0] }
 0x2ad   : > { %v9950_v44 = vpop.xlane.xlu2 %1130  ;;  %v7412_v15 = vor.u32 %v7918_v34, %v7411_v21 }
 0x2ae   : > { %2001 = vmatpush.bf16.msra.mxu2 %v7440_v2 }
 0x2af   : > { %1915 = vmatpush.bf16.msra.mxu1 %v7412_v15  ;;  %8025 = vmatpush.bf16.msrb.mxu3 %v7412_v15 }
 0x2b2   : > { %1104 = vadd.xlane.f32.xlu2 %v9955_v62  ;;  %2002 = vmatpush.bf16.msra.mxu2 %v7432_v32 }
 0x2b3   : > { %1916 = vmatpush.bf16.msra.mxu1 %v7404_v60  ;;  %8026 = vmatpush.bf16.msrb.mxu3 %v7404_v60 }
 0x2b5   : > { %v9958_v9 = vpop.xlane.xlu2 %1100 }
 0x2b6   : > { %2003 = vmatpush.bf16.msra.mxu2 %v7424_v29 }
 0x2b7   : > { %8027 = vmatpush.bf16.msra.mxu3 %v9934_v16 }
 0x2ba   : > { %2004 = vmatpush.bf16.msra.mxu2 %v7416_v39 }
 0x2bb   : > { %8028 = vmatpush.bf16.msra.mxu3 %v9943_v13 }
 0x2bd   : > { %v1242_v17 = vpop.xlane.xlu2 %1241 }
 0x2be   : > { %v1305_v50 = vmul.f32 %v1242_v17, %v9825_v46  ;;  %2005 = vmatpush.bf16.msra.mxu2 %v7408_v8 }
 0x2bf   : > { %8029 = vmatpush.bf16.msra.mxu3 %v9948_v36 }
 0x2c0   : > { %v1337_v4 = vadd.f32 1e-05, %v1305_v50 }
 0x2c2   : > { %8274 = vrsqrt.f32 %v1337_v4  ;;  %vm1375_vm3 = vweird.f32 %v1337_v4 }
 0x2c3   : > { %8030 = vmatpush.bf16.msra.mxu3 %v7440_v2 }
 0x2c5   : > { %v1244_v19 = vpop.xlane.xlu2 %1243 }
 0x2c6   : > { %v1306_v7 = vmul.f32 %v1244_v19, %v9825_v46  ;;  %v9968_v19 = vld [vmem:[#allocation11] ss:$0 sm:$0xff] }
 0x2c7   : > { %8031 = vmatpush.bf16.msra.mxu3 %v7432_v32 }
 0x2c8   : > { %v8275_v20 = vpop.eup %8274  ;;  %v1338_v42 = vadd.f32 1e-05, %v1306_v7 }
 0x2c9   : > { %v1370_v24 = vmul.f32 %v8275_v20, %v1337_v4  ;;  %vm1376_vm2 = vweird.f32 %v8275_v20 }
 0x2ca   : > { %8276 = vrsqrt.f32 %v1338_v42  ;;  %vm1377_vm4 = vmor %vm1375_vm3, %vm1376_vm2  ;;  %vm1385_vm6 = vweird.f32 %v1338_v42 }
 0x2cb   : > { %v1371_v11 = vmul.f32 %v8275_v20, %v1370_v24  ;;  %8032 = vmatpush.bf16.msra.mxu3 %v7424_v29 }
 0x2cd   : > { %v1372_v27 = vmul.f32 0.5, %v1371_v11  ;;  %v1246_v21 = vpop.xlane.xlu2 %1245  ;;  %v9972_v11 = vld [vmem:[#allocation12] ss:$0 sm:$0xff] }
 0x2ce   : > { %v1307_v34 = vmul.f32 %v1246_v21, %v9825_v46 }
 0x2cf   : > { %v1373_v35 = vsub.f32 1.5, %v1372_v27  ;;  %8033 = vmatpush.bf16.msra.mxu3 %v7416_v39 }
 0x2d0   : > { %v8277_v15 = vpop.eup %8276  ;;  %v1339_v16 = vadd.f32 1e-05, %v1307_v34 }
 0x2d1   : > { %v1374_v38 = vmul.f32 %v8275_v20, %v1373_v35  ;;  %v1380_v17 = vmul.f32 %v8277_v15, %v1338_v42  ;;  %vm1386_vm5 = vweird.f32 %v8277_v15 }
 0x2d2   : > { %8278 = vrsqrt.f32 %v1339_v16  ;;  %vm1387_vm7 = vmor %vm1385_vm6, %vm1386_vm5  ;;  %vm1395_vm9 = vweird.f32 %v1339_v16 }
 0x2d3   : > { %v1381_v13 = vmul.f32 %v8277_v15, %v1380_v17  ;;  %v1378_v36 = vsel %vm1377_vm4, %v8275_v20, %v1374_v38  ;;  %8034 = vmatpush.bf16.msra.mxu3 %v7408_v8 }
 0x2d4   : > { %v1689_v3 = vmul.f32 %v1378_v36, %v9835_v53 }
 0x2d5   : > { %v1382_v50 = vmul.f32 0.5, %v1381_v13  ;;  %v1248_v52 = vpop.xlane.xlu2 %1247 }
 0x2d6   : > { %v1308_v56 = vmul.f32 %v1248_v52, %v9825_v46  ;;  %v1724_v29 = vmul.f32 %v9968_v19, %v1689_v3 }
 0x2d7   : > { %v1383_v57 = vsub.f32 1.5, %v1382_v50 }
 0x2d8   : > { %v8279_v2 = vpop.eup %8278  ;;  %v1340_v60 = vadd.f32 1e-05, %v1308_v56  ;;  %v1759_v39 = vadd.f32 %v9972_v11, %v1724_v29 }
 0x2d9   : > { %v1384_v7 = vmul.f32 %v8277_v15, %v1383_v57  ;;  %v1390_v32 = vmul.f32 %v8279_v2, %v1339_v16  ;;  %vm1396_vm8 = vweird.f32 %v8279_v2 }
 0x2da   : > { %8280 = vrsqrt.f32 %v1340_v60  ;;  %vm1397_vm10 = vmor %vm1395_vm9, %vm1396_vm8  ;;  %vm1405_vm12 = vweird.f32 %v1340_v60 }
 0x2db   : > { %v1391_v4 = vmul.f32 %v8279_v2, %v1390_v32  ;;  %v1388_v24 = vsel %vm1387_vm7, %v8277_v15, %v1384_v7 }
 0x2dc   : > { %v1690_v20 = vmul.f32 %v1388_v24, %v9844_v58 }
 0x2dd   : > { %v1392_v27 = vmul.f32 0.5, %v1391_v4  ;;  %v1250_v21 = vpop.xlane.xlu2 %1249 }
 0x2de   : > { %v1309_v53 = vmul.f32 %v1250_v21, %v9825_v46  ;;  %v1725_v34 = vmul.f32 %v9968_v19, %v1690_v20 }
 0x2df   : > { %v1393_v42 = vsub.f32 1.5, %v1392_v27 }
 0x2e0   : > { %v8281_v35 = vpop.eup %8280  ;;  %v1341_v38 = vadd.f32 1e-05, %v1309_v53  ;;  %v1760_v15 = vadd.f32 %v9972_v11, %v1725_v34 }
 0x2e1   : > { %v1394_v17 = vmul.f32 %v8279_v2, %v1393_v42  ;;  %v1400_v58 = vmul.f32 %v8281_v35, %v1340_v60  ;;  %vm1406_vm11 = vweird.f32 %v8281_v35 }
 0x2e2   : > { %8282 = vrsqrt.f32 %v1341_v38  ;;  %v1791_v13 = vpack.c.bf16 %v1760_v15, %v1759_v39  ;;  %vm1407_vm13 = vmor %vm1405_vm12, %vm1406_vm11  ;;  %vm1415_vm15 = vweird.f32 %v1341_v38 }
 0x2e3   : > { %v1401_v50 = vmul.f32 %v8281_v35, %v1400_v58  ;;  %v1398_v8 = vsel %vm1397_vm10, %v8279_v2, %v1394_v17 }
 0x2e4   : > { %1917 = vmatmul.bf16.vlgmr.msra.gmra.mxu1 %v1791_v13  ;;  %2006 = vmatmul.bf16.vlgmr.msra.gmra.mxu2 %v1791_v13  ;;  %v1691_v32 = vmul.f32 %v1398_v8, %v9852_v63 }
 0x2e5   : > { %v1402_v52 = vmul.f32 0.5, %v1401_v50  ;;  %v1252_v36 = vpop.xlane.xlu2 %1251 }
 0x2e6   : > { %v1310_v56 = vmul.f32 %v1252_v36, %v9825_v46  ;;  %v1726_v27 = vmul.f32 %v9968_v19, %v1691_v32 }
 0x2e7   : > { %v1403_v57 = vsub.f32 1.5, %v1402_v52 }
 0x2e8   : > { %v8283_v3 = vpop.eup %8282  ;;  %v1342_v7 = vadd.f32 1e-05, %v1310_v56  ;;  %v1761_v60 = vadd.f32 %v9972_v11, %v1726_v27 }
 0x2e9   : > { %v1404_v4 = vmul.f32 %v8281_v35, %v1403_v57  ;;  %v1410_v24 = vmul.f32 %v8283_v3, %v1341_v38  ;;  %vm1416_vm14 = vweird.f32 %v8283_v3 }
 0x2ea   : > { %8284 = vrsqrt.f32 %v1342_v7  ;;  %vm1417_vm0 = vmor %vm1415_vm15, %vm1416_vm14  ;;  %vm1425_vm2 = vweird.f32 %v1342_v7 }
 0x2eb   : > { %v1411_v16 = vmul.f32 %v8283_v3, %v1410_v24  ;;  %v1408_v20 = vsel %vm1407_vm13, %v8281_v35, %v1404_v4 }
 0x2ec   : > { %v1692_v29 = vmul.f32 %v1408_v20, %v9860_v5 }
 0x2ed   : > { %v1412_v2 = vmul.f32 0.5, %v1411_v16  ;;  %v1254_v21 = vpop.xlane.xlu2 %1253 }
 0x2ee   : > { %v1311_v53 = vmul.f32 %v1254_v21, %v9825_v46  ;;  %v1727_v34 = vmul.f32 %v9968_v19, %v1692_v29 }
 0x2ef   : > { %v1413_v42 = vsub.f32 1.5, %v1412_v2 }
 0x2f0   : > { %v8285_v39 = vpop.eup %8284  ;;  %v1343_v63 = vadd.f32 1e-05, %v1311_v53  ;;  %v1762_v15 = vadd.f32 %v9972_v11, %v1727_v34 }
 0x2f1   : > { %v1414_v17 = vmul.f32 %v8283_v3, %v1413_v42  ;;  %v1420_v35 = vmul.f32 %v8285_v39, %v1342_v7  ;;  %vm1426_vm1 = vweird.f32 %v8285_v39 }
 0x2f2   : > { %8286 = vrsqrt.f32 %v1343_v63  ;;  %v1792_v5 = vpack.c.bf16 %v1762_v15, %v1761_v60  ;;  %vm1427_vm3 = vmor %vm1425_vm2, %vm1426_vm1  ;;  %vm1435_vm5 = vweird.f32 %v1343_v63 }
 0x2f3   : > { %v1421_v58 = vmul.f32 %v8285_v39, %v1420_v35  ;;  %v1418_v52 = vsel %vm1417_vm0, %v8283_v3, %v1414_v17 }
 0x2f4   : > { %1922 = vmatmul.bf16.gmra.mxu1 %v1792_v5  ;;  %2011 = vmatmul.bf16.gmra.mxu2 %v1792_v5  ;;  %v1693_v32 = vmul.f32 %v1418_v52, %v9868_v10 }
 0x2f5   : > { %v1422_v13 = vmul.f32 0.5, %v1421_v58  ;;  %v1256_v50 = vpop.xlane.xlu2 %1255  ;;  %v1067_v58 = vpop.f32.mrf.mxu3 }
 0x2f6   : > { %v1312_v36 = vmul.f32 %v1256_v50, %v9825_v46  ;;  %v1728_v29 = vmul.f32 %v9968_v19, %v1693_v32  ;;  %v1156_v32 = vmul.f32 %v9825_v46, %v9912_v51 }
 0x2f7   : > { %v1423_v8 = vsub.f32 1.5, %v1422_v13 }
 0x2f8   : > { %v8287_v56 = vpop.eup %8286  ;;  %v1344_v57 = vadd.f32 1e-05, %v1312_v36  ;;  %v1763_v7 = vadd.f32 %v9972_v11, %v1728_v29 }
 0x2f9   : > { %v1424_v4 = vmul.f32 %v8285_v39, %v1423_v8  ;;  %v1430_v24 = vmul.f32 %v8287_v56, %v1343_v63  ;;  %vm1436_vm4 = vweird.f32 %v8287_v56 }
 0x2fa   : > { %8288 = vrsqrt.f32 %v1344_v57  ;;  %vm1437_vm6 = vmor %vm1435_vm5, %vm1436_vm4  ;;  %vm1445_vm8 = vweird.f32 %v1344_v57 }
 0x2fb   : > { %v1431_v38 = vmul.f32 %v8287_v56, %v1430_v24  ;;  %v1428_v16 = vsel %vm1427_vm3, %v8285_v39, %v1424_v4 }
 0x2fc   : > { %v1694_v20 = vmul.f32 %v1428_v16, %v9876_v18  ;;  %v10017_v16 = vsub.f32 %v9804_v28, %v1156_v32 }
 0x2fd   : > { %v1432_v3 = vmul.f32 0.5, %v1431_v38  ;;  %v1123_v27 = vpop.xlane.xlu2 %1122  ;;  %v1069_v51 = vpop.f32.mrf.mxu3 }
 0x2fe   : > { %v1169_v2 = vmul.f32 %v9825_v46, %v1123_v27  ;;  %v1729_v21 = vmul.f32 %v9968_v19, %v1694_v20  ;;  %v1220_v28 = vmul.f32 %v10017_v16, %v10017_v16 }
 0x2ff   : > { %v1433_v53 = vsub.f32 1.5, %v1432_v3  ;;  %v1103_v3 = vpop.xlane.xlu1 %1102 }
 0x300   : > { %v8289_v34 = vpop.eup %8288  ;;  %v9993_v10 = vsub.f32 %v9898_v40, %v1169_v2  ;;  %v1764_v42 = vadd.f32 %v9972_v11, %v1729_v21  ;;  %v1171_v21 = vmul.f32 %v9825_v46, %v9906_v45 }
 0x301   : > { %v1434_v39 = vmul.f32 %v8287_v56, %v1433_v53  ;;  %v1440_v18 = vmul.f32 %v8289_v34, %v1344_v57  ;;  %vm1446_vm7 = vweird.f32 %v8289_v34  ;;  %v10029_v53 = vadd.f32 %v9748_v1, %v1069_v51 }
 0x302   : > { %v1793_v60 = vpack.c.bf16 %v1764_v42, %v1763_v7  ;;  %v1233_v15 = vmul.f32 %v9993_v10, %v9993_v10  ;;  %vm1447_vm9 = vmor %vm1445_vm8, %vm1446_vm7  ;;  %v10037_v42 = vsub.f32 %v9800_v26, %v1171_v21 }
 0x303   : > { %v1441_v17 = vmul.f32 %v8289_v34, %v1440_v18  ;;  %v1438_v5 = vsel %vm1437_vm6, %v8287_v56, %v1434_v39  ;;  %v10009_v56 = vadd.f32 %v9748_v1, %v1067_v58  ;;  %v10044_v18 = vadd.f32 %v9748_v1, %v9827_v48 }
 0x304   : > { %1927 = vmatmul.bf16.gmra.mxu1 %v1793_v60  ;;  %2016 = vmatmul.bf16.gmra.mxu2 %v1793_v60  ;;  %v1695_v36 = vmul.f32 %v1438_v5, %v9884_v25  ;;  %v1158_v60 = vmul.f32 %v9825_v46, %v9958_v9  ;;  %v10059_v9 = vadd.f32 %v9748_v1, %v9838_v55 }
 0x305   : > { %v1442_v35 = vmul.f32 0.5, %v1441_v17  ;;  %1289 = vadd.xlane.f32.xlu1 %v1233_v15  ;;  %v1125_v40 = vpop.xlane.xlu2 %1124  ;;  %v1235_v15 = vmul.f32 %v10037_v42, %v10037_v42  ;;  %v1173_v58 = vmul.f32 %v9825_v46, %v9950_v44  ;;  %v10071_v44 = vadd.f32 %v9748_v1, %v9846_v59 }
 0x306   : > { %v1170_v13 = vmul.f32 %v9825_v46, %v1125_v40 }
 0x307   : > { %v1443_v50 = vsub.f32 1.5, %v1442_v35  ;;  %v10055_v35 = vsub.f32 %v9830_v49, %v1158_v60  ;;  %v10067_v49 = vsub.f32 %v9822_v43, %v1173_v58 }
 0x308   : > { %v10001_v52 = vsub.f32 %v9909_v47, %v1170_v13  ;;  %v1730_v47 = vmul.f32 %v9968_v19, %v1695_v36 }
 0x309   : > { %v1444_v8 = vmul.f32 %v8289_v34, %v1443_v50  ;;  %v1222_v50 = vmul.f32 %v10055_v35, %v10055_v35 }
 0x30a   : > { %v1234_v63 = vmul.f32 %v10001_v52, %v10001_v52  ;;  %v1765_v29 = vadd.f32 %v9972_v11, %v1730_v47 }
 0x30b   : > { %v1448_v4 = vsel %vm1447_vm9, %v8289_v34, %v1444_v8 }
 0x30c   : > { %1291 = vadd.xlane.f32.xlu2 %v1234_v63  ;;  %v1696_v24 = vmul.f32 %v1448_v4, %v9892_v33 }
 0x30d   : > { %1134 = vadd.xlane.f32.xlu1 %v10009_v56  ;;  %v1133_v25 = vpop.xlane.xlu2 %1132 }
 0x30e   : > { %v1174_v57 = vmul.f32 %v9825_v46, %v1133_v25  ;;  %v1731_v38 = vmul.f32 %v9968_v19, %v1696_v24  ;;  %v1237_v25 = vmul.f32 %v10067_v49, %v10067_v49 }
 0x310   : > { %v10020_v20 = vsub.f32 %v9915_v23, %v1174_v57  ;;  %v1766_v33 = vadd.f32 %v9972_v11, %v1731_v38  ;;  %v1159_v23 = vmul.f32 %v9825_v46, %v1103_v3 }
 0x312   : > { %v1794_v27 = vpack.c.bf16 %v1766_v33, %v1765_v29  ;;  %v1238_v2 = vmul.f32 %v10020_v20, %v10020_v20  ;;  %v10040_v45 = vsub.f32 %v9815_v37, %v1159_v23  ;;  %v10083_v33 = vadd.f32 %v9748_v1, %v9854_v0 }
 0x313   : > { %v10095_v0 = vadd.f32 %v9748_v1, %v9862_v6 }
 0x314   : > { %1932 = vmatmul.bf16.gmra.mxu1 %v1794_v27  ;;  %2021 = vmatmul.bf16.gmra.mxu2 %v1794_v27  ;;  %v1223_v17 = vmul.f32 %v10040_v45, %v10040_v45 }
 0x315   : > { %1263 = vadd.xlane.f32.xlu1 %v1220_v28  ;;  %1136 = vadd.xlane.f32.xlu2 %v10029_v53  ;;  %v1258_v34 = vpop.xlane.xlu2 %1257 }
 0x316   : > { %1299 = vadd.xlane.f32.xlu0 %v1238_v2  ;;  %v1313_v7 = vmul.f32 %v1258_v34, %v9825_v46 }
 0x318   : > { %v1345_v39 = vadd.f32 1e-05, %v1313_v7  ;;  %v1262_v7 = vpop.xlane.xlu0 %1261 }
 0x31a   : > { %8290 = vrsqrt.f32 %v1345_v39  ;;  %vm1455_vm11 = vweird.f32 %v1345_v39 }
 0x31d   : > { %1106 = vadd.xlane.f32.xlu1 %v10044_v18  ;;  %1293 = vadd.xlane.f32.xlu2 %v1235_v15  ;;  %v1260_v26 = vpop.xlane.xlu2 %1259  ;;  %v1315_v15 = vmul.f32 %v1262_v7, %v9825_v46 }
 0x31e   : > { %1269 = vadd.xlane.f32.xlu0 %v1223_v17  ;;  %v1314_v37 = vmul.f32 %v1260_v26, %v9825_v46 }
 0x320   : > { %v8291_v48 = vpop.eup %8290  ;;  %v1346_v40 = vadd.f32 1e-05, %v1314_v37 }
 0x321   : > { %v1450_v5 = vmul.f32 %v8291_v48, %v1345_v39  ;;  %vm1456_vm10 = vweird.f32 %v8291_v48 }
 0x322   : > { %8292 = vrsqrt.f32 %v1346_v40  ;;  %vm1457_vm12 = vmor %vm1455_vm11, %vm1456_vm10  ;;  %vm1465_vm14 = vweird.f32 %v1346_v40 }
 0x323   : > { %v1451_v13 = vmul.f32 %v8291_v48, %v1450_v5 }
 0x325   : > { %v1452_v36 = vmul.f32 0.5, %v1451_v13  ;;  %1267 = vadd.xlane.f32.xlu1 %v1222_v50  ;;  %1108 = vadd.xlane.f32.xlu2 %v10059_v9  ;;  %v1105_v32 = vpop.xlane.xlu2 %1104  ;;  %v1296_v13 = vpop.xlane.xlu0 %1295 }
 0x326   : > { %v1160_v47 = vmul.f32 %v9825_v46, %v1105_v32 }
 0x327   : > { %v1453_v8 = vsub.f32 1.5, %v1452_v36 }
 0x328   : > { %v8293_v63 = vpop.eup %8292  ;;  %v10078_v51 = vsub.f32 %v9955_v62, %v1160_v47 }
 0x329   : > { %v1454_v4 = vmul.f32 %v8291_v48, %v1453_v8  ;;  %v1460_v55 = vmul.f32 %v8293_v63, %v1346_v40  ;;  %vm1466_vm13 = vweird.f32 %v8293_v63  ;;  %v1332_v8 = vmul.f32 %v1296_v13, %v9825_v46 }
 0x32a   : > { %vm1467_vm15 = vmor %vm1465_vm14, %vm1466_vm13  ;;  %v1224_v3 = vmul.f32 %v10078_v51, %v10078_v51 }
 0x32b   : > { %v1461_v24 = vmul.f32 %v8293_v63, %v1460_v55  ;;  %v1458_v57 = vsel %vm1457_vm12, %v8291_v48, %v1454_v4  ;;  %v10108_v48 = vadd.f32 1e-05, %v1315_v15  ;;  %v10118_v55 = vadd.f32 1e-05, %v1332_v8 }
 0x32c   : > { %v1697_v59 = vmul.f32 %v1458_v57, %v9920_v54 }
 0x32d   : > { %v1462_v43 = vmul.f32 0.5, %v1461_v24  ;;  %1110 = vadd.xlane.f32.xlu1 %v10071_v44  ;;  %1297 = vadd.xlane.f32.xlu2 %v1237_v25  ;;  %8294 = vrsqrt.f32 %v10108_v48  ;;  %vm1475_vm1 = vweird.f32 %v10108_v48  ;;  %vm1645_vm9 = vweird.f32 %v10118_v55 }
 0x32e   : > { %v1732_v21 = vmul.f32 %v9968_v19, %v1697_v59  ;;  %8296 = vrsqrt.f32 %v10118_v55 }
 0x32f   : > { %v1463_v38 = vsub.f32 1.5, %v1462_v43 }
 0x330   : > { %v1767_v62 = vadd.f32 %v9972_v11, %v1732_v21 }
 0x331   : > { %v1464_v29 = vmul.f32 %v8293_v63, %v1463_v38 }
 0x333   : > { %v1468_v27 = vsel %vm1467_vm15, %v8293_v63, %v1464_v29  ;;  %v10114_v63 = vpop.eup %8294 }
 0x334   : > { %v1698_v2 = vmul.f32 %v1468_v27, %v9932_v12  ;;  %v1823_v12 = vld [vmem:[%s13461_s12] sm:$0x3]  ;;  %v1470_v4 = vmul.f32 %v10114_v63, %v10108_v48  ;;  %v10130_v15 = vpop.eup %8296  ;;  %vm1476_vm0 = vweird.f32 %v10114_v63 }
 0x335   : > { %1112 = vadd.xlane.f32.xlu2 %v10083_v33  ;;  %1271 = vadd.xlane.f32.xlu1 %v1224_v3  ;;  %v10101_v39 = vperm.slane %v1823_v12, 0  ;;  %v10103_v60 = vperm.slane %v1823_v12, 1  ;;  %v1266_v3 = vpop.xlane.xlu0 %1265  ;;  %vm10156_vm3 = vmor %vm1475_vm1, %vm1476_vm0  ;;  %vm1646_vm10 = vweird.f32 %v10130_v15 }
 0x336   : > { %v1733_v54 = vmul.f32 %v9968_v19, %v1698_v2  ;;  %v1471_v29 = vmul.f32 %v10114_v63, %v1470_v4  ;;  %v1317_v27 = vmul.f32 %v1266_v3, %v9825_v46  ;;  %vm10252_vm12 = vmor %vm1645_vm9, %vm1646_vm10 }
 0x338   : > { %v1768_v28 = vadd.f32 %v9972_v11, %v1733_v54  ;;  %v1472_v54 = vmul.f32 0.5, %v1471_v29 }
 0x33a   : > { %v1795_v23 = vpack.c.bf16 %v1768_v28, %v1767_v62 }
 0x33c   : > { %1937 = vmatmul.bf16.gmra.mxu1 %v1795_v23  ;;  %2026 = vmatmul.bf16.gmra.mxu2 %v1795_v23 }
 0x33d   : > { %1114 = vadd.xlane.f32.xlu1 %v10095_v0 }
 0x361   : > { %v1918_v34 = vpop.f32.mrf.mxu1 }
 0x362   : > { %v1919_v1 = vadd.f32 %v1918_v34, %v10101_v39 }
 0x367   : > { %v2007_v17 = vpop.f32.mrf.mxu2 }
 0x368   : > { %v2008_v6 = vadd.f32 %v2007_v17, %v10103_v60 }
 0x369   : > { %v1920_v26 = vpop.f32.mrf.mxu1 }
 0x36a   : > { %v2087_v37 = vpack.c.bf16 %v2008_v6, %v1919_v1  ;;  %v1921_v5 = vadd.f32 %v1920_v26, %v10101_v39  ;;  %v10134_v26 = vadd.f32 1e-05, %v1317_v27 }
 0x36c   : > { %2119 = vst [vmem:[#allocation2] sm:$0xff] %v2087_v37 }
 0x36f   : > { %v2009_v40 = vpop.f32.mrf.mxu2 }
 0x370   : > { %v2010_v58 = vadd.f32 %v2009_v40, %v10103_v60  ;;  %v1473_v40 = vsub.f32 1.5, %v1472_v54 }
 0x371   : > { %v1923_v50 = vpop.f32.mrf.mxu1 }
 0x372   : > { %v2088_v36 = vpack.c.bf16 %v2010_v58, %v1921_v5  ;;  %v1924_v24 = vadd.f32 %v1923_v50, %v10101_v39  ;;  %v1640_v58 = vmul.f32 %v10130_v15, %v10118_v55 }
 0x374   : > { %2120 = vst [vmem:[#allocation2 + $0x8] sm:$0xff] %v2088_v36 }
 0x377   : > { %v2012_v32 = vpop.f32.mrf.mxu2 }
 0x378   : > { %v2013_v47 = vadd.f32 %v2012_v32, %v10103_v60  ;;  %v1290_v25 = vpop.xlane.xlu1 %1289 }
 0x379   : > { %v1329_v43 = vmul.f32 %v1290_v25, %v9825_v46  ;;  %v1925_v57 = vpop.f32.mrf.mxu1  ;;  %v1641_v25 = vmul.f32 %v10130_v15, %v1640_v58 }
 0x37a   : > { %v2089_v38 = vpack.c.bf16 %v2013_v47, %v1924_v24  ;;  %v1926_v62 = vadd.f32 %v1925_v57, %v10101_v39 }
 0x37b   : > { %v1361_v59 = vadd.f32 1e-05, %v1329_v43 }
 0x37c   : > { %2121 = vst [vmem:[#allocation2 + $0x10] sm:$0xff] %v2089_v38 }
 0x37d   : > { %8298 = vrsqrt.f32 %v1361_v59  ;;  %vm1615_vm4 = vweird.f32 %v1361_v59 }
 0x37f   : > { %v2014_v2 = vpop.f32.mrf.mxu2  ;;  %v1292_v21 = vpop.xlane.xlu2 %1291 }
 0x380   : > { %v2015_v28 = vadd.f32 %v2014_v2, %v10103_v60  ;;  %v1135_v23 = vpop.xlane.xlu1 %1134  ;;  %v1330_v12 = vmul.f32 %v1292_v21, %v9825_v46 }
 0x381   : > { %v1175_v34 = vmul.f32 %v9825_v46, %v1135_v23  ;;  %v1928_v7 = vpop.f32.mrf.mxu1 }
 0x382   : > { %v2090_v17 = vpack.c.bf16 %v2015_v28, %v1926_v62  ;;  %v10132_v1 = vadd.f32 1e-05, %v1330_v12  ;;  %v1929_v32 = vadd.f32 %v1928_v7, %v10101_v39  ;;  %v10171_v7 = vld [vmem:[#allocation9] ss:$0 sm:$0xff] }
 0x383   : > { %v8299_v6 = vpop.eup %8298  ;;  %v10137_v37 = vsub.f32 %v10009_v56, %v1175_v34  ;;  %v1474_v56 = vmul.f32 %v10114_v63, %v1473_v40  ;;  %v10209_v54 = vadd.f32 %v10171_v7, %v9878_v22 }
 0x384   : > { %v1610_v5 = vmul.f32 %v8299_v6, %v1361_v59  ;;  %2122 = vst [vmem:[#allocation2 + $0x18] sm:$0xff] %v2090_v17  ;;  %8300 = vrsqrt.f32 %v10132_v1  ;;  %vm1616_vm2 = vweird.f32 %v8299_v6  ;;  %v10175_v17 = vadd.f32 %v10171_v7, %v9870_v14 }
 0x385   : > { %v1239_v13 = vmul.f32 %v10137_v37, %v10137_v37  ;;  %8302 = vrsqrt.f32 %v10134_v26  ;;  %v1478_v12 = vsel %vm10156_vm3, %v10114_v63, %v1474_v56  ;;  %vm10177_vm5 = vmor %vm1615_vm4, %vm1616_vm2  ;;  %vm1625_vm7 = vweird.f32 %v10132_v1 }
 0x386   : > { %v1611_v50 = vmul.f32 %v8299_v6, %v1610_v5  ;;  %v1642_v5 = vmul.f32 0.5, %v1641_v25  ;;  %vm1495_vm2 = vweird.f32 %v10134_v26 }
 0x387   : > { %1301 = vadd.xlane.f32.xlu2 %v1239_v13  ;;  %v2017_v36 = vpop.f32.mrf.mxu2 }
 0x388   : > { %v1612_v8 = vmul.f32 0.5, %v1611_v50  ;;  %v2018_v4 = vadd.f32 %v2017_v36, %v10103_v60  ;;  %v1264_v24 = vpop.xlane.xlu1 %1263  ;;  %v1137_v47 = vpop.xlane.xlu2 %1136  ;;  %v1699_v50 = vmul.f32 %v1478_v12, %v9901_v41 }
 0x389   : > { %v1316_v43 = vmul.f32 %v1264_v24, %v9825_v46  ;;  %v1176_v57 = vmul.f32 %v9825_v46, %v1137_v47  ;;  %v1300_v38 = vpop.xlane.xlu0 %1299  ;;  %v1930_v29 = vpop.f32.mrf.mxu1 }
 0x38a   : > { %v8301_v3 = vpop.eup %8300  ;;  %v1613_v27 = vsub.f32 1.5, %v1612_v8  ;;  %v2091_v2 = vpack.c.bf16 %v2018_v4, %v1929_v32  ;;  %v1334_v21 = vmul.f32 %v1300_v38, %v9825_v46  ;;  %v1931_v56 = vadd.f32 %v1930_v29, %v10101_v39 }
 0x38b   : > { %v1620_v48 = vmul.f32 %v8301_v3, %v10132_v1  ;;  %v10161_v62 = vadd.f32 1e-05, %v1316_v43  ;;  %v10164_v28 = vsub.f32 %v10029_v53, %v1176_v57  ;;  %v10169_v34 = vpop.eup %8302  ;;  %vm1626_vm6 = vweird.f32 %v8301_v3 }
 0x38c   : > { %v1614_v23 = vmul.f32 %v8299_v6, %v1613_v27  ;;  %2123 = vst [vmem:[#allocation2 + $0x20] sm:$0xff] %v2091_v2  ;;  %v10186_v58 = vadd.f32 1e-05, %v1334_v21  ;;  %v1490_v36 = vmul.f32 %v10169_v34, %v10134_v26  ;;  %v1643_v57 = vsub.f32 1.5, %v1642_v5  ;;  %vm1627_vm8 = vmor %vm1625_vm7, %vm1626_vm6 }
 0x38d   : > { %v1621_v53 = vmul.f32 %v8301_v3, %v1620_v48  ;;  %8304 = vrsqrt.f32 %v10161_v62  ;;  %v1240_v59 = vmul.f32 %v10164_v28, %v10164_v28  ;;  %v1734_v40 = vmul.f32 %v9968_v19, %v1699_v50 }
 0x38e   : > { %v1618_v63 = vsel %vm10177_vm5, %v8299_v6, %v1614_v23  ;;  %8306 = vrsqrt.f32 %v10186_v58  ;;  %v1491_v48 = vmul.f32 %v10169_v34, %v1490_v36  ;;  %vm1485_vm13 = vweird.f32 %v10161_v62 }
 0x38f   : > { %v1622_v13 = vmul.f32 0.5, %v1621_v53  ;;  %1116 = vadd.xlane.f32.xlu2 %v10175_v17  ;;  %1303 = vadd.xlane.f32.xlu0 %v1240_v59  ;;  %v2019_v14 = vpop.f32.mrf.mxu2  ;;  %v1713_v6 = vmul.f32 %v1618_v63, %v9993_v10  ;;  %v1644_v53 = vmul.f32 %v10130_v15, %v1643_v57  ;;  %vm1496_vm15 = vweird.f32 %v10169_v34 }
 0x390   : > { %v2020_v8 = vadd.f32 %v2019_v14, %v10103_v60  ;;  %v1107_v32 = vpop.xlane.xlu1 %1106  ;;  %v1294_v4 = vpop.xlane.xlu2 %1293  ;;  %vm10308_vm4 = vmor %vm1495_vm2, %vm1496_vm15  ;;  %vm1665_vm9 = vweird.f32 %v10186_v58 }
 0x391   : > { %v1623_v24 = vsub.f32 1.5, %v1622_v13  ;;  %v1161_v47 = vmul.f32 %v9825_v46, %v1107_v32  ;;  %v1331_v25 = vmul.f32 %v1294_v4, %v9825_v46  ;;  %v1270_v43 = vpop.xlane.xlu0 %1269  ;;  %v1933_v21 = vpop.f32.mrf.mxu1  ;;  %v1648_v55 = vsel %vm10252_vm12, %v10130_v15, %v1644_v53 }
 0x392   : > { %v2092_v41 = vpack.c.bf16 %v2020_v8, %v1931_v56  ;;  %v1319_v10 = vmul.f32 %v1270_v43, %v9825_v46  ;;  %v1492_v8 = vmul.f32 0.5, %v1491_v48  ;;  %v1769_v15 = vadd.f32 %v9972_v11, %v1734_v40 }
 0x393   : > { %v10199_v38 = vpop.eup %8304  ;;  %v1624_v29 = vmul.f32 %v8301_v3, %v1623_v24  ;;  %v10202_v27 = vsub.f32 %v10044_v18, %v1161_v47  ;;  %v10204_v2 = vadd.f32 1e-05, %v1331_v25  ;;  %v1748_v18 = vmul.f32 %v9968_v19, %v1713_v6 }
 0x394   : > { %v1480_v1 = vmul.f32 %v10199_v38, %v10161_v62  ;;  %2124 = vst [vmem:[#allocation2 + $0x28] sm:$0xff] %v2092_v41  ;;  %v10223_v59 = vadd.f32 1e-05, %v1319_v10  ;;  %v10228_v63 = vpop.eup %8306  ;;  %vm1486_vm11 = vweird.f32 %v10199_v38  ;;  %v1716_v40 = vmul.f32 %v1648_v55, %v9925_v61 }
 0x395   : > { %v1628_v23 = vsel %vm1627_vm8, %v8301_v3, %v1624_v29  ;;  %8308 = vrsqrt.f32 %v10204_v2  ;;  %v1225_v3 = vmul.f32 %v10202_v27, %v10202_v27  ;;  %v1783_v6 = vadd.f32 %v9972_v11, %v1748_v18  ;;  %vm1487_vm14 = vmor %vm1485_vm13, %vm1486_vm11 }
 0x396   : > { %v1714_v12 = vmul.f32 %v1628_v23, %v10001_v52  ;;  %v1481_v22 = vmul.f32 %v10199_v38, %v1480_v1  ;;  %v1934_v52 = vadd.f32 %v1933_v21, %v10101_v39  ;;  %v1660_v57 = vmul.f32 %v10228_v63, %v10186_v58 }
 0x397   : > { %1118 = vadd.xlane.f32.xlu2 %v10209_v54  ;;  %v2022_v5 = vpop.f32.mrf.mxu2  ;;  %1273 = vadd.xlane.f32.xlu0 %v1225_v3  ;;  %8310 = vrsqrt.f32 %v10223_v59  ;;  %v1493_v23 = vsub.f32 1.5, %v1492_v8  ;;  %vm1635_vm1 = vweird.f32 %v10204_v2  ;;  %vm1666_vm5 = vweird.f32 %v10228_v63 }
 0x398   : > { %v1482_v13 = vmul.f32 0.5, %v1481_v22  ;;  %v2023_v14 = vadd.f32 %v2022_v5, %v10103_v60  ;;  %v1268_v50 = vpop.xlane.xlu1 %1267  ;;  %v1109_v36 = vpop.xlane.xlu2 %1108  ;;  %v1749_v56 = vmul.f32 %v9968_v19, %v1714_v12  ;;  %v10273_v22 = vadd.f32 %v10171_v7, %v9889_v31  ;;  %vm10339_vm10 = vmor %vm1665_vm9, %vm1666_vm5 }
 0x399   : > { %v1318_v32 = vmul.f32 %v1268_v50, %v9825_v46  ;;  %v1162_v4 = vmul.f32 %v9825_v46, %v1109_v36  ;;  %v1661_v3 = vmul.f32 %v10228_v63, %v1660_v57  ;;  %vm1515_vm15 = vweird.f32 %v10223_v59 }
 0x39a   : > { %v1483_v24 = vsub.f32 1.5, %v1482_v13  ;;  %v2093_v47 = vpack.c.bf16 %v2023_v14, %v1934_v52  ;;  %v1784_v25 = vadd.f32 %v9972_v11, %v1749_v56  ;;  %v1494_v56 = vmul.f32 %v10169_v34, %v1493_v23 }
 0x39b   : > { %v10238_v43 = vpop.eup %8308  ;;  %v10243_v41 = vadd.f32 1e-05, %v1318_v32  ;;  %v10246_v29 = vsub.f32 %v10059_v9, %v1162_v4  ;;  %v1935_v9 = vpop.f32.mrf.mxu1 }
 0x39c   : > { %v1484_v21 = vmul.f32 %v10199_v38, %v1483_v24  ;;  %v1630_v1 = vmul.f32 %v10238_v43, %v10204_v2  ;;  %2125 = vst [vmem:[#allocation2 + $0x30] sm:$0xff] %v2093_v47  ;;  %v10260_v48 = vpack.c.bf16 %v1784_v25, %v1783_v6  ;;  %v1936_v52 = vadd.f32 %v1935_v9, %v10101_v39 }
 0x39d   : > { %8312 = vrsqrt.f32 %v10243_v41  ;;  %v1226_v62 = vmul.f32 %v10246_v29, %v10246_v29  ;;  %v10281_v36 = vpop.eup %8310  ;;  %vm1636_vm0 = vweird.f32 %v10238_v43  ;;  %v1662_v6 = vmul.f32 0.5, %v1661_v3 }
 0x39e   : > { %v1631_v18 = vmul.f32 %v10238_v43, %v1630_v1  ;;  %1977 = vmatmul.bf16.vlgmr.msrb.gmra.mxu3 %v10260_v48  ;;  %v1488_v12 = vsel %vm1487_vm14, %v10199_v38, %v1484_v21  ;;  %v1510_v61 = vmul.f32 %v10281_v36, %v10223_v59  ;;  %vm1637_vm3 = vmor %vm1635_vm1, %vm1636_vm0  ;;  %v1751_v21 = vmul.f32 %v9968_v19, %v1716_v40 }
 0x39f   : > { %v2024_v5 = vpop.f32.mrf.mxu2  ;;  %v1700_v13 = vmul.f32 %v1488_v12, %v10017_v16  ;;  %1275 = vadd.xlane.f32.xlu1 %v1226_v62  ;;  %1120 = vadd.xlane.f32.xlu0 %v10273_v22  ;;  %v1663_v23 = vsub.f32 1.5, %v1662_v6  ;;  %vm1505_vm7 = vweird.f32 %v10243_v41  ;;  %vm1516_vm12 = vweird.f32 %v10281_v36 }
 0x3a0   : > { %v1632_v53 = vmul.f32 0.5, %v1631_v18  ;;  %v2025_v14 = vadd.f32 %v2024_v5, %v10103_v60  ;;  %v1111_v38 = vpop.xlane.xlu1 %1110  ;;  %v1298_v50 = vpop.xlane.xlu2 %1297  ;;  %v1498_v18 = vsel %vm10308_vm4, %v10169_v34, %v1494_v56  ;;  %v1511_v62 = vmul.f32 %v10281_v36, %v1510_v61  ;;  %vm1517_vm0 = vmor %vm1515_vm15, %vm1516_vm12 }
 0x3a1   : > { %v1163_v31 = vmul.f32 %v9825_v46, %v1111_v38  ;;  %v1333_v16 = vmul.f32 %v1298_v50, %v9825_v46  ;;  %v1735_v7 = vmul.f32 %v9968_v19, %v1700_v13  ;;  %v1701_v34 = vmul.f32 %v1498_v18, %v9939_v30 }
 0x3a2   : > { %v1633_v8 = vsub.f32 1.5, %v1632_v53  ;;  %v2094_v32 = vpack.c.bf16 %v2025_v14, %v1936_v52  ;;  %v1664_v14 = vmul.f32 %v10228_v63, %v1663_v23 }
 0x3a3   : > { %v8313_v4 = vpop.eup %8312  ;;  %v10291_v24 = vsub.f32 %v10071_v44, %v1163_v31  ;;  %v10293_v47 = vadd.f32 1e-05, %v1333_v16  ;;  %v1770_v25 = vadd.f32 %v9972_v11, %v1735_v7  ;;  %v1512_v16 = vmul.f32 0.5, %v1511_v62 }
 0x3a4   : > { %v1634_v57 = vmul.f32 %v10238_v43, %v1633_v8  ;;  %v1500_v10 = vmul.f32 %v8313_v4, %v10243_v41  ;;  %2126 = vst [vmem:[#allocation2 + $0x38] sm:$0xff] %v2094_v32  ;;  %vm1506_vm6 = vweird.f32 %v8313_v4  ;;  %v1736_v32 = vmul.f32 %v9968_v19, %v1701_v34 }
 0x3a5   : > { %8314 = vrsqrt.f32 %v10293_v47  ;;  %v1227_v44 = vmul.f32 %v10291_v24, %v10291_v24  ;;  %v1796_v9 = vpack.c.bf16 %v1770_v25, %v1769_v15  ;;  %vm1507_vm8 = vmor %vm1505_vm7, %vm1506_vm6  ;;  %v1513_v25 = vsub.f32 1.5, %v1512_v16  ;;  %v10379_v16 = vld [vmem:[#allocation12] ss:$0 sm:$0xff] }
 0x3a6   : > { %v1501_v1 = vmul.f32 %v8313_v4, %v1500_v10  ;;  %v1638_v55 = vsel %vm1637_vm3, %v10238_v43, %v1634_v57  ;;  %v1668_v58 = vsel %vm10339_vm10, %v10228_v63, %v1664_v14  ;;  %vm1655_vm13 = vweird.f32 %v10293_v47 }
 0x3a7   : > { %v1715_v26 = vmul.f32 %v1638_v55, %v10037_v42  ;;  %1277 = vadd.xlane.f32.xlu1 %v1227_v44  ;;  %1942 = vmatmul.bf16.gmra.mxu1 %v1796_v9  ;;  %v1786_v42 = vadd.f32 %v9972_v11, %v1751_v21  ;;  %v1771_v21 = vadd.f32 %v9972_v11, %v1736_v32 }
 0x3a8   : > { %v1502_v12 = vmul.f32 0.5, %v1501_v1  ;;  %v1272_v3 = vpop.xlane.xlu1 %1271  ;;  %v1113_v5 = vpop.xlane.xlu2 %1112  ;;  %2031 = vmatmul.bf16.gmra.mxu2 %v1796_v9  ;;  %v1718_v9 = vmul.f32 %v1668_v58, %v10020_v20  ;;  %v1514_v63 = vmul.f32 %v10281_v36, %v1513_v25 }
 0x3a9   : > { %v1320_v13 = vmul.f32 %v1272_v3, %v9825_v46  ;;  %v1164_v15 = vmul.f32 %v9825_v46, %v1113_v5  ;;  %v1750_v43 = vmul.f32 %v9968_v19, %v1715_v26 }
 0x3aa   : > { %v1503_v53 = vsub.f32 1.5, %v1502_v12  ;;  %v1753_v20 = vmul.f32 %v9968_v19, %v1718_v9 }
 0x3ab   : > { %v8315_v52 = vpop.eup %8314  ;;  %v1352_v38 = vadd.f32 1e-05, %v1320_v13  ;;  %v10326_v50 = vsub.f32 %v10083_v33, %v1164_v15  ;;  %v1785_v31 = vadd.f32 %v9972_v11, %v1750_v43 }
 0x3ac   : > { %v1504_v7 = vmul.f32 %v8313_v4, %v1503_v53  ;;  %v1650_v40 = vmul.f32 %v8315_v52, %v10293_v47  ;;  %vm1656_vm11 = vweird.f32 %v8315_v52  ;;  %v1518_v47 = vsel %vm1517_vm0, %v10281_v36, %v1514_v63 }
 0x3ad   : > { %8316 = vrsqrt.f32 %v1352_v38  ;;  %v1228_v30 = vmul.f32 %v10326_v50, %v10326_v50  ;;  %v10333_v56 = vpack.c.bf16 %v1786_v42, %v1785_v31  ;;  %vm1657_vm14 = vmor %vm1655_vm13, %vm1656_vm11  ;;  %v1788_v43 = vadd.f32 %v9972_v11, %v1753_v20 }
 0x3ae   : > { %v1651_v8 = vmul.f32 %v8315_v52, %v1650_v40  ;;  %v1508_v33 = vsel %vm1507_vm8, %v8313_v4, %v1504_v7  ;;  %v1703_v42 = vmul.f32 %v1518_v47, %v10040_v45  ;;  %vm1525_vm2 = vweird.f32 %v1352_v38 }
 0x3af   : > { %1279 = vadd.xlane.f32.xlu2 %v1228_v30  ;;  %1982 = vmatmul.bf16.gmra.mxu3 %v10333_v56  ;;  %v1702_v41 = vmul.f32 %v1508_v33, %v10055_v35 }
 0x3b0   : > { %v1652_v57 = vmul.f32 0.5, %v1651_v8  ;;  %v1115_v61 = vpop.xlane.xlu1 %1114 }
 0x3b1   : > { %v1165_v4 = vmul.f32 %v9825_v46, %v1115_v61  ;;  %v1737_v10 = vmul.f32 %v9968_v19, %v1702_v41 }
 0x3b2   : > { %v1653_v44 = vsub.f32 1.5, %v1652_v57 }
 0x3b3   : > { %v8317_v2 = vpop.eup %8316  ;;  %v10353_v35 = vsub.f32 %v10095_v0, %v1165_v4  ;;  %v1772_v1 = vadd.f32 %v9972_v11, %v1737_v10 }
 0x3b4   : > { %v1654_v55 = vmul.f32 %v8315_v52, %v1653_v44  ;;  %v1520_v23 = vmul.f32 %v8317_v2, %v1352_v38  ;;  %vm1526_vm1 = vweird.f32 %v8317_v2 }
 0x3b5   : > { %v1229_v26 = vmul.f32 %v10353_v35, %v10353_v35  ;;  %v1797_v18 = vpack.c.bf16 %v1772_v1, %v1771_v21  ;;  %vm1527_vm3 = vmor %vm1525_vm2, %vm1526_vm1 }
 0x3b6   : > { %v1521_v62 = vmul.f32 %v8317_v2, %v1520_v23  ;;  %v1658_v0 = vsel %vm1657_vm14, %v8315_v52, %v1654_v55  ;;  %v10373_v52 = vld [vmem:[#allocation11] ss:$0 sm:$0xff] }
 0x3b7   : > { %1281 = vadd.xlane.f32.xlu0 %v1229_v26  ;;  %v1717_v12 = vmul.f32 %v1658_v0, %v10067_v49  ;;  %1947 = vmatmul.bf16.gmra.mxu1 %v1797_v18  ;;  %v1738_v14 = vmul.f32 %v10373_v52, %v1703_v42 }
 0x3b8   : > { %v1522_v3 = vmul.f32 0.5, %v1521_v62  ;;  %2036 = vmatmul.bf16.gmra.mxu2 %v1797_v18 }
 0x3b9   : > { %v1752_v5 = vmul.f32 %v9968_v19, %v1717_v12  ;;  %v1938_v15 = vpop.f32.mrf.mxu1  ;;  %v1773_v7 = vadd.f32 %v10379_v16, %v1738_v14 }
 0x3ba   : > { %v1523_v13 = vsub.f32 1.5, %v1522_v3  ;;  %v1939_v31 = vadd.f32 %v1938_v15, %v10101_v39 }
 0x3bb   : > { %v1787_v59 = vadd.f32 %v9972_v11, %v1752_v5 }
 0x3bc   : > { %v1524_v53 = vmul.f32 %v8317_v2, %v1523_v13 }
 0x3bd   : > { %v10369_v49 = vpack.c.bf16 %v1788_v43, %v1787_v59 }
 0x3be   : > { %v1528_v34 = vsel %vm1527_vm3, %v8317_v2, %v1524_v53 }
 0x3bf   : > { %1987 = vmatmul.bf16.gmra.mxu3 %v10369_v49  ;;  %v2027_v36 = vpop.f32.mrf.mxu2  ;;  %v1704_v19 = vmul.f32 %v1528_v34, %v10078_v51 }
 0x3c0   : > { %v2028_v11 = vadd.f32 %v2027_v36, %v10103_v60 }
 0x3c1   : > { %v1739_v45 = vmul.f32 %v10373_v52, %v1704_v19  ;;  %v1940_v30 = vpop.f32.mrf.mxu1 }
 0x3c2   : > { %v2095_v38 = vpack.c.bf16 %v2028_v11, %v1939_v31  ;;  %v1941_v33 = vadd.f32 %v1940_v30, %v10101_v39 }
 0x3c3   : > { %v1774_v40 = vadd.f32 %v10379_v16, %v1739_v45 }
 0x3c4   : > { %2127 = vst [vmem:[#allocation2 + $0x40] sm:$0xff] %v2095_v38 }
 0x3c5   : > { %v1798_v51 = vpack.c.bf16 %v1774_v40, %v1773_v7 }
 0x3c7   : > { %v2029_v8 = vpop.f32.mrf.mxu2  ;;  %1952 = vmatmul.bf16.gmra.mxu1 %v1798_v51 }
 0x3c8   : > { %v2030_v32 = vadd.f32 %v2029_v8, %v10103_v60  ;;  %2041 = vmatmul.bf16.gmra.mxu2 %v1798_v51 }
 0x3ca   : > { %v2096_v6 = vpack.c.bf16 %v2030_v32, %v1941_v33 }
 0x3cc   : > { %2128 = vst [vmem:[#allocation2 + $0x48] sm:$0xff] %v2096_v6 }
 0x3fa   : > { %v1302_v41 = vpop.xlane.xlu2 %1301 }
 0x3fb   : > { %v1335_v25 = vmul.f32 %v1302_v41, %v9825_v46 }
 0x3fd   : > { %v1367_v57 = vadd.f32 1e-05, %v1335_v25 }
 0x3ff   : > { %8318 = vrsqrt.f32 %v1367_v57  ;;  %vm1675_vm5 = vweird.f32 %v1367_v57 }
 0x402   : > { %v1117_v61 = vpop.xlane.xlu2 %1116  ;;  %v1304_v58 = vpop.xlane.xlu0 %1303 }
 0x403   : > { %v1166_v4 = vmul.f32 %v9825_v46, %v1117_v61  ;;  %v1336_v10 = vmul.f32 %v1304_v58, %v9825_v46 }
 0x405   : > { %v8319_v44 = vpop.eup %8318  ;;  %v10389_v21 = vsub.f32 %v10175_v17, %v1166_v4  ;;  %v1368_v2 = vadd.f32 1e-05, %v1336_v10 }
 0x406   : > { %v1670_v1 = vmul.f32 %v8319_v44, %v1367_v57  ;;  %vm1676_vm4 = vweird.f32 %v8319_v44 }
 0x407   : > { %8320 = vrsqrt.f32 %v1368_v2  ;;  %v1230_v9 = vmul.f32 %v10389_v21, %v10389_v21  ;;  %vm1677_vm6 = vmor %vm1675_vm5, %vm1676_vm4  ;;  %vm1685_vm8 = vweird.f32 %v1368_v2 }
 0x408   : > { %v1671_v63 = vmul.f32 %v8319_v44, %v1670_v1 }
 0x409   : > { %1283 = vadd.xlane.f32.xlu1 %v1230_v9 }
 0x40a   : > { %v1672_v55 = vmul.f32 0.5, %v1671_v63  ;;  %v1119_v23 = vpop.xlane.xlu2 %1118  ;;  %v1274_v62 = vpop.xlane.xlu0 %1273 }
 0x40b   : > { %v1167_v26 = vmul.f32 %v9825_v46, %v1119_v23  ;;  %v1321_v17 = vmul.f32 %v1274_v62, %v9825_v46 }
 0x40c   : > { %v1673_v18 = vsub.f32 1.5, %v1672_v55 }
 0x40d   : > { %v8321_v0 = vpop.eup %8320  ;;  %v10395_v12 = vsub.f32 %v10209_v54, %v1167_v26  ;;  %v1353_v47 = vadd.f32 1e-05, %v1321_v17 }
 0x40e   : > { %v1680_v20 = vmul.f32 %v8321_v0, %v1368_v2  ;;  %v1674_v3 = vmul.f32 %v8319_v44, %v1673_v18  ;;  %vm1686_vm7 = vweird.f32 %v8321_v0 }
 0x40f   : > { %v1231_v5 = vmul.f32 %v10395_v12, %v10395_v12  ;;  %8322 = vrsqrt.f32 %v1353_v47  ;;  %vm1687_vm9 = vmor %vm1685_vm8, %vm1686_vm7  ;;  %vm1535_vm11 = vweird.f32 %v1353_v47 }
 0x410   : > { %v1681_v13 = vmul.f32 %v8321_v0, %v1680_v20  ;;  %v1678_v43 = vsel %vm1677_vm6, %v8319_v44, %v1674_v3 }
 0x411   : > { %1285 = vadd.xlane.f32.xlu2 %v1231_v5  ;;  %v1719_v14 = vmul.f32 %v1678_v43, %v10137_v37 }
 0x412   : > { %v1682_v15 = vmul.f32 0.5, %v1681_v13  ;;  %v1276_v59 = vpop.xlane.xlu1 %1275  ;;  %v1121_v53 = vpop.xlane.xlu0 %1120 }
 0x413   : > { %v1322_v54 = vmul.f32 %v1276_v59, %v9825_v46  ;;  %v1168_v34 = vmul.f32 %v9825_v46, %v1121_v53  ;;  %v1754_v51 = vmul.f32 %v10373_v52, %v1719_v14 }
 0x414   : > { %v1683_v42 = vsub.f32 1.5, %v1682_v15 }
 0x415   : > { %v1354_v19 = vadd.f32 1e-05, %v1322_v54  ;;  %v8323_v31 = vpop.eup %8322  ;;  %v10404_v11 = vsub.f32 %v10273_v22, %v1168_v34  ;;  %v1789_v25 = vadd.f32 %v10379_v16, %v1754_v51 }
 0x416   : > { %v1684_v36 = vmul.f32 %v8321_v0, %v1683_v42  ;;  %v1530_v45 = vmul.f32 %v8323_v31, %v1353_v47  ;;  %vm1536_vm10 = vweird.f32 %v8323_v31 }
 0x417   : > { %8324 = vrsqrt.f32 %v1354_v19  ;;  %v1232_v38 = vmul.f32 %v10404_v11, %v10404_v11  ;;  %vm1537_vm12 = vmor %vm1535_vm11, %vm1536_vm10  ;;  %vm1545_vm14 = vweird.f32 %v1354_v19 }
 0x418   : > { %v1688_v7 = vsel %vm1687_vm9, %v8321_v0, %v1684_v36  ;;  %v1531_v40 = vmul.f32 %v8323_v31, %v1530_v45 }
 0x419   : > { %v1720_v30 = vmul.f32 %v1688_v7, %v10164_v28  ;;  %1287 = vadd.xlane.f32.xlu0 %v1232_v38 }
 0x41a   : > { %v1278_v8 = vpop.xlane.xlu1 %1277  ;;  %v1532_v37 = vmul.f32 0.5, %v1531_v40 }
 0x41b   : > { %v1323_v33 = vmul.f32 %v1278_v8, %v9825_v46  ;;  %v1755_v22 = vmul.f32 %v10373_v52, %v1720_v30 }
 0x41c   : > { %v1533_v6 = vsub.f32 1.5, %v1532_v37 }
 0x41d   : > { %v8325_v32 = vpop.eup %8324  ;;  %v1355_v41 = vadd.f32 1e-05, %v1323_v33  ;;  %v1790_v57 = vadd.f32 %v10379_v16, %v1755_v22 }
 0x41e   : > { %v1540_v61 = vmul.f32 %v8325_v32, %v1354_v19  ;;  %v1534_v58 = vmul.f32 %v8323_v31, %v1533_v6  ;;  %vm1546_vm13 = vweird.f32 %v8325_v32 }
 0x41f   : > { %8326 = vrsqrt.f32 %v1355_v41  ;;  %v10414_v28 = vpack.c.bf16 %v1790_v57, %v1789_v25  ;;  %vm1547_vm15 = vmor %vm1545_vm14, %vm1546_vm13  ;;  %vm1555_vm1 = vweird.f32 %v1355_v41 }
 0x420   : > { %v1541_v4 = vmul.f32 %v8325_v32, %v1540_v61  ;;  %v1538_v1 = vsel %vm1537_vm12, %v8323_v31, %v1534_v58 }
 0x421   : > { %1992 = vmatmul.bf16.gmra.mxu3 %v10414_v28  ;;  %v1705_v26 = vmul.f32 %v1538_v1, %v10202_v27 }
 0x422   : > { %v1280_v10 = vpop.xlane.xlu2 %1279  ;;  %v1542_v44 = vmul.f32 0.5, %v1541_v4 }
 0x423   : > { %v1324_v2 = vmul.f32 %v1280_v10, %v9825_v46  ;;  %v1740_v3 = vmul.f32 %v10373_v52, %v1705_v26 }
 0x424   : > { %v1543_v9 = vsub.f32 1.5, %v1542_v44  ;;  %v1943_v55 = vpop.f32.mrf.mxu1 }
 0x425   : > { %v1356_v63 = vadd.f32 1e-05, %v1324_v2  ;;  %v8327_v23 = vpop.eup %8326  ;;  %v1944_v43 = vadd.f32 %v1943_v55, %v10101_v39  ;;  %v1775_v53 = vadd.f32 %v10379_v16, %v1740_v3 }
 0x426   : > { %v1544_v18 = vmul.f32 %v8325_v32, %v1543_v9  ;;  %v1550_v62 = vmul.f32 %v8327_v23, %v1355_v41  ;;  %vm1556_vm0 = vweird.f32 %v8327_v23 }
 0x427   : > { %8328 = vrsqrt.f32 %v1356_v63  ;;  %vm1557_vm2 = vmor %vm1555_vm1, %vm1556_vm0  ;;  %vm1565_vm4 = vweird.f32 %v1356_v63 }
 0x428   : > { %v1551_v0 = vmul.f32 %v8327_v23, %v1550_v62  ;;  %v1548_v17 = vsel %vm1547_vm15, %v8325_v32, %v1544_v18 }
 0x429   : > { %v1706_v20 = vmul.f32 %v1548_v17, %v10246_v29 }
 0x42a   : > { %v1552_v47 = vmul.f32 0.5, %v1551_v0 }
 0x42b   : > { %v2032_v5 = vpop.f32.mrf.mxu2  ;;  %v1741_v13 = vmul.f32 %v10373_v52, %v1706_v20  ;;  %v1282_v20 = vpop.xlane.xlu0 %1281 }
 0x42c   : > { %v1553_v59 = vsub.f32 1.5, %v1552_v47  ;;  %v2033_v27 = vadd.f32 %v2032_v5, %v10103_v60  ;;  %v1945_v42 = vpop.f32.mrf.mxu1  ;;  %v1325_v3 = vmul.f32 %v1282_v20, %v9825_v46  ;;  %v10447_v47 = vpop.f32.mrf.mxu3 }
 0x42d   : > { %v8329_v15 = vpop.eup %8328  ;;  %v1776_v34 = vadd.f32 %v10379_v16, %v1741_v13  ;;  %v1946_v40 = vadd.f32 %v1945_v42, %v10101_v39 }
 0x42e   : > { %v1560_v54 = vmul.f32 %v8329_v15, %v1356_v63  ;;  %v1554_v29 = vmul.f32 %v8327_v23, %v1553_v59  ;;  %v2097_v36 = vpack.c.bf16 %v2033_v27, %v1944_v43  ;;  %vm1566_vm3 = vweird.f32 %v8329_v15 }
 0x42f   : > { %v1799_v14 = vpack.c.bf16 %v1776_v34, %v1775_v53  ;;  %vm1567_vm5 = vmor %vm1565_vm4, %vm1566_vm3  ;;  %v1357_v5 = vadd.f32 1e-05, %v1325_v3 }
 0x430   : > { %v1561_v19 = vmul.f32 %v8329_v15, %v1560_v54  ;;  %2129 = vst [vmem:[#allocation2 + $0x50] sm:$0xff] %v2097_v36  ;;  %v1558_v45 = vsel %vm1557_vm2, %v8327_v23, %v1554_v29 }
 0x431   : > { %1957 = vmatmul.bf16.gmra.mxu1 %v1799_v14  ;;  %2046 = vmatmul.bf16.gmra.mxu2 %v1799_v14  ;;  %v1707_v8 = vmul.f32 %v1558_v45, %v10291_v24  ;;  %8330 = vrsqrt.f32 %v1357_v5  ;;  %vm1575_vm7 = vweird.f32 %v1357_v5 }
 0x432   : > { %v1562_v31 = vmul.f32 0.5, %v1561_v19  ;;  %2066 = vmatmul.bf16.vlgmr.msra.gmra.mxu3 %v10260_v48 }
 0x433   : > { %v2034_v7 = vpop.f32.mrf.mxu2  ;;  %v1742_v48 = vmul.f32 %v10373_v52, %v1707_v8 }
 0x434   : > { %v1563_v38 = vsub.f32 1.5, %v1562_v31  ;;  %v2035_v30 = vadd.f32 %v2034_v7, %v10103_v60  ;;  %v1948_v51 = vpop.f32.mrf.mxu1 }
 0x435   : > { %v1949_v25 = vadd.f32 %v1948_v51, %v10101_v39  ;;  %v1777_v61 = vadd.f32 %v10379_v16, %v1742_v48 }
 0x436   : > { %v1564_v37 = vmul.f32 %v8329_v15, %v1563_v38  ;;  %v2098_v33 = vpack.c.bf16 %v2035_v30, %v1946_v40 }
 0x437   : > { %v8331_v13 = vpop.eup %8330 }
 0x438   : > { %v1568_v22 = vsel %vm1567_vm5, %v8329_v15, %v1564_v37  ;;  %2130 = vst [vmem:[#allocation2 + $0x58] sm:$0xff] %v2098_v33  ;;  %v10449_v15 = vpop.f32.mrf.mxu3  ;;  %vm1576_vm6 = vweird.f32 %v8331_v13 }
 0x439   : > { %v1708_v32 = vmul.f32 %v1568_v22, %v10326_v50  ;;  %vm1577_vm8 = vmor %vm1575_vm7, %vm1576_vm6 }
 0x43b   : > { %v1743_v6 = vmul.f32 %v10373_v52, %v1708_v32  ;;  %v2037_v41 = vpop.f32.mrf.mxu2 }
 0x43c   : > { %v2038_v57 = vadd.f32 %v2037_v41, %v10103_v60  ;;  %v1950_v58 = vpop.f32.mrf.mxu1 }
 0x43d   : > { %v1778_v24 = vadd.f32 %v10379_v16, %v1743_v6  ;;  %v1951_v44 = vadd.f32 %v1950_v58, %v10101_v39 }
 0x43e   : > { %v2099_v4 = vpack.c.bf16 %v2038_v57, %v1949_v25 }
 0x43f   : > { %v1800_v10 = vpack.c.bf16 %v1778_v24, %v1777_v61 }
 0x440   : > { %2131 = vst [vmem:[#allocation2 + $0x60] sm:$0xff] %v2099_v4  ;;  %v10452_v42 = vpop.f32.mrf.mxu3 }
 0x441   : > { %1962 = vmatmul.bf16.gmra.mxu1 %v1800_v10  ;;  %2051 = vmatmul.bf16.gmra.mxu2 %v1800_v10 }
 0x442   : > { %2071 = vmatmul.bf16.gmra.mxu3 %v10333_v56 }
 0x443   : > { %v2039_v50 = vpop.f32.mrf.mxu2 }
 0x444   : > { %v2040_v2 = vadd.f32 %v2039_v50, %v10103_v60  ;;  %v1953_v9 = vpop.f32.mrf.mxu1 }
 0x445   : > { %v1954_v55 = vadd.f32 %v1953_v9, %v10101_v39 }
 0x446   : > { %v2100_v1 = vpack.c.bf16 %v2040_v2, %v1951_v44 }
 0x448   : > { %2132 = vst [vmem:[#allocation2 + $0x68] sm:$0xff] %v2100_v1  ;;  %v10455_v45 = vpop.f32.mrf.mxu3 }
 0x44b   : > { %v2042_v63 = vpop.f32.mrf.mxu2 }
 0x44c   : > { %v2043_v23 = vadd.f32 %v2042_v63, %v10103_v60  ;;  %v1955_v18 = vpop.f32.mrf.mxu1 }
 0x44d   : > { %v1956_v56 = vadd.f32 %v1955_v18, %v10101_v39 }
 0x44e   : > { %v2101_v26 = vpack.c.bf16 %v2043_v23, %v1954_v55 }
 0x450   : > { %2133 = vst [vmem:[#allocation2 + $0x70] sm:$0xff] %v2101_v26  ;;  %v10459_v25 = vpop.f32.mrf.mxu3 }
 0x452   : > { %2076 = vmatmul.bf16.gmra.mxu3 %v10369_v49  ;;  %v1570_v49 = vmul.f32 %v8331_v13, %v1357_v5 }
 0x453   : > { %v2044_v62 = vpop.f32.mrf.mxu2 }
 0x454   : > { %v2045_v0 = vadd.f32 %v2044_v62, %v10103_v60  ;;  %v1571_v59 = vmul.f32 %v8331_v13, %v1570_v49 }
 0x456   : > { %v2102_v17 = vpack.c.bf16 %v2045_v0, %v1956_v56  ;;  %v1572_v53 = vmul.f32 0.5, %v1571_v59 }
 0x458   : > { %2134 = vst [vmem:[#allocation2 + $0x78] sm:$0xff] %v2102_v17 }
 0x462   : > { %2081 = vmatmul.bf16.gmra.mxu3 %v10414_v28  ;;  %v1573_v28 = vsub.f32 1.5, %v1572_v53 }
 0x464   : > { %v1574_v14 = vmul.f32 %v8331_v13, %v1573_v28 }
 0x466   : > { %v1578_v40 = vsel %vm1577_vm8, %v8331_v13, %v1574_v14 }
 0x467   : > { %v1709_v33 = vmul.f32 %v1578_v40, %v10353_v35 }
 0x469   : > { %v1744_v61 = vmul.f32 %v10373_v52, %v1709_v33 }
 0x46b   : > { %v1779_v35 = vadd.f32 %v10379_v16, %v1744_v61 }
 0x47c   : > { %v1284_v43 = vpop.xlane.xlu1 %1283 }
 0x47d   : > { %v1326_v27 = vmul.f32 %v1284_v43, %v9825_v46 }
 0x47f   : > { %v1358_v54 = vadd.f32 1e-05, %v1326_v27 }
 0x481   : > { %8332 = vrsqrt.f32 %v1358_v54  ;;  %vm1585_vm10 = vweird.f32 %v1358_v54 }
 0x484   : > { %v1286_v34 = vpop.xlane.xlu2 %1285 }
 0x485   : > { %v1327_v29 = vmul.f32 %v1286_v34, %v9825_v46 }
 0x487   : > { %v8333_v36 = vpop.eup %8332  ;;  %v1359_v19 = vadd.f32 1e-05, %v1327_v29 }
 0x488   : > { %v1580_v31 = vmul.f32 %v8333_v36, %v1358_v54  ;;  %vm1586_vm9 = vweird.f32 %v8333_v36 }
 0x489   : > { %8334 = vrsqrt.f32 %v1359_v19  ;;  %vm1587_vm11 = vmor %vm1585_vm10, %vm1586_vm9  ;;  %vm1595_vm13 = vweird.f32 %v1359_v19 }
 0x48a   : > { %v1581_v38 = vmul.f32 %v8333_v36, %v1580_v31 }
 0x48c   : > { %v1582_v7 = vmul.f32 0.5, %v1581_v38  ;;  %v1288_v51 = vpop.xlane.xlu0 %1287 }
 0x48d   : > { %v1328_v37 = vmul.f32 %v1288_v51, %v9825_v46 }
 0x48e   : > { %v1583_v30 = vsub.f32 1.5, %v1582_v7 }
 0x48f   : > { %v8335_v8 = vpop.eup %8334  ;;  %v1360_v48 = vadd.f32 1e-05, %v1328_v37 }
 0x490   : > { %v1584_v22 = vmul.f32 %v8333_v36, %v1583_v30  ;;  %v1590_v32 = vmul.f32 %v8335_v8, %v1359_v19  ;;  %vm1596_vm12 = vweird.f32 %v8335_v8  ;;  %v1981_v19 = vadd.f32 %v10449_v15, %v10101_v39 }
 0x491   : > { %8336 = vrsqrt.f32 %v1360_v48  ;;  %vm1597_vm14 = vmor %vm1595_vm13, %vm1596_vm12  ;;  %vm1605_vm0 = vweird.f32 %v1360_v48 }
 0x492   : > { %v1591_v6 = vmul.f32 %v8335_v8, %v1590_v32  ;;  %v1588_v41 = vsel %vm1587_vm11, %v8333_v36, %v1584_v22 }
 0x493   : > { %v1710_v57 = vmul.f32 %v1588_v41, %v10389_v21  ;;  %v10466_v21 = vpop.f32.mrf.mxu3 }
 0x494   : > { %v1592_v24 = vmul.f32 0.5, %v1591_v6 }
 0x495   : > { %v1745_v58 = vmul.f32 %v10373_v52, %v1710_v57  ;;  %v1986_v57 = vadd.f32 %v10455_v45, %v10101_v39 }
 0x496   : > { %v1593_v46 = vsub.f32 1.5, %v1592_v24 }
 0x497   : > { %v1780_v4 = vadd.f32 %v10379_v16, %v1745_v58  ;;  %v8337_v10 = vpop.eup %8336 }
 0x498   : > { %v1594_v44 = vmul.f32 %v8335_v8, %v1593_v46  ;;  %v1600_v2 = vmul.f32 %v8337_v10, %v1360_v48  ;;  %vm1606_vm15 = vweird.f32 %v8337_v10  ;;  %v1989_v46 = vadd.f32 %v10459_v25, %v10101_v39 }
 0x499   : > { %v1801_v50 = vpack.c.bf16 %v1780_v4, %v1779_v35  ;;  %vm1607_vm1 = vmor %vm1605_vm0, %vm1606_vm15 }
 0x49a   : > { %v1601_v1 = vmul.f32 %v8337_v10, %v1600_v2  ;;  %v1598_v63 = vsel %vm1597_vm14, %v8335_v8, %v1594_v44  ;;  %v1984_v8 = vadd.f32 %v10452_v42, %v10101_v39 }
 0x49b   : > { %1967 = vmatmul.bf16.gmra.mxu1 %v1801_v50  ;;  %2056 = vmatmul.bf16.gmra.mxu2 %v1801_v50  ;;  %v1711_v23 = vmul.f32 %v1598_v63, %v10395_v12  ;;  %v1991_v50 = vadd.f32 %v10466_v21, %v10101_v39 }
 0x49c   : > { %v1602_v9 = vmul.f32 0.5, %v1601_v1 }
 0x49d   : > { %v1746_v0 = vmul.f32 %v10373_v52, %v1711_v23 }
 0x49e   : > { %v1603_v55 = vsub.f32 1.5, %v1602_v9 }
 0x49f   : > { %v1781_v20 = vadd.f32 %v10379_v16, %v1746_v0 }
 0x4a0   : > { %v1604_v26 = vmul.f32 %v8337_v10, %v1603_v55 }
 0x4a2   : > { %v1608_v18 = vsel %vm1607_vm1, %v8337_v10, %v1604_v26 }
 0x4a3   : > { %v1712_v56 = vmul.f32 %v1608_v18, %v10404_v11  ;;  %v1979_v11 = vadd.f32 %v10447_v47, %v10101_v39 }
 0x4a4   : > { %v10469_v62 = vpop.f32.mrf.mxu3 }
 0x4a5   : > { %v1747_v17 = vmul.f32 %v10373_v52, %v1712_v56  ;;  %v1994_v1 = vadd.f32 %v10469_v62, %v10101_v39 }
 0x4a7   : > { %v1782_v3 = vadd.f32 %v10379_v16, %v1747_v17 }
 0x4a9   : > { %v1802_v5 = vpack.c.bf16 %v1782_v3, %v1781_v20 }
 0x4ab   : > { %1972 = vmatmul.bf16.gmra.mxu1 %v1802_v5  ;;  %2061 = vmatmul.bf16.gmra.mxu2 %v1802_v5 }
 0x4ac   : > { %v1995_v12 = vpop.f32.mrf.mxu3 }
 0x4ad   : > { %v1996_v55 = vadd.f32 %v1995_v12, %v10101_v39 }
 0x4ae   : > { %v1958_v13 = vpop.f32.mrf.mxu1 }
 0x4af   : > { %v1959_v59 = vadd.f32 %v1958_v13, %v10101_v39 }
 0x4b4   : > { %v2047_v49 = vpop.f32.mrf.mxu2 }
 0x4b5   : > { %v2048_v43 = vadd.f32 %v2047_v49, %v10103_v60  ;;  %v2067_v27 = vpop.f32.mrf.mxu3 }
 0x4b6   : > { %v2068_v52 = vadd.f32 %v2067_v27, %v10103_v60  ;;  %v1960_v54 = vpop.f32.mrf.mxu1 }
 0x4b7   : > { %v2103_v53 = vpack.c.bf16 %v2048_v43, %v1959_v59  ;;  %v1961_v34 = vadd.f32 %v1960_v54, %v10101_v39 }
 0x4b8   : > { %v2111_v28 = vpack.c.bf16 %v2068_v52, %v1979_v11 }
 0x4b9   : > { %2135 = vst [vmem:[#allocation2 + $0x80] sm:$0xff] %v2103_v53 }
 0x4ba   : > { %2143 = vst [vmem:[#allocation2 + $0xc0] sm:$0xff] %v2111_v28 }
 0x4bc   : > { %v2049_v16 = vpop.f32.mrf.mxu2 }
 0x4bd   : > { %v2050_v29 = vadd.f32 %v2049_v16, %v10103_v60  ;;  %v2069_v36 = vpop.f32.mrf.mxu3 }
 0x4be   : > { %v2070_v14 = vadd.f32 %v2069_v36, %v10103_v60  ;;  %v1963_v38 = vpop.f32.mrf.mxu1 }
 0x4bf   : > { %v2104_v31 = vpack.c.bf16 %v2050_v29, %v1961_v34  ;;  %v1964_v40 = vadd.f32 %v1963_v38, %v10101_v39 }
 0x4c0   : > { %v2112_v47 = vpack.c.bf16 %v2070_v14, %v1981_v19 }
 0x4c1   : > { %2136 = vst [vmem:[#allocation2 + $0x88] sm:$0xff] %v2104_v31 }
 0x4c2   : > { %2144 = vst [vmem:[#allocation2 + $0xc8] sm:$0xff] %v2112_v47 }
 0x4c4   : > { %v2052_v7 = vpop.f32.mrf.mxu2 }
 0x4c5   : > { %v2053_v30 = vadd.f32 %v2052_v7, %v10103_v60  ;;  %v2072_v51 = vpop.f32.mrf.mxu3 }
 0x4c6   : > { %v2073_v37 = vadd.f32 %v2072_v51, %v10103_v60  ;;  %v1965_v22 = vpop.f32.mrf.mxu1 }
 0x4c7   : > { %v2105_v33 = vpack.c.bf16 %v2053_v30, %v1964_v40  ;;  %v1966_v48 = vadd.f32 %v1965_v22, %v10101_v39 }
 0x4c8   : > { %v2113_v15 = vpack.c.bf16 %v2073_v37, %v1984_v8 }
 0x4c9   : > { %2137 = vst [vmem:[#allocation2 + $0x90] sm:$0xff] %v2105_v33 }
 0x4ca   : > { %2145 = vst [vmem:[#allocation2 + $0xd0] sm:$0xff] %v2113_v15 }
 0x4cc   : > { %v2054_v32 = vpop.f32.mrf.mxu2 }
 0x4cd   : > { %v2055_v6 = vadd.f32 %v2054_v32, %v10103_v60  ;;  %v2074_v41 = vpop.f32.mrf.mxu3 }
 0x4ce   : > { %v2075_v61 = vadd.f32 %v2074_v41, %v10103_v60 }
 0x4cf   : > { %v2106_v24 = vpack.c.bf16 %v2055_v6, %v1966_v48 }
 0x4d0   : > { %v2114_v42 = vpack.c.bf16 %v2075_v61, %v1986_v57 }
 0x4d1   : > { %2138 = vst [vmem:[#allocation2 + $0x98] sm:$0xff] %v2106_v24 }
 0x4d2   : > { %2146 = vst [vmem:[#allocation2 + $0xd8] sm:$0xff] %v2114_v42 }
 0x4d5   : > { %v2077_v58 = vpop.f32.mrf.mxu3 }
 0x4d6   : > { %v2078_v35 = vadd.f32 %v2077_v58, %v10103_v60 }
 0x4d8   : > { %v2115_v4 = vpack.c.bf16 %v2078_v35, %v1989_v46 }
 0x4da   : > { %2147 = vst [vmem:[#allocation2 + $0xe0] sm:$0xff] %v2115_v4 }
 0x4dd   : > { %v2079_v10 = vpop.f32.mrf.mxu3 }
 0x4de   : > { %v2080_v45 = vadd.f32 %v2079_v10, %v10103_v60 }
 0x4e0   : > { %v2116_v44 = vpack.c.bf16 %v2080_v45, %v1991_v50 }
 0x4e2   : > { %2148 = vst [vmem:[#allocation2 + $0xe8] sm:$0xff] %v2116_v44 }
 0x4e5   : > { %v2082_v2 = vpop.f32.mrf.mxu3 }
 0x4e6   : > { %v2083_v9 = vadd.f32 %v2082_v2, %v10103_v60 }
 0x4e8   : > { %v2117_v63 = vpack.c.bf16 %v2083_v9, %v1994_v1 }
 0x4ea   : > { %2149 = vst [vmem:[#allocation2 + $0xf0] sm:$0xff] %v2117_v63 }
 0x4ed   : > { %v2084_v25 = vpop.f32.mrf.mxu3 }
 0x4ee   : > { %v2085_v23 = vadd.f32 %v2084_v25, %v10103_v60 }
 0x4f0   : > { %v2118_v26 = vpack.c.bf16 %v2085_v23, %v1996_v55 }
 0x4f2   : > { %2150 = vst [vmem:[#allocation2 + $0xf8] sm:$0xff] %v2118_v26 }
 0x518   : > { %v1968_v21 = vpop.f32.mrf.mxu1 }
 0x519   : > { %v1969_v56 = vadd.f32 %v1968_v21, %v10101_v39 }
 0x51e   : > { %v2057_v18 = vpop.f32.mrf.mxu2 }
 0x51f   : > { %v2058_v0 = vadd.f32 %v2057_v18, %v10103_v60 }
 0x520   : > { %v1970_v20 = vpop.f32.mrf.mxu1 }
 0x521   : > { %v2107_v17 = vpack.c.bf16 %v2058_v0, %v1969_v56  ;;  %v1971_v3 = vadd.f32 %v1970_v20, %v10101_v39 }
 0x523   : > { %2139 = vst [vmem:[#allocation2 + $0xa0] sm:$0xff] %v2107_v17 }
 0x526   : > { %v2059_v62 = vpop.f32.mrf.mxu2 }
 0x527   : > { %v2060_v5 = vadd.f32 %v2059_v62, %v10103_v60 }
 0x528   : > { %v1973_v12 = vpop.f32.mrf.mxu1 }
 0x529   : > { %v2108_v13 = vpack.c.bf16 %v2060_v5, %v1971_v3  ;;  %v1974_v59 = vadd.f32 %v1973_v12, %v10101_v39 }
 0x52b   : > { %2140 = vst [vmem:[#allocation2 + $0xa8] sm:$0xff] %v2108_v13 }
 0x52e   : > { %v2062_v49 = vpop.f32.mrf.mxu2 }
 0x52f   : > { %v2063_v43 = vadd.f32 %v2062_v49, %v10103_v60 }
 0x530   : > { %v1975_v11 = vpop.f32.mrf.mxu1 }
 0x531   : > { %v2109_v27 = vpack.c.bf16 %v2063_v43, %v1974_v59  ;;  %v1976_v54 = vadd.f32 %v1975_v11, %v10101_v39 }
 0x533   : > { %2141 = vst [vmem:[#allocation2 + $0xb0] sm:$0xff] %v2109_v27 }
 0x536   : > { %v2064_v52 = vpop.f32.mrf.mxu2 }
 0x537   : > { %v2065_v53 = vadd.f32 %v2064_v52, %v10103_v60 }
 0x539   : > { %v2110_v28 = vpack.c.bf16 %v2065_v53, %v1976_v54 }
 0x53b   : > { %2142 = vst [vmem:[#allocation2 + $0xb8] sm:$0xff] %v2110_v28 }
 0x53c PF: > { %v2151_v16 = vld [vmem:[%s9684_s26] sm:$0xff]  ;;  %v2152_v34 = vld [vmem:[%s9684_s26 + $0x8] sm:$0xff]  ;;  %v2153_v29 = vld [vmem:[%s9684_s26 + $0x10] sm:$0xff]  ;;  %vm2235_vm2 = vcmask 523264   ;;  %v9359_v13 = vmov 128.0   ;;  %vm3017_vm0 = vcmask 261120  }
 0x53d   : > { %2159 = vxpose.xlu0.b32.start [1/8] (short) %v2151_v16, 128  ;;  %v2154_v39 = vld [vmem:[%s9684_s26 + $0x18] sm:$0xff]  ;;  %v7933_v36 = vld [vmem:[#allocation8 + $0x10] sm:$0xff]  ;;  %v2155_v19 = vld [vmem:[%s9684_s26 + $0x20] sm:$0xff]  ;;  %8349 = vrcp.f32 %v9359_v13  ;;  %s13497_s4 = sld [smem:[#allocation115_spill]]  ;;  %s9360_s8 = smov 96  }
 0x53e   : > { %v7934_v60 = vld [vmem:[#allocation8 + $0x18] sm:$0xff]  ;;  %v2156_v14 = vld [vmem:[%s9684_s26 + $0x28] sm:$0xff]  ;;  %v2157_v31 = vld [vmem:[%s9684_s26 + $0x30] sm:$0xff]  ;;  %s9361_s14 = smov 64   ;;  %s13643_s7 = sld [smem:[#allocation119_spill]] }
 0x53f   : > { %2264 = vmatpush.bf16.msra.mxu0 %v7934_v60  ;;  %8035 = vmatpush.bf16.msra.mxu3 %v7934_v60  ;;  %v2158_v47 = vld [vmem:[%s9684_s26 + $0x38] sm:$0xff]  ;;  %v7932_v38 = vld [vmem:[#allocation8 + $0x8] sm:$0xff]  ;;  %v7931_v7 = vld [vmem:[#allocation8] sm:$0xff]  ;;  %s9362_s26 = smov 32   ;;  %s13672_s3 = sld [smem:[#allocation120_spill]] }
 0x540   : > { %v10529_v35 = vld [vmem:[#allocation9] ss:$0 sm:$0xff]  ;;  %s13673_s23 = sld [smem:[#allocation121_spill]] }
 0x541   : > { %s13677_s1 = sld [smem:[#allocation123_spill]] }
 0x542   : > { %s13680_s16 = sld [smem:[#allocation32_spill]] }
 0x543   : > { %2265 = vmatpush.bf16.msra.mxu0 %v7933_v36  ;;  %8036 = vmatpush.bf16.msra.mxu3 %v7933_v36  ;;  %v8350_v59 = vpop.eup %8349 }
 0x544   : > { %v2344_v43 = vmul.f32 128.0, %v8350_v59  ;;  %vm2348_vm3 = vweird.f32 %v8350_v59 }
 0x545   : > { %2160 = vxpose.xlu0.b32.cont [2/8] (short) %v2152_v34, 128 }
 0x546   : > { %v2345_v27 = vsub.f32 1.0, %v2344_v43 }
 0x547   : > { %2266 = vmatpush.bf16.msra.mxu0 %v7932_v38  ;;  %8037 = vmatpush.bf16.msra.mxu3 %v7932_v38 }
 0x548   : > { %v2346_v11 = vmul.f32 %v8350_v59, %v2345_v27 }
 0x54a   : > { %v2347_v52 = vadd.f32 %v8350_v59, %v2346_v11 }
 0x54b   : > { %2267 = vmatpush.bf16.msra.mxu0 %v7931_v7  ;;  %8038 = vmatpush.bf16.msra.mxu3 %v7931_v7 }
 0x54c   : > { %v10543_v54 = vsel %vm2348_vm3, %v8350_v59, %v2347_v52 }
 0x54d   : > { %2161 = vxpose.xlu0.b32.cont [3/8] (short) %v2153_v29, 128  ;;  %13472 = vst [vmem:[#allocation36_spill] sm:$0xff] %v10543_v54 }
 0x555   : > { %2162 = vxpose.xlu0.b32.cont [4/8] (short) %v2154_v39, 128 }
 0x55d   : > { %2163 = vxpose.xlu0.b32.cont [5/8] (short) %v2155_v19, 128 }
 0x565   : > { %2164 = vxpose.xlu0.b32.cont [6/8] (short) %v2156_v14, 128 }
 0x56d   : > { %2165 = vxpose.xlu0.b32.cont [7/8] (short) %v2157_v31, 128 }
 0x575   : > { %2166 = vxpose.xlu0.b32.end [8/8] (short) %v2158_v47, 128 }
 0x5e1   : > { %v2175_v40 = vpop.trf.xlu0 }
 0x5e9   : > { %v2176_v30 = vpop.trf.xlu0 }
 0x5ea   : > { %v2191_v51 = vpack.c.bf16 %v2176_v30, %v2175_v40 }
 0x5ec   : > { %7481 = vmatmul.msk.bf16.vlgmr.msra.gmra.mxu0 %vm2235_vm2, %v2191_v51 }
 0x5f1   : > { %v2177_v8 = vpop.trf.xlu0 }
 0x5f9   : > { %v2178_v37 = vpop.trf.xlu0 }
 0x5fa   : > { %v2192_v33 = vpack.c.bf16 %v2178_v37, %v2177_v8 }
 0x5fc   : > { %7482 = vmatmul.msk.bf16.gmra.mxu0 %vm2235_vm2, %v2192_v33 }
 0x601   : > { %v2179_v15 = vpop.trf.xlu0 }
 0x609   : > { %v2180_v22 = vpop.trf.xlu0 }
 0x60a   : > { %v2193_v32 = vpack.c.bf16 %v2180_v22, %v2179_v15 }
 0x60c   : > { %7483 = vmatmul.msk.bf16.vlgmr.msra.gmra.mxu3 %vm2235_vm2, %v2193_v32 }
 0x611   : > { %v2181_v48 = vpop.trf.xlu0 }
 0x619   : > { %v2182_v6 = vpop.trf.xlu0 }
 0x61a   : > { %v2194_v41 = vpack.c.bf16 %v2182_v6, %v2181_v48 }
 0x61c   : > { %7484 = vmatmul.msk.bf16.gmra.mxu3 %vm2235_vm2, %v2194_v41 }
 0x621   : > { %v2183_v57 = vpop.trf.xlu0 }
 0x629   : > { %v2184_v61 = vpop.trf.xlu0 }
 0x62a   : > { %v2195_v24 = vpack.c.bf16 %v2184_v61, %v2183_v57 }
 0x62c   : > { %7485 = vmatmul.msk.bf16.gmra.mxu3 %vm2235_vm2, %v2195_v24 }
 0x631   : > { %v2185_v42 = vpop.trf.xlu0 }
 0x639   : > { %v2186_v58 = vpop.trf.xlu0 }
 0x63a   : > { %v2196_v46 = vpack.c.bf16 %v2186_v58, %v2185_v42  ;;  %v7942_v58 = vld [vmem:[#allocation14 + $0x38] sm:$0xff] }
 0x63b   : > { %2752 = vmatpush.bf16.msra.mxu1 %v7942_v58 }
 0x63c   : > { %7486 = vmatmul.msk.bf16.gmra.mxu3 %vm2235_vm2, %v2196_v46  ;;  %v7941_v46 = vld [vmem:[#allocation14 + $0x30] sm:$0xff] }
 0x63f   : > { %2753 = vmatpush.bf16.msra.mxu1 %v7941_v46 }
 0x641   : > { %v2187_v55 = vpop.trf.xlu0 }
 0x649   : > { %v2188_v21 = vpop.trf.xlu0 }
 0x64a   : > { %v2197_v18 = vpack.c.bf16 %v2188_v21, %v2187_v55 }
 0x64c   : > { %7487 = vmatmul.msk.bf16.gmra.mxu3 %vm2235_vm2, %v2197_v18 }
 0x651   : > { %v2189_v3 = vpop.trf.xlu0 }
 0x659   : > { %v2190_v12 = vpop.trf.xlu0 }
 0x65a   : > { %v2198_v49 = vpack.c.bf16 %v2190_v12, %v2189_v3 }
 0x65c   : > { %7488 = vmatmul.msk.bf16.gmra.mxu3 %vm2235_vm2, %v2198_v49 }
 0x669   : > { %v2269_v4 = vpop.f32.mrf.mxu0 }
 0x66a   : > { %v2270_v10 = vadd.f32 %v10529_v35, %v2269_v4  ;;  %v7940_v4 = vld [vmem:[#allocation14 + $0x28] sm:$0xff] }
 0x66b   : > { %2754 = vmatpush.bf16.msra.mxu1 %v7940_v4 }
 0x66c   : > { %2311 = vadd.xlane.f32.xlu1 %v2270_v10 }
 0x671   : > { %v2271_v50 = vpop.f32.mrf.mxu0 }
 0x672   : > { %v2272_v45 = vadd.f32 %v10529_v35, %v2271_v50  ;;  %v7938_v50 = vld [vmem:[#allocation14 + $0x18] sm:$0xff] }
 0x674   : > { %2313 = vadd.xlane.f32.xlu1 %v2272_v45 }
 0x679   : > { %v2274_v44 = vpop.f32.mrf.mxu0 }
 0x67a   : > { %v2275_v2 = vadd.f32 %v10529_v35, %v2274_v44  ;;  %v7936_v44 = vld [vmem:[#allocation14 + $0x8] sm:$0xff] }
 0x67c   : > { %2315 = vadd.xlane.f32.xlu2 %v2275_v2 }
 0x681   : > { %v2276_v1 = vpop.f32.mrf.mxu0 }
 0x682   : > { %v2277_v9 = vadd.f32 %v10529_v35, %v2276_v1 }
 0x684   : > { %2317 = vadd.xlane.f32.xlu2 %v2277_v9 }
 0x68f   : > { %v2279_v63 = vpop.f32.mrf.mxu3 }
 0x690   : > { %v2280_v25 = vadd.f32 %v10529_v35, %v2279_v63 }
 0x692   : > { %2319 = vadd.xlane.f32.xlu1 %v2280_v25 }
 0x697   : > { %v2281_v23 = vpop.f32.mrf.mxu3 }
 0x698   : > { %v2282_v26 = vadd.f32 %v10529_v35, %v2281_v23 }
 0x69a   : > { %2321 = vadd.xlane.f32.xlu2 %v2282_v26 }
 0x69f   : > { %v2284_v56 = vpop.f32.mrf.mxu3 }
 0x6a0   : > { %v2285_v36 = vadd.f32 %v10529_v35, %v2284_v56 }
 0x6a7   : > { %v2286_v0 = vpop.f32.mrf.mxu3 }
 0x6a8   : > { %v10560_v38 = vadd.f32 %v10529_v35, %v2286_v0 }
 0x6af   : > { %v2289_v17 = vpop.f32.mrf.mxu3 }
 0x6b0   : > { %v10569_v8 = vadd.f32 %v10529_v35, %v2289_v17 }
 0x6b7   : > { %v2291_v20 = vpop.f32.mrf.mxu3 }
 0x6b8   : > { %v10575_v33 = vadd.f32 %v10529_v35, %v2291_v20 }
 0x6bf   : > { %v2294_v62 = vpop.f32.mrf.mxu3 }
 0x6c0   : > { %v10539_v5 = vadd.f32 %v10529_v35, %v2294_v62 }
 0x6c2   : > { %2331 = vadd.xlane.f32.xlu0 %v10539_v5 }
 0x6c7   : > { %v2296_v41 = vpop.f32.mrf.mxu3 }
 0x6c8   : > { %v10587_v24 = vadd.f32 %v10529_v35, %v2296_v41 }
 0x6cf   : > { %v2299_v17 = vpop.f32.mrf.mxu3 }
 0x6df   : > { %v2312_v53 = vpop.xlane.xlu1 %2311 }
 0x6e0   : > { %v2350_v28 = vmul.f32 %v10543_v54, %v2312_v53 }
 0x6e2   : > { %v10546_v16 = vsub.f32 %v2270_v10, %v2350_v28  ;;  %v7939_v10 = vld [vmem:[#allocation14 + $0x20] sm:$0xff] }
 0x6e3   : > { %2755 = vmatpush.bf16.msra.mxu1 %v7939_v10  ;;  %v10626_v10 = vld [vmem:[#allocation12] ss:$0 sm:$0xff] }
 0x6e4   : > { %v2382_v34 = vmul.f32 %v10546_v16, %v10546_v16 }
 0x6e6   : > { %2398 = vadd.xlane.f32.xlu1 %v2382_v34  ;;  %v10605_v34 = vadd.f32 %v10529_v35, %v2299_v17 }
 0x6e7   : > { %v2314_v29 = vpop.xlane.xlu1 %2313  ;;  %2756 = vmatpush.bf16.msra.mxu1 %v7938_v50 }
 0x6e8   : > { %v2351_v39 = vmul.f32 %v10543_v54, %v2314_v29 }
 0x6ea   : > { %v10551_v60 = vsub.f32 %v2272_v45, %v2351_v39  ;;  %v7937_v45 = vld [vmem:[#allocation14 + $0x10] sm:$0xff] }
 0x6eb   : > { %2757 = vmatpush.bf16.msra.mxu1 %v7937_v45 }
 0x6ec   : > { %v2383_v19 = vmul.f32 %v10551_v60, %v10551_v60 }
 0x6ee   : > { %2400 = vadd.xlane.f32.xlu2 %v2383_v19  ;;  %2323 = vadd.xlane.f32.xlu1 %v2285_v36 }
 0x6ef   : > { %v2316_v14 = vpop.xlane.xlu2 %2315  ;;  %2758 = vmatpush.bf16.msra.mxu1 %v7936_v44 }
 0x6f0   : > { %v2352_v31 = vmul.f32 %v10543_v54, %v2316_v14 }
 0x6f2   : > { %v10557_v47 = vsub.f32 %v2275_v2, %v2352_v31 }
 0x6f4   : > { %v2384_v7 = vmul.f32 %v10557_v47, %v10557_v47 }
 0x6f6   : > { %2325 = vadd.xlane.f32.xlu2 %v10560_v38  ;;  %2402 = vadd.xlane.f32.xlu1 %v2384_v7 }
 0x6f7   : > { %v2318_v40 = vpop.xlane.xlu2 %2317 }
 0x6f8   : > { %v2353_v30 = vmul.f32 %v10543_v54, %v2318_v40 }
 0x6fa   : > { %v10566_v51 = vsub.f32 %v2277_v9, %v2353_v30  ;;  %v7935_v9 = vld [vmem:[#allocation14] sm:$0xff] }
 0x6fb   : > { %2759 = vmatpush.bf16.msra.mxu1 %v7935_v9 }
 0x6fc   : > { %v2385_v37 = vmul.f32 %v10566_v51, %v10566_v51 }
 0x6fe   : > { %2404 = vadd.xlane.f32.xlu2 %v2385_v37  ;;  %2327 = vadd.xlane.f32.xlu1 %v10569_v8 }
 0x705   : > { %v2320_v15 = vpop.xlane.xlu1 %2319 }
 0x706   : > { %v2354_v22 = vmul.f32 %v10543_v54, %v2320_v15  ;;  %2329 = vadd.xlane.f32.xlu2 %v10575_v33 }
 0x708   : > { %v10579_v32 = vsub.f32 %v2280_v25, %v2354_v22 }
 0x70a   : > { %v2386_v48 = vmul.f32 %v10579_v32, %v10579_v32 }
 0x70c   : > { %2406 = vadd.xlane.f32.xlu1 %v2386_v48 }
 0x70d   : > { %v2322_v6 = vpop.xlane.xlu2 %2321 }
 0x70e   : > { %v2355_v57 = vmul.f32 %v10543_v54, %v2322_v6  ;;  %v10616_v6 = vld [vmem:[#allocation11] ss:$0 sm:$0xff] }
 0x710   : > { %v10584_v61 = vsub.f32 %v2282_v26, %v2355_v57 }
 0x712   : > { %v2387_v42 = vmul.f32 %v10584_v61, %v10584_v61 }
 0x714   : > { %2408 = vadd.xlane.f32.xlu2 %v2387_v42  ;;  %2333 = vadd.xlane.f32.xlu1 %v10587_v24 }
 0x759   : > { %v2399_v2 = vpop.xlane.xlu1 %2398 }
 0x75a   : > { %v2430_v1 = vmul.f32 %v2399_v2, %v10543_v54 }
 0x75c   : > { %v2446_v63 = vadd.f32 1e-05, %v2430_v1 }
 0x75e   : > { %8351 = vrsqrt.f32 %v2446_v63  ;;  %vm2468_vm5 = vweird.f32 %v2446_v63 }
 0x761   : > { %v2401_v25 = vpop.xlane.xlu2 %2400  ;;  %v2324_v55 = vpop.xlane.xlu1 %2323 }
 0x762   : > { %v2431_v23 = vmul.f32 %v2401_v25, %v10543_v54  ;;  %v2356_v26 = vmul.f32 %v10543_v54, %v2324_v55  ;;  %v2332_v25 = vpop.xlane.xlu0 %2331 }
 0x763   : > { %v2360_v17 = vmul.f32 %v10543_v54, %v2332_v25 }
 0x764   : > { %v8352_v21 = vpop.eup %8351  ;;  %v2447_v18 = vadd.f32 1e-05, %v2431_v23  ;;  %v10595_v56 = vsub.f32 %v2285_v36, %v2356_v26  ;;  %v2301_v36 = vpop.f32.mrf.mxu3 }
 0x765   : > { %v2463_v0 = vmul.f32 %v8352_v21, %v2446_v63  ;;  %vm2469_vm4 = vweird.f32 %v8352_v21  ;;  %v10619_v42 = vadd.f32 %v10529_v35, %v2301_v36  ;;  %v7950_v36 = vld [vmem:[#allocation2 + $0x74] sm:$0xf0] }
 0x766   : > { %8353 = vrsqrt.f32 %v2447_v18  ;;  %v2388_v20 = vmul.f32 %v10595_v56, %v10595_v56  ;;  %vm2470_vm6 = vmor %vm2468_vm5, %vm2469_vm4  ;;  %vm2478_vm8 = vweird.f32 %v2447_v18 }
 0x767   : > { %v2464_v62 = vmul.f32 %v8352_v21, %v2463_v0 }
 0x768   : > { %2410 = vadd.xlane.f32.xlu2 %v2388_v20 }
 0x769   : > { %v2465_v3 = vmul.f32 0.5, %v2464_v62  ;;  %v2326_v13 = vpop.xlane.xlu2 %2325  ;;  %v2403_v12 = vpop.xlane.xlu1 %2402 }
 0x76a   : > { %v2357_v49 = vmul.f32 %v10543_v54, %v2326_v13  ;;  %v2432_v59 = vmul.f32 %v2403_v12, %v10543_v54 }
 0x76b   : > { %v2466_v43 = vsub.f32 1.5, %v2465_v3 }
 0x76c   : > { %v8354_v27 = vpop.eup %8353  ;;  %v2448_v11 = vadd.f32 1e-05, %v2432_v59  ;;  %v10602_v52 = vsub.f32 %v10560_v38, %v2357_v49  ;;  %v2304_v45 = vpop.f32.mrf.mxu3 }
 0x76d   : > { %v2467_v53 = vmul.f32 %v8352_v21, %v2466_v43  ;;  %v2473_v28 = vmul.f32 %v8354_v27, %v2447_v18  ;;  %vm2479_vm7 = vweird.f32 %v8354_v27  ;;  %v10645_v20 = vadd.f32 %v10529_v35, %v2304_v45 }
 0x76e   : > { %8355 = vrsqrt.f32 %v2448_v11  ;;  %v2389_v29 = vmul.f32 %v10602_v52, %v10602_v52  ;;  %vm2480_vm9 = vmor %vm2478_vm8, %vm2479_vm7  ;;  %vm2488_vm11 = vweird.f32 %v2448_v11 }
 0x76f   : > { %v2474_v39 = vmul.f32 %v8354_v27, %v2473_v28  ;;  %v2471_v38 = vsel %vm2470_vm6, %v8352_v21, %v2467_v53 }
 0x770   : > { %2412 = vadd.xlane.f32.xlu1 %v2389_v29  ;;  %2335 = vadd.xlane.f32.xlu2 %v10605_v34  ;;  %v2622_v48 = vmul.f32 %v2471_v38, %v10546_v16 }
 0x771   : > { %v2475_v19 = vmul.f32 0.5, %v2474_v39  ;;  %v2405_v14 = vpop.xlane.xlu2 %2404  ;;  %v2328_v31 = vpop.xlane.xlu1 %2327  ;;  %v7551_v39 = vld [vmem:[#allocation2 + $0x70] sm:$0xf] }
 0x772   : > { %v2433_v7 = vmul.f32 %v2405_v14, %v10543_v54  ;;  %v2358_v40 = vmul.f32 %v10543_v54, %v2328_v31  ;;  %v10668_v38 = vor.u32 %v7950_v36, %v7551_v39 }
 0x773   : > { %v2476_v30 = vsub.f32 1.5, %v2475_v19 }
 0x774   : > { %v8356_v37 = vpop.eup %8355  ;;  %v2449_v15 = vadd.f32 1e-05, %v2433_v7  ;;  %v10613_v22 = vsub.f32 %v10569_v8, %v2358_v40  ;;  %v2641_v8 = vmul.f32 %v10616_v6, %v2622_v48  ;;  %v2306_v43 = vpop.f32.mrf.mxu3  ;;  %13477 = vst [vmem:[#allocation39_spill] sm:$0xff] %v10668_v38  ;;  %v7583_v7 = vld [vmem:[#allocation2 + $0xf0] sm:$0xf] }
 0x775   : > { %v2477_v41 = vmul.f32 %v8354_v27, %v2476_v30  ;;  %v2483_v57 = vmul.f32 %v8356_v37, %v2448_v11  ;;  %vm2489_vm10 = vweird.f32 %v8356_v37  ;;  %v10661_v29 = vadd.f32 %v10529_v35, %v2306_v43  ;;  %v7958_v40 = vld [vmem:[#allocation2 + $0xf4] sm:$0xf0]  ;;  %v7547_v48 = vld [vmem:[#allocation2 + $0x60] sm:$0xf] }
 0x776   : > { %8357 = vrsqrt.f32 %v2449_v15  ;;  %v2390_v58 = vmul.f32 %v10613_v22, %v10613_v22  ;;  %v10631_v55 = vadd.f32 %v10626_v10, %v2641_v8  ;;  %vm2490_vm12 = vmor %vm2488_vm11, %vm2489_vm10  ;;  %vm2498_vm14 = vweird.f32 %v2449_v15 }
 0x777   : > { %v2484_v46 = vmul.f32 %v8356_v37, %v2483_v57  ;;  %v2481_v4 = vsel %vm2480_vm9, %v8354_v27, %v2477_v41  ;;  %v10652_v27 = vsub.f32 %v10539_v5, %v2360_v17  ;;  %v7949_v41 = vld [vmem:[#allocation2 + $0x64] sm:$0xf0]  ;;  %v3064_v57 = vsel %vm3017_vm0, %v10668_v38, 0 }
 0x778   : > { %2337 = vadd.xlane.f32.xlu1 %v10619_v42  ;;  %2414 = vadd.xlane.f32.xlu2 %v2390_v58  ;;  %v2623_v16 = vmul.f32 %v2481_v4, %v10551_v60  ;;  %13473 = vst [vmem:[#allocation37_spill] sm:$0xff] %v10631_v55  ;;  %v7579_v58 = vld [vmem:[#allocation2 + $0xe0] sm:$0xf] }
 0x779   : > { %v2485_v50 = vmul.f32 0.5, %v2484_v46  ;;  %v2330_v44 = vpop.xlane.xlu2 %2329  ;;  %v2392_v5 = vmul.f32 %v10652_v27, %v10652_v27  ;;  %v7957_v46 = vld [vmem:[#allocation2 + $0xe4] sm:$0xf0]  ;;  %3090 = vmatpush.bf16.xpose.msra.mxu2 %v3064_v57 }
 0x77a   : > { %v2359_v2 = vmul.f32 %v10543_v54, %v2330_v44  ;;  %v2642_v1 = vmul.f32 %v10616_v6, %v2623_v16  ;;  %v10685_v44 = vor.u32 %v7949_v41, %v7547_v48  ;;  %v7571_v48 = vld [vmem:[#allocation2 + $0xc0] sm:$0xf]  ;;  %v7955_v57 = vld [vmem:[#allocation2 + $0xc4] sm:$0xf0] }
 0x77b   : > { %v2486_v9 = vsub.f32 1.5, %v2485_v50 }
 0x77c   : > { %v8358_v63 = vpop.eup %8357  ;;  %v10634_v60 = vadd.f32 %v10626_v10, %v2642_v1  ;;  %v10637_v23 = vsub.f32 %v10575_v33, %v2359_v2  ;;  %13479 = vst [vmem:[#allocation41_spill] sm:$0xff] %v10685_v44 }
 0x77d   : > { %v2487_v26 = vmul.f32 %v8356_v37, %v2486_v9  ;;  %v2493_v21 = vmul.f32 %v8358_v63, %v2449_v15  ;;  %vm2499_vm13 = vweird.f32 %v8358_v63  ;;  %v10674_v15 = vor.u32 %v7958_v40, %v7583_v7 }
 0x77e   : > { %13474 = vst [vmem:[#allocation38_spill] sm:$0xff] %v10634_v60  ;;  %v2676_v18 = vpack.c.bf16 %v10634_v60, %v10631_v55  ;;  %v2391_v0 = vmul.f32 %v10637_v23, %v10637_v23  ;;  %vm10656_vm15 = vmor %vm2498_vm14, %vm2499_vm13  ;;  %v10693_v9 = vor.u32 %v7957_v46, %v7579_v58  ;;  %v10726_v58 = vor.u32 %v7955_v57, %v7571_v48  ;;  %v7523_v57 = vld [vmem:[#allocation2] sm:$0xf] }
 0x77f   : > { %v2494_v62 = vmul.f32 %v8358_v63, %v2493_v21  ;;  %v2407_v3 = vpop.xlane.xlu1 %2406  ;;  %v2491_v13 = vsel %vm2490_vm12, %v8356_v37, %v2487_v26  ;;  %13478 = vst [vmem:[#allocation40_spill] sm:$0xff] %v10674_v15  ;;  %v3061_v21 = vsel %vm3017_vm0, %v10685_v44, 0 }
 0x780   : > { %v2434_v33 = vmul.f32 %v2407_v3, %v10543_v54  ;;  %2760 = vmatmul.bf16.vlgmr.msra.gmra.mxu1 %v2676_v18  ;;  %2416 = vadd.xlane.f32.xlu1 %v2391_v0  ;;  %v2624_v11 = vmul.f32 %v2491_v13, %v10557_v47  ;;  %13482 = vst [vmem:[#allocation44_spill] sm:$0xff] %v10693_v9  ;;  %v3085_v18 = vsel %vm3017_vm0, %v10693_v9, 0 }
 0x781   : > { %v2495_v12 = vmul.f32 0.5, %v2494_v62  ;;  %2339 = vadd.xlane.f32.xlu2 %v10645_v20  ;;  %3091 = vmatpush.bf16.xpose.msra.mxu2 %v3061_v21  ;;  %13488 = vst [vmem:[#allocation50_spill] sm:$0xff] %v10726_v58  ;;  %v7531_v21 = vld [vmem:[#allocation2 + $0x20] sm:$0xf] }
 0x782   : > { %v10649_v49 = vadd.f32 1e-05, %v2434_v33  ;;  %v2643_v31 = vmul.f32 %v10616_v6, %v2624_v11 }
 0x783   : > { %v2496_v59 = vsub.f32 1.5, %v2495_v12 }
 0x784   : > { %8359 = vrsqrt.f32 %v10649_v49  ;;  %v10688_v2 = vadd.f32 %v10626_v10, %v2643_v31  ;;  %vm2508_vm2 = vweird.f32 %v10649_v49 }
 0x785   : > { %v2497_v53 = vmul.f32 %v8358_v63, %v2496_v59 }
 0x786   : > { %13480 = vst [vmem:[#allocation42_spill] sm:$0xff] %v10688_v2 }
 0x787   : > { %v2409_v19 = vpop.xlane.xlu2 %2408  ;;  %v2334_v14 = vpop.xlane.xlu1 %2333  ;;  %v2501_v47 = vsel %vm10656_vm15, %v8358_v63, %v2497_v53 }
 0x788   : > { %v2435_v35 = vmul.f32 %v2409_v19, %v10543_v54  ;;  %v2361_v30 = vmul.f32 %v10543_v54, %v2334_v14  ;;  %2341 = vadd.xlane.f32.xlu1 %v10661_v29  ;;  %v2625_v37 = vmul.f32 %v2501_v47, %v10566_v51  ;;  %v3088_v51 = vsel %vm3017_vm0, %v10674_v15, 0  ;;  %v7575_v47 = vld [vmem:[#allocation2 + $0xd0] sm:$0xf] }
 0x789   : > { %2418 = vadd.xlane.f32.xlu2 %v2392_v5  ;;  %3139 = vmatpush.bf16.xpose.msrb.mxu3 %v3088_v51  ;;  %v7948_v5 = vld [vmem:[#allocation2 + $0x54] sm:$0xf0]  ;;  %v7567_v51 = vld [vmem:[#allocation2 + $0xb0] sm:$0xf] }
 0x78a   : > { %v8360_v4 = vpop.eup %8359  ;;  %v2451_v16 = vadd.f32 1e-05, %v2435_v35  ;;  %v2644_v8 = vmul.f32 %v10616_v6, %v2625_v37  ;;  %v10680_v50 = vsub.f32 %v10587_v24, %v2361_v30  ;;  %v7539_v30 = vld [vmem:[#allocation2 + $0x40] sm:$0xf]  ;;  %v7947_v37 = vld [vmem:[#allocation2 + $0x44] sm:$0xf0] }
 0x78b   : > { %v2503_v45 = vmul.f32 %v8360_v4, %v10649_v49  ;;  %vm2509_vm1 = vweird.f32 %v8360_v4  ;;  %v10724_v41 = vor.u32 %v7947_v37, %v7539_v30 }
 0x78c   : > { %8361 = vrsqrt.f32 %v2451_v16  ;;  %v10691_v1 = vadd.f32 %v10626_v10, %v2644_v8  ;;  %v2393_v25 = vmul.f32 %v10680_v50, %v10680_v50  ;;  %vm2510_vm3 = vmor %vm2508_vm2, %vm2509_vm1  ;;  %vm2518_vm5 = vweird.f32 %v2451_v16  ;;  %v7946_v8 = vld [vmem:[#allocation2 + $0x34] sm:$0xf0] }
 0x78d   : > { %v2504_v24 = vmul.f32 %v8360_v4, %v2503_v45  ;;  %13487 = vst [vmem:[#allocation49_spill] sm:$0xff] %v10724_v41  ;;  %v3055_v46 = vsel %vm3017_vm0, %v10724_v41, 0 }
 0x78e   : > { %13481 = vst [vmem:[#allocation43_spill] sm:$0xff] %v10691_v1  ;;  %v2677_v63 = vpack.c.bf16 %v10691_v1, %v10688_v2 }
 0x78f   : > { %v2505_v26 = vmul.f32 0.5, %v2504_v24  ;;  %v7954_v24 = vld [vmem:[#allocation2 + $0xb4] sm:$0xf0] }
 0x790   : > { %2765 = vmatmul.bf16.gmra.mxu1 %v2677_v63  ;;  %2420 = vadd.xlane.f32.xlu1 %v2393_v25  ;;  %v10734_v63 = vor.u32 %v7954_v24, %v7567_v51  ;;  %v7951_v51 = vld [vmem:[#allocation2 + $0x84] sm:$0xf0] }
 0x791   : > { %v2506_v0 = vsub.f32 1.5, %v2505_v26  ;;  %3140 = vmatpush.bf16.xpose.msrb.mxu3 %v3085_v18  ;;  %v7945_v18 = vld [vmem:[#allocation2 + $0x24] sm:$0xf0] }
 0x792   : > { %v8362_v17 = vpop.eup %8361  ;;  %13490 = vst [vmem:[#allocation52_spill] sm:$0xff] %v10734_v63  ;;  %v3076_v26 = vsel %vm3017_vm0, %v10734_v63, 0 }
 0x793   : > { %v2507_v62 = vmul.f32 %v8360_v4, %v2506_v0  ;;  %v2513_v3 = vmul.f32 %v8362_v17, %v2451_v16  ;;  %vm2519_vm4 = vweird.f32 %v8362_v17  ;;  %v7535_v16 = vld [vmem:[#allocation2 + $0x30] sm:$0xf]  ;;  %v7563_v0 = vld [vmem:[#allocation2 + $0xa0] sm:$0xf] }
 0x794   : > { %vm2520_vm6 = vmor %vm2518_vm5, %vm2519_vm4  ;;  %v10732_v45 = vor.u32 %v7946_v8, %v7535_v16  ;;  %v7555_v8 = vld [vmem:[#allocation2 + $0x80] sm:$0xf] }
 0x795   : > { %v2514_v33 = vmul.f32 %v8362_v17, %v2513_v3  ;;  %v2511_v12 = vsel %vm2510_vm3, %v8360_v4, %v2507_v62  ;;  %v3079_v4 = vsel %vm3017_vm0, %v10726_v58, 0  ;;  %v7953_v62 = vld [vmem:[#allocation2 + $0xa4] sm:$0xf0] }
 0x796   : > { %v2626_v43 = vmul.f32 %v2511_v12, %v10579_v32  ;;  %v7543_v32 = vld [vmem:[#allocation2 + $0x50] sm:$0xf]  ;;  %13489 = vst [vmem:[#allocation51_spill] sm:$0xff] %v10732_v45  ;;  %v3052_v25 = vsel %vm3017_vm0, %v10732_v45, 0  ;;  %v10742_v3 = vor.u32 %v7953_v62, %v7563_v0 }
 0x797   : > { %v2515_v13 = vmul.f32 0.5, %v2514_v33  ;;  %v10716_v31 = vor.u32 %v7948_v5, %v7543_v32 }
 0x798   : > { %v2645_v39 = vmul.f32 %v10616_v6, %v2626_v43  ;;  %13492 = vst [vmem:[#allocation54_spill] sm:$0xff] %v10742_v3 }
 0x799   : > { %v2516_v59 = vsub.f32 1.5, %v2515_v13  ;;  %13485 = vst [vmem:[#allocation47_spill] sm:$0xff] %v10716_v31  ;;  %v3058_v40 = vsel %vm3017_vm0, %v10716_v31, 0  ;;  %v3073_v13 = vsel %vm3017_vm0, %v10742_v3, 0 }
 0x79a   : > { %v10709_v49 = vadd.f32 %v10626_v10, %v2645_v39  ;;  %3092 = vmatpush.bf16.xpose.msra.mxu2 %v3058_v40  ;;  %v7559_v39 = vld [vmem:[#allocation2 + $0x90] sm:$0xf] }
 0x79b   : > { %v2517_v11 = vmul.f32 %v8362_v17, %v2516_v59 }
 0x79c   : > { %13483 = vst [vmem:[#allocation45_spill] sm:$0xff] %v10709_v49 }
 0x79d   : > { %v2521_v53 = vsel %vm2520_vm6, %v8362_v17, %v2517_v11  ;;  %v10740_v17 = vor.u32 %v7945_v18, %v7531_v21  ;;  %v7527_v11 = vld [vmem:[#allocation2 + $0x10] sm:$0xf] }
 0x79e   : > { %v2627_v28 = vmul.f32 %v2521_v53, %v10584_v61  ;;  %v7956_v61 = vld [vmem:[#allocation2 + $0xd4] sm:$0xf0] }
 0x79f   : > { %v10718_v7 = vor.u32 %v7956_v61, %v7575_v47  ;;  %13491 = vst [vmem:[#allocation53_spill] sm:$0xff] %v10740_v17  ;;  %v3049_v33 = vsel %vm3017_vm0, %v10740_v17, 0  ;;  %v7944_v53 = vld [vmem:[#allocation2 + $0x14] sm:$0xf0] }
 0x7a0   : > { %v2646_v36 = vmul.f32 %v10616_v6, %v2627_v28  ;;  %v10749_v28 = vor.u32 %v7944_v53, %v7527_v11 }
 0x7a1   : > { %13486 = vst [vmem:[#allocation48_spill] sm:$0xff] %v10718_v7  ;;  %v3082_v35 = vsel %vm3017_vm0, %v10718_v7, 0 }
 0x7a2   : > { %v10712_v19 = vadd.f32 %v10626_v10, %v2646_v36  ;;  %3141 = vmatpush.bf16.xpose.msrb.mxu3 %v3082_v35  ;;  %3093 = vmatpush.bf16.xpose.msra.mxu2 %v3055_v46  ;;  %13493 = vst [vmem:[#allocation55_spill] sm:$0xff] %v10749_v28  ;;  %v7952_v36 = vld [vmem:[#allocation2 + $0x94] sm:$0xf0]  ;;  %v3046_v32 = vsel %vm3017_vm0, %v10749_v28, 0  ;;  %v7943_v46 = vld [vmem:[#allocation2 + $0x4] sm:$0xf0] }
 0x7a3   : > { %v10762_v16 = vor.u32 %v7943_v46, %v7523_v57 }
 0x7a4   : > { %13484 = vst [vmem:[#allocation46_spill] sm:$0xff] %v10712_v19  ;;  %v2678_v14 = vpack.c.bf16 %v10712_v19, %v10709_v49 }
 0x7a5   : > { %13495 = vst [vmem:[#allocation57_spill] sm:$0xff] %v10762_v16  ;;  %v3043_v21 = vsel %vm3017_vm0, %v10762_v16, 0 }
 0x7a6   : > { %2770 = vmatmul.bf16.gmra.mxu1 %v2678_v14  ;;  %v10751_v14 = vor.u32 %v7952_v36, %v7559_v39 }
 0x7a8   : > { %13494 = vst [vmem:[#allocation56_spill] sm:$0xff] %v10751_v14  ;;  %v3070_v5 = vsel %vm3017_vm0, %v10751_v14, 0 }
 0x7aa   : > { %3142 = vmatpush.bf16.xpose.msrb.mxu3 %v3079_v4  ;;  %3094 = vmatpush.bf16.xpose.msra.mxu2 %v3052_v25  ;;  %v10766_v25 = vor.u32 %v7951_v51, %v7555_v8 }
 0x7ac   : > { %13496 = vst [vmem:[#allocation58_spill] sm:$0xff] %v10766_v25 }
 0x7b2   : > { %3143 = vmatpush.bf16.xpose.msrb.mxu3 %v3076_v26  ;;  %3095 = vmatpush.bf16.xpose.msra.mxu2 %v3049_v33 }
 0x7ba   : > { %3144 = vmatpush.bf16.xpose.msrb.mxu3 %v3073_v13  ;;  %3096 = vmatpush.bf16.xpose.msra.mxu2 %v3046_v32 }
 0x7c2   : > { %3145 = vmatpush.bf16.xpose.msrb.mxu3 %v3070_v5  ;;  %3097 = vmatpush.bf16.xpose.msra.mxu2 %v3043_v21 }
 0x7db   : > { %v2411_v12 = vpop.xlane.xlu2 %2410 }
 0x7dc   : > { %v2436_v59 = vmul.f32 %v2411_v12, %v10543_v54 }
 0x7de   : > { %v2452_v43 = vadd.f32 1e-05, %v2436_v59 }
 0x7e0   : > { %8363 = vrsqrt.f32 %v2452_v43  ;;  %vm2528_vm8 = vweird.f32 %v2452_v43 }
 0x7e3   : > { %v2413_v47 = vpop.xlane.xlu1 %2412  ;;  %v2336_v61 = vpop.xlane.xlu2 %2335 }
 0x7e4   : > { %v2437_v40 = vmul.f32 %v2413_v47, %v10543_v54  ;;  %v2362_v35 = vmul.f32 %v10543_v54, %v2336_v61 }
 0x7e6   : > { %v8364_v30 = vpop.eup %8363  ;;  %v2453_v37 = vadd.f32 1e-05, %v2437_v40  ;;  %v10760_v48 = vsub.f32 %v10605_v34, %v2362_v35  ;;  %v3067_v34 = vsel %vm3017_vm0, %v10766_v25, 0 }
 0x7e7   : > { %v2523_v4 = vmul.f32 %v8364_v30, %v2452_v43  ;;  %3146 = vmatpush.bf16.xpose.msrb.mxu3 %v3067_v34  ;;  %vm2529_vm7 = vweird.f32 %v8364_v30 }
 0x7e8   : > { %8365 = vrsqrt.f32 %v2453_v37  ;;  %v2394_v24 = vmul.f32 %v10760_v48, %v10760_v48  ;;  %vm2530_vm9 = vmor %vm2528_vm8, %vm2529_vm7  ;;  %vm2538_vm11 = vweird.f32 %v2453_v37 }
 0x7e9   : > { %v2524_v26 = vmul.f32 %v8364_v30, %v2523_v4 }
 0x7ea   : > { %2422 = vadd.xlane.f32.xlu2 %v2394_v24 }
 0x7eb   : > { %v2525_v18 = vmul.f32 0.5, %v2524_v26  ;;  %v2338_v0 = vpop.xlane.xlu1 %2337  ;;  %v2415_v62 = vpop.xlane.xlu2 %2414 }
 0x7ec   : > { %v2363_v33 = vmul.f32 %v10543_v54, %v2338_v0  ;;  %v2438_v13 = vmul.f32 %v2415_v62, %v10543_v54 }
 0x7ed   : > { %v2526_v12 = vsub.f32 1.5, %v2525_v18 }
 0x7ee   : > { %v8366_v59 = vpop.eup %8365  ;;  %v2454_v11 = vadd.f32 1e-05, %v2438_v13  ;;  %v10775_v53 = vsub.f32 %v10619_v42, %v2363_v33 }
 0x7ef   : > { %v2527_v39 = vmul.f32 %v8364_v30, %v2526_v12  ;;  %v2533_v36 = vmul.f32 %v8366_v59, %v2453_v37  ;;  %vm2539_vm10 = vweird.f32 %v8366_v59 }
 0x7f0   : > { %8367 = vrsqrt.f32 %v2454_v11  ;;  %v2395_v32 = vmul.f32 %v10775_v53, %v10775_v53  ;;  %vm2540_vm12 = vmor %vm2538_vm11, %vm2539_vm10  ;;  %vm2548_vm14 = vweird.f32 %v2454_v11 }
 0x7f1   : > { %v2534_v5 = vmul.f32 %v8366_v59, %v2533_v36  ;;  %v2531_v40 = vsel %vm2530_vm9, %v8364_v30, %v2527_v39  ;;  %v10795_v39 = vld [vmem:[%s13497_s4] ss:$0 sm:$0xff] }
 0x7f2   : > { %2424 = vadd.xlane.f32.xlu1 %v2395_v32  ;;  %v2628_v51 = vmul.f32 %v2531_v40, %v10595_v56 }
 0x7f3   : > { %v2535_v47 = vmul.f32 0.5, %v2534_v5  ;;  %v2417_v61 = vpop.xlane.xlu1 %2416 }
 0x7f4   : > { %v2439_v35 = vmul.f32 %v2417_v61, %v10543_v54  ;;  %v2340_v57 = vpop.xlane.xlu2 %2339  ;;  %v2647_v0 = vmul.f32 %v10616_v6, %v2628_v51 }
 0x7f5   : > { %v2536_v46 = vsub.f32 1.5, %v2535_v47  ;;  %v2364_v42 = vmul.f32 %v10543_v54, %v2340_v57 }
 0x7f6   : > { %v8368_v4 = vpop.eup %8367  ;;  %v2455_v8 = vadd.f32 1e-05, %v2439_v35  ;;  %v10798_v36 = vadd.f32 %v10626_v10, %v2647_v0 }
 0x7f7   : > { %v2537_v24 = vmul.f32 %v8366_v59, %v2536_v46  ;;  %v2543_v43 = vmul.f32 %v8368_v4, %v2454_v11  ;;  %v10783_v26 = vsub.f32 %v10645_v20, %v2364_v42  ;;  %vm2549_vm13 = vweird.f32 %v8368_v4 }
 0x7f8   : > { %8369 = vrsqrt.f32 %v2455_v8  ;;  %13498 = vst [vmem:[#allocation59_spill] sm:$0xff] %v10798_v36  ;;  %vm2550_vm15 = vmor %vm2548_vm14, %vm2549_vm13  ;;  %vm2558_vm2 = vweird.f32 %v2455_v8 }
 0x7f9   : > { %v2544_v30 = vmul.f32 %v8368_v4, %v2543_v43  ;;  %v2396_v21 = vmul.f32 %v10783_v26, %v10783_v26  ;;  %v2541_v34 = vsel %vm2540_vm12, %v8366_v59, %v2537_v24 }
 0x7fa   : > { %v2629_v18 = vmul.f32 %v2541_v34, %v10602_v52 }
 0x7fb   : > { %v2545_v62 = vmul.f32 0.5, %v2544_v30  ;;  %2426 = vadd.xlane.f32.xlu2 %v2396_v21  ;;  %v2342_v56 = vpop.xlane.xlu1 %2341 }
 0x7fc   : > { %v2365_v37 = vmul.f32 %v10543_v54, %v2342_v56  ;;  %v2419_v33 = vpop.xlane.xlu2 %2418  ;;  %v2648_v20 = vmul.f32 %v10616_v6, %v2629_v18 }
 0x7fd   : > { %v2546_v13 = vsub.f32 1.5, %v2545_v62  ;;  %v2440_v12 = vmul.f32 %v2419_v33, %v10543_v54  ;;  %v2761_v59 = vpop.f32.mrf.mxu1 }
 0x7fe   : > { %v8370_v52 = vpop.eup %8369  ;;  %v10801_v32 = vadd.f32 %v10626_v10, %v2648_v20  ;;  %v10804_v5 = vsub.f32 %v10661_v29, %v2365_v37  ;;  %v2762_v42 = vadd.f32 %v10795_v39, %v2761_v59 }
 0x7ff   : > { %v2547_v47 = vmul.f32 %v8368_v4, %v2546_v13  ;;  %v2553_v61 = vmul.f32 %v8370_v52, %v2455_v8  ;;  %v2456_v40 = vadd.f32 1e-05, %v2440_v12  ;;  %vm2559_vm1 = vweird.f32 %v8370_v52 }
 0x800   : > { %13499 = vst [vmem:[#allocation60_spill] sm:$0xff] %v10801_v32  ;;  %v2679_v35 = vpack.c.bf16 %v10801_v32, %v10798_v36  ;;  %v2397_v57 = vmul.f32 %v10804_v5, %v10804_v5  ;;  %v2801_v21 = vmul.f32 0.17677669, %v2762_v42  ;;  %vm2560_vm3 = vmor %vm2558_vm2, %vm2559_vm1 }
 0x801   : > { %v2554_v46 = vmul.f32 %v8370_v52, %v2553_v61  ;;  %8371 = vrsqrt.f32 %v2456_v40  ;;  %v2551_v24 = vsel %vm2550_vm15, %v8368_v4, %v2547_v47  ;;  %vm2568_vm5 = vweird.f32 %v2456_v40 }
 0x802   : > { %2775 = vmatmul.bf16.gmra.mxu1 %v2679_v35  ;;  %2428 = vadd.xlane.f32.xlu1 %v2397_v57  ;;  %v2630_v11 = vmul.f32 %v2551_v24, %v10613_v22  ;;  %v2817_v33 = vpack.c.bf16 %v2801_v21, %v2801_v21 }
 0x803   : > { %v2555_v29 = vmul.f32 0.5, %v2554_v46  ;;  %v2421_v51 = vpop.xlane.xlu1 %2420 }
 0x804   : > { %v2441_v43 = vmul.f32 %v2421_v51, %v10543_v54  ;;  %v2649_v59 = vmul.f32 %v10616_v6, %v2630_v11  ;;  %v2913_v57 = vunpack.c.l.b16 %v2817_v33 }
 0x805   : > { %v2556_v30 = vsub.f32 1.5, %v2555_v29  ;;  %v2763_v34 = vpop.f32.mrf.mxu1 }
 0x806   : > { %v2457_v18 = vadd.f32 1e-05, %v2441_v43  ;;  %v2764_v0 = vadd.f32 %v10795_v39, %v2763_v34  ;;  %v10818_v29 = vadd.f32 %v10626_v10, %v2649_v59 }
 0x807   : > { %v8372_v62 = vpop.eup %8371  ;;  %v2557_v56 = vmul.f32 %v8370_v52, %v2556_v30 }
 0x808   : > { %v2563_v37 = vmul.f32 %v8372_v62, %v2456_v40  ;;  %8373 = vrsqrt.f32 %v2457_v18  ;;  %v2802_v20 = vmul.f32 0.17677669, %v2764_v0  ;;  %13500 = vst [vmem:[#allocation61_spill] sm:$0xff] %v10818_v29  ;;  %vm2569_vm4 = vweird.f32 %v8372_v62 }
 0x809   : > { %v2561_v4 = vsel %vm2560_vm3, %v8370_v52, %v2557_v56  ;;  %vm2570_vm6 = vmor %vm2568_vm5, %vm2569_vm4  ;;  %vm2578_vm8 = vweird.f32 %v2457_v18 }
 0x80a   : > { %v2564_v13 = vmul.f32 %v8372_v62, %v2563_v37  ;;  %v2631_v12 = vmul.f32 %v2561_v4, %v10637_v23  ;;  %v2818_v47 = vpack.c.bf16 %v2802_v20, %v2802_v20 }
 0x80c   : > { %v2565_v61 = vmul.f32 0.5, %v2564_v13  ;;  %v2650_v35 = vmul.f32 %v10616_v6, %v2631_v12  ;;  %v2914_v22 = vunpack.c.l.b16 %v2818_v47 }
 0x80d   : > { %v2766_v46 = vpop.f32.mrf.mxu1 }
 0x80e   : > { %v8374_v42 = vpop.eup %8373  ;;  %v2566_v8 = vsub.f32 1.5, %v2565_v61  ;;  %v10821_v51 = vadd.f32 %v10626_v10, %v2650_v35  ;;  %v10823_v23 = vpack.c.b16 %v2914_v22, %v2913_v57  ;;  %v2767_v43 = vadd.f32 %v10795_v39, %v2766_v46 }
 0x80f   : > { %v2573_v52 = vmul.f32 %v8374_v42, %v2457_v18  ;;  %vm2579_vm7 = vweird.f32 %v8374_v42 }
 0x810   : > { %13501 = vst [vmem:[#allocation62_spill] sm:$0xff] %v10821_v51  ;;  %v2567_v24 = vmul.f32 %v8372_v62, %v2566_v8  ;;  %v2680_v30 = vpack.c.bf16 %v10821_v51, %v10818_v29  ;;  %7585 = vmatmul.msk.bf16.vlgmr.msra.gmra.mxu2 %vm3017_vm0, %v10823_v23  ;;  %7593 = vmatmul.msk.bf16.vlgmr.msrb.gmra.mxu3 %vm3017_vm0, %v10823_v23  ;;  %v2803_v11 = vmul.f32 0.17677669, %v2767_v43  ;;  %vm2580_vm9 = vmor %vm2578_vm8, %vm2579_vm7 }
 0x811   : > { %13502 = vst [vmem:[#allocation63_spill] sm:$0xff] %v10823_v23  ;;  %v2574_v21 = vmul.f32 %v8374_v42, %v2573_v52 }
 0x812   : > { %2780 = vmatmul.bf16.gmra.mxu1 %v2680_v30  ;;  %v2571_v0 = vsel %vm2570_vm6, %v8372_v62, %v2567_v24  ;;  %v2819_v4 = vpack.c.bf16 %v2803_v11, %v2803_v11  ;;  %v7631_v11 = vld [vmem:[#allocation2 + $0x74] sm:$0xf] }
 0x813   : > { %v2575_v34 = vmul.f32 0.5, %v2574_v21  ;;  %3680 = vrot.lane.b32.xlu2 %v10668_v38, %s9360_s8  ;;  %v2632_v33 = vmul.f32 %v2571_v0, %v10652_v27 }
 0x814   : > { %v2915_v62 = vunpack.c.l.b16 %v2819_v4 }
 0x815   : > { %v2576_v56 = vsub.f32 1.5, %v2575_v34  ;;  %v2768_v37 = vpop.f32.mrf.mxu1  ;;  %v2651_v61 = vmul.f32 %v10616_v6, %v2632_v33  ;;  %v7623_v33 = vld [vmem:[#allocation2 + $0x54] sm:$0xf] }
 0x816   : > { %v2769_v40 = vadd.f32 %v10795_v39, %v2768_v37 }
 0x817   : > { %v2577_v20 = vmul.f32 %v8374_v42, %v2576_v56  ;;  %v10846_v57 = vadd.f32 %v10626_v10, %v2651_v61  ;;  %v7966_v56 = vld [vmem:[#allocation2 + $0x78] sm:$0xf0]  ;;  %v7963_v61 = vld [vmem:[#allocation2 + $0x48] sm:$0xf0] }
 0x818   : > { %v2804_v13 = vmul.f32 0.17677669, %v2769_v40  ;;  %v10873_v40 = vor.u32 %v7966_v56, %v7631_v11 }
 0x819   : > { %v2581_v12 = vsel %vm2580_vm9, %v8374_v42, %v2577_v20  ;;  %13504 = vst [vmem:[#allocation65_spill] sm:$0xff] %v10846_v57  ;;  %v7964_v20 = vld [vmem:[#allocation2 + $0x58] sm:$0xf0] }
 0x81a   : > { %v2820_v59 = vpack.c.bf16 %v2804_v13, %v2804_v13  ;;  %v2633_v47 = vmul.f32 %v2581_v12, %v10680_v50  ;;  %13507 = vst [vmem:[#allocation68_spill] sm:$0xff] %v10873_v40  ;;  %3540 = vmatpush.bf16.msrb.mxu0 %v10873_v40  ;;  %v10892_v4 = vor.u32 %v7964_v20, %v7623_v33  ;;  %v7615_v13 = vld [vmem:[#allocation2 + $0x34] sm:$0xf]  ;;  %v7962_v12 = vld [vmem:[#allocation2 + $0x38] sm:$0xf0] }
 0x81b   : > { %3678 = vrot.lane.b32.xlu2 %v10685_v44, %s9360_s8  ;;  %3696 = vrot.lane.b32.xlu1 %v10674_v15, %s9360_s8  ;;  %v7973_v44 = vld [vmem:[#allocation2 + $0xe8] sm:$0xf0] }
 0x81c   : > { %v2916_v35 = vunpack.c.l.b16 %v2820_v59  ;;  %v2652_v27 = vmul.f32 %v10616_v6, %v2633_v47  ;;  %13508 = vst [vmem:[#allocation69_spill] sm:$0xff] %v10892_v4  ;;  %v10898_v59 = vor.u32 %v7962_v12, %v7615_v13  ;;  %v7619_v47 = vld [vmem:[#allocation2 + $0x44] sm:$0xf] }
 0x81e   : > { %v10843_v18 = vpack.c.b16 %v2916_v35, %v2915_v62  ;;  %v10849_v22 = vadd.f32 %v10626_v10, %v2652_v27  ;;  %13509 = vst [vmem:[#allocation70_spill] sm:$0xff] %v10898_v59  ;;  %v10905_v27 = vor.u32 %v7963_v61, %v7619_v47 }
 0x820   : > { %13503 = vst [vmem:[#allocation64_spill] sm:$0xff] %v10843_v18  ;;  %v2681_v50 = vpack.c.bf16 %v10849_v22, %v10846_v57  ;;  %7586 = vmatmul.msk.bf16.gmra.mxu2 %vm3017_vm0, %v10843_v18  ;;  %7594 = vmatmul.msk.bf16.gmra.mxu3 %vm3017_vm0, %v10843_v18 }
 0x821   : > { %13505 = vst [vmem:[#allocation66_spill] sm:$0xff] %v10849_v22 }
 0x822   : > { %2785 = vmatmul.bf16.gmra.mxu1 %v2681_v50  ;;  %13510 = vst [vmem:[#allocation71_spill] sm:$0xff] %v10905_v27 }
 0x823   : > { %3694 = vrot.lane.b32.xlu2 %v10693_v9, %s9360_s8  ;;  %v2771_v46 = vpop.f32.mrf.mxu1  ;;  %3676 = vrot.lane.b32.xlu1 %v10716_v31, %s9360_s8 }
 0x824   : > { %v2772_v42 = vadd.f32 %v10795_v39, %v2771_v46 }
 0x826   : > { %v2805_v8 = vmul.f32 0.17677669, %v2772_v42 }
 0x828   : > { %v2821_v43 = vpack.c.bf16 %v2805_v8, %v2805_v8 }
 0x82a   : > { %v2917_v34 = vunpack.c.l.b16 %v2821_v43 }
 0x82b   : > { %3692 = vrot.lane.b32.xlu2 %v10718_v7, %s9360_s8  ;;  %v2773_v52 = vpop.f32.mrf.mxu1  ;;  %3674 = vrot.lane.b32.xlu1 %v10724_v41, %s9360_s8  ;;  %v7655_v41 = vld [vmem:[#allocation2 + $0xd4] sm:$0xf] }
 0x82c   : > { %v2774_v24 = vadd.f32 %v10795_v39, %v2773_v52 }
 0x82e   : > { %v2806_v30 = vmul.f32 0.17677669, %v2774_v24 }
 0x830   : > { %v2822_v21 = vpack.c.bf16 %v2806_v30, %v2806_v30 }
 0x832   : > { %v2918_v0 = vunpack.c.l.b16 %v2822_v21 }
 0x833   : > { %3690 = vrot.lane.b32.xlu2 %v10726_v58, %s9360_s8  ;;  %3672 = vrot.lane.b32.xlu1 %v10732_v45, %s9360_s8 }
 0x834   : > { %v10871_v37 = vpack.c.b16 %v2918_v0, %v2917_v34 }
 0x836   : > { %13506 = vst [vmem:[#allocation67_spill] sm:$0xff] %v10871_v37  ;;  %7587 = vmatmul.msk.bf16.gmra.mxu2 %vm3017_vm0, %v10871_v37  ;;  %7595 = vmatmul.msk.bf16.gmra.mxu3 %vm3017_vm0, %v10871_v37 }
 0x83b   : > { %3688 = vrot.lane.b32.xlu2 %v10734_v63, %s9360_s8  ;;  %3670 = vrot.lane.b32.xlu1 %v10740_v17, %s9360_s8 }
 0x843   : > { %3686 = vrot.lane.b32.xlu2 %v10742_v3, %s9360_s8  ;;  %3668 = vrot.lane.b32.xlu1 %v10749_v28, %s9360_s8 }
 0x84b   : > { %3684 = vrot.lane.b32.xlu2 %v10751_v14, %s9360_s8  ;;  %3666 = vrot.lane.b32.xlu1 %v10762_v16, %s9360_s8 }
 0x853   : > { %3682 = vrot.lane.b32.xlu2 %v10766_v25, %s9360_s8  ;;  %4134 = vrot.lane.b32.xlu1 %v10892_v4, %s9360_s8 }
 0x85b   : > { %4138 = vrot.lane.b32.xlu2 %v10873_v40, %s9360_s8  ;;  %4130 = vrot.lane.b32.xlu1 %v10898_v59, %s9360_s8 }
 0x85d   : > { %v2423_v62 = vpop.xlane.xlu2 %2422 }
 0x85e   : > { %v2442_v35 = vmul.f32 %v2423_v62, %v10543_v54 }
 0x860   : > { %v2458_v50 = vadd.f32 1e-05, %v2442_v35 }
 0x862   : > { %8375 = vrsqrt.f32 %v2458_v50  ;;  %vm2588_vm11 = vweird.f32 %v2458_v50 }
 0x863   : > { %4132 = vrot.lane.b32.xlu2 %v10905_v27, %s9360_s8  ;;  %3650 = vrot.lane.b32.xlu1 %v10823_v23, %s9360_s8 }
 0x865   : > { %v2425_v46 = vpop.xlane.xlu1 %2424 }
 0x866   : > { %v2443_v42 = vmul.f32 %v2425_v46, %v10543_v54 }
 0x868   : > { %v8376_v8 = vpop.eup %8375  ;;  %v2459_v52 = vadd.f32 1e-05, %v2443_v42 }
 0x869   : > { %v2583_v24 = vmul.f32 %v8376_v8, %v2458_v50  ;;  %vm2589_vm10 = vweird.f32 %v8376_v8 }
 0x86a   : > { %8377 = vrsqrt.f32 %v2459_v52  ;;  %vm2590_vm12 = vmor %vm2588_vm11, %vm2589_vm10  ;;  %vm2598_vm14 = vweird.f32 %v2459_v52 }
 0x86b   : > { %v2584_v43 = vmul.f32 %v8376_v8, %v2583_v24  ;;  %3652 = vrot.lane.b32.xlu2 %v10843_v18, %s9360_s8  ;;  %3654 = vrot.lane.b32.xlu1 %v10871_v37, %s9360_s8  ;;  %v7627_v24 = vld [vmem:[#allocation2 + $0x64] sm:$0xf] }
 0x86d   : > { %v2585_v30 = vmul.f32 0.5, %v2584_v43  ;;  %v7965_v43 = vld [vmem:[#allocation2 + $0x68] sm:$0xf0] }
 0x86e   : > { %v2427_v21 = vpop.xlane.xlu2 %2426 }
 0x86f   : > { %v2586_v34 = vsub.f32 1.5, %v2585_v30  ;;  %v2444_v0 = vmul.f32 %v2427_v21, %v10543_v54 }
 0x870   : > { %v8378_v11 = vpop.eup %8377 }
 0x871   : > { %v2587_v56 = vmul.f32 %v8376_v8, %v2586_v34  ;;  %v2593_v33 = vmul.f32 %v8378_v11, %v2459_v52  ;;  %v2460_v20 = vadd.f32 1e-05, %v2444_v0  ;;  %vm2599_vm13 = vweird.f32 %v8378_v11 }
 0x872   : > { %v10919_v34 = vor.u32 %v7965_v43, %v7627_v24  ;;  %vm2600_vm15 = vmor %vm2598_vm14, %vm2599_vm13 }
 0x873   : > { %v2594_v13 = vmul.f32 %v8378_v11, %v2593_v33  ;;  %8379 = vrsqrt.f32 %v2460_v20  ;;  %v2591_v61 = vsel %vm2590_vm12, %v8376_v8, %v2587_v56  ;;  %vm2608_vm2 = vweird.f32 %v2460_v20 }
 0x874   : > { %v2634_v42 = vmul.f32 %v2591_v61, %v10760_v48  ;;  %13511 = vst [vmem:[#allocation72_spill] sm:$0xff] %v10919_v34  ;;  %4136 = vrot.lane.b32.xlu0 %v10919_v34, %s9360_s8  ;;  %3541 = vmatpush.bf16.msrb.mxu0 %v10919_v34 }
 0x875   : > { %v2595_v12 = vmul.f32 0.5, %v2594_v13  ;;  %v2429_v47 = vpop.xlane.xlu1 %2428 }
 0x876   : > { %v2445_v62 = vmul.f32 %v2429_v47, %v10543_v54  ;;  %v2653_v48 = vmul.f32 %v10616_v6, %v2634_v42 }
 0x877   : > { %v2596_v35 = vsub.f32 1.5, %v2595_v12 }
 0x878   : > { %v2461_v46 = vadd.f32 1e-05, %v2445_v62  ;;  %3542 = vmatpush.bf16.msrb.mxu0 %v10892_v4 }
 0x879   : > { %v8380_v30 = vpop.eup %8379  ;;  %v2597_v21 = vmul.f32 %v8378_v11, %v2596_v35 }
 0x87a   : > { %v2603_v50 = vmul.f32 %v8380_v30, %v2460_v20  ;;  %8381 = vrsqrt.f32 %v2461_v46  ;;  %vm2609_vm1 = vweird.f32 %v8380_v30  ;;  %vm2618_vm5 = vweird.f32 %v2461_v46 }
 0x87b   : > { %v2601_v0 = vsel %vm2600_vm15, %v8378_v11, %v2597_v21  ;;  %v10929_v11 = vadd.f32 %v10626_v10, %v2653_v48  ;;  %vm2610_vm3 = vmor %vm2608_vm2, %vm2609_vm1 }
 0x87c   : > { %v2604_v8 = vmul.f32 %v8380_v30, %v2603_v50  ;;  %v2635_v56 = vmul.f32 %v2601_v0, %v10775_v53  ;;  %3543 = vmatpush.bf16.msrb.mxu0 %v10905_v27 }
 0x87d   : > { %13512 = vst [vmem:[#allocation73_spill] sm:$0xff] %v10929_v11 }
 0x87e   : > { %v2605_v33 = vmul.f32 0.5, %v2604_v8  ;;  %v2654_v13 = vmul.f32 %v10616_v6, %v2635_v56 }
 0x87f   : > { %v2776_v52 = vpop.f32.mrf.mxu1 }
 0x880   : > { %v8382_v12 = vpop.eup %8381  ;;  %v2606_v47 = vsub.f32 1.5, %v2605_v33  ;;  %v10932_v61 = vadd.f32 %v10626_v10, %v2654_v13  ;;  %v2777_v53 = vadd.f32 %v10795_v39, %v2776_v52  ;;  %3544 = vmatpush.bf16.msrb.mxu0 %v10898_v59 }
 0x881   : > { %v2613_v62 = vmul.f32 %v8382_v12, %v2461_v46  ;;  %vm2619_vm4 = vweird.f32 %v8382_v12 }
 0x882   : > { %13513 = vst [vmem:[#allocation74_spill] sm:$0xff] %v10932_v61  ;;  %v2607_v35 = vmul.f32 %v8380_v30, %v2606_v47  ;;  %v2682_v42 = vpack.c.bf16 %v10932_v61, %v10929_v11  ;;  %v2807_v50 = vmul.f32 0.17677669, %v2777_v53  ;;  %vm2620_vm6 = vmor %vm2618_vm5, %vm2619_vm4  ;;  %v7959_v61 = vld [vmem:[#allocation2 + $0x8] sm:$0xf0] }
 0x883   : > { %v2614_v24 = vmul.f32 %v8382_v12, %v2613_v62 }
 0x884   : > { %2790 = vmatmul.bf16.gmra.mxu1 %v2682_v42  ;;  %v2611_v21 = vsel %vm2610_vm3, %v8380_v30, %v2607_v35  ;;  %v2823_v20 = vpack.c.bf16 %v2807_v50, %v2807_v50 }
 0x885   : > { %v2615_v43 = vmul.f32 0.5, %v2614_v24  ;;  %v2636_v48 = vmul.f32 %v2611_v21, %v10783_v26 }
 0x886   : > { %v2919_v53 = vunpack.c.l.b16 %v2823_v20 }
 0x887   : > { %v2616_v0 = vsub.f32 1.5, %v2615_v43  ;;  %v2778_v8 = vpop.f32.mrf.mxu1  ;;  %v2655_v30 = vmul.f32 %v10616_v6, %v2636_v48 }
 0x888   : > { %v2779_v56 = vadd.f32 %v10795_v39, %v2778_v8 }
 0x889   : > { %v2617_v33 = vmul.f32 %v8382_v12, %v2616_v0  ;;  %v10948_v46 = vadd.f32 %v10626_v10, %v2655_v30 }
 0x88a   : > { %v2808_v13 = vmul.f32 0.17677669, %v2779_v56 }
 0x88b   : > { %v2621_v52 = vsel %vm2620_vm6, %v8382_v12, %v2617_v33  ;;  %13515 = vst [vmem:[#allocation76_spill] sm:$0xff] %v10948_v46 }
 0x88c   : > { %v2824_v47 = vpack.c.bf16 %v2808_v13, %v2808_v13  ;;  %v2637_v62 = vmul.f32 %v2621_v52, %v10804_v5 }
 0x88d   : > { %v3697_v35 = vpop.permute.xlu1 %3696 }
 0x88e   : > { %v2920_v42 = vunpack.c.l.b16 %v2824_v47  ;;  %v3768_v24 = vsel %vm3017_vm0, %v3697_v35, 0  ;;  %v2656_v43 = vmul.f32 %v10616_v6, %v2637_v62  ;;  %v3681_v47 = vpop.permute.xlu2 %3680 }
 0x88f   : > { %v2781_v8 = vpop.f32.mrf.mxu1  ;;  %3819 = vmatpush.bf16.xpose.msra.mxu3 %v3768_v24 }
 0x890   : > { %v10945_v26 = vpack.c.b16 %v2920_v42, %v2919_v53  ;;  %v10951_v12 = vadd.f32 %v10626_v10, %v2656_v43  ;;  %v2782_v5 = vadd.f32 %v10795_v39, %v2781_v8 }
 0x892   : > { %13514 = vst [vmem:[#allocation75_spill] sm:$0xff] %v10945_v26  ;;  %7588 = vmatmul.msk.bf16.gmra.mxu2 %vm3017_vm0, %v10945_v26  ;;  %7596 = vmatmul.msk.bf16.gmra.mxu3 %vm3017_vm0, %v10945_v26  ;;  %v2683_v6 = vpack.c.bf16 %v10951_v12, %v10948_v46  ;;  %v2809_v21 = vmul.f32 0.17677669, %v2782_v5 }
 0x893   : > { %13516 = vst [vmem:[#allocation77_spill] sm:$0xff] %v10951_v12  ;;  %3656 = vrot.lane.b32.xlu2 %v10945_v26, %s9360_s8  ;;  %v7961_v12 = vld [vmem:[#allocation2 + $0x28] sm:$0xf0] }
 0x894   : > { %2795 = vmatmul.bf16.gmra.mxu1 %v2683_v6  ;;  %v2825_v0 = vpack.c.bf16 %v2809_v21, %v2809_v21 }
 0x896   : > { %v2921_v33 = vunpack.c.l.b16 %v2825_v0  ;;  %v3679_v43 = vpop.permute.xlu2 %3678 }
 0x897   : > { %v2783_v50 = vpop.f32.mrf.mxu1 }
 0x898   : > { %v2784_v10 = vadd.f32 %v10795_v39, %v2783_v50 }
 0x89a   : > { %v2810_v56 = vmul.f32 0.17677669, %v2784_v10  ;;  %v3744_v10 = vsel %vm3017_vm0, %v3681_v47, 0 }
 0x89b   : > { %3770 = vmatpush.bf16.xpose.msrb.mxu2 %v3744_v10 }
 0x89c   : > { %v2826_v48 = vpack.c.bf16 %v2810_v56, %v2810_v56  ;;  %v3677_v56 = vpop.permute.xlu1 %3676 }
 0x89e   : > { %v2922_v20 = vunpack.c.l.b16 %v2826_v48  ;;  %v3695_v50 = vpop.permute.xlu2 %3694 }
 0x89f   : > { %v2786_v13 = vpop.f32.mrf.mxu1 }
 0x8a0   : > { %v10963_v52 = vpack.c.b16 %v2922_v20, %v2921_v33  ;;  %v2787_v62 = vadd.f32 %v10795_v39, %v2786_v13  ;;  %v10982_v33 = vpop.f32.mrf.mxu2  ;;  %v10984_v20 = vpop.f32.mrf.mxu3  ;;  %v3741_v13 = vsel %vm3017_vm0, %v3679_v43, 0 }
 0x8a2   : > { %13517 = vst [vmem:[#allocation78_spill] sm:$0xff] %v10963_v52  ;;  %3658 = vrot.lane.b32.xlu0 %v10963_v52, %s9360_s8  ;;  %7589 = vmatmul.msk.bf16.gmra.mxu2 %vm3017_vm0, %v10963_v52  ;;  %v2811_v30 = vmul.f32 0.17677669, %v2787_v62  ;;  %v3765_v62 = vsel %vm3017_vm0, %v3695_v50, 0 }
 0x8a3   : > { %7597 = vmatmul.msk.bf16.gmra.mxu3 %vm3017_vm0, %v10963_v52  ;;  %3771 = vmatpush.bf16.xpose.msrb.mxu2 %v3741_v13 }
 0x8a4   : > { %v2827_v42 = vpack.c.bf16 %v2811_v30, %v2811_v30  ;;  %3820 = vmatpush.bf16.xpose.msra.mxu3 %v3765_v62  ;;  %v3675_v30 = vpop.permute.xlu1 %3674 }
 0x8a5   : > { %v3735_v43 = vsel %vm3017_vm0, %v3675_v30, 0 }
 0x8a6   : > { %v2923_v5 = vunpack.c.l.b16 %v2827_v42  ;;  %v3693_v0 = vpop.permute.xlu2 %3692 }
 0x8a7   : > { %v2788_v35 = vpop.f32.mrf.mxu1  ;;  %v3762_v10 = vsel %vm3017_vm0, %v3693_v0, 0 }
 0x8a8   : > { %v2789_v53 = vadd.f32 %v10795_v39, %v2788_v35  ;;  %v3738_v35 = vsel %vm3017_vm0, %v3677_v56, 0  ;;  %v10989_v42 = vpop.f32.mrf.mxu2  ;;  %v10991_v47 = vpop.f32.mrf.mxu3 }
 0x8aa   : > { %v2812_v24 = vmul.f32 0.17677669, %v2789_v53 }
 0x8ab   : > { %3772 = vmatpush.bf16.xpose.msrb.mxu2 %v3738_v35 }
 0x8ac   : > { %v2828_v8 = vpack.c.bf16 %v2812_v24, %v2812_v24  ;;  %v3191_v24 = vmax.f32 %v10989_v42, %v10991_v47  ;;  %3821 = vmatpush.bf16.xpose.msra.mxu3 %v3762_v10 }
 0x8ae   : > { %v2924_v6 = vunpack.c.l.b16 %v2828_v8  ;;  %v3691_v48 = vpop.permute.xlu2 %3690  ;;  %v3673_v8 = vpop.permute.xlu1 %3672 }
 0x8af   : > { %v3732_v50 = vsel %vm3017_vm0, %v3673_v8, 0  ;;  %v3759_v62 = vsel %vm3017_vm0, %v3691_v48, 0  ;;  %v7960_v48 = vld [vmem:[#allocation2 + $0x18] sm:$0xf0] }
 0x8b0   : > { %v10973_v21 = vpack.c.b16 %v2924_v6, %v2923_v5  ;;  %v11002_v30 = vpop.f32.mrf.mxu3 }
 0x8b2   : > { %13518 = vst [vmem:[#allocation79_spill] sm:$0xff] %v10973_v21  ;;  %3660 = vrot.lane.b32.xlu2 %v10973_v21, %s9360_s8  ;;  %7590 = vmatmul.msk.bf16.gmra.mxu2 %vm3017_vm0, %v10973_v21 }
 0x8b3   : > { %7598 = vmatmul.msk.bf16.gmra.mxu3 %vm3017_vm0, %v10973_v21  ;;  %3773 = vmatpush.bf16.xpose.msrb.mxu2 %v3735_v43  ;;  %v7611_v43 = vld [vmem:[#allocation2 + $0x24] sm:$0xf] }
 0x8b4   : > { %3822 = vmatpush.bf16.xpose.msra.mxu3 %v3759_v62  ;;  %v11004_v8 = vor.u32 %v7961_v12, %v7611_v43  ;;  %v7603_v62 = vld [vmem:[#allocation2 + $0x4] sm:$0xf] }
 0x8b5   : > { %v11012_v11 = vor.u32 %v7959_v61, %v7603_v62 }
 0x8b6   : > { %v3689_v53 = vpop.permute.xlu2 %3688  ;;  %v3671_v6 = vpop.permute.xlu1 %3670  ;;  %13519 = vst [vmem:[#allocation80_spill] sm:$0xff] %v11004_v8  ;;  %3545 = vmatpush.bf16.msrb.mxu0 %v11004_v8 }
 0x8b7   : > { %v3729_v13 = vsel %vm3017_vm0, %v3671_v6, 0  ;;  %v3756_v6 = vsel %vm3017_vm0, %v3689_v53, 0  ;;  %13521 = vst [vmem:[#allocation82_spill] sm:$0xff] %v11012_v11 }
 0x8b8   : > { %v11016_v43 = vpop.f32.mrf.mxu3 }
 0x8bb   : > { %3774 = vmatpush.bf16.xpose.msrb.mxu2 %v3732_v50  ;;  %v7607_v50 = vld [vmem:[#allocation2 + $0x14] sm:$0xf] }
 0x8bc   : > { %3823 = vmatpush.bf16.xpose.msra.mxu3 %v3756_v6  ;;  %v11009_v10 = vor.u32 %v7960_v48, %v7607_v50 }
 0x8be   : > { %v3687_v5 = vpop.permute.xlu2 %3686  ;;  %v3669_v35 = vpop.permute.xlu1 %3668  ;;  %13520 = vst [vmem:[#allocation81_spill] sm:$0xff] %v11009_v10  ;;  %3546 = vmatpush.bf16.msrb.mxu0 %v11009_v10 }
 0x8bf   : > { %v3726_v0 = vsel %vm3017_vm0, %v3669_v35, 0 }
 0x8c0   : > { %v11023_v62 = vpop.f32.mrf.mxu3 }
 0x8c2   : > { %3547 = vmatpush.bf16.msrb.mxu0 %v11012_v11 }
 0x8c3   : > { %3775 = vmatpush.bf16.xpose.msrb.mxu2 %v3729_v13 }
 0x8c6   : > { %v3685_v56 = vpop.permute.xlu2 %3684  ;;  %v3667_v13 = vpop.permute.xlu1 %3666 }
 0x8c7   : > { %v3723_v53 = vsel %vm3017_vm0, %v3667_v13, 0  ;;  %v3750_v57 = vsel %vm3017_vm0, %v3685_v56, 0 }
 0x8c8   : > { %v11030_v32 = vpop.f32.mrf.mxu3 }
 0x8cb   : > { %3776 = vmatpush.bf16.xpose.msrb.mxu2 %v3726_v0  ;;  %v3753_v0 = vsel %vm3017_vm0, %v3687_v5, 0 }
 0x8cc   : > { %3824 = vmatpush.bf16.xpose.msra.mxu3 %v3753_v0 }
 0x8ce   : > { %v3683_v46 = vpop.permute.xlu2 %3682  ;;  %v4135_v48 = vpop.permute.xlu1 %4134 }
 0x8d3   : > { %3777 = vmatpush.bf16.xpose.msrb.mxu2 %v3723_v53 }
 0x8d4   : > { %3825 = vmatpush.bf16.xpose.msra.mxu3 %v3750_v57 }
 0x8d6   : > { %v4139_v35 = vpop.permute.xlu2 %4138  ;;  %v4131_v53 = vpop.permute.xlu1 %4130 }
 0x8d7   : > { %4172 = vmatpush.bf16.msra.mxu0 %v4139_v35 }
 0x8db   : > { %3192 = vmax.xlane.f32.xlu2 %v3191_v24  ;;  %v11000_v24 = vpop.f32.mrf.mxu2 }
 0x8de   : > { %v4133_v35 = vpop.permute.xlu2 %4132 }
 0x8e3   : > { %v11014_v12 = vpop.f32.mrf.mxu2 }
 0x8e4   : > { %v3197_v2 = vmax.f32 %v11014_v12, %v11016_v43 }
 0x8e6   : > { %v4137_v6 = vpop.permute.xlu0 %4136  ;;  %v3653_v49 = vpop.permute.xlu2 %3652 }
 0x8e7   : > { %4173 = vmatpush.bf16.msra.mxu0 %v4137_v6 }
 0x8eb   : > { %v11021_v61 = vpop.f32.mrf.mxu2  ;;  %4174 = vmatpush.bf16.msra.mxu0 %v4135_v48 }
 0x8ec   : > { %v3200_v1 = vmax.f32 %v11021_v61, %v11023_v62 }
 0x8ef   : > { %4175 = vmatpush.bf16.msra.mxu0 %v4133_v35 }
 0x8f3   : > { %v11028_v29 = vpop.f32.mrf.mxu2  ;;  %4176 = vmatpush.bf16.msra.mxu0 %v4131_v53 }
 0x901   : > { %v2791_v50 = vpop.f32.mrf.mxu1 }
 0x902   : > { %v2792_v22 = vadd.f32 %v10795_v39, %v2791_v50  ;;  %v3747_v50 = vsel %vm3017_vm0, %v3683_v46, 0 }
 0x903   : > { %3826 = vmatpush.bf16.xpose.msra.mxu3 %v3747_v50 }
 0x904   : > { %v2813_v13 = vmul.f32 0.17677669, %v2792_v22 }
 0x906   : > { %v2829_v0 = vpack.c.bf16 %v2813_v13, %v2813_v13 }
 0x908   : > { %v2925_v56 = vunpack.c.l.b16 %v2829_v0 }
 0x909   : > { %v2793_v51 = vpop.f32.mrf.mxu1 }
 0x90a   : > { %v2794_v5 = vadd.f32 %v10795_v39, %v2793_v51 }
 0x90c   : > { %v2814_v6 = vmul.f32 0.17677669, %v2794_v5 }
 0x90e   : > { %v2830_v48 = vpack.c.bf16 %v2814_v6, %v2814_v6 }
 0x910   : > { %v2926_v57 = vunpack.c.l.b16 %v2830_v48 }
 0x911   : > { %v2796_v54 = vpop.f32.mrf.mxu1 }
 0x912   : > { %v11033_v22 = vpack.c.b16 %v2926_v57, %v2925_v56  ;;  %v2797_v35 = vadd.f32 %v10795_v39, %v2796_v54 }
 0x914   : > { %13522 = vst [vmem:[#allocation83_spill] sm:$0xff] %v11033_v22  ;;  %3662 = vrot.lane.b32.xlu1 %v11033_v22, %s9360_s8  ;;  %7591 = vmatmul.msk.bf16.gmra.mxu2 %vm3017_vm0, %v11033_v22  ;;  %v2815_v5 = vmul.f32 0.17677669, %v2797_v35 }
 0x915   : > { %7599 = vmatmul.msk.bf16.gmra.mxu3 %vm3017_vm0, %v11033_v22  ;;  %v11042_v51 = vpop.f32.mrf.mxu2  ;;  %v11044_v46 = vpop.f32.mrf.mxu3 }
 0x916   : > { %v3206_v13 = vmax.f32 %v11042_v51, %v11044_v46  ;;  %v2831_v0 = vpack.c.bf16 %v2815_v5, %v2815_v5 }
 0x918   : > { %3207 = vmax.xlane.f32.xlu2 %v3206_v13  ;;  %v2927_v57 = vunpack.c.l.b16 %v2831_v0 }
 0x919   : > { %v2798_v53 = vpop.f32.mrf.mxu1 }
 0x91a   : > { %v2799_v54 = vadd.f32 %v10795_v39, %v2798_v53 }
 0x91c   : > { %v2816_v6 = vmul.f32 0.17677669, %v2799_v54  ;;  %v3651_v54 = vpop.permute.xlu1 %3650 }
 0x91d   : > { %v11049_v50 = vpop.f32.mrf.mxu2  ;;  %v11051_v48 = vpop.f32.mrf.mxu3 }
 0x91e   : > { %v2832_v56 = vpack.c.bf16 %v2816_v6, %v2816_v6  ;;  %v3209_v60 = vmax.f32 %v11049_v50, %v11051_v48 }
 0x920   : > { %v2928_v36 = vunpack.c.l.b16 %v2832_v56  ;;  %v3188_v56 = vmax.f32 %v10982_v33, %v10984_v20 }
 0x922   : > { %v11053_v19 = vpack.c.b16 %v2928_v36, %v2927_v57 }
 0x924   : > { %13523 = vst [vmem:[#allocation84_spill] sm:$0xff] %v11053_v19  ;;  %3664 = vrot.lane.b32.xlu0 %v11053_v19, %s9360_s8  ;;  %7592 = vmatmul.msk.bf16.gmra.mxu2 %vm3017_vm0, %v11053_v19 }
 0x925   : > { %7600 = vmatmul.msk.bf16.gmra.mxu3 %vm3017_vm0, %v11053_v19  ;;  %v11061_v39 = vpop.f32.mrf.mxu2 }
 0x926   : > { %v11063_v35 = vpop.f32.mrf.mxu3 }
 0x927   : > { %v3212_v13 = vmax.f32 %v11061_v39, %v11063_v35 }
 0x929   : > { %3213 = vmax.xlane.f32.xlu2 %v3212_v13 }
 0x92d   : > { %v11067_v5 = vpop.f32.mrf.mxu2 }
 0x92e   : > { %v11069_v36 = vpop.f32.mrf.mxu3 }
 0x92f   : > { %v3215_v53 = vmax.f32 %v11067_v5, %v11069_v36 }
 0x931   : > { %3216 = vmax.xlane.f32.xlu2 %v3215_v53 }
 0x934   : > { %7665 = vmatmul.msk.bf16.vlgmr.msrb.gmra.mxu2 %vm3017_vm0, %v3651_v54 }
 0x935   : > { %7673 = vmatmul.msk.bf16.vlgmr.msra.gmra.mxu3 %vm3017_vm0, %v3651_v54  ;;  %v11075_v0 = vpop.f32.mrf.mxu2  ;;  %v3194_v54 = vmax.f32 %v11000_v24, %v11002_v30 }
 0x936   : > { %v11077_v6 = vpop.f32.mrf.mxu3 }
 0x93d   : > { %v11081_v57 = vpop.f32.mrf.mxu2 }
 0x93e   : > { %v11083_v13 = vpop.f32.mrf.mxu3  ;;  %3189 = vmax.xlane.f32.xlu1 %v3188_v56  ;;  %v3655_v56 = vpop.permute.xlu1 %3654 }
 0x93f   : > { %v3221_v53 = vmax.f32 %v11081_v57, %v11083_v13 }
 0x941   : > { %3222 = vmax.xlane.f32.xlu2 %v3221_v53  ;;  %v3203_v53 = vmax.f32 %v11028_v29, %v11030_v32 }
 0x944   : > { %7666 = vmatmul.msk.bf16.gmra.mxu2 %vm3017_vm0, %v3653_v49 }
 0x945   : > { %7674 = vmatmul.msk.bf16.gmra.mxu3 %vm3017_vm0, %v3653_v49  ;;  %v3218_v49 = vmax.f32 %v11075_v0, %v11077_v6 }
 0x946   : > { %3195 = vmax.xlane.f32.xlu1 %v3194_v54  ;;  %v3657_v54 = vpop.permute.xlu2 %3656 }
 0x94e   : > { %3201 = vmax.xlane.f32.xlu1 %v3200_v1  ;;  %3198 = vmax.xlane.f32.xlu0 %v3197_v2  ;;  %v3659_v2 = vpop.permute.xlu0 %3658  ;;  %v3661_v1 = vpop.permute.xlu2 %3660 }
 0x954   : > { %7667 = vmatmul.msk.bf16.gmra.mxu2 %vm3017_vm0, %v3655_v56 }
 0x955   : > { %7675 = vmatmul.msk.bf16.gmra.mxu3 %vm3017_vm0, %v3655_v56 }
 0x956   : > { %3204 = vmax.xlane.f32.xlu1 %v3203_v53  ;;  %3210 = vmax.xlane.f32.xlu0 %v3209_v60 }
 0x95e   : > { %3219 = vmax.xlane.f32.xlu1 %v3218_v49 }
 0x964   : > { %7668 = vmatmul.msk.bf16.gmra.mxu2 %vm3017_vm0, %v3657_v54 }
 0x965   : > { %7676 = vmatmul.msk.bf16.gmra.mxu3 %vm3017_vm0, %v3657_v54  ;;  %v3193_v54 = vpop.xlane.xlu2 %3192 }
 0x974   : > { %7669 = vmatmul.msk.bf16.gmra.mxu2 %vm3017_vm0, %v3659_v2 }
 0x975   : > { %7677 = vmatmul.msk.bf16.gmra.mxu3 %vm3017_vm0, %v3659_v2  ;;  %v3238_v2 = vsub.f32 %v10989_v42, %v3193_v54 }
 0x977   : > { %v3272_v27 = vmul.f32 1.442695, %v3238_v2 }
 0x979   : > { %8383 = vpow2.f32 %v3272_v27 }
 0x984   : > { %7670 = vmatmul.msk.bf16.gmra.mxu2 %vm3017_vm0, %v3661_v1 }
 0x985   : > { %7678 = vmatmul.msk.bf16.gmra.mxu3 %vm3017_vm0, %v3661_v1  ;;  %v3239_v1 = vsub.f32 %v10991_v47, %v3193_v54  ;;  %v11133_v54 = vpop.eup %8383 }
 0x986   : > { %v3663_v60 = vpop.permute.xlu1 %3662 }
 0x987   : > { %v3274_v14 = vmul.f32 1.442695, %v3239_v1 }
 0x989   : > { %8385 = vpow2.f32 %v3274_v14 }
 0x98f   : > { %v11135_v2 = vpop.eup %8385 }
 0x990   : > { %v3335_v14 = vadd.f32 %v11135_v2, %v11133_v54 }
 0x994   : > { %7671 = vmatmul.msk.bf16.gmra.mxu2 %vm3017_vm0, %v3663_v60 }
 0x995   : > { %7679 = vmatmul.msk.bf16.gmra.mxu3 %vm3017_vm0, %v3663_v60 }
 0x996   : > { %v3665_v34 = vpop.permute.xlu0 %3664 }
 0x997   : > { %v11111_v56 = vpop.f32.mrf.mxu2 }
 0x998   : > { %v11113_v53 = vpop.f32.mrf.mxu3 }
 0x999   : > { %v3224_v49 = vmax.f32 %v11111_v56, %v11113_v53 }
 0x99b   : > { %3225 = vmax.xlane.f32.xlu1 %v3224_v49 }
 0x99f   : > { %v11118_v55 = vpop.f32.mrf.mxu2 }
 0x9a0   : > { %v11121_v59 = vpop.f32.mrf.mxu3 }
 0x9a1   : > { %v3227_v60 = vmax.f32 %v11118_v55, %v11121_v59 }
 0x9a3   : > { %3228 = vmax.xlane.f32.xlu2 %v3227_v60 }
 0x9a4   : > { %7672 = vmatmul.msk.bf16.gmra.mxu2 %vm3017_vm0, %v3665_v34 }
 0x9a5   : > { %7680 = vmatmul.msk.bf16.gmra.mxu3 %vm3017_vm0, %v3665_v34 }
 0x9a7   : > { %v11127_v49 = vpop.f32.mrf.mxu2 }
 0x9a8   : > { %v11129_v42 = vpop.f32.mrf.mxu3 }
 0x9a9   : > { %v3230_v47 = vmax.f32 %v11127_v49, %v11129_v42 }
 0x9ab   : > { %3231 = vmax.xlane.f32.xlu0 %v3230_v47 }
 0x9af   : > { %v11137_v60 = vpop.f32.mrf.mxu2 }
 0x9b0   : > { %v11139_v1 = vpop.f32.mrf.mxu3 }
 0x9b1   : > { %v3190_v63 = vpop.xlane.xlu1 %3189  ;;  %v3233_v27 = vmax.f32 %v11137_v60, %v11139_v1 }
 0x9b2   : > { %v3236_v34 = vsub.f32 %v10982_v33, %v3190_v63  ;;  %v3237_v7 = vsub.f32 %v10984_v20, %v3190_v63 }
 0x9b3   : > { %3234 = vmax.xlane.f32.xlu1 %v3233_v27  ;;  %3336 = vadd.xlane.f32.xlu0 %v3335_v14 }
 0x9b4   : > { %v3268_v47 = vmul.f32 1.442695, %v3236_v34  ;;  %v3270_v15 = vmul.f32 1.442695, %v3237_v7 }
 0x9b6   : > { %8387 = vpow2.f32 %v3268_v47 }
 0x9b7   : > { %8389 = vpow2.f32 %v3270_v15  ;;  %v11147_v40 = vpop.f32.mrf.mxu2 }
 0x9b8   : > { %v11149_v19 = vpop.f32.mrf.mxu3 }
 0x9b9   : > { %v3196_v4 = vpop.xlane.xlu1 %3195  ;;  %v3868_v16 = vmax.f32 %v11147_v40, %v11149_v19 }
 0x9ba   : > { %v3240_v26 = vsub.f32 %v11000_v24, %v3196_v4  ;;  %v3241_v22 = vsub.f32 %v11002_v30, %v3196_v4 }
 0x9bc   : > { %v11153_v25 = vpop.eup %8387  ;;  %v3276_v33 = vmul.f32 1.442695, %v3240_v26  ;;  %v3278_v21 = vmul.f32 1.442695, %v3241_v22 }
 0x9bd   : > { %v11155_v63 = vpop.eup %8389 }
 0x9be   : > { %8391 = vpow2.f32 %v3276_v33  ;;  %v3332_v7 = vadd.f32 %v11155_v63, %v11153_v25 }
 0x9bf   : > { %8393 = vpow2.f32 %v3278_v21  ;;  %v11159_v15 = vpop.f32.mrf.mxu2 }
 0x9c0   : > { %3333 = vadd.xlane.f32.xlu1 %v3332_v7  ;;  %v11161_v20 = vpop.f32.mrf.mxu3 }
 0x9c1   : > { %v3202_v27 = vpop.xlane.xlu1 %3201  ;;  %v3199_v24 = vpop.xlane.xlu0 %3198  ;;  %v3871_v4 = vmax.f32 %v11159_v15, %v11161_v20 }
 0x9c2   : > { %v3244_v26 = vsub.f32 %v11021_v61, %v3202_v27  ;;  %v3245_v30 = vsub.f32 %v11023_v62, %v3202_v27  ;;  %v3242_v22 = vsub.f32 %v11014_v12, %v3199_v24  ;;  %v3243_v14 = vsub.f32 %v11016_v43, %v3199_v24 }
 0x9c3   : > { %3872 = vmax.xlane.f32.xlu2 %v3871_v4 }
 0x9c4   : > { %v11169_v21 = vpop.eup %8391  ;;  %v3284_v34 = vmul.f32 1.442695, %v3244_v26  ;;  %v3286_v47 = vmul.f32 1.442695, %v3245_v30  ;;  %v3280_v33 = vmul.f32 1.442695, %v3242_v22 }
 0x9c5   : > { %v11171_v7 = vpop.eup %8393  ;;  %v3282_v3 = vmul.f32 1.442695, %v3243_v14 }
 0x9c6   : > { %8395 = vpow2.f32 %v3284_v34  ;;  %v3338_v61 = vadd.f32 %v11171_v7, %v11169_v21 }
 0x9c7   : > { %8397 = vpow2.f32 %v3286_v47  ;;  %v11177_v12 = vpop.f32.mrf.mxu2 }
 0x9c8   : > { %8399 = vpow2.f32 %v3280_v33  ;;  %3869 = vmax.xlane.f32.xlu1 %v3868_v16  ;;  %v11179_v43 = vpop.f32.mrf.mxu3  ;;  %3339 = vadd.xlane.f32.xlu0 %v3338_v61  ;;  %v3208_v61 = vpop.xlane.xlu2 %3207 }
 0x9c9   : > { %8401 = vpow2.f32 %v3282_v3  ;;  %v3205_v62 = vpop.xlane.xlu1 %3204  ;;  %v3874_v27 = vmax.f32 %v11177_v12, %v11179_v43 }
 0x9ca   : > { %v3246_v24 = vsub.f32 %v11028_v29, %v3205_v62  ;;  %v3247_v4 = vsub.f32 %v11030_v32, %v3205_v62 }
 0x9cb   : > { %3875 = vmax.xlane.f32.xlu2 %v3874_v27 }
 0x9cc   : > { %v11185_v26 = vpop.eup %8395  ;;  %v3288_v30 = vmul.f32 1.442695, %v3246_v24  ;;  %v3290_v22 = vmul.f32 1.442695, %v3247_v4  ;;  %v3248_v24 = vsub.f32 %v11042_v51, %v3208_v61 }
 0x9cd   : > { %v11187_v14 = vpop.eup %8397 }
 0x9ce   : > { %v11189_v16 = vpop.eup %8399  ;;  %v3344_v3 = vadd.f32 %v11187_v14, %v11185_v26  ;;  %8403 = vpow2.f32 %v3288_v30  ;;  %v3249_v30 = vsub.f32 %v11044_v46, %v3208_v61  ;;  %v3211_v61 = vpop.xlane.xlu0 %3210 }
 0x9cf   : > { %v11193_v34 = vpop.eup %8401  ;;  %v11195_v47 = vpop.f32.mrf.mxu2  ;;  %8405 = vpow2.f32 %v3290_v22 }
 0x9d0   : > { %3345 = vadd.xlane.f32.xlu1 %v3344_v3  ;;  %v11197_v32 = vpop.f32.mrf.mxu3  ;;  %v3341_v33 = vadd.f32 %v11193_v34, %v11189_v16  ;;  %v3294_v52 = vmul.f32 1.442695, %v3249_v30  ;;  %v3251_v30 = vsub.f32 %v11051_v48, %v3211_v61  ;;  %v3214_v28 = vpop.xlane.xlu2 %3213 }
 0x9d1   : > { %v3877_v29 = vmax.f32 %v11195_v47, %v11197_v32  ;;  %v3252_v23 = vsub.f32 %v11061_v39, %v3214_v28  ;;  %v3253_v48 = vsub.f32 %v11063_v35, %v3214_v28 }
 0x9d2   : > { %v3298_v37 = vmul.f32 1.442695, %v3251_v30 }
 0x9d3   : > { %3878 = vmax.xlane.f32.xlu0 %v3877_v29  ;;  %3342 = vadd.xlane.f32.xlu2 %v3341_v33  ;;  %v3292_v33 = vmul.f32 1.442695, %v3248_v24  ;;  %v3250_v24 = vsub.f32 %v11049_v50, %v3211_v61  ;;  %v3300_v45 = vmul.f32 1.442695, %v3252_v23  ;;  %v7663_v23 = vld [vmem:[#allocation2 + $0xf4] sm:$0xf] }
 0x9d4   : > { %v11203_v62 = vpop.eup %8403 }
 0x9d5   : > { %v11205_v27 = vpop.eup %8405  ;;  %8407 = vpow2.f32 %v3292_v33 }
 0x9d6   : > { %v3347_v29 = vadd.f32 %v11205_v27, %v11203_v62  ;;  %8409 = vpow2.f32 %v3294_v52 }
 0x9d7   : > { %v11208_v4 = vpop.f32.mrf.mxu2 }
 0x9d8   : > { %v11211_v22 = vpop.f32.mrf.mxu3 }
 0x9d9   : > { %v3880_v3 = vmax.f32 %v11208_v4, %v11211_v22 }
 0x9db   : > { %3881 = vmax.xlane.f32.xlu0 %v3880_v3  ;;  %3348 = vadd.xlane.f32.xlu2 %v3347_v29  ;;  %v11223_v9 = vpop.eup %8407 }
 0x9dc   : > { %13524 = vst [vmem:[#allocation85_spill] sm:$0xff] %v11223_v9  ;;  %v11225_v18 = vpop.eup %8409 }
 0x9dd   : > { %13525 = vst [vmem:[#allocation86_spill] sm:$0xff] %v11225_v18  ;;  %v3350_v33 = vadd.f32 %v11225_v18, %v11223_v9  ;;  %v7968_v18 = vld [vmem:[#allocation2 + $0x98] sm:$0xf0] }
 0x9df   : > { %v11217_v58 = vpop.f32.mrf.mxu2 }
 0x9e0   : > { %v11219_v51 = vpop.f32.mrf.mxu3 }
 0x9e1   : > { %v3883_v46 = vmax.f32 %v11217_v58, %v11219_v51 }
 0x9e3   : > { %3884 = vmax.xlane.f32.xlu1 %v3883_v46  ;;  %v3296_v46 = vmul.f32 1.442695, %v3250_v24  ;;  %v3302_v24 = vmul.f32 1.442695, %v3253_v48 }
 0x9e5   : > { %8411 = vpow2.f32 %v3296_v46 }
 0x9e6   : > { %8413 = vpow2.f32 %v3298_v37 }
 0x9e7   : > { %v11228_v3 = vpop.f32.mrf.mxu2  ;;  %8415 = vpow2.f32 %v3300_v45  ;;  %v7974_v45 = vld [vmem:[#allocation2 + $0xf8] sm:$0xf0] }
 0x9e8   : > { %v11231_v29 = vpop.f32.mrf.mxu3  ;;  %8417 = vpow2.f32 %v3302_v24  ;;  %v11265_v48 = vor.u32 %v7974_v45, %v7663_v23  ;;  %v7972_v23 = vld [vmem:[#allocation2 + $0xd8] sm:$0xf0] }
 0x9e9   : > { %13526 = vst [vmem:[#allocation87_spill] sm:$0xff] %v11231_v29  ;;  %v3886_v52 = vmax.f32 %v11228_v3, %v11231_v29  ;;  %v11279_v31 = vor.u32 %v7972_v23, %v7655_v41  ;;  %v7643_v41 = vld [vmem:[#allocation2 + $0xa4] sm:$0xf]  ;;  %v7969_v23 = vld [vmem:[#allocation2 + $0xa8] sm:$0xf0] }
 0x9ea   : > { %13533 = vst [vmem:[#allocation94_spill] sm:$0xff] %v11265_v48  ;;  %3589 = vmatpush.bf16.msrb.mxu1 %v11265_v48  ;;  %v7971_v48 = vld [vmem:[#allocation2 + $0xc8] sm:$0xf0] }
 0x9eb   : > { %3887 = vmax.xlane.f32.xlu0 %v3886_v52  ;;  %3351 = vadd.xlane.f32.xlu1 %v3350_v33  ;;  %v11245_v52 = vpop.eup %8411  ;;  %13536 = vst [vmem:[#allocation97_spill] sm:$0xff] %v11279_v31 }
 0x9ec   : > { %13529 = vst [vmem:[#allocation90_spill] sm:$0xff] %v11245_v52  ;;  %v11247_v33 = vpop.eup %8413 }
 0x9ed   : > { %13530 = vst [vmem:[#allocation91_spill] sm:$0xff] %v11247_v33  ;;  %v3353_v28 = vadd.f32 %v11247_v33, %v11245_v52  ;;  %v11255_v37 = vpop.eup %8415 }
 0x9ee   : > { %13531 = vst [vmem:[#allocation92_spill] sm:$0xff] %v11255_v37  ;;  %v11257_v35 = vpop.eup %8417 }
 0x9ef   : > { %v11238_v50 = vpop.f32.mrf.mxu2  ;;  %13532 = vst [vmem:[#allocation93_spill] sm:$0xff] %v11257_v35  ;;  %v3356_v24 = vadd.f32 %v11257_v35, %v11255_v37 }
 0x9f0   : > { %13527 = vst [vmem:[#allocation88_spill] sm:$0xff] %v11238_v50  ;;  %v11241_v61 = vpop.f32.mrf.mxu3 }
 0x9f1   : > { %13528 = vst [vmem:[#allocation89_spill] sm:$0xff] %v11241_v61  ;;  %v3889_v17 = vmax.f32 %v11238_v50, %v11241_v61 }
 0x9f3   : > { %3890 = vmax.xlane.f32.xlu2 %v3889_v17 }
 0x9f7   : > { %v11249_v39 = vpop.f32.mrf.mxu2 }
 0x9f8   : > { %v11251_v30 = vpop.f32.mrf.mxu3 }
 0x9fb   : > { %3354 = vadd.xlane.f32.xlu2 %v3353_v28  ;;  %v7659_v28 = vld [vmem:[#allocation2 + $0xe4] sm:$0xf] }
 0x9ff   : > { %4126 = vrot.lane.b32.xlu0 %v11009_v10, %s9360_s8  ;;  %v11261_v17 = vpop.f32.mrf.mxu2  ;;  %v11272_v10 = vor.u32 %v7973_v44, %v7659_v28  ;;  %v7647_v44 = vld [vmem:[#allocation2 + $0xb4] sm:$0xf]  ;;  %v7970_v28 = vld [vmem:[#allocation2 + $0xb8] sm:$0xf0] }
 0xa00   : > { %v11263_v46 = vpop.f32.mrf.mxu3 }
 0xa01   : > { %13534 = vst [vmem:[#allocation95_spill] sm:$0xff] %v11272_v10  ;;  %3590 = vmatpush.bf16.msrb.mxu1 %v11272_v10  ;;  %v11285_v10 = vor.u32 %v7970_v28, %v7647_v44 }
 0xa03   : > { %3357 = vadd.xlane.f32.xlu2 %v3356_v24  ;;  %v7651_v24 = vld [vmem:[#allocation2 + $0xc4] sm:$0xf]  ;;  %13538 = vst [vmem:[#allocation99_spill] sm:$0xff] %v11285_v10 }
 0xa04   : > { %4124 = vrot.lane.b32.xlu1 %v11012_v11, %s9360_s8  ;;  %v11282_v35 = vor.u32 %v7971_v48, %v7651_v24  ;;  %v3217_v11 = vpop.xlane.xlu2 %3216  ;;  %v3220_v24 = vpop.xlane.xlu1 %3219 }
 0xa05   : > { %3591 = vmatpush.bf16.msrb.mxu1 %v11279_v31  ;;  %v11292_v31 = vor.u32 %v7969_v23, %v7643_v41  ;;  %v7635_v41 = vld [vmem:[#allocation2 + $0x84] sm:$0xf]  ;;  %v7967_v23 = vld [vmem:[#allocation2 + $0x88] sm:$0xf0] }
 0xa06   : > { %13537 = vst [vmem:[#allocation98_spill] sm:$0xff] %v11282_v35 }
 0xa07   : > { %v11275_v38 = vpop.f32.mrf.mxu2  ;;  %13539 = vst [vmem:[#allocation100_spill] sm:$0xff] %v11292_v31 }
 0xa08   : > { %v11277_v45 = vpop.f32.mrf.mxu3 }
 0xa09   : > { %13535 = vst [vmem:[#allocation96_spill] sm:$0xff] %v11277_v45  ;;  %3592 = vmatpush.bf16.msrb.mxu1 %v11282_v35  ;;  %v7639_v35 = vld [vmem:[#allocation2 + $0x94] sm:$0xf] }
 0xa0a   : > { %v11295_v52 = vor.u32 %v7968_v18, %v7639_v35  ;;  %v3254_v18 = vsub.f32 %v11067_v5, %v3217_v11  ;;  %v3255_v35 = vsub.f32 %v11069_v36, %v3217_v11 }
 0xa0c   : > { %v3223_v48 = vpop.xlane.xlu2 %3222  ;;  %13540 = vst [vmem:[#allocation101_spill] sm:$0xff] %v11295_v52  ;;  %v3306_v61 = vmul.f32 1.442695, %v3255_v35 }
 0xa0d   : > { %3593 = vmatpush.bf16.msrb.mxu1 %v11285_v10  ;;  %v3258_v44 = vsub.f32 %v11081_v57, %v3223_v48  ;;  %v3259_v28 = vsub.f32 %v11083_v13, %v3223_v48  ;;  %v3304_v48 = vmul.f32 1.442695, %v3254_v18 }
 0xa0e   : > { %v3226_v13 = vpop.xlane.xlu1 %3225 }
 0xa0f   : > { %v11287_v37 = vpop.f32.mrf.mxu2  ;;  %v3312_v57 = vmul.f32 1.442695, %v3258_v44  ;;  %v3260_v50 = vsub.f32 %v11111_v56, %v3226_v13  ;;  %v3895_v44 = vmax.f32 %v11261_v17, %v11263_v46 }
 0xa10   : > { %v11289_v33 = vpop.f32.mrf.mxu3 }
 0xa11   : > { %3594 = vmatpush.bf16.msrb.mxu1 %v11292_v31  ;;  %v11306_v31 = vor.u32 %v7967_v23, %v7635_v41  ;;  %8419 = vpow2.f32 %v3312_v57  ;;  %v3316_v11 = vmul.f32 1.442695, %v3260_v50  ;;  %v3257_v50 = vsub.f32 %v11077_v6, %v3220_v24 }
 0xa13   : > { %13541 = vst [vmem:[#allocation102_spill] sm:$0xff] %v11306_v31 }
 0xa15   : > { %3595 = vmatpush.bf16.msrb.mxu1 %v11295_v52  ;;  %v3314_v52 = vmul.f32 1.442695, %v3259_v28 }
 0xa16   : > { %v3229_v18 = vpop.xlane.xlu2 %3228 }
 0xa17   : > { %v11300_v9 = vpop.f32.mrf.mxu2  ;;  %8421 = vpow2.f32 %v3314_v52  ;;  %v11321_v28 = vpop.eup %8419 }
 0xa18   : > { %v11302_v10 = vpop.f32.mrf.mxu3  ;;  %8423 = vpow2.f32 %v3304_v48  ;;  %13542 = vst [vmem:[#allocation103_spill] sm:$0xff] %v11321_v28 }
 0xa19   : > { %3596 = vmatpush.bf16.msrb.mxu1 %v11306_v31  ;;  %8425 = vpow2.f32 %v3306_v61 }
 0xa1a   : > { %8427 = vpow2.f32 %v3316_v11 }
 0xa1b   : > { %4128 = vrot.lane.b32.xlu2 %v11004_v8, %s9360_s8  ;;  %v3261_v8 = vsub.f32 %v11113_v53, %v3226_v13 }
 0xa1d   : > { %v3318_v36 = vmul.f32 1.442695, %v3261_v8  ;;  %v11323_v23 = vpop.eup %8421  ;;  %v3256_v8 = vsub.f32 %v11075_v0, %v3220_v24  ;;  %v3310_v0 = vmul.f32 1.442695, %v3257_v50  ;;  %v3262_v50 = vsub.f32 %v11118_v55, %v3229_v18 }
 0xa1e   : > { %v11313_v29 = vpop.xlane.xlu0 %3231  ;;  %13543 = vst [vmem:[#allocation104_spill] sm:$0xff] %v11323_v23  ;;  %v11325_v56 = vpop.eup %8423  ;;  %v3365_v61 = vadd.f32 %v11323_v23, %v11321_v28 }
 0xa1f   : > { %v11315_v41 = vpop.f32.mrf.mxu2  ;;  %8429 = vpow2.f32 %v3318_v36  ;;  %v11327_v52 = vpop.eup %8425 }
 0xa20   : > { %v11317_v5 = vpop.f32.mrf.mxu3  ;;  %13544 = vst [vmem:[#allocation105_spill] sm:$0xff] %v11327_v52  ;;  %v3359_v48 = vadd.f32 %v11327_v52, %v11325_v56  ;;  %v11339_v11 = vpop.eup %8427 }
 0xa21   : > { %13545 = vst [vmem:[#allocation106_spill] sm:$0xff] %v11339_v11 }
 0xa25   : > { %v11341_v36 = vpop.eup %8429 }
 0xa26   : > { %v3235_v53 = vpop.xlane.xlu1 %3234  ;;  %v3337_v35 = vpop.xlane.xlu0 %3336  ;;  %13546 = vst [vmem:[#allocation107_spill] sm:$0xff] %v11341_v36 }
 0xa27   : > { %v11333_v57 = vpop.f32.mrf.mxu2  ;;  %v3266_v31 = vsub.f32 %v11137_v60, %v3235_v53  ;;  %v3267_v6 = vsub.f32 %v11139_v1, %v3235_v53  ;;  %8431 = vrcp.f32 %v3337_v35  ;;  %v3898_v60 = vmax.f32 %v11275_v38, %v11277_v45 }
 0xa28   : > { %v11335_v13 = vpop.f32.mrf.mxu3  ;;  %v3263_v1 = vsub.f32 %v11121_v59, %v3229_v18 }
 0xa29   : > { %3896 = vmax.xlane.f32.xlu0 %v3895_v44  ;;  %v3308_v44 = vmul.f32 1.442695, %v3256_v8  ;;  %v3328_v23 = vmul.f32 1.442695, %v3266_v31  ;;  %v3330_v28 = vmul.f32 1.442695, %v3267_v6 }
 0xa2d   : > { %v8432_v8 = vpop.eup %8431 }
 0xa2e   : > { %3366 = vadd.xlane.f32.xlu1 %v3365_v61  ;;  %v3368_v61 = vadd.f32 %v11341_v36, %v11339_v11  ;;  %v3398_v6 = vmul.f32 %v8432_v8, %v11133_v54  ;;  %v3399_v55 = vmul.f32 %v8432_v8, %v11135_v2 }
 0xa2f   : > { %v11353_v53 = vpop.f32.mrf.mxu2 }
 0xa30   : > { %v11355_v35 = vpop.f32.mrf.mxu3 }
 0xa31   : > { %3360 = vadd.xlane.f32.xlu0 %v3359_v48 }
 0xa33   : > { %v3334_v24 = vpop.xlane.xlu1 %3333 }
 0xa34   : > { %8433 = vrcp.f32 %v3334_v24 }
 0xa35   : > { %8435 = vpow2.f32 %v3308_v44 }
 0xa36   : > { %8437 = vpow2.f32 %v3310_v0  ;;  %3369 = vadd.xlane.f32.xlu1 %v3368_v61  ;;  %v11347_v52 = vpop.xlane.xlu2 %3872 }
 0xa37   : > { %8439 = vpow2.f32 %v3328_v23  ;;  %v3320_v23 = vmul.f32 1.442695, %v3262_v50  ;;  %v3892_v50 = vmax.f32 %v11249_v39, %v11251_v30 }
 0xa38   : > { %8441 = vpow2.f32 %v3330_v28  ;;  %v3913_v28 = vmax.f32 %v11353_v53, %v11355_v35 }
 0xa39   : > { %3899 = vmax.xlane.f32.xlu0 %v3898_v60  ;;  %v3322_v60 = vmul.f32 1.442695, %v3263_v1  ;;  %8443 = vpow2.f32 %v3320_v23 }
 0xa3a   : > { %v8434_v31 = vpop.eup %8433 }
 0xa3b   : > { %v11357_v48 = vpop.eup %8435  ;;  %v3870_v44 = vpop.xlane.xlu1 %3869  ;;  %v3396_v0 = vmul.f32 %v8434_v31, %v11153_v25  ;;  %v3397_v24 = vmul.f32 %v8434_v31, %v11155_v63  ;;  %8445 = vpow2.f32 %v3322_v60  ;;  %v3265_v31 = vsub.f32 %v11129_v42, %v11313_v29 }
 0xa3c   : > { %v11363_v59 = vpop.eup %8437  ;;  %v3916_v18 = vsub.f32 %v11147_v40, %v3870_v44  ;;  %v3917_v61 = vsub.f32 %v11149_v19, %v3870_v44  ;;  %v3340_v19 = vpop.xlane.xlu0 %3339 }
 0xa3d   : > { %v3428_v36 = vpack.c.bf16 %v3398_v6, %v3396_v0  ;;  %v3429_v11 = vpack.c.bf16 %v3399_v55, %v3397_v24  ;;  %v11369_v54 = vpop.eup %8439  ;;  %v3362_v2 = vadd.f32 %v11363_v59, %v11357_v48  ;;  %v3326_v42 = vmul.f32 1.442695, %v3265_v31 }
 0xa3e   : > { %v3948_v25 = vmul.f32 1.442695, %v3916_v18  ;;  %v3876_v45 = vpop.xlane.xlu2 %3875  ;;  %3914 = vmax.xlane.f32.xlu1 %v3913_v28  ;;  %v3950_v63 = vmul.f32 1.442695, %v3917_v61  ;;  %v11373_v40 = vpop.eup %8441  ;;  %v3918_v61 = vsub.f32 %v11159_v15, %v11347_v52  ;;  %v3910_v15 = vmax.f32 %v11333_v57, %v11335_v13 }
 0xa3f   : > { %3548 = vmatmul.bf16.vlgmr.msrb.gmra.mxu0 %v3428_v36  ;;  %3597 = vmatmul.bf16.vlgmr.msrb.gmra.mxu1 %v3429_v11  ;;  %v3920_v8 = vsub.f32 %v11177_v12, %v3876_v45  ;;  %v3921_v1 = vsub.f32 %v11179_v43, %v3876_v45  ;;  %v3264_v11 = vsub.f32 %v11127_v49, %v11313_v29  ;;  %v11385_v44 = vpop.eup %8443 }
 0xa40   : > { %8447 = vpow2.f32 %v3948_v25  ;;  %v3377_v36 = vadd.f32 %v11373_v40, %v11369_v54  ;;  %v3907_v49 = vmax.f32 %v11315_v41, %v11317_v5  ;;  %v3919_v25 = vsub.f32 %v11161_v20, %v11347_v52 }
 0xa41   : > { %3363 = vadd.xlane.f32.xlu0 %v3362_v2  ;;  %8449 = vpow2.f32 %v3950_v63  ;;  %v3956_v12 = vmul.f32 1.442695, %v3920_v8  ;;  %v11387_v6 = vpop.eup %8445  ;;  %v3958_v24 = vmul.f32 1.442695, %v3921_v1  ;;  %v3324_v45 = vmul.f32 1.442695, %v3264_v11 }
 0xa42   : > { %8451 = vrcp.f32 %v3340_v19  ;;  %v3371_v29 = vadd.f32 %v11387_v6, %v11385_v44  ;;  %v3952_v11 = vmul.f32 1.442695, %v3918_v61 }
 0xa43   : > { %v3346_v63 = vpop.xlane.xlu1 %3345 }
 0xa44   : > { %3893 = vmax.xlane.f32.xlu2 %v3892_v50 }
 0xa46   : > { %3378 = vadd.xlane.f32.xlu1 %v3377_v36  ;;  %v3343_v0 = vpop.xlane.xlu2 %3342  ;;  %v11391_v43 = vpop.eup %8447 }
 0xa47   : > { %8453 = vrcp.f32 %v3343_v0  ;;  %v3879_v55 = vpop.xlane.xlu0 %3878  ;;  %v11393_v23 = vpop.eup %8449  ;;  %v3901_v0 = vmax.f32 %v11287_v37, %v11289_v33 }
 0xa48   : > { %8455 = vpow2.f32 %v3956_v12  ;;  %v8452_v18 = vpop.eup %8451  ;;  %v4012_v28 = vadd.f32 %v11393_v23, %v11391_v43  ;;  %v3922_v36 = vsub.f32 %v11195_v47, %v3879_v55 }
 0xa49   : > { %3908 = vmax.xlane.f32.xlu0 %v3907_v49  ;;  %8457 = vpow2.f32 %v3958_v24  ;;  %v3400_v2 = vmul.f32 %v8452_v18, %v11169_v21  ;;  %v3401_v8 = vmul.f32 %v8452_v18, %v11171_v7  ;;  %v3923_v21 = vsub.f32 %v11197_v32, %v3879_v55 }
 0xa4a   : > { %8459 = vpow2.f32 %v3324_v45  ;;  %v3954_v7 = vmul.f32 1.442695, %v3919_v25  ;;  %v3960_v47 = vmul.f32 1.442695, %v3922_v36 }
 0xa4b   : > { %8461 = vpow2.f32 %v3326_v42  ;;  %v3962_v32 = vmul.f32 1.442695, %v3923_v21 }
 0xa4c   : > { %3372 = vadd.xlane.f32.xlu2 %v3371_v29 }
 0xa4d   : > { %v8454_v60 = vpop.eup %8453 }
 0xa4e   : > { %4013 = vadd.xlane.f32.xlu1 %v4012_v28  ;;  %v3402_v19 = vmul.f32 %v8454_v60, %v11189_v16  ;;  %v3403_v50 = vmul.f32 %v8454_v60, %v11193_v34  ;;  %v11409_v1 = vpop.eup %8455  ;;  %v3349_v31 = vpop.xlane.xlu2 %3348 }
 0xa4f   : > { %v11412_v12 = vpop.eup %8457  ;;  %v3882_v34 = vpop.xlane.xlu0 %3881  ;;  %8463 = vrcp.f32 %v3349_v31 }
 0xa50   : > { %v3430_v20 = vpack.c.bf16 %v3402_v19, %v3400_v2  ;;  %v3431_v52 = vpack.c.bf16 %v3403_v50, %v3401_v8  ;;  %v11415_v16 = vpop.eup %8459  ;;  %8465 = vpow2.f32 %v3952_v11  ;;  %v4018_v49 = vadd.f32 %v11412_v12, %v11409_v1 }
 0xa51   : > { %3911 = vmax.xlane.f32.xlu0 %v3910_v15  ;;  %v11419_v24 = vpop.eup %8461  ;;  %8467 = vrcp.f32 %v3346_v63  ;;  %v3924_v45 = vsub.f32 %v11208_v4, %v3882_v34  ;;  %v3925_v55 = vsub.f32 %v11211_v22, %v3882_v34  ;;  %v3904_v22 = vmax.f32 %v11300_v9, %v11302_v10 }
 0xa52   : > { %3553 = vmatmul.bf16.gmra.mxu0 %v3430_v20  ;;  %3602 = vmatmul.bf16.gmra.mxu1 %v3431_v52  ;;  %8469 = vpow2.f32 %v3954_v7  ;;  %v3374_v61 = vadd.f32 %v11419_v24, %v11415_v16  ;;  %v13547_v52 = vld [vmem:[#allocation87_spill] sm:$0xff] }
 0xa53   : > { %8471 = vpow2.f32 %v3960_v47  ;;  %v3964_v60 = vmul.f32 1.442695, %v3924_v45  ;;  %v3966_v2 = vmul.f32 1.442695, %v3925_v55  ;;  %v13548_v55 = vld [vmem:[#allocation88_spill] sm:$0xff] }
 0xa54   : > { %3902 = vmax.xlane.f32.xlu2 %v3901_v0  ;;  %8473 = vpow2.f32 %v3962_v32 }
 0xa55   : > { %v8464_v28 = vpop.eup %8463 }
 0xa56   : > { %v3885_v42 = vpop.xlane.xlu1 %3884  ;;  %4019 = vadd.xlane.f32.xlu1 %v4018_v49  ;;  %v11429_v4 = vpop.eup %8465  ;;  %v3407_v8 = vmul.f32 %v8464_v28, %v11205_v27 }
 0xa57   : > { %v3926_v29 = vsub.f32 %v11217_v58, %v3885_v42  ;;  %v3927_v18 = vsub.f32 %v11219_v51, %v3885_v42  ;;  %v8468_v19 = vpop.eup %8467  ;;  %v3406_v51 = vmul.f32 %v8464_v28, %v11203_v62 }
 0xa58   : > { %v11433_v58 = vpop.eup %8469  ;;  %v3404_v11 = vmul.f32 %v8468_v19, %v11185_v26  ;;  %v3405_v36 = vmul.f32 %v8468_v19, %v11187_v14 }
 0xa59   : > { %v3968_v25 = vmul.f32 1.442695, %v3926_v29  ;;  %v3970_v63 = vmul.f32 1.442695, %v3927_v18  ;;  %3375 = vadd.xlane.f32.xlu0 %v3374_v61  ;;  %v11437_v50 = vpop.eup %8471  ;;  %v4015_v62 = vadd.f32 %v11433_v58, %v11429_v4  ;;  %v13549_v29 = vld [vmem:[#allocation89_spill] sm:$0xff] }
 0xa5a   : > { %v11441_v31 = vpop.eup %8473  ;;  %v3432_v7 = vpack.c.bf16 %v3406_v51, %v3404_v11  ;;  %v3433_v27 = vpack.c.bf16 %v3407_v8, %v3405_v36 }
 0xa5b   : > { %8475 = vpow2.f32 %v3968_v25  ;;  %v4021_v26 = vadd.f32 %v11441_v31, %v11437_v50 }
 0xa5c   : > { %8477 = vpow2.f32 %v3970_v63  ;;  %3905 = vmax.xlane.f32.xlu2 %v3904_v22 }
 0xa5d   : > { %8479 = vpow2.f32 %v3964_v60 }
 0xa5e   : > { %8481 = vpow2.f32 %v3966_v2  ;;  %v3888_v15 = vpop.xlane.xlu0 %3887  ;;  %v3352_v2 = vpop.xlane.xlu1 %3351 }
 0xa5f   : > { %v3928_v20 = vsub.f32 %v11228_v3, %v3888_v15  ;;  %v3929_v21 = vsub.f32 %v13547_v52, %v3888_v15  ;;  %v13550_v52 = vld [vmem:[#allocation85_spill] sm:$0xff] }
 0xa61   : > { %v11447_v34 = vpop.eup %8475  ;;  %v3972_v0 = vmul.f32 1.442695, %v3928_v20  ;;  %v3974_v47 = vmul.f32 1.442695, %v3929_v21  ;;  %4016 = vadd.xlane.f32.xlu0 %v4015_v62  ;;  %v13551_v62 = vld [vmem:[#allocation90_spill] sm:$0xff] }
 0xa62   : > { %v11449_v49 = vpop.eup %8477  ;;  %3558 = vmatmul.bf16.gmra.mxu0 %v3432_v7  ;;  %3607 = vmatmul.bf16.gmra.mxu1 %v3433_v27  ;;  %v13552_v27 = vld [vmem:[#allocation86_spill] sm:$0xff] }
 0xa63   : > { %v11453_v14 = vpop.eup %8479  ;;  %8483 = vpow2.f32 %v3972_v0  ;;  %v4027_v3 = vadd.f32 %v11449_v49, %v11447_v34 }
 0xa64   : > { %v11457_v32 = vpop.eup %8481  ;;  %8485 = vpow2.f32 %v3974_v47  ;;  %4022 = vadd.xlane.f32.xlu2 %v4021_v26  ;;  %v13553_v47 = vld [vmem:[#allocation91_spill] sm:$0xff] }
 0xa65   : > { %4028 = vadd.xlane.f32.xlu1 %v4027_v3  ;;  %v4024_v61 = vadd.f32 %v11457_v32, %v11453_v14 }
 0xa66   : > { %v3891_v45 = vpop.xlane.xlu2 %3890 }
 0xa67   : > { %v3930_v42 = vsub.f32 %v13548_v55, %v3891_v45  ;;  %v3931_v18 = vsub.f32 %v13549_v29, %v3891_v45  ;;  %v13554_v55 = vld [vmem:[#allocation47_spill] sm:$0xff] }
 0xa69   : > { %v11463_v28 = vpop.eup %8483  ;;  %v3976_v60 = vmul.f32 1.442695, %v3930_v42  ;;  %v3978_v25 = vmul.f32 1.442695, %v3931_v18  ;;  %4025 = vadd.xlane.f32.xlu0 %v4024_v61  ;;  %v13555_v18 = vld [vmem:[#allocation49_spill] sm:$0xff]  ;;  %v13556_v61 = vld [vmem:[#allocation39_spill] sm:$0xff] }
 0xa6a   : > { %v11465_v63 = vpop.eup %8485 }
 0xa6b   : > { %8487 = vpow2.f32 %v3976_v60  ;;  %v4030_v22 = vadd.f32 %v11465_v63, %v11463_v28 }
 0xa6c   : > { %8489 = vpow2.f32 %v3978_v25  ;;  %v13557_v25 = vld [vmem:[#allocation41_spill] sm:$0xff] }
 0xa6d   : > { %8491 = vrcp.f32 %v3352_v2  ;;  %4031 = vadd.xlane.f32.xlu1 %v4030_v22 }
 0xa6e   : > { %v3355_v19 = vpop.xlane.xlu2 %3354 }
 0xa6f   : > { %8493 = vrcp.f32 %v3355_v19 }
 0xa71   : > { %v11469_v51 = vpop.eup %8487  ;;  %v4127_v29 = vpop.permute.xlu0 %4126 }
 0xa72   : > { %v11471_v8 = vpop.eup %8489 }
 0xa73   : > { %v8492_v15 = vpop.eup %8491  ;;  %v4033_v11 = vadd.f32 %v11471_v8, %v11469_v51 }
 0xa74   : > { %v3408_v21 = vmul.f32 %v8492_v15, %v13550_v52  ;;  %v3409_v0 = vmul.f32 %v8492_v15, %v13552_v27  ;;  %v7976_v52 = vld [vmem:[#allocation17 + $0x8] sm:$0xff] }
 0xa75   : > { %v8494_v36 = vpop.eup %8493  ;;  %4034 = vadd.xlane.f32.xlu2 %v4033_v11  ;;  %4410 = vmatpush.bf16.msrb.mxu3 %v7976_v52 }
 0xa76   : > { %v3358_v20 = vpop.xlane.xlu2 %3357  ;;  %v3410_v7 = vmul.f32 %v8494_v36, %v13551_v62  ;;  %v3411_v26 = vmul.f32 %v8494_v36, %v13553_v47  ;;  %v4125_v60 = vpop.permute.xlu1 %4124  ;;  %v7975_v62 = vld [vmem:[#allocation17] sm:$0xff] }
 0xa77   : > { %8495 = vrcp.f32 %v3358_v20 }
 0xa78   : > { %v3434_v3 = vpack.c.bf16 %v3410_v7, %v3408_v21  ;;  %v3435_v45 = vpack.c.bf16 %v3411_v26, %v3409_v0  ;;  %v13558_v26 = vld [vmem:[#allocation92_spill] sm:$0xff] }
 0xa79   : > { %4411 = vmatpush.bf16.msrb.mxu3 %v7975_v62 }
 0xa7a   : > { %3563 = vmatmul.bf16.gmra.mxu0 %v3434_v3  ;;  %3612 = vmatmul.bf16.gmra.mxu1 %v3435_v45  ;;  %v13559_v45 = vld [vmem:[#allocation93_spill] sm:$0xff] }
 0xa7d   : > { %4479 = vrot.lane.b32.xlu0 %v13554_v55, %s9361_s14  ;;  %v8496_v7 = vpop.eup %8495 }
 0xa7e   : > { %v4129_v42 = vpop.permute.xlu2 %4128  ;;  %v3412_v3 = vmul.f32 %v8496_v7, %v13558_v26 }
 0xa7f   : > { %4177 = vmatpush.bf16.msra.mxu0 %v4129_v42  ;;  %v3413_v42 = vmul.f32 %v8496_v7, %v13559_v45 }
 0xa83   : > { %4178 = vmatpush.bf16.msra.mxu0 %v4127_v29  ;;  %v13560_v29 = vld [vmem:[#allocation105_spill] sm:$0xff] }
 0xa85   : > { %4477 = vrot.lane.b32.xlu0 %v13555_v18, %s9361_s14 }
 0xa86   : > { %4483 = vrot.lane.b32.xlu1 %v13556_v61, %s9361_s14 }
 0xa87   : > { %4179 = vmatpush.bf16.msra.mxu0 %v4125_v60 }
 0xa8d   : > { %4481 = vrot.lane.b32.xlu2 %v13557_v25, %s9361_s14 }
 0xa9c   : > { %v3897_v2 = vpop.xlane.xlu0 %3896 }
 0xa9d   : > { %v3934_v22 = vsub.f32 %v11261_v17, %v3897_v2  ;;  %v3935_v19 = vsub.f32 %v11263_v46, %v3897_v2 }
 0xa9f   : > { %v3984_v15 = vmul.f32 1.442695, %v3934_v22  ;;  %v3986_v11 = vmul.f32 1.442695, %v3935_v19 }
 0xaa1   : > { %v3367_v36 = vpop.xlane.xlu1 %3366  ;;  %8497 = vpow2.f32 %v3984_v15 }
 0xaa2   : > { %8499 = vpow2.f32 %v3986_v11 }
 0xaa4   : > { %v3361_v21 = vpop.xlane.xlu0 %3360 }
 0xaa5   : > { %8501 = vrcp.f32 %v3361_v21 }
 0xaa6   : > { %8503 = vrcp.f32 %v3367_v36 }
 0xaa7   : > { %v11489_v27 = vpop.eup %8497 }
 0xaa8   : > { %v11491_v47 = vpop.eup %8499 }
 0xaa9   : > { %v3370_v0 = vpop.xlane.xlu1 %3369  ;;  %v4039_v2 = vadd.f32 %v11491_v47, %v11489_v27 }
 0xaab   : > { %v8502_v17 = vpop.eup %8501 }
 0xaac   : > { %v3900_v46 = vpop.xlane.xlu0 %3899  ;;  %v3414_v20 = vmul.f32 %v8502_v17, %v11325_v56  ;;  %v3415_v60 = vmul.f32 %v8502_v17, %v13560_v29  ;;  %v8504_v21 = vpop.eup %8503  ;;  %v13562_v29 = vld [vmem:[#allocation103_spill] sm:$0xff] }
 0xaad   : > { %v3936_v7 = vsub.f32 %v11275_v38, %v3900_v46 }
 0xaae   : > { %v3436_v22 = vpack.c.bf16 %v3414_v20, %v3412_v3  ;;  %v3437_v19 = vpack.c.bf16 %v3415_v60, %v3413_v42  ;;  %v13561_v20 = vld [vmem:[#allocation96_spill] sm:$0xff]  ;;  %v3418_v60 = vmul.f32 %v8504_v21, %v13562_v29 }
 0xaaf   : > { %4040 = vadd.xlane.f32.xlu0 %v4039_v2  ;;  %v3937_v45 = vsub.f32 %v13561_v20, %v3900_v46  ;;  %v3988_v38 = vmul.f32 1.442695, %v3936_v7 }
 0xab0   : > { %3568 = vmatmul.bf16.gmra.mxu0 %v3436_v22  ;;  %3617 = vmatmul.bf16.gmra.mxu1 %v3437_v19 }
 0xab1   : > { %v11499_v15 = vpop.xlane.xlu1 %3914 }
 0xab4   : > { %v3364_v11 = vpop.xlane.xlu0 %3363 }
 0xab5   : > { %8505 = vrcp.f32 %v3364_v11 }
 0xab7   : > { %v3894_v52 = vpop.xlane.xlu2 %3893 }
 0xab8   : > { %v3932_v56 = vsub.f32 %v11249_v39, %v3894_v52  ;;  %v3933_v62 = vsub.f32 %v11251_v30, %v3894_v52  ;;  %v13563_v39 = vld [vmem:[#allocation104_spill] sm:$0xff] }
 0xab9   : > { %v3379_v42 = vpop.xlane.xlu1 %3378  ;;  %v3419_v11 = vmul.f32 %v8504_v21, %v13563_v39 }
 0xaba   : > { %v3980_v17 = vmul.f32 1.442695, %v3932_v56  ;;  %v3982_v26 = vmul.f32 1.442695, %v3933_v62  ;;  %v3990_v62 = vmul.f32 1.442695, %v3937_v45 }
 0xabb   : > { %v8506_v3 = vpop.eup %8505 }
 0xabc   : > { %8507 = vpow2.f32 %v3980_v17  ;;  %v3549_v36 = vpop.f32.mrf.mxu0  ;;  %v3598_v2 = vpop.f32.mrf.mxu1  ;;  %v3416_v22 = vmul.f32 %v8506_v3, %v11357_v48  ;;  %v3417_v19 = vmul.f32 %v8506_v3, %v11363_v59 }
 0xabd   : > { %8509 = vpow2.f32 %v3982_v26  ;;  %v3909_v30 = vpop.xlane.xlu0 %3908  ;;  %v3599_v3 = vadd.f32 %v3598_v2, %v3549_v36 }
 0xabe   : > { %v3438_v52 = vpack.c.bf16 %v3418_v60, %v3416_v22  ;;  %v3439_v56 = vpack.c.bf16 %v3419_v11, %v3417_v19  ;;  %8511 = vrcp.f32 %v3370_v0  ;;  %v3942_v46 = vsub.f32 %v11315_v41, %v3909_v30 }
 0xabf   : > { %v3373_v18 = vpop.xlane.xlu2 %3372  ;;  %v3943_v59 = vsub.f32 %v11317_v5, %v3909_v30 }
 0xac0   : > { %3573 = vmatmul.bf16.gmra.mxu0 %v3438_v52  ;;  %3622 = vmatmul.bf16.gmra.mxu1 %v3439_v56  ;;  %8513 = vrcp.f32 %v3373_v18  ;;  %v4000_v0 = vmul.f32 1.442695, %v3942_v46  ;;  %v13565_v46 = vld [vmem:[#allocation107_spill] sm:$0xff] }
 0xac1   : > { %8515 = vpow2.f32 %v3988_v38  ;;  %v4014_v18 = vpop.xlane.xlu1 %4013  ;;  %v4002_v60 = vmul.f32 1.442695, %v3943_v59 }
 0xac2   : > { %v11510_v17 = vpop.eup %8507  ;;  %8517 = vpow2.f32 %v3990_v62  ;;  %v13564_v62 = vld [vmem:[#allocation106_spill] sm:$0xff] }
 0xac3   : > { %v11512_v48 = vpop.eup %8509  ;;  %8519 = vpow2.f32 %v4000_v0 }
 0xac4   : > { %v3551_v21 = vpop.f32.mrf.mxu0  ;;  %v3600_v7 = vpop.f32.mrf.mxu1  ;;  %v4036_v26 = vadd.f32 %v11512_v48, %v11510_v17  ;;  %8521 = vpow2.f32 %v4002_v60 }
 0xac5   : > { %v3601_v20 = vadd.f32 %v3600_v7, %v3551_v21  ;;  %v11517_v45 = vpop.xlane.xlu0 %3911  ;;  %v8512_v41 = vpop.eup %8511 }
 0xac6   : > { %4037 = vadd.xlane.f32.xlu2 %v4036_v26  ;;  %v8514_v29 = vpop.eup %8513 }
 0xac7   : > { %v3638_v22 = vpack.c.bf16 %v3601_v20, %v3599_v3  ;;  %v3903_v19 = vpop.xlane.xlu2 %3902  ;;  %v11519_v39 = vpop.eup %8515  ;;  %v3422_v38 = vmul.f32 %v8514_v29, %v11385_v44  ;;  %v3423_v52 = vmul.f32 %v8514_v29, %v11387_v6 }
 0xac8   : > { %v3938_v5 = vsub.f32 %v11287_v37, %v3903_v19  ;;  %v3939_v11 = vsub.f32 %v11289_v33, %v3903_v19  ;;  %v11523_v30 = vpop.eup %8517  ;;  %v3420_v37 = vmul.f32 %v8512_v41, %v13564_v62  ;;  %v3421_v33 = vmul.f32 %v8512_v41, %v13565_v46 }
 0xac9   : > { %7705 = vmatmul.msk.bf16.vlgmr.msrb.gmra.mxu3 %vm3017_vm0, %v3638_v22  ;;  %v4042_v56 = vadd.f32 %v11523_v30, %v11519_v39  ;;  %v11532_v26 = vpop.eup %8519  ;;  %v4020_v6 = vpop.xlane.xlu1 %4019  ;;  %v3946_v22 = vsub.f32 %v11353_v53, %v11499_v15 }
 0xaca   : > { %v3992_v36 = vmul.f32 1.442695, %v3938_v5  ;;  %v3994_v2 = vmul.f32 1.442695, %v3939_v11  ;;  %v3440_v21 = vpack.c.bf16 %v3422_v38, %v3420_v37  ;;  %v3441_v7 = vpack.c.bf16 %v3423_v52, %v3421_v33  ;;  %v11536_v60 = vpop.eup %8521 }
 0xacb   : > { %v4051_v11 = vadd.f32 %v11536_v60, %v11532_v26  ;;  %v4008_v53 = vmul.f32 1.442695, %v3946_v22 }
 0xacc   : > { %8523 = vpow2.f32 %v3992_v36 }
 0xacd   : > { %8525 = vpow2.f32 %v3994_v2  ;;  %v3376_v59 = vpop.xlane.xlu0 %3375 }
 0xace   : > { %4043 = vadd.xlane.f32.xlu2 %v4042_v56  ;;  %8527 = vrcp.f32 %v3379_v42 }
 0xacf   : > { %v3906_v3 = vpop.xlane.xlu2 %3905  ;;  %v3554_v44 = vpop.f32.mrf.mxu0  ;;  %8529 = vrcp.f32 %v3376_v59 }
 0xad0   : > { %v3940_v0 = vsub.f32 %v11300_v9, %v3906_v3  ;;  %v3941_v20 = vsub.f32 %v11302_v10, %v3906_v3  ;;  %v3603_v29 = vpop.f32.mrf.mxu1  ;;  %3578 = vmatmul.bf16.gmra.mxu0 %v3440_v21  ;;  %3627 = vmatmul.bf16.gmra.mxu1 %v3441_v7  ;;  %8531 = vrcp.f32 %v4014_v18  ;;  %v3947_v9 = vsub.f32 %v11355_v35, %v11499_v15 }
 0xad1   : > { %8533 = vrcp.f32 %v4020_v6  ;;  %v3604_v37 = vadd.f32 %v3603_v29, %v3554_v44 }
 0xad2   : > { %v11538_v41 = vpop.eup %8523  ;;  %v3996_v19 = vmul.f32 1.442695, %v3940_v0  ;;  %v3998_v5 = vmul.f32 1.442695, %v3941_v20  ;;  %v4010_v38 = vmul.f32 1.442695, %v3947_v9 }
 0xad3   : > { %v11542_v42 = vpop.eup %8525 }
 0xad4   : > { %8535 = vpow2.f32 %v3996_v19  ;;  %v4045_v10 = vadd.f32 %v11542_v42, %v11538_v41  ;;  %v8528_v2 = vpop.eup %8527 }
 0xad5   : > { %8537 = vpow2.f32 %v3998_v5  ;;  %v4017_v36 = vpop.xlane.xlu0 %4016  ;;  %v8530_v18 = vpop.eup %8529  ;;  %v3426_v44 = vmul.f32 %v8528_v2, %v11369_v54  ;;  %v3427_v29 = vmul.f32 %v8528_v2, %v11373_v40 }
 0xad6   : > { %8539 = vrcp.f32 %v4017_v36  ;;  %4046 = vadd.xlane.f32.xlu0 %v4045_v10  ;;  %4052 = vadd.xlane.f32.xlu2 %v4051_v11  ;;  %v8532_v35 = vpop.eup %8531  ;;  %v3424_v21 = vmul.f32 %v8530_v18, %v11415_v16  ;;  %v3425_v7 = vmul.f32 %v8530_v18, %v11419_v24 }
 0xad7   : > { %v3556_v52 = vpop.f32.mrf.mxu0  ;;  %v4023_v56 = vpop.xlane.xlu2 %4022  ;;  %v11563_v22 = vmul.f32 %v8532_v35, %v11393_v23 }
 0xad8   : > { %v3605_v15 = vpop.f32.mrf.mxu1  ;;  %8541 = vrcp.f32 %v4023_v56  ;;  %v11550_v62 = vpop.eup %8533  ;;  %v3442_v5 = vpack.c.bf16 %v3426_v44, %v3424_v21  ;;  %v3443_v9 = vpack.c.bf16 %v3427_v29, %v3425_v7  ;;  %v13567_v44 = vld [vmem:[#allocation53_spill] sm:$0xff] }
 0xad9   : > { %v4029_v46 = vpop.xlane.xlu1 %4028  ;;  %v3606_v33 = vadd.f32 %v3605_v15, %v3556_v52  ;;  %8543 = vpow2.f32 %v4008_v53  ;;  %v11573_v40 = vmul.f32 %v11550_v62, %v11412_v12 }
 0xada   : > { %v11552_v59 = vpop.eup %8535  ;;  %8545 = vpow2.f32 %v4010_v38 }
 0xadb   : > { %v11556_v3 = vpop.eup %8537  ;;  %v3639_v6 = vpack.c.bf16 %v3606_v33, %v3604_v37  ;;  %8547 = vrcp.f32 %v4029_v46 }
 0xadc   : > { %v8540_v0 = vpop.eup %8539  ;;  %v4048_v20 = vadd.f32 %v11556_v3, %v11552_v59 }
 0xadd   : > { %v11566_v16 = vmul.f32 %v8540_v0, %v11433_v58  ;;  %7706 = vmatmul.msk.bf16.gmra.mxu3 %vm3017_vm0, %v3639_v6  ;;  %v4026_v24 = vpop.xlane.xlu0 %4025  ;;  %v4078_v7 = vmul.f32 %v8540_v0, %v11429_v4  ;;  %v13566_v6 = vld [vmem:[#allocation51_spill] sm:$0xff] }
 0xade   : > { %v8542_v19 = vpop.eup %8541  ;;  %8549 = vrcp.f32 %v4026_v24  ;;  %4049 = vadd.xlane.f32.xlu1 %v4048_v20 }
 0xadf   : > { %v3559_v54 = vpop.f32.mrf.mxu0  ;;  %v11576_v23 = vmul.f32 %v8542_v19, %v11441_v31  ;;  %v11578_v58 = vpop.eup %8543 }
 0xae0   : > { %v3608_v11 = vpop.f32.mrf.mxu1  ;;  %3583 = vmatmul.bf16.gmra.mxu0 %v3442_v5  ;;  %3632 = vmatmul.bf16.gmra.mxu1 %v3443_v9  ;;  %v11580_v36 = vpop.eup %8545 }
 0xae1   : > { %v8548_v53 = vpop.eup %8547  ;;  %v4032_v38 = vpop.xlane.xlu1 %4031  ;;  %v4057_v12 = vadd.f32 %v11580_v36, %v11578_v58  ;;  %v3609_v33 = vadd.f32 %v3608_v11, %v3559_v54 }
 0xae2   : > { %v11590_v31 = vmul.f32 %v8548_v53, %v11449_v49  ;;  %8551 = vrcp.f32 %v4032_v38  ;;  %v4076_v49 = vmul.f32 %v8532_v35, %v11391_v43  ;;  %v13568_v43 = vld [vmem:[#allocation63_spill] sm:$0xff]  ;;  %v4082_v38 = vmul.f32 %v8542_v19, %v11437_v50 }
 0xae4   : > { %v8550_v18 = vpop.eup %8549  ;;  %v4108_v29 = vpack.c.bf16 %v4078_v7, %v4076_v49  ;;  %v3944_v7 = vsub.f32 %v11333_v57, %v11517_v45 }
 0xae5   : > { %v11587_v52 = vmul.f32 %v8550_v18, %v11457_v32 }
 0xae6   : > { %4058 = vadd.xlane.f32.xlu1 %v4057_v12  ;;  %v4004_v49 = vmul.f32 1.442695, %v3944_v7  ;;  %v13577_v7 = vld [vmem:[#allocation44_spill] sm:$0xff] }
 0xae7   : > { %v3561_v56 = vpop.f32.mrf.mxu0 }
 0xae8   : > { %v3610_v37 = vpop.f32.mrf.mxu1  ;;  %v4035_v46 = vpop.xlane.xlu2 %4034 }
 0xae9   : > { %v3611_v21 = vadd.f32 %v3610_v37, %v3561_v56  ;;  %8553 = vrcp.f32 %v4035_v46  ;;  %v8552_v20 = vpop.eup %8551  ;;  %v13570_v37 = vld [vmem:[#allocation55_spill] sm:$0xff] }
 0xaea   : > { %4475 = vrot.lane.b32.xlu0 %v13566_v6, %s9361_s14  ;;  %v11602_v5 = vmul.f32 %v8552_v20, %v11465_v63  ;;  %v4080_v63 = vmul.f32 %v11550_v62, %v11409_v1  ;;  %v3945_v1 = vsub.f32 %v11335_v13, %v11517_v45  ;;  %8555 = vpow2.f32 %v4004_v49 }
 0xaeb   : > { %v3640_v32 = vpack.c.bf16 %v3611_v21, %v3609_v33  ;;  %v4084_v13 = vmul.f32 %v8550_v18, %v11453_v14  ;;  %v4086_v45 = vmul.f32 %v8548_v53, %v11447_v34  ;;  %v13575_v34 = vld [vmem:[#allocation102_spill] sm:$0xff] }
 0xaec   : > { %v4110_v56 = vpack.c.bf16 %v4082_v38, %v4080_v63  ;;  %v13573_v63 = vld [vmem:[#allocation99_spill] sm:$0xff]  ;;  %v13576_v53 = vld [vmem:[#allocation98_spill] sm:$0xff] }
 0xaed   : > { %7707 = vmatmul.msk.bf16.gmra.mxu3 %vm3017_vm0, %v3640_v32  ;;  %v4112_v38 = vpack.c.bf16 %v4086_v45, %v4084_v13 }
 0xaee   : > { %4473 = vrot.lane.b32.xlu2 %v13567_v44, %s9361_s14 }
 0xaef   : > { %v8554_v24 = vpop.eup %8553  ;;  %v4480_v19 = vpop.permute.xlu0 %4479 }
 0xaf0   : > { %4180 = vmatmul.bf16.vlgmr.msra.gmra.mxu0 %v4108_v29  ;;  %v11605_v4 = vmul.f32 %v8554_v24, %v11471_v8  ;;  %v4482_v12 = vpop.permute.xlu2 %4481  ;;  %v13569_v8 = vld [vmem:[#allocation67_spill] sm:$0xff]  ;;  %v4006_v29 = vmul.f32 1.442695, %v3945_v1  ;;  %v4541_v57 = vsel %vm3017_vm0, %v4480_v19, 0  ;;  %v4090_v18 = vmul.f32 %v8554_v24, %v11469_v51  ;;  %v13580_v1 = vld [vmem:[#allocation78_spill] sm:$0xff] }
 0xaf1   : > { %v4544_v21 = vsel %vm3017_vm0, %v4482_v12, 0  ;;  %v13584_v19 = vld [vmem:[#allocation95_spill] sm:$0xff] }
 0xaf2   : > { %8557 = vpow2.f32 %v4006_v29 }
 0xaf6   : > { %4453 = vrot.lane.b32.xlu2 %v13568_v43, %s9361_s14 }
 0xaf7   : > { %v3564_v35 = vpop.f32.mrf.mxu0  ;;  %v3613_v9 = vpop.f32.mrf.mxu1 }
 0xaf8   : > { %v4484_v54 = vpop.permute.xlu1 %4483  ;;  %v3614_v32 = vadd.f32 %v3613_v9, %v3564_v35  ;;  %v4478_v35 = vpop.permute.xlu0 %4477 }
 0xaf9   : > { %v4547_v11 = vsel %vm3017_vm0, %v4484_v54, 0  ;;  %v13571_v54 = vld [vmem:[#allocation97_spill] sm:$0xff]  ;;  %v11632_v9 = vpop.eup %8555 }
 0xafa   : > { %4573 = vmatpush.bf16.xpose.msrb.mxu0 %v4547_v11  ;;  %v13572_v11 = vld [vmem:[#allocation64_spill] sm:$0xff]  ;;  %v11636_v12 = vpop.eup %8557 }
 0xafb   : > { %v4054_v14 = vadd.f32 %v11636_v12, %v11632_v9 }
 0xafe   : > { %4457 = vrot.lane.b32.xlu2 %v13569_v8, %s9361_s14 }
 0xaff   : > { %4471 = vrot.lane.b32.xlu1 %v13570_v37, %s9361_s14  ;;  %v3566_v46 = vpop.f32.mrf.mxu0  ;;  %v3615_v33 = vpop.f32.mrf.mxu1 }
 0xb00   : > { %v3616_v50 = vadd.f32 %v3615_v33, %v3566_v46  ;;  %4185 = vmatmul.bf16.gmra.mxu0 %v4110_v56  ;;  %v13574_v56 = vld [vmem:[#allocation94_spill] sm:$0xff]  ;;  %v4538_v46 = vsel %vm3017_vm0, %v4478_v35, 0  ;;  %v4088_v33 = vmul.f32 %v8552_v20, %v11463_v28  ;;  %v13583_v20 = vld [vmem:[#allocation79_spill] sm:$0xff] }
 0xb01   : > { %v13582_v28 = vld [vmem:[#allocation54_spill] sm:$0xff] }
 0xb02   : > { %v3641_v62 = vpack.c.bf16 %v3616_v50, %v3614_v32  ;;  %4574 = vmatpush.bf16.xpose.msrb.mxu0 %v4544_v21  ;;  %v4114_v21 = vpack.c.bf16 %v4090_v18, %v4088_v33  ;;  %v13578_v32 = vld [vmem:[#allocation100_spill] sm:$0xff]  ;;  %v13579_v50 = vld [vmem:[#allocation50_spill] sm:$0xff] }
 0xb03   : > { %v13585_v35 = vld [vmem:[#allocation58_spill] sm:$0xff] }
 0xb04   : > { %7708 = vmatmul.msk.bf16.gmra.mxu3 %vm3017_vm0, %v3641_v62  ;;  %v13581_v62 = vld [vmem:[#allocation57_spill] sm:$0xff] }
 0xb06   : > { %4150 = vrot.lane.b32.xlu2 %v13571_v54, %s9360_s8 }
 0xb07   : > { %4455 = vrot.lane.b32.xlu1 %v13572_v11, %s9361_s14 }
 0xb0a   : > { %4575 = vmatpush.bf16.xpose.msrb.mxu0 %v4541_v57 }
 0xb0e   : > { %4146 = vrot.lane.b32.xlu2 %v13573_v63, %s9360_s8 }
 0xb0f   : > { %4154 = vrot.lane.b32.xlu1 %v13574_v56, %s9360_s8 }
 0xb10   : > { %4190 = vmatmul.bf16.gmra.mxu0 %v4112_v38  ;;  %v13586_v38 = vld [vmem:[#allocation83_spill] sm:$0xff] }
 0xb12   : > { %4576 = vmatpush.bf16.xpose.msrb.mxu0 %v4538_v46 }
 0xb14   : > { %4055 = vadd.xlane.f32.xlu0 %v4054_v14  ;;  %v13587_v14 = vld [vmem:[#allocation75_spill] sm:$0xff] }
 0xb16   : > { %4140 = vrot.lane.b32.xlu2 %v13575_v34, %s9360_s8 }
 0xb17   : > { %4148 = vrot.lane.b32.xlu1 %v13576_v53, %s9360_s8 }
 0xb1e   : > { %4497 = vrot.lane.b32.xlu2 %v13577_v7, %s9361_s14 }
 0xb1f   : > { %4144 = vrot.lane.b32.xlu1 %v13578_v32, %s9360_s8 }
 0xb20   : > { %4195 = vmatmul.bf16.gmra.mxu0 %v4114_v21 }
 0xb22   : > { %v4041_v49 = vpop.xlane.xlu0 %4040 }
 0xb23   : > { %8559 = vrcp.f32 %v4041_v49  ;;  %v13590_v49 = vld [vmem:[#allocation101_spill] sm:$0xff] }
 0xb26   : > { %4493 = vrot.lane.b32.xlu2 %v13579_v50, %s9361_s14 }
 0xb27   : > { %4461 = vrot.lane.b32.xlu1 %v13580_v1, %s9361_s14 }
 0xb28   : > { %4469 = vrot.lane.b32.xlu0 %v13581_v62, %s9361_s14 }
 0xb29   : > { %v8560_v0 = vpop.eup %8559 }
 0xb2d   : > { %v3569_v51 = vpop.f32.mrf.mxu0  ;;  %v3618_v24 = vpop.f32.mrf.mxu1 }
 0xb2e   : > { %4489 = vrot.lane.b32.xlu2 %v13582_v28, %s9361_s14  ;;  %v3619_v13 = vadd.f32 %v3618_v24, %v3569_v51  ;;  %v13588_v51 = vld [vmem:[#allocation69_spill] sm:$0xff]  ;;  %v13589_v24 = vld [vmem:[#allocation84_spill] sm:$0xff] }
 0xb2f   : > { %4463 = vrot.lane.b32.xlu1 %v13583_v20, %s9361_s14 }
 0xb30   : > { %4152 = vrot.lane.b32.xlu0 %v13584_v19, %s9360_s8 }
 0xb35   : > { %v3571_v29 = vpop.f32.mrf.mxu0  ;;  %v3620_v57 = vpop.f32.mrf.mxu1 }
 0xb36   : > { %v3621_v45 = vadd.f32 %v3620_v57, %v3571_v29  ;;  %4485 = vrot.lane.b32.xlu2 %v13585_v35, %s9361_s14 }
 0xb37   : > { %4465 = vrot.lane.b32.xlu1 %v13586_v38, %s9361_s14 }
 0xb38   : > { %v3642_v46 = vpack.c.bf16 %v3621_v45, %v3619_v13  ;;  %4459 = vrot.lane.b32.xlu0 %v13587_v14, %s9361_s14  ;;  %v4094_v13 = vmul.f32 %v8560_v0, %v11489_v27  ;;  %v13592_v27 = vld [vmem:[#allocation68_spill] sm:$0xff] }
 0xb39   : > { %v4038_v18 = vpop.xlane.xlu2 %4037 }
 0xb3a   : > { %8561 = vrcp.f32 %v4038_v18  ;;  %7709 = vmatmul.msk.bf16.gmra.mxu3 %vm3017_vm0, %v3642_v46  ;;  %v11684_v46 = vmul.f32 %v8560_v0, %v11491_v47  ;;  %v13593_v47 = vld [vmem:[#allocation40_spill] sm:$0xff] }
 0xb3d   : > { %v3574_v33 = vpop.f32.mrf.mxu0  ;;  %v3623_v21 = vpop.f32.mrf.mxu1 }
 0xb3e   : > { %4937 = vrot.lane.b32.xlu2 %v13588_v51, %s9361_s14 }
 0xb3f   : > { %4467 = vrot.lane.b32.xlu1 %v13589_v24, %s9361_s14  ;;  %v3624_v24 = vadd.f32 %v3623_v21, %v3574_v33  ;;  %v13595_v21 = vld [vmem:[#allocation48_spill] sm:$0xff] }
 0xb40   : > { %v8562_v29 = vpop.eup %8561  ;;  %4142 = vrot.lane.b32.xlu0 %v13590_v49, %s9360_s8  ;;  %s13678_s8 = sld [smem:[#allocation125_spill]] }
 0xb41   : > { %v4092_v57 = vmul.f32 %v8562_v29, %v11510_v17  ;;  %v11681_v45 = vmul.f32 %v8562_v29, %v11512_v48  ;;  %v4044_v18 = vpop.xlane.xlu2 %4043  ;;  %v13591_v17 = vld [vmem:[#allocation80_spill] sm:$0xff] }
 0xb42   : > { %8563 = vrcp.f32 %v4044_v18 }
 0xb43   : > { %v4116_v15 = vpack.c.bf16 %v4094_v13, %v4092_v57 }
 0xb45   : > { %4200 = vmatmul.bf16.gmra.mxu0 %v4116_v15  ;;  %v3576_v10 = vpop.f32.mrf.mxu0  ;;  %v3625_v51 = vpop.f32.mrf.mxu1 }
 0xb46   : > { %v3626_v1 = vadd.f32 %v3625_v51, %v3576_v10  ;;  %4931 = vrot.lane.b32.xlu2 %v13591_v17, %s9361_s14  ;;  %v13594_v10 = vld [vmem:[#allocation81_spill] sm:$0xff] }
 0xb47   : > { %4941 = vrot.lane.b32.xlu1 %v13592_v27, %s9361_s14 }
 0xb48   : > { %v3643_v48 = vpack.c.bf16 %v3626_v1, %v3624_v24  ;;  %4499 = vrot.lane.b32.xlu0 %v13593_v47, %s9361_s14  ;;  %v8564_v33 = vpop.eup %8563 }
 0xb49   : > { %v4047_v0 = vpop.xlane.xlu0 %4046  ;;  %v4053_v15 = vpop.xlane.xlu2 %4052  ;;  %v11700_v1 = vmul.f32 %v8564_v33, %v11523_v30  ;;  %v4096_v18 = vmul.f32 %v8564_v33, %v11519_v39 }
 0xb4a   : > { %7710 = vmatmul.msk.bf16.gmra.mxu3 %vm3017_vm0, %v3643_v48  ;;  %8565 = vrcp.f32 %v4047_v0 }
 0xb4b   : > { %8567 = vrcp.f32 %v4053_v15 }
 0xb4d   : > { %v3579_v29 = vpop.f32.mrf.mxu0  ;;  %v3628_v57 = vpop.f32.mrf.mxu1 }
 0xb4e   : > { %v3629_v27 = vadd.f32 %v3628_v57, %v3579_v29  ;;  %5217 = vrot.lane.b32.xlu2 %v13556_v61, %s9362_s26 }
 0xb4f   : > { %4929 = vrot.lane.b32.xlu1 %v13594_v10, %s9361_s14 }
 0xb50   : > { %4495 = vrot.lane.b32.xlu0 %v13595_v21, %s9361_s14  ;;  %v8566_v51 = vpop.eup %8565 }
 0xb51   : > { %v4050_v24 = vpop.xlane.xlu1 %4049  ;;  %v11703_v13 = vmul.f32 %v8566_v51, %v11542_v42  ;;  %v4098_v48 = vmul.f32 %v8566_v51, %v11538_v41  ;;  %v8568_v17 = vpop.eup %8567  ;;  %v13596_v42 = vld [vmem:[#allocation52_spill] sm:$0xff] }
 0xb52   : > { %8569 = vrcp.f32 %v4050_v24  ;;  %v11715_v39 = vmul.f32 %v8568_v17, %v11536_v60  ;;  %v4474_v60 = vpop.permute.xlu2 %4473 }
 0xb53   : > { %v4119_v0 = vpack.c.bf16 %v11703_v13, %v11700_v1  ;;  %v4118_v15 = vpack.c.bf16 %v4098_v48, %v4096_v18 }
 0xb55   : > { %v3581_v2 = vpop.f32.mrf.mxu0  ;;  %v3630_v10 = vpop.f32.mrf.mxu1  ;;  %4205 = vmatmul.bf16.gmra.mxu0 %v4118_v15 }
 0xb56   : > { %v3631_v30 = vadd.f32 %v3630_v10, %v3581_v2  ;;  %v13597_v10 = vld [vmem:[#allocation56_spill] sm:$0xff] }
 0xb57   : > { %5233 = vrot.lane.b32.xlu1 %v13593_v47, %s9362_s26 }
 0xb58   : > { %v8570_v11 = vpop.eup %8569  ;;  %v3644_v37 = vpack.c.bf16 %v3631_v30, %v3629_v27  ;;  %4491 = vrot.lane.b32.xlu0 %v13596_v42, %s9361_s14 }
 0xb59   : > { %v11712_v24 = vmul.f32 %v8570_v11, %v11556_v3  ;;  %v4100_v27 = vmul.f32 %v8570_v11, %v11552_v59  ;;  %v4102_v3 = vmul.f32 %v8568_v17, %v11532_v26  ;;  %v4059_v59 = vpop.xlane.xlu1 %4058  ;;  %v13599_v11 = vld [vmem:[#allocation71_spill] sm:$0xff] }
 0xb5a   : > { %7711 = vmatmul.msk.bf16.gmra.mxu3 %vm3017_vm0, %v3644_v37  ;;  %v4532_v37 = vsel %vm3017_vm0, %v4474_v60, 0  ;;  %8571 = vrcp.f32 %v4059_v59 }
 0xb5b   : > { %v4120_v51 = vpack.c.bf16 %v4102_v3, %v4100_v27  ;;  %v13604_v1 = vpack.c.bf16 %v11715_v39, %v11712_v24 }
 0xb5c   : > { %v4476_v33 = vpop.permute.xlu0 %4475 }
 0xb5d   : > { %v3584_v29 = vpop.f32.mrf.mxu0  ;;  %v3633_v57 = vpop.f32.mrf.mxu1  ;;  %v4535_v2 = vsel %vm3017_vm0, %v4476_v33, 0  ;;  %v13598_v33 = vld [vmem:[#allocation72_spill] sm:$0xff] }
 0xb5e   : > { %4577 = vmatpush.bf16.xpose.msrb.mxu0 %v4535_v2  ;;  %v3634_v15 = vadd.f32 %v3633_v57, %v3584_v29  ;;  %v13600_v2 = vld [vmem:[#allocation70_spill] sm:$0xff] }
 0xb5f   : > { %v13601_v57 = vld [vmem:[#allocation82_spill] sm:$0xff]  ;;  %4957 = vrot.lane.b32.xlu1 %v13574_v56, %s9361_s14 }
 0xb60   : > { %4487 = vrot.lane.b32.xlu0 %v13597_v10, %s9361_s14  ;;  %v8572_v3 = vpop.eup %8571 }
 0xb65   : > { %v3586_v18 = vpop.f32.mrf.mxu0  ;;  %v3635_v48 = vpop.f32.mrf.mxu1  ;;  %4210 = vmatmul.bf16.gmra.mxu0 %v4120_v51 }
 0xb66   : > { %v3636_v30 = vadd.f32 %v3635_v48, %v3586_v18  ;;  %4578 = vmatpush.bf16.xpose.msrb.mxu0 %v4532_v37  ;;  %v4106_v37 = vmul.f32 %v8572_v3, %v11578_v58  ;;  %v11744_v48 = vmul.f32 %v8572_v3, %v11580_v36 }
 0xb68   : > { %v3645_v41 = vpack.c.bf16 %v3636_v30, %v3634_v15  ;;  %4939 = vrot.lane.b32.xlu0 %v13598_v33, %s9361_s14  ;;  %v11746_v15 = vpop.permute.xlu2 %4453 }
 0xb6a   : > { %7712 = vmatmul.msk.bf16.gmra.mxu3 %vm3017_vm0, %v3645_v41 }
 0xb70   : > { %4935 = vrot.lane.b32.xlu0 %v13599_v11, %s9361_s14 }
 0xb71   : > { %v4472_v26 = vpop.permute.xlu1 %4471 }
 0xb72   : > { %v4529_v17 = vsel %vm3017_vm0, %v4472_v26, 0  ;;  %v11750_v26 = vpop.permute.xlu2 %4457 }
 0xb73   : > { %4579 = vmatpush.bf16.xpose.msrb.mxu0 %v4529_v17 }
 0xb78   : > { %4933 = vrot.lane.b32.xlu0 %v13600_v2, %s9361_s14 }
 0xb79   : > { %v11734_v29 = vpop.permute.xlu1 %4455 }
 0xb80   : > { %4927 = vrot.lane.b32.xlu0 %v13601_v57, %s9361_s14 }
 0xb81   : > { %v4155_v27 = vpop.permute.xlu1 %4154 }
 0xb82   : > { %4221 = vmatpush.bf16.msra.mxu1 %v4155_v27  ;;  %8039 = vmatpush.bf16.msra.mxu2 %v4155_v27  ;;  %v4151_v27 = vpop.permute.xlu2 %4150 }
 0xb87   : > { %v4056_v41 = vpop.xlane.xlu0 %4055 }
 0xb88   : > { %8573 = vrcp.f32 %v4056_v41  ;;  %v11757_v41 = vpop.f32.mrf.mxu0  ;;  %5231 = vrot.lane.b32.xlu0 %v13577_v7, %s9362_s26  ;;  %v13607_v7 = vpack.c.bf16 %v11684_v46, %v11681_v45  ;;  %v7978_v45 = vld [vmem:[#allocation17 + $0x18] sm:$0xff]  ;;  %v7977_v46 = vld [vmem:[#allocation17 + $0x10] sm:$0xff] }
 0xb89   : > { %v4149_v36 = vpop.permute.xlu1 %4148 }
 0xb8a   : > { %v4147_v3 = vpop.permute.xlu2 %4146 }
 0xb8e   : > { %v8574_v60 = vpop.eup %8573 }
 0xb8f   : > { %v4104_v51 = vmul.f32 %v8574_v60, %v11632_v9  ;;  %v11741_v18 = vmul.f32 %v8574_v60, %v11636_v12 }
 0xb91   : > { %v4122_v30 = vpack.c.bf16 %v4106_v37, %v4104_v51  ;;  %v4123_v59 = vpack.c.bf16 %v11744_v48, %v11741_v18  ;;  %v4145_v60 = vpop.permute.xlu1 %4144  ;;  %v11761_v37 = vpop.f32.mrf.mxu0 }
 0xb92   : > { %v4141_v18 = vpop.permute.xlu2 %4140 }
 0xb93   : > { %4215 = vmatmul.bf16.gmra.mxu0 %v4122_v30 }
 0xb9a   : > { %v4470_v17 = vpop.permute.xlu0 %4469 }
 0xb9b   : > { %v4526_v9 = vsel %vm3017_vm0, %v4470_v17, 0  ;;  %v13602_v17 = vpack.c.bf16 %v11566_v16, %v11563_v22  ;;  %v13603_v16 = vpack.c.bf16 %v11576_v23, %v11573_v40  ;;  %v13605_v23 = vpack.c.bf16 %v11590_v31, %v11587_v52 }
 0xb9c   : > { %4580 = vmatpush.bf16.xpose.msrb.mxu0 %v4526_v9  ;;  %v4498_v9 = vpop.permute.xlu2 %4497  ;;  %v13606_v31 = vpack.c.bf16 %v11605_v4, %v11602_v5 }
 0xba2   : > { %v4153_v58 = vpop.permute.xlu0 %4152 }
 0xba3   : > { %4222 = vmatpush.bf16.msra.mxu1 %v4153_v58  ;;  %8040 = vmatpush.bf16.msra.mxu2 %v4153_v58  ;;  %v11770_v58 = vpop.f32.mrf.mxu0 }
 0xba4   : > { %7713 = vmatmul.msk.bf16.vlgmr.msrb.gmra.mxu0 %vm3017_vm0, %v11746_v15  ;;  %v4494_v13 = vpop.permute.xlu2 %4493 }
 0xba7   : > { %4223 = vmatpush.bf16.msra.mxu1 %v4151_v27  ;;  %8041 = vmatpush.bf16.msra.mxu2 %v4151_v27  ;;  %v4568_v27 = vsel %vm3017_vm0, %v4498_v9, 0 }
 0xbaa   : > { %v11755_v12 = vpop.permute.xlu0 %4459 }
 0xbab   : > { %4224 = vmatpush.bf16.msra.mxu1 %v4149_v36  ;;  %8042 = vmatpush.bf16.msra.mxu2 %v4149_v36 }
 0xbac   : > { %v4490_v24 = vpop.permute.xlu2 %4489 }
 0xbad   : > { %v4556_v39 = vsel %vm3017_vm0, %v4490_v24, 0 }
 0xbaf   : > { %4225 = vmatpush.bf16.msra.mxu1 %v4147_v3  ;;  %8043 = vmatpush.bf16.msra.mxu2 %v4147_v3  ;;  %v11775_v3 = vpop.f32.mrf.mxu0 }
 0xbb2   : > { %v4143_v51 = vpop.permute.xlu0 %4142 }
 0xbb3   : > { %4226 = vmatpush.bf16.msra.mxu1 %v4145_v60  ;;  %8044 = vmatpush.bf16.msra.mxu2 %v4145_v60 }
 0xbb4   : > { %7714 = vmatmul.msk.bf16.gmra.mxu0 %vm3017_vm0, %v11734_v29 }
 0xbb7   : > { %4227 = vmatpush.bf16.msra.mxu1 %v4143_v51  ;;  %8045 = vmatpush.bf16.msra.mxu2 %v4143_v51  ;;  %v11785_v60 = vpop.f32.mrf.mxu0 }
 0xbba   : > { %v4500_v48 = vpop.permute.xlu0 %4499 }
 0xbbb   : > { %4228 = vmatpush.bf16.msra.mxu1 %v4141_v18  ;;  %8046 = vmatpush.bf16.msra.mxu2 %v4141_v18  ;;  %v4571_v30 = vsel %vm3017_vm0, %v4500_v48, 0  ;;  %v4462_v48 = vpop.permute.xlu1 %4461 }
 0xbbc   : > { %4622 = vmatpush.bf16.xpose.msra.mxu0 %v4571_v30 }
 0xbbe   : > { %4229 = vmatmul.bf16.vlgmr.msra.gmra.mxu1 %v13602_v17  ;;  %4254 = vmatmul.bf16.vlgmr.msra.gmra.mxu2 %v4119_v0  ;;  %v4562_v0 = vsel %vm3017_vm0, %v4494_v13, 0 }
 0xbbf   : > { %8047 = vmatpush.bf16.xpose.msrb.mxu1 %v4571_v30  ;;  %v11790_v40 = vpop.f32.mrf.mxu0  ;;  %4325 = vmatpush.bf16.msrb.mxu2 %v7978_v45 }
 0xbc2   : > { %v4496_v36 = vpop.permute.xlu0 %4495 }
 0xbc3   : > { %v4565_v22 = vsel %vm3017_vm0, %v4496_v36, 0  ;;  %4326 = vmatpush.bf16.msrb.mxu2 %v7977_v46 }
 0xbc4   : > { %7715 = vmatmul.msk.bf16.gmra.mxu0 %vm3017_vm0, %v11750_v26 }
 0xbc5   : > { %4623 = vmatpush.bf16.xpose.msra.mxu0 %v4568_v27 }
 0xbc7   : > { %8048 = vmatpush.bf16.xpose.msrb.mxu1 %v4568_v27  ;;  %v11797_v17 = vpop.f32.mrf.mxu0  ;;  %v4464_v27 = vpop.permute.xlu1 %4463 }
 0xbca   : > { %v4492_v51 = vpop.permute.xlu0 %4491 }
 0xbcb   : > { %v4559_v18 = vsel %vm3017_vm0, %v4492_v51, 0 }
 0xbcd   : > { %4624 = vmatpush.bf16.xpose.msra.mxu0 %v4565_v22 }
 0xbce   : > { %4234 = vmatmul.bf16.gmra.mxu1 %v13603_v16  ;;  %4259 = vmatmul.bf16.gmra.mxu2 %v13604_v1 }
 0xbcf   : > { %8049 = vmatpush.bf16.xpose.msrb.mxu1 %v4565_v22  ;;  %v4198_v9 = vpop.f32.mrf.mxu0  ;;  %v4466_v36 = vpop.permute.xlu1 %4465 }
 0xbd2   : > { %v4488_v30 = vpop.permute.xlu0 %4487 }
 0xbd3   : > { %v4553_v52 = vsel %vm3017_vm0, %v4488_v30, 0 }
 0xbd4   : > { %7716 = vmatmul.msk.bf16.gmra.mxu0 %vm3017_vm0, %v11755_v12 }
 0xbd5   : > { %4625 = vmatpush.bf16.xpose.msra.mxu0 %v4562_v0 }
 0xbd7   : > { %8050 = vmatpush.bf16.xpose.msrb.mxu1 %v4562_v0  ;;  %v4201_v61 = vpop.f32.mrf.mxu0  ;;  %v4468_v22 = vpop.permute.xlu1 %4467 }
 0xbdd   : > { %4626 = vmatpush.bf16.xpose.msra.mxu0 %v4559_v18 }
 0xbde   : > { %4239 = vmatmul.bf16.gmra.mxu1 %v13605_v23  ;;  %4264 = vmatmul.bf16.gmra.mxu2 %v4123_v59  ;;  %v4486_v59 = vpop.permute.xlu2 %4485 }
 0xbdf   : > { %8051 = vmatpush.bf16.xpose.msrb.mxu1 %v4559_v18  ;;  %v4550_v47 = vsel %vm3017_vm0, %v4486_v59, 0  ;;  %v4203_v5 = vpop.f32.mrf.mxu0 }
 0xbe4   : > { %7717 = vmatmul.msk.bf16.gmra.mxu0 %vm3017_vm0, %v4462_v48 }
 0xbe5   : > { %4627 = vmatpush.bf16.xpose.msra.mxu0 %v4556_v39 }
 0xbe7   : > { %8052 = vmatpush.bf16.xpose.msrb.mxu1 %v4556_v39  ;;  %v11817_v4 = vpop.f32.mrf.mxu0 }
 0xbed   : > { %4628 = vmatpush.bf16.xpose.msra.mxu0 %v4553_v52 }
 0xbee   : > { %4244 = vmatmul.bf16.gmra.mxu1 %v13606_v31 }
 0xbef   : > { %8053 = vmatpush.bf16.xpose.msrb.mxu1 %v4553_v52  ;;  %v4208_v16 = vpop.f32.mrf.mxu0 }
 0xbf4   : > { %7718 = vmatmul.msk.bf16.gmra.mxu0 %vm3017_vm0, %v4464_v27 }
 0xbf5   : > { %4629 = vmatpush.bf16.xpose.msra.mxu0 %v4550_v47 }
 0xbf7   : > { %8054 = vmatpush.bf16.xpose.msrb.mxu1 %v4550_v47  ;;  %v11824_v1 = vpop.f32.mrf.mxu0 }
 0xbfe   : > { %4249 = vmatmul.bf16.gmra.mxu1 %v13607_v7 }
 0xbff   : > { %v11828_v13 = vpop.f32.mrf.mxu0 }
 0xc04   : > { %7719 = vmatmul.msk.bf16.gmra.mxu0 %vm3017_vm0, %v4466_v36 }
 0xc0e   : > { %7722 = vmatmul.msk.bf16.vlgmr.msrb.gmra.mxu1 %vm3017_vm0, %v11734_v29 }
 0xc10   : > { %v11832_v29 = vpop.f32.mrf.mxu0 }
 0xc14   : > { %7720 = vmatmul.msk.bf16.gmra.mxu0 %vm3017_vm0, %v4468_v22 }
 0xc18   : > { %v11834_v51 = vpop.f32.mrf.mxu0 }
 0xc1e   : > { %7723 = vmatmul.msk.bf16.gmra.mxu1 %vm3017_vm0, %v11750_v26 }
 0xc21   : > { %v11839_v24 = vpop.f32.mrf.mxu0 }
 0xc24   : > { %7721 = vmatmul.msk.bf16.vlgmr.msra.gmra.mxu0 %vm3017_vm0, %v11746_v15 }
 0xc2e   : > { %7724 = vmatmul.msk.bf16.gmra.mxu1 %vm3017_vm0, %v11755_v12  ;;  %v11843_v12 = vpop.f32.mrf.mxu0 }
 0xc3b   : > { %v4230_v0 = vpop.f32.mrf.mxu1 }
 0xc3c   : > { %v4231_v18 = vadd.f32 %v4230_v0, %v11757_v41  ;;  %v11848_v41 = vpop.f32.mrf.mxu0 }
 0xc3e   : > { %7725 = vmatmul.msk.bf16.gmra.mxu1 %vm3017_vm0, %v4462_v48 }
 0xc43   : > { %v4232_v26 = vpop.f32.mrf.mxu1 }
 0xc44   : > { %v4233_v15 = vadd.f32 %v4232_v26, %v11761_v37  ;;  %v11853_v7 = vpop.f32.mrf.mxu0 }
 0xc46   : > { %v4270_v23 = vpack.c.bf16 %v4233_v15, %v4231_v18  ;;  %v4255_v18 = vpop.f32.mrf.mxu2 }
 0xc48   : > { %7689 = vmatmul.msk.bf16.vlgmr.msrb.gmra.mxu2 %vm3017_vm0, %v4270_v23 }
 0xc4b   : > { %v4235_v39 = vpop.f32.mrf.mxu1 }
 0xc4c   : > { %v4236_v52 = vadd.f32 %v4235_v39, %v11770_v58 }
 0xc4e   : > { %7726 = vmatmul.msk.bf16.gmra.mxu1 %vm3017_vm0, %v4464_v27 }
 0xc53   : > { %v4237_v30 = vpop.f32.mrf.mxu1 }
 0xc54   : > { %v4238_v48 = vadd.f32 %v4237_v30, %v11775_v3  ;;  %v11857_v3 = vpop.f32.mrf.mxu0 }
 0xc56   : > { %v4271_v31 = vpack.c.bf16 %v4238_v48, %v4236_v52 }
 0xc58   : > { %7690 = vmatmul.msk.bf16.gmra.mxu2 %vm3017_vm0, %v4271_v31 }
 0xc5b   : > { %v4240_v37 = vpop.f32.mrf.mxu1 }
 0xc5c   : > { %v4241_v47 = vadd.f32 %v4240_v37, %v11785_v60  ;;  %v11861_v60 = vpop.f32.mrf.mxu0 }
 0xc5e   : > { %7727 = vmatmul.msk.bf16.gmra.mxu1 %vm3017_vm0, %v4466_v36 }
 0xc63   : > { %v4242_v59 = vpop.f32.mrf.mxu1 }
 0xc64   : > { %v4243_v27 = vadd.f32 %v4242_v59, %v11790_v40  ;;  %v11863_v15 = vpop.f32.mrf.mxu0 }
 0xc66   : > { %v4272_v45 = vpack.c.bf16 %v4243_v27, %v4241_v47  ;;  %v4256_v47 = vadd.f32 %v4255_v18, %v11817_v4 }
 0xc68   : > { %7691 = vmatmul.msk.bf16.gmra.mxu2 %vm3017_vm0, %v4272_v45  ;;  %v4942_v45 = vpop.permute.xlu1 %4941 }
 0xc69   : > { %4975 = vmatpush.bf16.msra.mxu2 %v4942_v45 }
 0xc6b   : > { %v4245_v58 = vpop.f32.mrf.mxu1 }
 0xc6c   : > { %v4246_v0 = vadd.f32 %v4245_v58, %v11797_v17  ;;  %v4940_v58 = vpop.permute.xlu0 %4939 }
 0xc6d   : > { %4976 = vmatpush.bf16.msra.mxu2 %v4940_v58 }
 0xc6e   : > { %7728 = vmatmul.msk.bf16.gmra.mxu1 %vm3017_vm0, %v4468_v22  ;;  %v4257_v22 = vpop.f32.mrf.mxu2 }
 0xc6f   : > { %v4258_v37 = vadd.f32 %v4257_v22, %v4208_v16 }
 0xc73   : > { %v4247_v46 = vpop.f32.mrf.mxu1 }
 0xc74   : > { %v4248_v26 = vadd.f32 %v4247_v46, %v4198_v9  ;;  %v11870_v9 = vpop.f32.mrf.mxu0 }
 0xc76   : > { %v4273_v36 = vpack.c.bf16 %v4248_v26, %v4246_v0  ;;  %v4260_v31 = vpop.f32.mrf.mxu2  ;;  %v4938_v26 = vpop.permute.xlu2 %4937 }
 0xc77   : > { %4977 = vmatpush.bf16.msra.mxu2 %v4938_v26 }
 0xc78   : > { %7692 = vmatmul.msk.bf16.gmra.mxu2 %vm3017_vm0, %v4273_v36 }
 0xc7b   : > { %v4250_v40 = vpop.f32.mrf.mxu1 }
 0xc7c   : > { %v4251_v39 = vadd.f32 %v4250_v40, %v4201_v61  ;;  %v11877_v27 = vpop.f32.mrf.mxu0  ;;  %v4936_v40 = vpop.permute.xlu0 %4935 }
 0xc7d   : > { %4978 = vmatpush.bf16.msra.mxu2 %v4936_v40 }
 0xc7e   : > { %v4262_v46 = vpop.f32.mrf.mxu2 }
 0xc7f   : > { %v4263_v36 = vadd.f32 %v4262_v46, %v11828_v13 }
 0xc83   : > { %v4252_v23 = vpop.f32.mrf.mxu1 }
 0xc84   : > { %v4253_v30 = vadd.f32 %v4252_v23, %v4203_v5  ;;  %v4275_v5 = vpack.c.bf16 %v4258_v37, %v4256_v47  ;;  %v11884_v4 = vpop.f32.mrf.mxu0  ;;  %v4261_v23 = vadd.f32 %v4260_v31, %v11824_v1  ;;  %v4934_v22 = vpop.permute.xlu0 %4933 }
 0xc85   : > { %4979 = vmatpush.bf16.msra.mxu2 %v4934_v22  ;;  %v4932_v47 = vpop.permute.xlu2 %4931 }
 0xc86   : > { %v4274_v52 = vpack.c.bf16 %v4253_v30, %v4251_v39  ;;  %v4265_v30 = vpop.f32.mrf.mxu2 }
 0xc88   : > { %7693 = vmatmul.msk.bf16.gmra.mxu2 %vm3017_vm0, %v4274_v52  ;;  %v4276_v52 = vpack.c.bf16 %v4263_v36, %v4261_v23 }
 0xc89   : > { %4980 = vmatpush.bf16.msra.mxu2 %v4932_v47 }
 0xc8b   : > { %v11866_v48 = vpop.f32.mrf.mxu1 }
 0xc8c   : > { %v4677_v17 = vmax.f32 %v11848_v41, %v11866_v48  ;;  %v4928_v47 = vpop.permute.xlu0 %4927 }
 0xc8d   : > { %v5218_v46 = vpop.permute.xlu2 %5217 }
 0xc8e   : > { %4678 = vmax.xlane.f32.xlu2 %v4677_v17  ;;  %v11893_v17 = vpop.f32.mrf.mxu0  ;;  %v4267_v1 = vpop.f32.mrf.mxu2  ;;  %v5281_v26 = vsel %vm3017_vm0, %v5218_v46, 0 }
 0xc8f   : > { %v4268_v31 = vadd.f32 %v4267_v1, %v11834_v51  ;;  %5307 = vmatpush.bf16.xpose.msra.mxu1 %v5281_v26 }
 0xc93   : > { %v11872_v59 = vpop.f32.mrf.mxu1 }
 0xc94   : > { %v4680_v61 = vmax.f32 %v11853_v7, %v11872_v59 }
 0xc96   : > { %4681 = vmax.xlane.f32.xlu1 %v4680_v61  ;;  %v11905_v58 = vpop.f32.mrf.mxu0 }
 0xc98   : > { %7694 = vmatmul.msk.bf16.gmra.mxu2 %vm3017_vm0, %v4275_v5  ;;  %v4266_v5 = vadd.f32 %v4265_v30, %v11832_v29 }
 0xc9b   : > { %v11880_v0 = vpop.f32.mrf.mxu1 }
 0xc9c   : > { %v4683_v16 = vmax.f32 %v11857_v3, %v11880_v0 }
 0xc9e   : > { %4684 = vmax.xlane.f32.xlu0 %v4683_v16  ;;  %v4277_v16 = vpack.c.bf16 %v4268_v31, %v4266_v5  ;;  %v11913_v29 = vpop.f32.mrf.mxu0 }
 0xca3   : > { %v11887_v18 = vpop.f32.mrf.mxu1 }
 0xca4   : > { %v4686_v39 = vmax.f32 %v11861_v60, %v11887_v18 }
 0xca6   : > { %4687 = vmax.xlane.f32.xlu2 %v4686_v39  ;;  %v4930_v39 = vpop.permute.xlu1 %4929  ;;  %v11919_v30 = vpop.f32.mrf.mxu0 }
 0xca7   : > { %4981 = vmatpush.bf16.msra.mxu2 %v4930_v39 }
 0xca8   : > { %7695 = vmatmul.msk.bf16.gmra.mxu2 %vm3017_vm0, %v4276_v52 }
 0xcab   : > { %v11895_v37 = vpop.f32.mrf.mxu1  ;;  %4982 = vmatpush.bf16.msra.mxu2 %v4928_v47 }
 0xcac   : > { %v4689_v13 = vmax.f32 %v11863_v15, %v11895_v37 }
 0xcae   : > { %4690 = vmax.xlane.f32.xlu1 %v4689_v13  ;;  %v5234_v13 = vpop.permute.xlu1 %5233  ;;  %v11926_v31 = vpop.f32.mrf.mxu0 }
 0xcaf   : > { %v5305_v1 = vsel %vm3017_vm0, %v5234_v13, 0 }
 0xcb0   : > { %5356 = vmatpush.bf16.xpose.msrb.mxu2 %v5305_v1  ;;  %v5232_v1 = vpop.permute.xlu0 %5231 }
 0xcb3   : > { %v11900_v61 = vpop.f32.mrf.mxu1 }
 0xcb4   : > { %v4692_v45 = vmax.f32 %v11870_v9, %v11900_v61 }
 0xcb6   : > { %4693 = vmax.xlane.f32.xlu2 %v4692_v45  ;;  %v4958_v46 = vpop.permute.xlu1 %4957 }
 0xcb7   : > { %5024 = vmatpush.bf16.msra.mxu3 %v4958_v46 }
 0xcb8   : > { %7696 = vmatmul.msk.bf16.gmra.mxu2 %vm3017_vm0, %v4277_v16 }
 0xcbb   : > { %v11909_v36 = vpop.f32.mrf.mxu1 }
 0xcbc   : > { %v4695_v51 = vmax.f32 %v11877_v27, %v11909_v36 }
 0xcbe   : > { %4696 = vmax.xlane.f32.xlu2 %v4695_v51  ;;  %v11936_v51 = vpop.f32.mrf.mxu0 }
 0xcc3   : > { %v11915_v40 = vpop.f32.mrf.mxu1 }
 0xcc4   : > { %v4698_v23 = vmax.f32 %v11884_v4, %v11915_v40 }
 0xcc6   : > { %4699 = vmax.xlane.f32.xlu1 %v4698_v23 }
 0xccb   : > { %v11921_v52 = vpop.f32.mrf.mxu1 }
 0xccc   : > { %v4701_v22 = vmax.f32 %v11893_v17, %v11921_v52 }
 0xcce   : > { %4702 = vmax.xlane.f32.xlu1 %v4701_v22  ;;  %v11942_v22 = vpop.f32.mrf.mxu0 }
 0xccf   : > { %v4671_v2 = vmax.f32 %v11839_v24, %v11942_v22 }
 0xcd3   : > { %v11928_v5 = vpop.f32.mrf.mxu1 }
 0xcd4   : > { %v4704_v45 = vmax.f32 %v11905_v58, %v11928_v5 }
 0xcd6   : > { %4705 = vmax.xlane.f32.xlu2 %v4704_v45  ;;  %v5302_v45 = vsel %vm3017_vm0, %v5232_v1, 0  ;;  %v11949_v46 = vpop.f32.mrf.mxu0 }
 0xcd7   : > { %5357 = vmatpush.bf16.xpose.msrb.mxu2 %v5302_v45  ;;  %v4674_v57 = vmax.f32 %v11843_v12, %v11949_v46 }
 0xcdb   : > { %v11932_v16 = vpop.f32.mrf.mxu1 }
 0xcdc   : > { %v4707_v26 = vmax.f32 %v11913_v29, %v11932_v16 }
 0xcde   : > { %4708 = vmax.xlane.f32.xlu2 %v4707_v26 }
 0xce3   : > { %v11938_v23 = vpop.f32.mrf.mxu1 }
 0xce4   : > { %v4710_v39 = vmax.f32 %v11919_v30, %v11938_v23 }
 0xce6   : > { %4711 = vmax.xlane.f32.xlu0 %v4710_v39 }
 0xceb   : > { %v11944_v13 = vpop.f32.mrf.mxu1 }
 0xcec   : > { %v4713_v47 = vmax.f32 %v11926_v31, %v11944_v13 }
 0xcee   : > { %4714 = vmax.xlane.f32.xlu0 %v4713_v47 }
 0xcf3   : > { %v11951_v26 = vpop.f32.mrf.mxu1 }
 0xcf4   : > { %v4716_v39 = vmax.f32 %v11936_v51, %v11951_v26 }
 0xcf6   : > { %4717 = vmax.xlane.f32.xlu1 %v4716_v39  ;;  %4675 = vmax.xlane.f32.xlu0 %v4674_v57 }
 0xcfe   : > { %4672 = vmax.xlane.f32.xlu1 %v4671_v2 }
 0xd01   : > { %v4679_v47 = vpop.xlane.xlu2 %4678 }
 0xd02   : > { %v4723_v1 = vsub.f32 %v11848_v41, %v4679_v47  ;;  %v4724_v45 = vsub.f32 %v11866_v48, %v4679_v47 }
 0xd04   : > { %v4759_v11 = vmul.f32 1.442695, %v4723_v1  ;;  %v4761_v33 = vmul.f32 1.442695, %v4724_v45 }
 0xd06   : > { %8575 = vpow2.f32 %v4759_v11 }
 0xd07   : > { %8577 = vpow2.f32 %v4761_v33 }
 0xd09   : > { %v4682_v38 = vpop.xlane.xlu1 %4681 }
 0xd0a   : > { %v4725_v14 = vsub.f32 %v11853_v7, %v4682_v38  ;;  %v4726_v43 = vsub.f32 %v11872_v59, %v4682_v38 }
 0xd0c   : > { %v11963_v39 = vpop.eup %8575  ;;  %v4763_v57 = vmul.f32 1.442695, %v4725_v14  ;;  %v4765_v56 = vmul.f32 1.442695, %v4726_v43 }
 0xd0d   : > { %v11965_v44 = vpop.eup %8577 }
 0xd0e   : > { %8579 = vpow2.f32 %v4763_v57  ;;  %v4821_v2 = vadd.f32 %v11965_v44, %v11963_v39 }
 0xd0f   : > { %8581 = vpow2.f32 %v4765_v56 }
 0xd10   : > { %4822 = vadd.xlane.f32.xlu0 %v4821_v2 }
 0xd11   : > { %v4685_v41 = vpop.xlane.xlu0 %4684 }
 0xd12   : > { %v4727_v33 = vsub.f32 %v11857_v3, %v4685_v41  ;;  %v4728_v11 = vsub.f32 %v11880_v0, %v4685_v41 }
 0xd14   : > { %v11971_v7 = vpop.eup %8579  ;;  %v4767_v38 = vmul.f32 1.442695, %v4727_v33  ;;  %v4769_v48 = vmul.f32 1.442695, %v4728_v11 }
 0xd15   : > { %v11973_v59 = vpop.eup %8581 }
 0xd16   : > { %8583 = vpow2.f32 %v4767_v38  ;;  %v4824_v43 = vadd.f32 %v11973_v59, %v11971_v7 }
 0xd17   : > { %8585 = vpow2.f32 %v4769_v48 }
 0xd18   : > { %4825 = vadd.xlane.f32.xlu2 %v4824_v43 }
 0xd19   : > { %v4688_v14 = vpop.xlane.xlu2 %4687 }
 0xd1a   : > { %v4729_v56 = vsub.f32 %v11861_v60, %v4688_v14  ;;  %v4730_v47 = vsub.f32 %v11887_v18, %v4688_v14 }
 0xd1c   : > { %v11979_v3 = vpop.eup %8583  ;;  %v4771_v0 = vmul.f32 1.442695, %v4729_v56  ;;  %v4773_v1 = vmul.f32 1.442695, %v4730_v47 }
 0xd1d   : > { %v11981_v45 = vpop.eup %8585 }
 0xd1e   : > { %8587 = vpow2.f32 %v4771_v0  ;;  %v4827_v57 = vadd.f32 %v11981_v45, %v11979_v3 }
 0xd1f   : > { %8589 = vpow2.f32 %v4773_v1 }
 0xd20   : > { %4828 = vadd.xlane.f32.xlu0 %v4827_v57 }
 0xd21   : > { %v4691_v2 = vpop.xlane.xlu1 %4690 }
 0xd22   : > { %v4731_v41 = vsub.f32 %v11863_v15, %v4691_v2  ;;  %v4732_v33 = vsub.f32 %v11895_v37, %v4691_v2 }
 0xd24   : > { %v11987_v60 = vpop.eup %8587  ;;  %v4775_v18 = vmul.f32 1.442695, %v4731_v41  ;;  %v4777_v11 = vmul.f32 1.442695, %v4732_v33 }
 0xd25   : > { %v11989_v38 = vpop.eup %8589 }
 0xd26   : > { %8591 = vpow2.f32 %v4775_v18  ;;  %v4830_v48 = vadd.f32 %v11989_v38, %v11987_v60 }
 0xd27   : > { %8593 = vpow2.f32 %v4777_v11 }
 0xd28   : > { %4831 = vadd.xlane.f32.xlu1 %v4830_v48 }
 0xd29   : > { %v4694_v43 = vpop.xlane.xlu2 %4693 }
 0xd2a   : > { %v4733_v14 = vsub.f32 %v11870_v9, %v4694_v43  ;;  %v4734_v56 = vsub.f32 %v11900_v61, %v4694_v43 }
 0xd2c   : > { %v11995_v15 = vpop.eup %8591  ;;  %v4779_v37 = vmul.f32 1.442695, %v4733_v14  ;;  %v4781_v47 = vmul.f32 1.442695, %v4734_v56 }
 0xd2d   : > { %v11997_v0 = vpop.eup %8593 }
 0xd2e   : > { %8595 = vpow2.f32 %v4779_v37  ;;  %v4833_v1 = vadd.f32 %v11997_v0, %v11995_v15 }
 0xd2f   : > { %8597 = vpow2.f32 %v4781_v47 }
 0xd30   : > { %4834 = vadd.xlane.f32.xlu1 %v4833_v1 }
 0xd31   : > { %v4697_v57 = vpop.xlane.xlu2 %4696 }
 0xd32   : > { %v4735_v2 = vsub.f32 %v11877_v27, %v4697_v57  ;;  %v4736_v41 = vsub.f32 %v11909_v36, %v4697_v57 }
 0xd34   : > { %v12003_v9 = vpop.eup %8595  ;;  %v4783_v61 = vmul.f32 1.442695, %v4735_v2  ;;  %v4785_v33 = vmul.f32 1.442695, %v4736_v41 }
 0xd35   : > { %v12005_v18 = vpop.eup %8597 }
 0xd36   : > { %8599 = vpow2.f32 %v4783_v61  ;;  %v4836_v11 = vadd.f32 %v12005_v18, %v12003_v9 }
 0xd37   : > { %8601 = vpow2.f32 %v4785_v33 }
 0xd38   : > { %4837 = vadd.xlane.f32.xlu2 %v4836_v11 }
 0xd39   : > { %v4700_v48 = vpop.xlane.xlu1 %4699 }
 0xd3a   : > { %v4737_v43 = vsub.f32 %v11884_v4, %v4700_v48  ;;  %v4738_v14 = vsub.f32 %v11915_v40, %v4700_v48 }
 0xd3c   : > { %v12011_v27 = vpop.eup %8599  ;;  %v4787_v36 = vmul.f32 1.442695, %v4737_v43  ;;  %v4789_v56 = vmul.f32 1.442695, %v4738_v14 }
 0xd3d   : > { %v12013_v37 = vpop.eup %8601 }
 0xd3e   : > { %8603 = vpow2.f32 %v4787_v36  ;;  %v4839_v47 = vadd.f32 %v12013_v37, %v12011_v27 }
 0xd3f   : > { %8605 = vpow2.f32 %v4789_v56 }
 0xd40   : > { %4840 = vadd.xlane.f32.xlu2 %v4839_v47 }
 0xd41   : > { %v4703_v1 = vpop.xlane.xlu1 %4702 }
 0xd42   : > { %v4739_v57 = vsub.f32 %v11893_v17, %v4703_v1  ;;  %v4740_v2 = vsub.f32 %v11921_v52, %v4703_v1 }
 0xd44   : > { %v12019_v4 = vpop.eup %8603  ;;  %v4791_v40 = vmul.f32 1.442695, %v4739_v57  ;;  %v4793_v41 = vmul.f32 1.442695, %v4740_v2 }
 0xd45   : > { %v12021_v61 = vpop.eup %8605 }
 0xd46   : > { %8607 = vpow2.f32 %v4791_v40  ;;  %v4842_v33 = vadd.f32 %v12021_v61, %v12019_v4 }
 0xd47   : > { %8609 = vpow2.f32 %v4793_v41 }
 0xd48   : > { %4843 = vadd.xlane.f32.xlu0 %v4842_v33 }
 0xd49   : > { %4955 = vrot.lane.b32.xlu1 %v13584_v19, %s9361_s14  ;;  %v4706_v11 = vpop.xlane.xlu2 %4705 }
 0xd4a   : > { %v4741_v17 = vsub.f32 %v11905_v58, %v4706_v11  ;;  %v4742_v52 = vsub.f32 %v11928_v5, %v4706_v11 }
 0xd4c   : > { %v12029_v48 = vpop.eup %8607  ;;  %v4795_v43 = vmul.f32 1.442695, %v4741_v17  ;;  %v4797_v14 = vmul.f32 1.442695, %v4742_v52 }
 0xd4d   : > { %v12031_v36 = vpop.eup %8609 }
 0xd4e   : > { %8611 = vpow2.f32 %v4795_v43  ;;  %v4845_v56 = vadd.f32 %v12031_v36, %v12029_v48 }
 0xd4f   : > { %8613 = vpow2.f32 %v4797_v14 }
 0xd50   : > { %4846 = vadd.xlane.f32.xlu2 %v4845_v56 }
 0xd51   : > { %4953 = vrot.lane.b32.xlu1 %v13571_v54, %s9361_s14 }
 0xd54   : > { %v12037_v47 = vpop.eup %8611 }
 0xd55   : > { %v12039_v58 = vpop.eup %8613 }
 0xd56   : > { %v4848_v5 = vadd.f32 %v12039_v58, %v12037_v47 }
 0xd58   : > { %4849 = vadd.xlane.f32.xlu0 %v4848_v5 }
 0xd59   : > { %5213 = vrot.lane.b32.xlu1 %v13554_v55, %s9362_s26  ;;  %v4712_v1 = vpop.xlane.xlu0 %4711 }
 0xd5a   : > { %v4745_v5 = vsub.f32 %v11919_v30, %v4712_v1 }
 0xd61   : > { %5227 = vrot.lane.b32.xlu1 %v13579_v50, %s9362_s26  ;;  %v12051_v2 = vpop.xlane.xlu0 %4714 }
 0xd68   : > { %5229 = vrot.lane.b32.xlu2 %v13595_v21, %s9362_s26 }
 0xd69   : > { %v12049_v57 = vpop.xlane.xlu1 %4717  ;;  %v4676_v11 = vpop.xlane.xlu0 %4675 }
 0xd6a   : > { %v4721_v55 = vsub.f32 %v11843_v12, %v4676_v11  ;;  %v4722_v50 = vsub.f32 %v11949_v46, %v4676_v11  ;;  %v4803_v12 = vmul.f32 1.442695, %v4745_v5  ;;  %v4709_v11 = vpop.xlane.xlu2 %4708 }
 0xd6c   : > { %v4755_v43 = vmul.f32 1.442695, %v4721_v55  ;;  %v4757_v14 = vmul.f32 1.442695, %v4722_v50  ;;  %v4743_v50 = vsub.f32 %v11913_v29, %v4709_v11 }
 0xd6e   : > { %v4799_v5 = vmul.f32 1.442695, %v4743_v50 }
 0xd71   : > { %v4673_v40 = vpop.xlane.xlu1 %4672 }
 0xd72   : > { %v4719_v41 = vsub.f32 %v11839_v24, %v4673_v40  ;;  %v4720_v33 = vsub.f32 %v11942_v22, %v4673_v40  ;;  %v4746_v24 = vsub.f32 %v11938_v23, %v4712_v1 }
 0xd74   : > { %v4751_v17 = vmul.f32 1.442695, %v4719_v41  ;;  %v4753_v52 = vmul.f32 1.442695, %v4720_v33  ;;  %v4805_v40 = vmul.f32 1.442695, %v4746_v24 }
 0xd76   : > { %8615 = vpow2.f32 %v4751_v17 }
 0xd77   : > { %8617 = vpow2.f32 %v4753_v52 }
 0xd78   : > { %8619 = vpow2.f32 %v4755_v43  ;;  %v4744_v43 = vsub.f32 %v11932_v16, %v4709_v11 }
 0xd79   : > { %8621 = vpow2.f32 %v4757_v14 }
 0xd7a   : > { %8623 = vpow2.f32 %v4803_v12  ;;  %v4801_v24 = vmul.f32 1.442695, %v4744_v43 }
 0xd7b   : > { %8625 = vpow2.f32 %v4805_v40 }
 0xd7c   : > { %v12057_v21 = vpop.eup %8615 }
 0xd7d   : > { %v12059_v56 = vpop.eup %8617 }
 0xd7e   : > { %v4815_v22 = vadd.f32 %v12059_v56, %v12057_v21  ;;  %v12065_v41 = vpop.eup %8619 }
 0xd7f   : > { %v12067_v46 = vpop.eup %8621 }
 0xd80   : > { %4816 = vadd.xlane.f32.xlu0 %v4815_v22  ;;  %v4818_v33 = vadd.f32 %v12067_v46, %v12065_v41  ;;  %v12071_v30 = vpop.eup %8623 }
 0xd81   : > { %v12073_v23 = vpop.eup %8625 }
 0xd82   : > { %v4854_v1 = vadd.f32 %v12073_v23, %v12071_v30 }
 0xd83   : > { %v12089_v14 = vpop.xlane.xlu0 %4822 }
 0xd8b   : > { %4819 = vadd.xlane.f32.xlu1 %v4818_v33  ;;  %v12081_v52 = vpop.xlane.xlu2 %4825 }
 0xd91   : > { %4855 = vadd.xlane.f32.xlu2 %v4854_v1 }
 0xd93   : > { %v12095_v12 = vpop.xlane.xlu0 %4828 }
 0xd94   : > { %5215 = vrot.lane.b32.xlu0 %v13557_v25, %s9362_s26 }
 0xd9b   : > { %v12079_v17 = vpop.xlane.xlu1 %4831 }
 0xda3   : > { %v4835_v55 = vpop.xlane.xlu1 %4834 }
 0xda4   : > { %4951 = vrot.lane.b32.xlu1 %v13576_v53, %s9361_s14  ;;  %8627 = vrcp.f32 %v4835_v55 }
 0xda9   : > { %4947 = vrot.lane.b32.xlu2 %v13578_v32, %s9361_s14 }
 0xdaa   : > { %v8628_v22 = vpop.eup %8627 }
 0xdab   : > { %v4838_v25 = vpop.xlane.xlu2 %4837  ;;  %v12098_v16 = vmul.f32 %v8628_v22, %v11995_v15  ;;  %v12104_v33 = vmul.f32 %v8628_v22, %v11997_v0 }
 0xdac   : > { %8629 = vrcp.f32 %v4838_v25  ;;  %4949 = vrot.lane.b32.xlu1 %v13573_v63, %s9361_s14 }
 0xdad   : > { %8631 = vpow2.f32 %v4799_v5 }
 0xdae   : > { %8633 = vpow2.f32 %v4801_v24 }
 0xdb1   : > { %4945 = vrot.lane.b32.xlu2 %v13590_v49, %s9361_s14 }
 0xdb2   : > { %v8630_v29 = vpop.eup %8629 }
 0xdb3   : > { %v12101_v40 = vmul.f32 %v8630_v29, %v12003_v9  ;;  %v12107_v1 = vmul.f32 %v8630_v29, %v12005_v18  ;;  %v12115_v15 = vpop.eup %8631  ;;  %v4841_v50 = vpop.xlane.xlu2 %4840 }
 0xdb4   : > { %5225 = vrot.lane.b32.xlu1 %v13596_v42, %s9362_s26  ;;  %v12117_v9 = vpop.eup %8633  ;;  %8635 = vrcp.f32 %v4841_v50 }
 0xdb5   : > { %v4917_v11 = vpack.c.bf16 %v12101_v40, %v12098_v16  ;;  %v4851_v42 = vadd.f32 %v12117_v9, %v12115_v15 }
 0xdb9   : > { %5209 = vrot.lane.b32.xlu2 %v13566_v6, %s9362_s26 }
 0xdba   : > { %v8636_v43 = vpop.eup %8635 }
 0xdbb   : > { %v4844_v0 = vpop.xlane.xlu0 %4843  ;;  %v4956_v18 = vpop.permute.xlu1 %4955  ;;  %v12126_v24 = vmul.f32 %v8636_v43, %v12011_v27  ;;  %v12132_v22 = vmul.f32 %v8636_v43, %v12013_v37  ;;  %v4747_v27 = vsub.f32 %v11926_v31, %v12051_v2  ;;  %v4748_v37 = vsub.f32 %v11944_v13, %v12051_v2  ;;  %v13608_v13 = vld [vmem:[#allocation49_spill] sm:$0xff] }
 0xdbc   : > { %8637 = vrcp.f32 %v4844_v0  ;;  %5025 = vmatpush.bf16.msra.mxu3 %v4956_v18 }
 0xdbe   : > { %4852 = vadd.xlane.f32.xlu0 %v4851_v42  ;;  %v4807_v42 = vmul.f32 1.442695, %v4747_v27 }
 0xdc1   : > { %5223 = vrot.lane.b32.xlu2 %v13582_v28, %s9362_s26 }
 0xdc2   : > { %v8638_v25 = vpop.eup %8637 }
 0xdc3   : > { %v4954_v5 = vpop.permute.xlu1 %4953  ;;  %v12129_v6 = vmul.f32 %v8638_v25, %v12019_v4  ;;  %v12135_v29 = vmul.f32 %v8638_v25, %v12021_v61  ;;  %v4847_v50 = vpop.xlane.xlu2 %4846  ;;  %v4809_v25 = vmul.f32 1.442695, %v4748_v37 }
 0xdc4   : > { %5026 = vmatpush.bf16.msra.mxu3 %v4954_v5  ;;  %8639 = vrcp.f32 %v4847_v50 }
 0xdc5   : > { %v4919_v0 = vpack.c.bf16 %v12129_v6, %v12126_v24 }
 0xdc9   : > { %4943 = vrot.lane.b32.xlu2 %v13575_v34, %s9361_s14 }
 0xdca   : > { %v8640_v5 = vpop.eup %8639 }
 0xdcb   : > { %v4850_v4 = vpop.xlane.xlu0 %4849  ;;  %v12147_v61 = vpop.permute.xlu1 %5213  ;;  %v12155_v50 = vmul.f32 %v8640_v5, %v12029_v48  ;;  %v12161_v37 = vmul.f32 %v8640_v5, %v12031_v36 }
 0xdcc   : > { %8641 = vrcp.f32 %v4850_v4  ;;  %v5230_v18 = vpop.permute.xlu2 %5229 }
 0xdcd   : > { %v5299_v43 = vsel %vm3017_vm0, %v5230_v18, 0  ;;  %8643 = vpow2.f32 %v4807_v42 }
 0xdce   : > { %5358 = vmatpush.bf16.xpose.msrb.mxu2 %v5299_v43  ;;  %8645 = vpow2.f32 %v4809_v25 }
 0xdd1   : > { %5221 = vrot.lane.b32.xlu2 %v13597_v10, %s9362_s26 }
 0xdd2   : > { %v8642_v31 = vpop.eup %8641  ;;  %5211 = vrot.lane.b32.xlu0 %v13608_v13, %s9362_s26 }
 0xdd3   : > { %v5228_v2 = vpop.permute.xlu1 %5227  ;;  %v12158_v27 = vmul.f32 %v8642_v31, %v12037_v47  ;;  %v12164_v4 = vmul.f32 %v8642_v31, %v12039_v58  ;;  %v12171_v48 = vpop.eup %8643  ;;  %v4749_v47 = vsub.f32 %v11936_v51, %v12049_v57  ;;  %v4750_v58 = vsub.f32 %v11951_v26, %v12049_v57  ;;  %v13609_v51 = vld [vmem:[#allocation53_spill] sm:$0xff] }
 0xdd4   : > { %v5296_v10 = vsel %vm3017_vm0, %v5228_v2, 0  ;;  %v12173_v43 = vpop.eup %8645  ;;  %v12187_v31 = vpop.f32.mrf.mxu2 }
 0xdd5   : > { %v4921_v18 = vpack.c.bf16 %v12158_v27, %v12155_v50  ;;  %v4857_v36 = vadd.f32 %v12173_v43, %v12171_v48  ;;  %v4811_v25 = vmul.f32 1.442695, %v4749_v47  ;;  %v4813_v5 = vmul.f32 1.442695, %v4750_v58 }
 0xdd6   : > { %5359 = vmatpush.bf16.xpose.msrb.mxu2 %v5296_v10 }
 0xdd7   : > { %8647 = vpow2.f32 %v4811_v25 }
 0xdd8   : > { %8649 = vpow2.f32 %v4813_v5 }
 0xdd9   : > { %5219 = vrot.lane.b32.xlu2 %v13585_v35, %s9362_s26 }
 0xddc   : > { %v12197_v26 = vpop.f32.mrf.mxu2 }
 0xddd   : > { %v12191_v35 = vpop.eup %8647 }
 0xdde   : > { %4858 = vadd.xlane.f32.xlu1 %v4857_v36 }
 0xde1   : > { %5203 = vrot.lane.b32.xlu2 %v13581_v62, %s9362_s26  ;;  %v12193_v62 = vpop.eup %8649 }
 0xde2   : > { %v4860_v13 = vadd.f32 %v12193_v62, %v12191_v35 }
 0xde4   : > { %v12207_v36 = vpop.f32.mrf.mxu2 }
 0xde9   : > { %5191 = vrot.lane.b32.xlu2 %v13569_v8, %s9362_s26  ;;  %v13610_v8 = vld [vmem:[#allocation94_spill] sm:$0xff] }
 0xdf1   : > { %5197 = vrot.lane.b32.xlu2 %v13583_v20, %s9362_s26  ;;  %v13611_v20 = vld [vmem:[#allocation63_spill] sm:$0xff] }
 0xdf3   : > { %v4817_v57 = vpop.xlane.xlu0 %4816 }
 0xdf4   : > { %8651 = vrcp.f32 %v4817_v57 }
 0xdf7   : > { %5207 = vrot.lane.b32.xlu1 %v13609_v51, %s9362_s26 }
 0xdf9   : > { %5691 = vrot.lane.b32.xlu2 %v13610_v8, %s9362_s26  ;;  %v13612_v8 = vld [vmem:[#allocation75_spill] sm:$0xff] }
 0xdfa   : > { %v8652_v10 = vpop.eup %8651 }
 0xdfb   : > { %v4879_v25 = vmul.f32 %v8652_v10, %v12057_v21  ;;  %v5275_v21 = vsel %vm3017_vm0, %v12147_v61, 0  ;;  %v13616_v61 = vld [vmem:[#allocation64_spill] sm:$0xff]  ;;  %v4880_v28 = vmul.f32 %v8652_v10, %v12059_v56 }
 0xdfc   : > { %4861 = vadd.xlane.f32.xlu0 %v4860_v13 }
 0xdfe   : > { %v4820_v2 = vpop.xlane.xlu1 %4819 }
 0xdff   : > { %8653 = vrcp.f32 %v4820_v2  ;;  %5187 = vrot.lane.b32.xlu1 %v13611_v20, %s9362_s26  ;;  %v12217_v2 = vpop.f32.mrf.mxu2  ;;  %v13614_v20 = vld [vmem:[#allocation55_spill] sm:$0xff] }
 0xe00   : > { %8655 = vrcp.f32 %v12081_v52 }
 0xe01   : > { %5683 = vrot.lane.b32.xlu2 %v13573_v63, %s9362_s26  ;;  %8657 = vrcp.f32 %v12089_v14  ;;  %v13615_v14 = vld [vmem:[#allocation72_spill] sm:$0xff] }
 0xe02   : > { %8659 = vrcp.f32 %v12079_v17 }
 0xe03   : > { %8661 = vrcp.f32 %v12095_v12 }
 0xe04   : > { %v12209_v47 = vpop.xlane.xlu2 %4855 }
 0xe05   : > { %v8654_v58 = vpop.eup %8653 }
 0xe06   : > { %v4881_v5 = vmul.f32 %v8654_v58, %v12065_v41  ;;  %v5216_v51 = vpop.permute.xlu0 %5215  ;;  %v13613_v41 = vld [vmem:[#allocation83_spill] sm:$0xff] }
 0xe07   : > { %5193 = vrot.lane.b32.xlu1 %v13612_v8, %s9362_s26  ;;  %v5278_v57 = vsel %vm3017_vm0, %v5216_v51, 0 }
 0xe08   : > { %v4911_v13 = vpack.c.bf16 %v4881_v5, %v4879_v25  ;;  %5308 = vmatpush.bf16.xpose.msra.mxu1 %v5278_v57  ;;  %v8656_v25 = vpop.eup %8655 }
 0xe09   : > { %v8658_v5 = vpop.eup %8657  ;;  %v4885_v52 = vmul.f32 %v8656_v25, %v11971_v7 }
 0xe0a   : > { %4983 = vmatmul.bf16.vlgmr.msra.gmra.mxu2 %v4911_v13  ;;  %v4883_v57 = vmul.f32 %v8658_v5, %v11963_v39  ;;  %v12228_v13 = vpop.f32.mrf.mxu2  ;;  %v13617_v39 = vld [vmem:[#allocation71_spill] sm:$0xff] }
 0xe0c   : > { %v4948_v63 = vpop.permute.xlu2 %4947 }
 0xe0f   : > { %5199 = vrot.lane.b32.xlu1 %v13613_v41, %s9362_s26  ;;  %v4913_v41 = vpack.c.bf16 %v4885_v52, %v4883_v57 }
 0xe10   : > { %5205 = vrot.lane.b32.xlu0 %v13614_v20, %s9362_s26  ;;  %5309 = vmatpush.bf16.xpose.msra.mxu1 %v5275_v21  ;;  %v12234_v21 = vpop.f32.mrf.mxu3 }
 0xe12   : > { %v12242_v42 = vpop.f32.mrf.mxu2 }
 0xe14   : > { %v4946_v51 = vpop.permute.xlu2 %4945 }
 0xe16   : > { %v4952_v8 = vpop.permute.xlu1 %4951 }
 0xe17   : > { %5027 = vmatpush.bf16.msra.mxu3 %v4952_v8  ;;  %5673 = vrot.lane.b32.xlu1 %v13615_v14, %s9362_s26  ;;  %v13618_v8 = vld [vmem:[#allocation78_spill] sm:$0xff]  ;;  %v8660_v14 = vpop.eup %8659 }
 0xe18   : > { %5189 = vrot.lane.b32.xlu0 %v13616_v61, %s9362_s26  ;;  %v8662_v52 = vpop.eup %8661  ;;  %v4889_v61 = vmul.f32 %v8660_v14, %v11987_v60  ;;  %v12245_v17 = vpop.f32.mrf.mxu3 }
 0xe19   : > { %v4887_v12 = vmul.f32 %v8662_v52, %v11979_v3 }
 0xe1a   : > { %4988 = vmatmul.bf16.gmra.mxu2 %v4913_v41  ;;  %v12254_v60 = vpop.f32.mrf.mxu2 }
 0xe1c   : > { %v5210_v20 = vpop.permute.xlu2 %5209 }
 0xe1e   : > { %v4950_v7 = vpop.permute.xlu1 %4949 }
 0xe1f   : > { %5028 = vmatpush.bf16.msra.mxu3 %v4950_v7  ;;  %5669 = vrot.lane.b32.xlu1 %v13617_v39, %s9362_s26  ;;  %v13619_v39 = vld [vmem:[#allocation84_spill] sm:$0xff] }
 0xe20   : > { %5195 = vrot.lane.b32.xlu0 %v13618_v8, %s9362_s26  ;;  %v4915_v8 = vpack.c.bf16 %v4889_v61, %v4887_v12  ;;  %v12257_v55 = vpop.f32.mrf.mxu3  ;;  %v13621_v61 = vld [vmem:[#allocation68_spill] sm:$0xff] }
 0xe23   : > { %5029 = vmatpush.bf16.msra.mxu3 %v4948_v63  ;;  %v4882_v63 = vmul.f32 %v8654_v58, %v12067_v46  ;;  %v12264_v58 = vpop.f32.mrf.mxu2 }
 0xe24   : > { %v5224_v57 = vpop.permute.xlu2 %5223 }
 0xe26   : > { %v5226_v41 = vpop.permute.xlu1 %5225 }
 0xe27   : > { %5030 = vmatpush.bf16.msra.mxu3 %v4946_v51  ;;  %v5293_v7 = vsel %vm3017_vm0, %v5226_v41, 0  ;;  %5687 = vrot.lane.b32.xlu1 %v13571_v54, %s9362_s26  ;;  %v5290_v51 = vsel %vm3017_vm0, %v5224_v57, 0  ;;  %v4912_v41 = vpack.c.bf16 %v4882_v63, %v4880_v28  ;;  %v13620_v54 = vld [vmem:[#allocation70_spill] sm:$0xff]  ;;  %v13622_v28 = vld [vmem:[#allocation69_spill] sm:$0xff]  ;;  %v4886_v57 = vmul.f32 %v8656_v25, %v11973_v59 }
 0xe28   : > { %5201 = vrot.lane.b32.xlu0 %v13619_v39, %s9362_s26  ;;  %5360 = vmatpush.bf16.xpose.msrb.mxu2 %v5293_v7  ;;  %v12267_v10 = vpop.f32.mrf.mxu3  ;;  %v4884_v39 = vmul.f32 %v8658_v5, %v11965_v44  ;;  %v13624_v44 = vld [vmem:[#allocation80_spill] sm:$0xff]  ;;  %v5269_v5 = vsel %vm3017_vm0, %v5210_v20, 0 }
 0xe2a   : > { %4993 = vmatmul.bf16.gmra.mxu2 %v4915_v8  ;;  %v4914_v63 = vpack.c.bf16 %v4886_v57, %v4884_v39 }
 0xe2c   : > { %v4944_v3 = vpop.permute.xlu2 %4943 }
 0xe2d   : > { %5031 = vmatpush.bf16.msra.mxu3 %v4944_v3  ;;  %v12279_v3 = vpop.f32.mrf.mxu2 }
 0xe2f   : > { %5667 = vrot.lane.b32.xlu1 %v13620_v54, %s9362_s26 }
 0xe30   : > { %5032 = vmatmul.bf16.vlgmr.msra.gmra.mxu3 %v4912_v41  ;;  %5361 = vmatpush.bf16.xpose.msrb.mxu2 %v5290_v51 }
 0xe31   : > { %5675 = vrot.lane.b32.xlu0 %v13621_v61, %s9362_s26  ;;  %v4853_v12 = vpop.xlane.xlu0 %4852 }
 0xe32   : > { %8663 = vrcp.f32 %v4853_v12 }
 0xe33   : > { %8665 = vrcp.f32 %v12209_v47 }
 0xe34   : > { %v5222_v46 = vpop.permute.xlu2 %5221 }
 0xe35   : > { %v5287_v56 = vsel %vm3017_vm0, %v5222_v46, 0  ;;  %v12286_v59 = vpop.f32.mrf.mxu2 }
 0xe36   : > { %13623 = vst [vmem:[#allocation87_spill] sm:$0xff] %v12286_v59 }
 0xe37   : > { %5685 = vrot.lane.b32.xlu1 %v13576_v53, %s9362_s26  ;;  %v12281_v53 = vpop.f32.mrf.mxu3 }
 0xe38   : > { %5362 = vmatpush.bf16.xpose.msrb.mxu2 %v5287_v56  ;;  %v8664_v6 = vpop.eup %8663 }
 0xe39   : > { %5671 = vrot.lane.b32.xlu0 %v13622_v28, %s9362_s26  ;;  %v8666_v20 = vpop.eup %8665 }
 0xe3a   : > { %4998 = vmatmul.bf16.gmra.mxu2 %v4917_v11  ;;  %v4890_v11 = vmul.f32 %v8660_v14, %v11989_v38  ;;  %v4903_v14 = vmul.f32 %v8664_v6, %v12115_v15  ;;  %v4905_v50 = vmul.f32 %v8666_v20, %v12071_v30  ;;  %v13628_v15 = vpack.c.bf16 %v12135_v29, %v12132_v22 }
 0xe3c   : > { %v5220_v7 = vpop.permute.xlu2 %5219 }
 0xe3d   : > { %v5284_v8 = vsel %vm3017_vm0, %v5220_v7, 0  ;;  %v12300_v54 = vpop.f32.mrf.mxu2 }
 0xe3f   : > { %v12294_v25 = vpop.f32.mrf.mxu3 }
 0xe40   : > { %5037 = vmatmul.bf16.gmra.mxu3 %v4914_v63  ;;  %5363 = vmatpush.bf16.xpose.msrb.mxu2 %v5284_v8  ;;  %v13630_v8 = vpack.c.bf16 %v12164_v4, %v12161_v37  ;;  %v4906_v37 = vmul.f32 %v8666_v20, %v12073_v23  ;;  %v7979_v20 = vld [vmem:[#allocation17 + $0x20] sm:$0xff] }
 0xe41   : > { %5689 = vrot.lane.b32.xlu0 %v13584_v19, %s9362_s26  ;;  %v4888_v19 = vmul.f32 %v8662_v52, %v11981_v45  ;;  %v13626_v45 = vpack.c.bf16 %v12107_v1, %v12104_v33 }
 0xe43   : > { %v4916_v51 = vpack.c.bf16 %v4890_v11, %v4888_v19 }
 0xe44   : > { %v5212_v16 = vpop.permute.xlu0 %5211 }
 0xe45   : > { %v5272_v40 = vsel %vm3017_vm0, %v5212_v16, 0  ;;  %v12307_v38 = vpop.f32.mrf.mxu2 }
 0xe46   : > { %5310 = vmatpush.bf16.xpose.msra.mxu1 %v5272_v40  ;;  %13625 = vst [vmem:[#allocation88_spill] sm:$0xff] %v12307_v38 }
 0xe47   : > { %v12298_v41 = vpop.f32.mrf.mxu3 }
 0xe49   : > { %5665 = vrot.lane.b32.xlu0 %v13624_v44, %s9362_s26  ;;  %v4904_v44 = vmul.f32 %v8664_v6, %v12117_v9 }
 0xe4a   : > { %5003 = vmatmul.bf16.gmra.mxu2 %v4919_v0 }
 0xe4d   : > { %v12317_v27 = vpop.f32.mrf.mxu2 }
 0xe4e   : > { %5311 = vmatpush.bf16.xpose.msra.mxu1 %v5269_v5  ;;  %v4924_v5 = vpack.c.bf16 %v4906_v37, %v4904_v44 }
 0xe4f   : > { %v12305_v24 = vpop.f32.mrf.mxu3 }
 0xe50   : > { %5042 = vmatmul.bf16.gmra.mxu3 %v4916_v51  ;;  %v7980_v51 = vld [vmem:[#allocation17 + $0x28] sm:$0xff] }
 0xe51   : > { %v4859_v0 = vpop.xlane.xlu1 %4858  ;;  %5128 = vmatpush.bf16.msrb.mxu0 %v7980_v51 }
 0xe52   : > { %8667 = vrcp.f32 %v4859_v0 }
 0xe55   : > { %v12325_v47 = vpop.f32.mrf.mxu2  ;;  %5129 = vmatpush.bf16.msrb.mxu0 %v7979_v20 }
 0xe56   : > { %13629 = vst [vmem:[#allocation85_spill] sm:$0xff] %v12325_v47 }
 0xe57   : > { %v12314_v52 = vpop.f32.mrf.mxu3 }
 0xe58   : > { %v8668_v30 = vpop.eup %8667 }
 0xe59   : > { %v4907_v28 = vmul.f32 %v8668_v30, %v12171_v48  ;;  %v5204_v48 = vpop.permute.xlu2 %5203  ;;  %v4908_v6 = vmul.f32 %v8668_v30, %v12173_v43 }
 0xe5a   : > { %5008 = vmatmul.bf16.gmra.mxu2 %v4921_v18  ;;  %v4923_v18 = vpack.c.bf16 %v4905_v50, %v4903_v14 }
 0xe5d   : > { %v12331_v39 = vpop.f32.mrf.mxu2 }
 0xe5f   : > { %v12320_v33 = vpop.f32.mrf.mxu3 }
 0xe60   : > { %5047 = vmatmul.bf16.gmra.mxu3 %v13626_v45  ;;  %13627 = vst [vmem:[#allocation89_spill] sm:$0xff] %v12320_v33 }
 0xe65   : > { %v12339_v16 = vpop.f32.mrf.mxu2 }
 0xe66   : > { %13632 = vst [vmem:[#allocation86_spill] sm:$0xff] %v12339_v16 }
 0xe67   : > { %v12329_v12 = vpop.f32.mrf.mxu3 }
 0xe69   : > { %v5208_v61 = vpop.permute.xlu1 %5207 }
 0xe6a   : > { %v5266_v46 = vsel %vm3017_vm0, %v5208_v61, 0  ;;  %5013 = vmatmul.bf16.gmra.mxu2 %v4923_v18  ;;  %v5192_v61 = vpop.permute.xlu2 %5191 }
 0xe6b   : > { %5312 = vmatpush.bf16.xpose.msra.mxu1 %v5266_v46 }
 0xe6f   : > { %v4862_v1 = vpop.xlane.xlu0 %4861  ;;  %v12336_v29 = vpop.f32.mrf.mxu3 }
 0xe70   : > { %8669 = vrcp.f32 %v4862_v1  ;;  %5052 = vmatmul.bf16.gmra.mxu3 %v13628_v15  ;;  %13631 = vst [vmem:[#allocation90_spill] sm:$0xff] %v12336_v29 }
 0xe71   : > { %v5188_v40 = vpop.permute.xlu1 %5187 }
 0xe76   : > { %v8670_v56 = vpop.eup %8669 }
 0xe77   : > { %v4909_v57 = vmul.f32 %v8670_v56, %v12191_v35  ;;  %v5260_v35 = vsel %vm3017_vm0, %v5204_v48, 0  ;;  %v12345_v4 = vpop.f32.mrf.mxu3  ;;  %v4910_v9 = vmul.f32 %v8670_v56, %v12193_v62 }
 0xe79   : > { %v4925_v7 = vpack.c.bf16 %v4909_v57, %v4907_v28  ;;  %v4926_v14 = vpack.c.bf16 %v4910_v9, %v4908_v6  ;;  %v5194_v15 = vpop.permute.xlu1 %5193 }
 0xe7b   : > { %5018 = vmatmul.bf16.gmra.mxu2 %v4925_v7 }
 0xe7f   : > { %v12348_v45 = vpop.f32.mrf.mxu3 }
 0xe80   : > { %5057 = vmatmul.bf16.gmra.mxu3 %v13630_v8  ;;  %13633 = vst [vmem:[#allocation91_spill] sm:$0xff] %v12348_v45 }
 0xe82   : > { %v5206_v22 = vpop.permute.xlu0 %5205 }
 0xe83   : > { %v5263_v63 = vsel %vm3017_vm0, %v5206_v22, 0 }
 0xe84   : > { %5313 = vmatpush.bf16.xpose.msra.mxu1 %v5263_v63 }
 0xe87   : > { %v12353_v50 = vpop.f32.mrf.mxu3 }
 0xe8a   : > { %v5190_v0 = vpop.permute.xlu0 %5189 }
 0xe8b   : > { %7753 = vmatmul.msk.bf16.vlgmr.msrb.gmra.mxu2 %vm3017_vm0, %v5188_v40 }
 0xe8c   : > { %5314 = vmatpush.bf16.xpose.msra.mxu1 %v5260_v35 }
 0xe8d   : > { %v4984_v11 = vpop.f32.mrf.mxu2 }
 0xe8f   : > { %v12356_v46 = vpop.f32.mrf.mxu3 }
 0xe90   : > { %5062 = vmatmul.bf16.gmra.mxu3 %v4924_v5  ;;  %13634 = vst [vmem:[#allocation47_spill] sm:$0xff] %v12356_v46 }
 0xe92   : > { %v5196_v63 = vpop.permute.xlu0 %5195 }
 0xe93   : > { %7745 = vmatmul.msk.bf16.vlgmr.msra.gmra.mxu1 %vm3017_vm0, %v5188_v40 }
 0xe95   : > { %v4986_v19 = vpop.f32.mrf.mxu2 }
 0xe9b   : > { %7754 = vmatmul.msk.bf16.gmra.mxu2 %vm3017_vm0, %v5190_v0 }
 0xe9d   : > { %v4989_v23 = vpop.f32.mrf.mxu2 }
 0xea0   : > { %5067 = vmatmul.bf16.gmra.mxu3 %v4926_v14 }
 0xea3   : > { %7746 = vmatmul.msk.bf16.gmra.mxu1 %vm3017_vm0, %v5190_v0 }
 0xea5   : > { %v4991_v18 = vpop.f32.mrf.mxu2 }
 0xeab   : > { %7755 = vmatmul.msk.bf16.gmra.mxu2 %vm3017_vm0, %v5192_v61 }
 0xead   : > { %v4994_v62 = vpop.f32.mrf.mxu2 }
 0xeb3   : > { %v5033_v1 = vpop.f32.mrf.mxu3  ;;  %7747 = vmatmul.msk.bf16.gmra.mxu1 %vm3017_vm0, %v5192_v61 }
 0xeb4   : > { %v5034_v56 = vadd.f32 %v5033_v1, %v4984_v11 }
 0xeb5   : > { %v4996_v43 = vpop.f32.mrf.mxu2 }
 0xebb   : > { %v5035_v30 = vpop.f32.mrf.mxu3  ;;  %7756 = vmatmul.msk.bf16.gmra.mxu2 %vm3017_vm0, %v5194_v15 }
 0xebc   : > { %v5036_v28 = vadd.f32 %v5035_v30, %v4986_v19  ;;  %v5198_v19 = vpop.permute.xlu2 %5197 }
 0xebd   : > { %v4999_v57 = vpop.f32.mrf.mxu2 }
 0xebe   : > { %v5073_v7 = vpack.c.bf16 %v5036_v28, %v5034_v56  ;;  %v5202_v28 = vpop.permute.xlu0 %5201 }
 0xec0   : > { %7737 = vmatmul.msk.bf16.vlgmr.msrb.gmra.mxu0 %vm3017_vm0, %v5073_v7 }
 0xec3   : > { %v5038_v8 = vpop.f32.mrf.mxu3  ;;  %7748 = vmatmul.msk.bf16.gmra.mxu1 %vm3017_vm0, %v5194_v15 }
 0xec4   : > { %v5039_v35 = vadd.f32 %v5038_v8, %v4989_v23 }
 0xec5   : > { %v5001_v22 = vpop.f32.mrf.mxu2 }
 0xecb   : > { %v5040_v48 = vpop.f32.mrf.mxu3  ;;  %7757 = vmatmul.msk.bf16.gmra.mxu2 %vm3017_vm0, %v5196_v63 }
 0xecc   : > { %v5041_v40 = vadd.f32 %v5040_v48, %v4991_v18  ;;  %v5200_v18 = vpop.permute.xlu1 %5199 }
 0xecd   : > { %v5004_v44 = vpop.f32.mrf.mxu2 }
 0xece   : > { %v5074_v37 = vpack.c.bf16 %v5041_v40, %v5039_v35 }
 0xed0   : > { %7738 = vmatmul.msk.bf16.gmra.mxu0 %vm3017_vm0, %v5074_v37 }
 0xed3   : > { %v5043_v11 = vpop.f32.mrf.mxu3  ;;  %7749 = vmatmul.msk.bf16.gmra.mxu1 %vm3017_vm0, %v5196_v63 }
 0xed4   : > { %v5044_v0 = vadd.f32 %v5043_v11, %v4994_v62 }
 0xed5   : > { %v5006_v5 = vpop.f32.mrf.mxu2 }
 0xedb   : > { %v5045_v51 = vpop.f32.mrf.mxu3  ;;  %7758 = vmatmul.msk.bf16.gmra.mxu2 %vm3017_vm0, %v5198_v19 }
 0xedc   : > { %v5046_v9 = vadd.f32 %v5045_v51, %v4996_v43 }
 0xedd   : > { %v5009_v6 = vpop.f32.mrf.mxu2 }
 0xede   : > { %v5075_v20 = vpack.c.bf16 %v5046_v9, %v5044_v0 }
 0xee0   : > { %7739 = vmatmul.msk.bf16.gmra.mxu0 %vm3017_vm0, %v5075_v20 }
 0xee3   : > { %v5048_v23 = vpop.f32.mrf.mxu3  ;;  %7750 = vmatmul.msk.bf16.gmra.mxu1 %vm3017_vm0, %v5198_v19 }
 0xee4   : > { %v5049_v1 = vadd.f32 %v5048_v23, %v4999_v57 }
 0xee5   : > { %v5011_v14 = vpop.f32.mrf.mxu2 }
 0xeeb   : > { %v5050_v61 = vpop.f32.mrf.mxu3  ;;  %7759 = vmatmul.msk.bf16.gmra.mxu2 %vm3017_vm0, %v5200_v18 }
 0xeec   : > { %v5051_v15 = vadd.f32 %v5050_v61, %v5001_v22 }
 0xeed   : > { %v5014_v30 = vpop.f32.mrf.mxu2 }
 0xeee   : > { %v5076_v56 = vpack.c.bf16 %v5051_v15, %v5049_v1 }
 0xef0   : > { %7740 = vmatmul.msk.bf16.gmra.mxu0 %vm3017_vm0, %v5076_v56 }
 0xef3   : > { %v5053_v62 = vpop.f32.mrf.mxu3  ;;  %7751 = vmatmul.msk.bf16.gmra.mxu1 %vm3017_vm0, %v5200_v18 }
 0xef4   : > { %v5054_v8 = vadd.f32 %v5053_v62, %v5004_v44  ;;  %v5676_v62 = vpop.permute.xlu0 %5675 }
 0xef5   : > { %v5016_v43 = vpop.f32.mrf.mxu2  ;;  %5709 = vmatpush.bf16.msrb.mxu3 %v5676_v62 }
 0xefb   : > { %v5055_v7 = vpop.f32.mrf.mxu3  ;;  %7760 = vmatmul.msk.bf16.gmra.mxu2 %vm3017_vm0, %v5202_v28 }
 0xefc   : > { %v5056_v63 = vadd.f32 %v5055_v7, %v5006_v5  ;;  %v5674_v7 = vpop.permute.xlu1 %5673 }
 0xefd   : > { %5710 = vmatpush.bf16.msrb.mxu3 %v5674_v7 }
 0xefe   : > { %v5077_v48 = vpack.c.bf16 %v5056_v63, %v5054_v8  ;;  %v5019_v35 = vpop.f32.mrf.mxu2  ;;  %v5672_v63 = vpop.permute.xlu0 %5671 }
 0xf00   : > { %7741 = vmatmul.msk.bf16.gmra.mxu0 %vm3017_vm0, %v5077_v48 }
 0xf01   : > { %5711 = vmatpush.bf16.msrb.mxu3 %v5672_v63 }
 0xf03   : > { %v5058_v57 = vpop.f32.mrf.mxu3  ;;  %7752 = vmatmul.msk.bf16.gmra.mxu1 %vm3017_vm0, %v5202_v28 }
 0xf04   : > { %v5059_v37 = vadd.f32 %v5058_v57, %v5009_v6 }
 0xf06   : > { %v5021_v22 = vpop.f32.mrf.mxu2 }
 0xf0b   : > { %v5060_v40 = vpop.f32.mrf.mxu3 }
 0xf0c   : > { %v5061_v11 = vadd.f32 %v5060_v40, %v5011_v14 }
 0xf0e   : > { %v5078_v19 = vpack.c.bf16 %v5061_v11, %v5059_v37  ;;  %v12375_v51 = vpop.f32.mrf.mxu2  ;;  %v5670_v37 = vpop.permute.xlu1 %5669 }
 0xf0f   : > { %v5692_v11 = vpop.permute.xlu2 %5691  ;;  %5712 = vmatpush.bf16.msrb.mxu3 %v5670_v37  ;;  %v4419_v37 = vadd.f32 %v12257_v55, %v12207_v36 }
 0xf10   : > { %7742 = vmatmul.msk.bf16.gmra.mxu0 %vm3017_vm0, %v5078_v19  ;;  %v12378_v0 = vpop.f32.mrf.mxu1 }
 0xf11   : > { %v5405_v44 = vmax.f32 %v12378_v0, %v12375_v51  ;;  %5758 = vmatpush.bf16.msra.mxu0 %v5692_v11 }
 0xf13   : > { %v5063_v5 = vpop.f32.mrf.mxu3  ;;  %5406 = vmax.xlane.f32.xlu2 %v5405_v44 }
 0xf14   : > { %v5064_v14 = vadd.f32 %v5063_v5, %v5014_v30 }
 0xf16   : > { %v12382_v9 = vpop.f32.mrf.mxu2 }
 0xf18   : > { %v12384_v20 = vpop.f32.mrf.mxu1 }
 0xf19   : > { %v5408_v6 = vmax.f32 %v12384_v20, %v12382_v9 }
 0xf1b   : > { %v5065_v23 = vpop.f32.mrf.mxu3  ;;  %5409 = vmax.xlane.f32.xlu1 %v5408_v6 }
 0xf1c   : > { %v5066_v18 = vadd.f32 %v5065_v23, %v5016_v43  ;;  %v5690_v23 = vpop.permute.xlu0 %5689 }
 0xf1d   : > { %5759 = vmatpush.bf16.msra.mxu0 %v5690_v23 }
 0xf1e   : > { %v5079_v61 = vpack.c.bf16 %v5066_v18, %v5064_v14  ;;  %v12388_v1 = vpop.f32.mrf.mxu2  ;;  %v5688_v14 = vpop.permute.xlu1 %5687 }
 0xf20   : > { %7743 = vmatmul.msk.bf16.gmra.mxu0 %vm3017_vm0, %v5079_v61  ;;  %v12391_v15 = vpop.f32.mrf.mxu1  ;;  %v4414_v61 = vadd.f32 %v12234_v21, %v12187_v31 }
 0xf21   : > { %v5411_v56 = vmax.f32 %v12391_v15, %v12388_v1  ;;  %5760 = vmatpush.bf16.msra.mxu0 %v5688_v14  ;;  %v4424_v14 = vadd.f32 %v12281_v53, %v12228_v13  ;;  %v4434_v13 = vadd.f32 %v12314_v52, %v12279_v3  ;;  %v4439_v3 = vadd.f32 %v12329_v12, %v12300_v54 }
 0xf23   : > { %v5068_v28 = vpop.f32.mrf.mxu3  ;;  %5412 = vmax.xlane.f32.xlu0 %v5411_v56 }
 0xf24   : > { %v5069_v57 = vadd.f32 %v5068_v28, %v5019_v35 }
 0xf26   : > { %v12395_v8 = vpop.f32.mrf.mxu2  ;;  %v5668_v62 = vpop.permute.xlu1 %5667 }
 0xf27   : > { %5713 = vmatpush.bf16.msrb.mxu3 %v5668_v62 }
 0xf28   : > { %v12397_v30 = vpop.f32.mrf.mxu1 }
 0xf29   : > { %v5414_v43 = vmax.f32 %v12397_v30, %v12395_v8 }
 0xf2b   : > { %v5070_v48 = vpop.f32.mrf.mxu3  ;;  %5415 = vmax.xlane.f32.xlu2 %v5414_v43 }
 0xf2c   : > { %v5071_v40 = vadd.f32 %v5070_v48, %v5021_v22 }
 0xf2e   : > { %v5080_v19 = vpack.c.bf16 %v5071_v40, %v5069_v57  ;;  %v12401_v44 = vpop.f32.mrf.mxu2  ;;  %v5686_v57 = vpop.permute.xlu1 %5685 }
 0xf2f   : > { %5761 = vmatpush.bf16.msra.mxu0 %v5686_v57 }
 0xf30   : > { %7744 = vmatmul.msk.bf16.gmra.mxu0 %vm3017_vm0, %v5080_v19  ;;  %v12404_v5 = vpop.f32.mrf.mxu1 }
 0xf31   : > { %v5417_v6 = vmax.f32 %v12404_v5, %v12401_v44 }
 0xf33   : > { %5418 = vmax.xlane.f32.xlu1 %v5417_v6  ;;  %v5684_v6 = vpop.permute.xlu2 %5683 }
 0xf34   : > { %5762 = vmatpush.bf16.msra.mxu0 %v5684_v6 }
 0xf36   : > { %v12408_v35 = vpop.f32.mrf.mxu2 }
 0xf38   : > { %v12410_v22 = vpop.f32.mrf.mxu1 }
 0xf39   : > { %v5420_v18 = vmax.f32 %v12410_v22, %v12408_v35 }
 0xf3b   : > { %5421 = vmax.xlane.f32.xlu2 %v5420_v18 }
 0xf3d   : > { %v5131_v56 = vpop.f32.mrf.mxu0 }
 0xf3e   : > { %v12416_v28 = vadd.f32 %v5131_v56, %v4414_v61  ;;  %v12418_v7 = vpop.f32.mrf.mxu2  ;;  %v13635_v56 = vld [vmem:[#allocation81_spill] sm:$0xff] }
 0xf40   : > { %v12420_v43 = vpop.f32.mrf.mxu1 }
 0xf41   : > { %v5423_v63 = vmax.f32 %v12420_v43, %v12418_v7 }
 0xf43   : > { %5424 = vmax.xlane.f32.xlu2 %v5423_v63  ;;  %v5666_v63 = vpop.permute.xlu0 %5665 }
 0xf44   : > { %5714 = vmatpush.bf16.msrb.mxu3 %v5666_v63 }
 0xf45   : > { %v12424_v48 = vpop.f32.mrf.mxu0 }
 0xf46   : > { %v12426_v40 = vpop.f32.mrf.mxu2 }
 0xf48   : > { %v12428_v31 = vpop.f32.mrf.mxu1 }
 0xf49   : > { %v5426_v21 = vmax.f32 %v12428_v31, %v12426_v40 }
 0xf4b   : > { %5427 = vmax.xlane.f32.xlu0 %v5426_v21 }
 0xf4c   : > { %5681 = vrot.lane.b32.xlu1 %v13578_v32, %s9362_s26  ;;  %v4429_v32 = vadd.f32 %v12298_v41, %v12254_v60 }
 0xf4d   : > { %v5136_v11 = vpop.f32.mrf.mxu0 }
 0xf4e   : > { %v12436_v19 = vadd.f32 %v5136_v11, %v4419_v37  ;;  %v12462_v6 = vpop.f32.mrf.mxu2 }
 0xf50   : > { %v12458_v37 = vpop.f32.mrf.mxu1 }
 0xf51   : > { %v5429_v41 = vmax.f32 %v12458_v37, %v12462_v6 }
 0xf55   : > { %v12438_v23 = vpop.f32.mrf.mxu0 }
 0xf58   : > { %v12482_v12 = vpop.f32.mrf.mxu1 }
 0xf5d   : > { %v5141_v18 = vpop.f32.mrf.mxu0 }
 0xf5e   : > { %v12442_v61 = vadd.f32 %v5141_v18, %v4424_v14 }
 0xf5f   : > { %5663 = vrot.lane.b32.xlu0 %v13635_v56, %s9362_s26 }
 0xf65   : > { %v12446_v55 = vpop.f32.mrf.mxu0 }
 0xf6d   : > { %v5146_v36 = vpop.f32.mrf.mxu0 }
 0xf6e   : > { %v12450_v62 = vadd.f32 %v5146_v36, %v4429_v32 }
 0xf75   : > { %v12452_v57 = vpop.f32.mrf.mxu0 }
 0xf7d   : > { %v5151_v53 = vpop.f32.mrf.mxu0 }
 0xf7e   : > { %v12456_v21 = vadd.f32 %v5151_v53, %v4434_v13 }
 0xf85   : > { %v12460_v11 = vpop.f32.mrf.mxu0 }
 0xf86   : > { %13636 = vst [vmem:[#allocation39_spill] sm:$0xff] %v12460_v11  ;;  %v5407_v60 = vpop.xlane.xlu2 %5406 }
 0xf87   : > { %v5453_v14 = vsub.f32 %v12378_v0, %v5407_v60  ;;  %v5454_v18 = vsub.f32 %v12375_v51, %v5407_v60 }
 0xf89   : > { %v5485_v56 = vmul.f32 1.442695, %v5453_v14  ;;  %v5487_v32 = vmul.f32 1.442695, %v5454_v18  ;;  %5430 = vmax.xlane.f32.xlu0 %v5429_v41 }
 0xf8b   : > { %8671 = vpow2.f32 %v5485_v56  ;;  %v4444_v56 = vadd.f32 %v12345_v4, %v12317_v27 }
 0xf8c   : > { %8673 = vpow2.f32 %v5487_v32 }
 0xf8d   : > { %v5156_v52 = vpop.f32.mrf.mxu0 }
 0xf8e   : > { %v12470_v36 = vadd.f32 %v5156_v52, %v4439_v3  ;;  %v5410_v63 = vpop.xlane.xlu1 %5409 }
 0xf8f   : > { %v5455_v13 = vsub.f32 %v12384_v20, %v5410_v63  ;;  %v5456_v53 = vsub.f32 %v12382_v9, %v5410_v63  ;;  %v12488_v9 = vpop.f32.mrf.mxu2 }
 0xf90   : > { %13637 = vst [vmem:[#allocation41_spill] sm:$0xff] %v12470_v36 }
 0xf91   : > { %v12474_v46 = vpop.eup %8671  ;;  %v5489_v0 = vmul.f32 1.442695, %v5455_v13  ;;  %v5491_v51 = vmul.f32 1.442695, %v5456_v53 }
 0xf92   : > { %v12476_v60 = vpop.eup %8673 }
 0xf93   : > { %8675 = vpow2.f32 %v5489_v0  ;;  %v5549_v41 = vadd.f32 %v12476_v60, %v12474_v46 }
 0xf94   : > { %8677 = vpow2.f32 %v5491_v51  ;;  %v12498_v51 = vpop.f32.mrf.mxu1 }
 0xf95   : > { %5550 = vadd.xlane.f32.xlu1 %v5549_v41  ;;  %v12480_v54 = vpop.f32.mrf.mxu0 }
 0xf96   : > { %13638 = vst [vmem:[#allocation92_spill] sm:$0xff] %v12480_v54 }
 0xf97   : > { %v12500_v41 = vpop.f32.mrf.mxu2 }
 0xf99   : > { %v12484_v14 = vpop.eup %8675 }
 0xf9a   : > { %v12486_v20 = vpop.eup %8677 }
 0xf9b   : > { %v5552_v18 = vadd.f32 %v12486_v20, %v12484_v14 }
 0xf9d   : > { %5553 = vadd.xlane.f32.xlu2 %v5552_v18  ;;  %v5161_v32 = vpop.f32.mrf.mxu0 }
 0xf9e   : > { %v12494_v3 = vadd.f32 %v5161_v32, %v4444_v56  ;;  %v5416_v52 = vpop.xlane.xlu2 %5415 }
 0xf9f   : > { %v5459_v63 = vsub.f32 %v12397_v30, %v5416_v52  ;;  %v5460_v13 = vsub.f32 %v12395_v8, %v5416_v52  ;;  %v4449_v8 = vadd.f32 %v12353_v50, %v12331_v39  ;;  %v12512_v30 = vpop.f32.mrf.mxu1  ;;  %v12514_v32 = vpop.f32.mrf.mxu2  ;;  %v13642_v50 = vld [vmem:[#allocation82_spill] sm:$0xff] }
 0xfa0   : > { %13639 = vst [vmem:[#allocation93_spill] sm:$0xff] %v12494_v3  ;;  %v5438_v39 = vmax.f32 %v12512_v30, %v12514_v32 }
 0xfa1   : > { %v5497_v53 = vmul.f32 1.442695, %v5459_v63  ;;  %v5499_v0 = vmul.f32 1.442695, %v5460_v13 }
 0xfa3   : > { %8679 = vpow2.f32 %v5497_v53 }
 0xfa4   : > { %8681 = vpow2.f32 %v5499_v0 }
 0xfa5   : > { %v12502_v16 = vpop.f32.mrf.mxu0 }
 0xfa6   : > { %13640 = vst [vmem:[#allocation105_spill] sm:$0xff] %v12502_v16 }
 0xfa9   : > { %v12504_v27 = vpop.eup %8679 }
 0xfaa   : > { %v12506_v4 = vpop.eup %8681 }
 0xfab   : > { %v5558_v18 = vadd.f32 %v12506_v4, %v12504_v27 }
 0xfad   : > { %5559 = vadd.xlane.f32.xlu0 %v5558_v18  ;;  %v5166_v56 = vpop.f32.mrf.mxu0  ;;  %v12526_v18 = vpop.f32.mrf.mxu1 }
 0xfae   : > { %v12516_v52 = vadd.f32 %v5166_v56, %v4449_v8  ;;  %5679 = vrot.lane.b32.xlu1 %v13590_v49, %s9362_s26  ;;  %v5422_v63 = vpop.xlane.xlu2 %5421  ;;  %v5413_v8 = vpop.xlane.xlu0 %5412 }
 0xfaf   : > { %v5463_v13 = vsub.f32 %v12410_v22, %v5422_v63  ;;  %v5464_v53 = vsub.f32 %v12408_v35, %v5422_v63  ;;  %v12530_v49 = vpop.f32.mrf.mxu2 }
 0xfb0   : > { %13641 = vst [vmem:[#allocation96_spill] sm:$0xff] %v12516_v52 }
 0xfb1   : > { %v5505_v0 = vmul.f32 1.442695, %v5463_v13  ;;  %v5507_v16 = vmul.f32 1.442695, %v5464_v53 }
 0xfb3   : > { %8683 = vpow2.f32 %v5505_v0 }
 0xfb4   : > { %8685 = vpow2.f32 %v5507_v16 }
 0xfb5   : > { %5661 = vrot.lane.b32.xlu2 %v13642_v50, %s9362_s26  ;;  %5439 = vmax.xlane.f32.xlu0 %v5438_v39  ;;  %v12540_v53 = vpop.f32.mrf.mxu1 }
 0xfb6   : > { %5677 = vrot.lane.b32.xlu1 %v13575_v34, %s9362_s26  ;;  %s7124_s26 = scalar_lea.sflag [#allocation5], %s9680_s9 }
 0xfb7   : > { %v12542_v34 = vpop.f32.mrf.mxu2 }
 0xfb8   : > { %v5444_v50 = vmax.f32 %v12540_v53, %v12542_v34 }
 0xfb9   : > { %v12532_v35 = vpop.eup %8683 }
 0xfba   : > { %v12534_v22 = vpop.eup %8685 }
 0xfbb   : > { %v5564_v56 = vadd.f32 %v12534_v22, %v12532_v35 }
 0xfbd   : > { %5565 = vadd.xlane.f32.xlu0 %v5564_v56 }
 0xfbe   : > { %v5428_v16 = vpop.xlane.xlu0 %5427 }
 0xfbf   : > { %v5467_v63 = vsub.f32 %v12428_v31, %v5428_v16  ;;  %v5468_v13 = vsub.f32 %v12426_v40, %v5428_v16  ;;  %v5457_v40 = vsub.f32 %v12391_v15, %v5413_v8  ;;  %v5458_v16 = vsub.f32 %v12388_v1, %v5413_v8 }
 0xfc0   : > { %v5432_v15 = vmax.f32 %v12482_v12, %v12488_v9 }
 0xfc1   : > { %v5513_v0 = vmul.f32 1.442695, %v5467_v63  ;;  %v5515_v39 = vmul.f32 1.442695, %v5468_v13  ;;  %v5493_v63 = vmul.f32 1.442695, %v5457_v40  ;;  %v12564_v40 = vpop.f32.mrf.mxu1 }
 0xfc2   : > { %v5495_v13 = vmul.f32 1.442695, %v5458_v16 }
 0xfc3   : > { %8687 = vpow2.f32 %v5513_v0  ;;  %v5419_v0 = vpop.xlane.xlu1 %5418 }
 0xfc4   : > { %8689 = vpow2.f32 %v5515_v39  ;;  %v5462_v3 = vsub.f32 %v12401_v44, %v5419_v0  ;;  %v12568_v44 = vpop.f32.mrf.mxu2 }
 0xfc5   : > { %5445 = vmax.xlane.f32.xlu0 %v5444_v50  ;;  %8691 = vpow2.f32 %v5493_v63  ;;  %v5461_v50 = vsub.f32 %v12404_v5, %v5419_v0  ;;  %v5435_v5 = vmax.f32 %v12498_v51, %v12500_v41  ;;  %v5447_v16 = vmax.f32 %v12564_v40, %v12568_v44  ;;  %v5425_v63 = vpop.xlane.xlu2 %5424 }
 0xfc6   : > { %8693 = vpow2.f32 %v5495_v13  ;;  %v5465_v0 = vsub.f32 %v12420_v43, %v5425_v63 }
 0xfc7   : > { %v5501_v1 = vmul.f32 1.442695, %v5461_v50  ;;  %v5466_v50 = vsub.f32 %v12418_v7, %v5425_v63 }
 0xfc9   : > { %v12546_v52 = vpop.eup %8687  ;;  %8695 = vpow2.f32 %v5501_v1  ;;  %v5509_v1 = vmul.f32 1.442695, %v5465_v0 }
 0xfca   : > { %v12548_v56 = vpop.eup %8689 }
 0xfcb   : > { %v5570_v31 = vadd.f32 %v12548_v56, %v12546_v52  ;;  %v12554_v39 = vpop.eup %8691 }
 0xfcc   : > { %v12557_v47 = vpop.eup %8693 }
 0xfcd   : > { %5571 = vadd.xlane.f32.xlu0 %v5570_v31  ;;  %v5555_v8 = vadd.f32 %v12557_v47, %v12554_v39  ;;  %v5682_v31 = vpop.permute.xlu1 %5681 }
 0xfce   : > { %5763 = vmatpush.bf16.msra.mxu0 %v5682_v31 }
 0xfcf   : > { %v12572_v13 = vpop.eup %8695 }
 0xfd1   : > { %v5664_v45 = vpop.permute.xlu0 %5663 }
 0xfd2   : > { %5715 = vmatpush.bf16.msrb.mxu3 %v5664_v45  ;;  %v5503_v45 = vmul.f32 1.442695, %v5462_v3 }
 0xfd4   : > { %8697 = vpow2.f32 %v5503_v45  ;;  %v5441_v45 = vmax.f32 %v12526_v18, %v12530_v49 }
 0xfd5   : > { %8699 = vpow2.f32 %v5509_v1  ;;  %v12592_v1 = vpop.f32.mrf.mxu2 }
 0xfda   : > { %v12574_v3 = vpop.eup %8697 }
 0xfdb   : > { %v12582_v31 = vpop.eup %8699 }
 0xfde   : > { %5433 = vmax.xlane.f32.xlu2 %v5432_v15  ;;  %v5561_v15 = vadd.f32 %v12574_v3, %v12572_v13 }
 0xfe0   : > { %5556 = vadd.xlane.f32.xlu1 %v5555_v8  ;;  %v5511_v8 = vmul.f32 1.442695, %v5466_v50 }
 0xfe2   : > { %8701 = vpow2.f32 %v5511_v8 }
 0xfe6   : > { %5436 = vmax.xlane.f32.xlu2 %v5435_v5 }
 0xfe8   : > { %5448 = vmax.xlane.f32.xlu1 %v5447_v16  ;;  %v12584_v5 = vpop.eup %8701 }
 0xfe9   : > { %v5567_v7 = vadd.f32 %v12584_v5, %v12582_v31 }
 0xfee   : > { %5562 = vadd.xlane.f32.xlu2 %v5561_v15  ;;  %v12590_v15 = vpop.f32.mrf.mxu1 }
 0xfef   : > { %v5450_v8 = vmax.f32 %v12590_v15, %v12592_v1 }
 0xff6   : > { %5442 = vmax.xlane.f32.xlu2 %v5441_v45 }
 0xffc   : > { %v5431_v16 = vpop.xlane.xlu0 %5430 }
 0xffd   : > { %v5469_v43 = vsub.f32 %v12458_v37, %v5431_v16  ;;  %v5470_v63 = vsub.f32 %v12462_v6, %v5431_v16 }
 0xffe   : > { %5568 = vadd.xlane.f32.xlu2 %v5567_v7 }
 0xfff   : > { %v5517_v0 = vmul.f32 1.442695, %v5469_v43  ;;  %v5519_v50 = vmul.f32 1.442695, %v5470_v63 }
0x1001   : > { %8703 = vpow2.f32 %v5517_v0 }
0x1002   : > { %8705 = vpow2.f32 %v5519_v50 }
0x1006   : > { %5451 = vmax.xlane.f32.xlu2 %v5450_v8 }
0x1007   : > { %v12596_v45 = vpop.eup %8703 }
0x1008   : > { %v12598_v54 = vpop.eup %8705  ;;  %v5551_v6 = vpop.xlane.xlu1 %5550 }
0x1009   : > { %v5573_v37 = vadd.f32 %v12598_v54, %v12596_v45  ;;  %8707 = vrcp.f32 %v5551_v6 }
0x100b   : > { %5574 = vadd.xlane.f32.xlu0 %v5573_v37 }
0x100f   : > { %v8708_v7 = vpop.eup %8707 }
0x1010   : > { %v5554_v16 = vpop.xlane.xlu2 %5553  ;;  %v5613_v63 = vmul.f32 %v8708_v7, %v12474_v46  ;;  %v5614_v37 = vmul.f32 %v8708_v7, %v12476_v60 }
0x1011   : > { %8709 = vrcp.f32 %v5554_v16 }
0x1017   : > { %v8710_v43 = vpop.eup %8709 }
0x1018   : > { %v5615_v0 = vmul.f32 %v8710_v43, %v12484_v14  ;;  %v5662_v50 = vpop.permute.xlu2 %5661  ;;  %v5616_v36 = vmul.f32 %v8710_v43, %v12486_v20 }
0x1019   : > { %5716 = vmatpush.bf16.msrb.mxu3 %v5662_v50 }
0x101a   : > { %v5645_v8 = vpack.c.bf16 %v5615_v0, %v5613_v63  ;;  %v5646_v46 = vpack.c.bf16 %v5616_v36, %v5614_v37 }
0x101c   : > { %5717 = vmatmul.bf16.vlgmr.msrb.gmra.mxu3 %v5645_v8 }
0x1020   : > { %v5680_v29 = vpop.permute.xlu1 %5679  ;;  %v5560_v38 = vpop.xlane.xlu0 %5559 }
0x1021   : > { %5764 = vmatpush.bf16.msra.mxu0 %v5680_v29 }
0x1028   : > { %v5678_v6 = vpop.permute.xlu1 %5677  ;;  %v5440_v11 = vpop.xlane.xlu0 %5439 }
0x1029   : > { %v5475_v16 = vsub.f32 %v12512_v30, %v5440_v11  ;;  %v5476_v33 = vsub.f32 %v12514_v32, %v5440_v11  ;;  %5765 = vmatpush.bf16.msra.mxu0 %v5678_v6 }
0x102b   : > { %v5529_v14 = vmul.f32 1.442695, %v5475_v16  ;;  %v5531_v59 = vmul.f32 1.442695, %v5476_v33 }
0x102c   : > { %5766 = vmatmul.bf16.vlgmr.msra.gmra.mxu0 %v5646_v46 }
0x102d   : > { %8711 = vpow2.f32 %v5529_v14 }
0x102e   : > { %8713 = vpow2.f32 %v5531_v59 }
0x102f   : > { %8715 = vrcp.f32 %v5560_v38 }
0x1030   : > { %v5566_v20 = vpop.xlane.xlu0 %5565 }
0x1033   : > { %v12608_v63 = vpop.eup %8711 }
0x1034   : > { %v12610_v29 = vpop.eup %8713 }
0x1035   : > { %v5582_v60 = vadd.f32 %v12610_v29, %v12608_v63  ;;  %v8716_v59 = vpop.eup %8715 }
0x1036   : > { %v5619_v38 = vmul.f32 %v8716_v59, %v12504_v27  ;;  %v5620_v46 = vmul.f32 %v8716_v59, %v12506_v4 }
0x1037   : > { %5583 = vadd.xlane.f32.xlu0 %v5582_v60 }
0x1038   : > { %v5446_v43 = vpop.xlane.xlu0 %5445 }
0x1039   : > { %v5480_v27 = vsub.f32 %v12542_v34, %v5446_v43 }
0x1051   : > { %v5434_v30 = vpop.xlane.xlu2 %5433 }
0x1052   : > { %v5471_v11 = vsub.f32 %v12482_v12, %v5434_v30  ;;  %v5472_v36 = vsub.f32 %v12488_v9, %v5434_v30  ;;  %v5479_v12 = vsub.f32 %v12540_v53, %v5446_v43 }
0x1053   : > { %v5557_v32 = vpop.xlane.xlu1 %5556 }
0x1054   : > { %v5521_v33 = vmul.f32 1.442695, %v5471_v11  ;;  %v5523_v7 = vmul.f32 1.442695, %v5472_v36  ;;  %8717 = vrcp.f32 %v5557_v32  ;;  %v5537_v32 = vmul.f32 1.442695, %v5479_v12 }
0x1056   : > { %8719 = vpow2.f32 %v5521_v33 }
0x1057   : > { %8721 = vpow2.f32 %v5523_v7 }
0x1058   : > { %8723 = vrcp.f32 %v5566_v20 }
0x1059   : > { %v5437_v0 = vpop.xlane.xlu2 %5436 }
0x105a   : > { %v8718_v50 = vpop.eup %8717  ;;  %v5473_v8 = vsub.f32 %v12498_v51, %v5437_v0  ;;  %v5474_v37 = vsub.f32 %v12500_v41, %v5437_v0 }
0x105b   : > { %v5449_v6 = vpop.xlane.xlu1 %5448  ;;  %v5617_v9 = vmul.f32 %v8718_v50, %v12554_v39  ;;  %v5618_v16 = vmul.f32 %v8718_v50, %v12557_v47 }
0x105c   : > { %v12623_v14 = vpop.eup %8719  ;;  %v5525_v60 = vmul.f32 1.442695, %v5473_v8  ;;  %v5527_v30 = vmul.f32 1.442695, %v5474_v37  ;;  %v5481_v11 = vsub.f32 %v12564_v40, %v5449_v6  ;;  %v5482_v51 = vsub.f32 %v12568_v44, %v5449_v6 }
0x105d   : > { %v12627_v41 = vpop.eup %8721  ;;  %v5647_v53 = vpack.c.bf16 %v5619_v38, %v5617_v9  ;;  %v5648_v36 = vpack.c.bf16 %v5620_v46, %v5618_v16  ;;  %v5539_v40 = vmul.f32 1.442695, %v5480_v27 }
0x105e   : > { %8725 = vpow2.f32 %v5525_v60  ;;  %v5541_v39 = vmul.f32 1.442695, %v5481_v11  ;;  %v5543_v47 = vmul.f32 1.442695, %v5482_v51  ;;  %v5576_v4 = vadd.f32 %v12627_v41, %v12623_v14  ;;  %v8724_v20 = vpop.eup %8723 }
0x105f   : > { %8727 = vpow2.f32 %v5527_v30  ;;  %5722 = vmatmul.bf16.gmra.mxu3 %v5647_v53  ;;  %5771 = vmatmul.bf16.gmra.mxu0 %v5648_v36  ;;  %v5623_v46 = vmul.f32 %v8724_v20, %v12532_v35  ;;  %v5624_v60 = vmul.f32 %v8724_v20, %v12534_v22 }
0x1060   : > { %8729 = vpow2.f32 %v5541_v39  ;;  %5577 = vadd.xlane.f32.xlu1 %v5576_v4 }
0x1061   : > { %8731 = vpow2.f32 %v5543_v47  ;;  %v5563_v44 = vpop.xlane.xlu2 %5562 }
0x1062   : > { %8733 = vrcp.f32 %v5563_v44 }
0x1063   : > { %8735 = vpow2.f32 %v5537_v32 }
0x1064   : > { %v12632_v34 = vpop.eup %8725  ;;  %8737 = vpow2.f32 %v5539_v40 }
0x1065   : > { %v12634_v33 = vpop.eup %8727 }
0x1066   : > { %v12636_v7 = vpop.eup %8729  ;;  %v5579_v59 = vadd.f32 %v12634_v33, %v12632_v34 }
0x1067   : > { %v12640_v43 = vpop.eup %8731 }
0x1068   : > { %v8734_v0 = vpop.eup %8733  ;;  %5580 = vadd.xlane.f32.xlu2 %v5579_v59  ;;  %v5591_v50 = vadd.f32 %v12640_v43, %v12636_v7 }
0x1069   : > { %v5443_v8 = vpop.xlane.xlu2 %5442  ;;  %v5621_v37 = vmul.f32 %v8734_v0, %v12572_v13  ;;  %v5622_v38 = vmul.f32 %v8734_v0, %v12574_v3  ;;  %v12646_v12 = vpop.eup %8735 }
0x106a   : > { %v5477_v6 = vsub.f32 %v12526_v18, %v5443_v8  ;;  %v5478_v9 = vsub.f32 %v12530_v49, %v5443_v8  ;;  %5592 = vadd.xlane.f32.xlu0 %v5591_v50  ;;  %v12650_v16 = vpop.eup %8737  ;;  %v5572_v13 = vpop.xlane.xlu0 %5571 }
0x106b   : > { %v5649_v51 = vpack.c.bf16 %v5623_v46, %v5621_v37  ;;  %v5650_v27 = vpack.c.bf16 %v5624_v60, %v5622_v38  ;;  %v5588_v3 = vadd.f32 %v12650_v16, %v12646_v12 }
0x106c   : > { %v5533_v30 = vmul.f32 1.442695, %v5477_v6  ;;  %v5535_v11 = vmul.f32 1.442695, %v5478_v9 }
0x106e   : > { %8739 = vpow2.f32 %v5533_v30 }
0x106f   : > { %8741 = vpow2.f32 %v5535_v11  ;;  %5727 = vmatmul.bf16.gmra.mxu3 %v5649_v51  ;;  %5776 = vmatmul.bf16.gmra.mxu0 %v5650_v27 }
0x1070   : > { %5589 = vadd.xlane.f32.xlu2 %v5588_v3  ;;  %8743 = vrcp.f32 %v5572_v13 }
0x1071   : > { %v5569_v18 = vpop.xlane.xlu2 %5568 }
0x1072   : > { %8745 = vrcp.f32 %v5569_v18 }
0x1074   : > { %v12656_v49 = vpop.eup %8739 }
0x1075   : > { %v12658_v35 = vpop.eup %8741 }
0x1076   : > { %v5585_v22 = vadd.f32 %v12658_v35, %v12656_v49  ;;  %v8744_v53 = vpop.eup %8743 }
0x1077   : > { %v5627_v44 = vmul.f32 %v8744_v53, %v12546_v52  ;;  %v5628_v20 = vmul.f32 %v8744_v53, %v12548_v56  ;;  %v7981_v52 = vld [vmem:[#allocation17 + $0x30] sm:$0xff]  ;;  %v12674_v56 = vpop.f32.mrf.mxu0 }
0x1078   : > { %v8746_v36 = vpop.eup %8745  ;;  %5586 = vadd.xlane.f32.xlu1 %v5585_v22 }
0x1079   : > { %v5452_v39 = vpop.xlane.xlu2 %5451  ;;  %v5625_v47 = vmul.f32 %v8746_v36, %v12582_v31  ;;  %v5626_v4 = vmul.f32 %v8746_v36, %v12584_v5 }
0x107a   : > { %v5483_v32 = vsub.f32 %v12590_v15, %v5452_v39  ;;  %v5484_v40 = vsub.f32 %v12592_v1, %v5452_v39  ;;  %v7982_v15 = vld [vmem:[#allocation17 + $0x38] sm:$0xff] }
0x107b   : > { %v5651_v50 = vpack.c.bf16 %v5627_v44, %v5625_v47  ;;  %v5652_v8 = vpack.c.bf16 %v5628_v20, %v5626_v4  ;;  %5862 = vmatpush.bf16.msrb.mxu1 %v7982_v15 }
0x107c   : > { %v5545_v59 = vmul.f32 1.442695, %v5483_v32  ;;  %v5547_v0 = vmul.f32 1.442695, %v5484_v40 }
0x107e   : > { %8747 = vpow2.f32 %v5545_v59  ;;  %v5575_v11 = vpop.xlane.xlu0 %5574 }
0x107f   : > { %8749 = vpow2.f32 %v5547_v0  ;;  %5732 = vmatmul.bf16.gmra.mxu3 %v5651_v50  ;;  %5781 = vmatmul.bf16.gmra.mxu0 %v5652_v8 }
0x1080   : > { %5863 = vmatpush.bf16.msrb.mxu1 %v7981_v52  ;;  %8751 = vrcp.f32 %v5575_v11 }
0x1084   : > { %v12668_v37 = vpop.eup %8747 }
0x1085   : > { %v12670_v31 = vpop.eup %8749 }
0x1086   : > { %v5594_v5 = vadd.f32 %v12670_v31, %v12668_v37  ;;  %v8752_v27 = vpop.eup %8751 }
0x1087   : > { %v5629_v3 = vmul.f32 %v8752_v27, %v12596_v45  ;;  %v5630_v22 = vmul.f32 %v8752_v27, %v12598_v54 }
0x1088   : > { %5595 = vadd.xlane.f32.xlu1 %v5594_v5 }
0x109f   : > { %v5718_v1 = vpop.f32.mrf.mxu3 }
0x10a7   : > { %v5720_v6 = vpop.f32.mrf.mxu3 }
0x10a9   : > { %v5767_v38 = vpop.f32.mrf.mxu0 }
0x10aa   : > { %v5768_v46 = vadd.f32 %v5767_v38, %v5718_v1  ;;  %v5584_v32 = vpop.xlane.xlu0 %5583 }
0x10b1   : > { %v5769_v9 = vpop.f32.mrf.mxu0 }
0x10b2   : > { %v5770_v60 = vadd.f32 %v5769_v9, %v5720_v6 }
0x10b4   : > { %v5807_v30 = vpack.c.bf16 %v5770_v60, %v5768_v46 }
0x10b6   : > { %7769 = vmatmul.msk.bf16.vlgmr.msrb.gmra.mxu1 %vm3017_vm0, %v5807_v30 }
0x10d3   : > { %v5578_v51 = vpop.xlane.xlu1 %5577 }
0x10d4   : > { %8753 = vrcp.f32 %v5578_v51 }
0x10da   : > { %v8754_v13 = vpop.eup %8753 }
0x10db   : > { %v5631_v18 = vmul.f32 %v8754_v13, %v12623_v14  ;;  %v5632_v53 = vmul.f32 %v8754_v13, %v12627_v41  ;;  %v5581_v39 = vpop.xlane.xlu2 %5580 }
0x10dc   : > { %v5772_v36 = vpop.f32.mrf.mxu0  ;;  %8755 = vrcp.f32 %v5581_v39 }
0x10dd   : > { %v5653_v47 = vpack.c.bf16 %v5631_v18, %v5629_v3  ;;  %v5654_v4 = vpack.c.bf16 %v5632_v53, %v5630_v22  ;;  %8757 = vrcp.f32 %v5584_v32  ;;  %v5593_v53 = vpop.xlane.xlu0 %5592 }
0x10df   : > { %5737 = vmatmul.bf16.gmra.mxu3 %v5653_v47  ;;  %5786 = vmatmul.bf16.gmra.mxu0 %v5654_v4 }
0x10e2   : > { %v5723_v40 = vpop.f32.mrf.mxu3  ;;  %v8756_v20 = vpop.eup %8755 }
0x10e3   : > { %v8758_v59 = vpop.eup %8757  ;;  %v5633_v45 = vmul.f32 %v8756_v20, %v12632_v34  ;;  %v5634_v14 = vmul.f32 %v8756_v20, %v12634_v33  ;;  %v5773_v0 = vadd.f32 %v5772_v36, %v5723_v40  ;;  %v5590_v6 = vpop.xlane.xlu2 %5589 }
0x10e4   : > { %v5774_v44 = vpop.f32.mrf.mxu0  ;;  %v5635_v50 = vmul.f32 %v8758_v59, %v12608_v63  ;;  %v5636_v8 = vmul.f32 %v8758_v59, %v12610_v29 }
0x10e6   : > { %v5655_v1 = vpack.c.bf16 %v5635_v50, %v5633_v45  ;;  %v5656_v38 = vpack.c.bf16 %v5636_v8, %v5634_v14 }
0x10ea   : > { %v5725_v54 = vpop.f32.mrf.mxu3 }
0x10eb   : > { %v5775_v41 = vadd.f32 %v5774_v44, %v5725_v54  ;;  %v5587_v15 = vpop.xlane.xlu1 %5586 }
0x10ec   : > { %v5777_v5 = vpop.f32.mrf.mxu0  ;;  %8759 = vrcp.f32 %v5587_v15 }
0x10ed   : > { %v5808_v52 = vpack.c.bf16 %v5775_v41, %v5773_v0  ;;  %8761 = vrcp.f32 %v5590_v6 }
0x10ef   : > { %5742 = vmatmul.bf16.gmra.mxu3 %v5655_v1  ;;  %5791 = vmatmul.bf16.gmra.mxu0 %v5656_v38 }
0x10f0   : > { %7770 = vmatmul.msk.bf16.gmra.mxu1 %vm3017_vm0, %v5808_v52  ;;  %v13645_v52 = vld [vmem:[#allocation38_spill] sm:$0xff] }
0x10f2   : > { %v5728_v34 = vpop.f32.mrf.mxu3  ;;  %v8760_v33 = vpop.eup %8759 }
0x10f3   : > { %v8762_v46 = vpop.eup %8761  ;;  %v5637_v63 = vmul.f32 %v8760_v33, %v12656_v49  ;;  %v5638_v29 = vmul.f32 %v8760_v33, %v12658_v35  ;;  %v5778_v30 = vadd.f32 %v5777_v5, %v5728_v34 }
0x10f4   : > { %v5779_v9 = vpop.f32.mrf.mxu0  ;;  %v5639_v51 = vmul.f32 %v8762_v46, %v12646_v12  ;;  %v5640_v27 = vmul.f32 %v8762_v46, %v12650_v16 }
0x10f6   : > { %v5657_v18 = vpack.c.bf16 %v5639_v51, %v5637_v63  ;;  %v5658_v22 = vpack.c.bf16 %v5640_v27, %v5638_v29  ;;  %v4421_v29 = vadd.f32 %v12267_v10, %v12217_v2 }
0x10f8   : > { %v5174_v51 = vadd.f32 %v12438_v23, %v4421_v29 }
0x10fa   : > { %v5730_v60 = vpop.f32.mrf.mxu3 }
0x10fb   : > { %v5780_v11 = vadd.f32 %v5779_v9, %v5730_v60  ;;  %v5596_v13 = vpop.xlane.xlu1 %5595 }
0x10fc   : > { %8763 = vrcp.f32 %v5596_v13  ;;  %v5782_v36 = vpop.f32.mrf.mxu0 }
0x10fd   : > { %v5809_v3 = vpack.c.bf16 %v5780_v11, %v5778_v30  ;;  %8765 = vrcp.f32 %v5593_v53  ;;  %v13646_v30 = vld [vmem:[#allocation42_spill] sm:$0xff] }
0x10ff   : > { %5747 = vmatmul.bf16.gmra.mxu3 %v5657_v18  ;;  %5796 = vmatmul.bf16.gmra.mxu0 %v5658_v22  ;;  %v13647_v22 = vld [vmem:[#allocation43_spill] sm:$0xff] }
0x1100   : > { %7771 = vmatmul.msk.bf16.gmra.mxu1 %vm3017_vm0, %v5809_v3 }
0x1102   : > { %v5733_v49 = vpop.f32.mrf.mxu3  ;;  %v8764_v35 = vpop.eup %8763 }
0x1103   : > { %v8766_v39 = vpop.eup %8765  ;;  %v5643_v47 = vmul.f32 %v8764_v35, %v12668_v37  ;;  %v5644_v12 = vmul.f32 %v8764_v35, %v12670_v31  ;;  %v5783_v32 = vadd.f32 %v5782_v36, %v5733_v49  ;;  %v12699_v37 = vld [vmem:[%s13643_s7] ss:$0 sm:$0xff]  ;;  %s13679_s7 = sld [smem:[#allocation33_spill]] }
0x1104   : > { %v5784_v16 = vpop.f32.mrf.mxu0  ;;  %v5641_v44 = vmul.f32 %v8766_v39, %v12636_v7  ;;  %v5642_v20 = vmul.f32 %v8766_v39, %v12640_v43  ;;  %v4416_v7 = vadd.f32 %v12245_v17, %v12197_v26  ;;  %v13644_v43 = vld [vmem:[#allocation37_spill] sm:$0xff] }
0x1106   : > { %v5659_v45 = vpack.c.bf16 %v5643_v47, %v5641_v44  ;;  %v5660_v14 = vpack.c.bf16 %v5644_v12, %v5642_v20  ;;  %v5172_v50 = vadd.f32 %v12424_v48, %v4416_v7  ;;  %v4426_v47 = vadd.f32 %v12294_v25, %v12242_v42 }
0x1109   : > { %s7906_s27 = sshll.u32 %s13679_s7, 5 }
0x110a   : > { %v5735_v4 = vpop.f32.mrf.mxu3  ;;  %s7134_s20 = sadd.s32 %s13680_s16, %s7906_s27 }
0x110b   : > { %v5785_v40 = vadd.f32 %v5784_v16, %v5735_v4  ;;  %v13648_v16 = vld [vmem:[#allocation45_spill] sm:$0xff]  ;;  %s7907_s13 = sshll.u32 %s7134_s20, 3 }
0x110d   : > { %v5810_v59 = vpack.c.bf16 %v5785_v40, %v5783_v32  ;;  %v5176_v32 = vadd.f32 %v12446_v55, %v4426_v47 }
0x110f   : > { %5752 = vmatmul.bf16.gmra.mxu3 %v5659_v45  ;;  %5801 = vmatmul.bf16.gmra.mxu0 %v5660_v14  ;;  %v13649_v45 = vld [vmem:[#allocation46_spill] sm:$0xff] }
0x1110   : > { %7772 = vmatmul.msk.bf16.gmra.mxu1 %vm3017_vm0, %v5810_v59 }
0x1133   : > { %v5865_v31 = vpop.f32.mrf.mxu1 }
0x1134   : > { %v5905_v54 = vadd.f32 %v5865_v31, %v12416_v28 }
0x1136   : > { %v5925_v0 = vadd.f32 %v12699_v37, %v5905_v54 }
0x1138   : > { %v12706_v41 = vadd.f32 %v5925_v0, %v13644_v43 }
0x113a   : > { %5959 = vadd.xlane.f32.xlu2 %v12706_v41 }
0x113b   : > { %v5867_v8 = vpop.f32.mrf.mxu1 }
0x113c   : > { %v5906_v5 = vadd.f32 %v5867_v8, %v5172_v50  ;;  %v13650_v50 = vld [vmem:[#allocation59_spill] sm:$0xff] }
0x113e   : > { %v5926_v15 = vadd.f32 %v12699_v37, %v5906_v5 }
0x1140   : > { %v12712_v1 = vadd.f32 %v5926_v15, %v13645_v52 }
0x1142   : > { %5961 = vadd.xlane.f32.xlu0 %v12712_v1 }
0x115c   : > { %v5787_v28 = vpop.f32.mrf.mxu0 }
0x1162   : > { %v5738_v38 = vpop.f32.mrf.mxu3 }
0x1163   : > { %v5788_v17 = vadd.f32 %v5787_v28, %v5738_v38 }
0x1164   : > { %v5789_v6 = vpop.f32.mrf.mxu0 }
0x116a   : > { %v5740_v26 = vpop.f32.mrf.mxu3 }
0x116b   : > { %v5790_v34 = vadd.f32 %v5789_v6, %v5740_v26  ;;  %v13651_v26 = vld [vmem:[#allocation36_spill] sm:$0xff] }
0x116c   : > { %v5792_v33 = vpop.f32.mrf.mxu0 }
0x116d   : > { %v5811_v9 = vpack.c.bf16 %v5790_v34, %v5788_v17  ;;  %v5870_v48 = vpop.f32.mrf.mxu1 }
0x116e   : > { %v5907_v46 = vadd.f32 %v5870_v48, %v12436_v19 }
0x116f   : > { %7773 = vmatmul.msk.bf16.gmra.mxu1 %vm3017_vm0, %v5811_v9 }
0x1170   : > { %v5927_v63 = vadd.f32 %v12699_v37, %v5907_v46 }
0x1172   : > { %v5743_v60 = vpop.f32.mrf.mxu3  ;;  %v12721_v11 = vadd.f32 %v5927_v63, %v13646_v30 }
0x1173   : > { %v5793_v36 = vadd.f32 %v5792_v33, %v5743_v60 }
0x1174   : > { %5963 = vadd.xlane.f32.xlu1 %v12721_v11  ;;  %v5794_v27 = vpop.f32.mrf.mxu0 }
0x1175   : > { %v5872_v13 = vpop.f32.mrf.mxu1 }
0x1176   : > { %v5908_v3 = vadd.f32 %v5872_v13, %v5174_v51 }
0x1178   : > { %v5928_v19 = vadd.f32 %v12699_v37, %v5908_v3 }
0x117a   : > { %v5745_v18 = vpop.f32.mrf.mxu3  ;;  %v12727_v53 = vadd.f32 %v5928_v19, %v13647_v22 }
0x117b   : > { %v5795_v49 = vadd.f32 %v5794_v27, %v5745_v18 }
0x117c   : > { %5965 = vadd.xlane.f32.xlu2 %v12727_v53  ;;  %v5797_v2 = vpop.f32.mrf.mxu0 }
0x117d   : > { %v5812_v10 = vpack.c.bf16 %v5795_v49, %v5793_v36  ;;  %v5875_v35 = vpop.f32.mrf.mxu1  ;;  %v13653_v36 = vld [vmem:[#allocation87_spill] sm:$0xff]  ;;  %v13654_v49 = vld [vmem:[#allocation89_spill] sm:$0xff] }
0x117e   : > { %v5909_v23 = vadd.f32 %v5875_v35, %v12442_v61 }
0x117f   : > { %7774 = vmatmul.msk.bf16.gmra.mxu1 %vm3017_vm0, %v5812_v10  ;;  %v13655_v10 = vld [vmem:[#allocation61_spill] sm:$0xff] }
0x1180   : > { %v5929_v39 = vadd.f32 %v12699_v37, %v5909_v23  ;;  %v13656_v23 = vld [vmem:[#allocation39_spill] sm:$0xff] }
0x1182   : > { %v5748_v12 = vpop.f32.mrf.mxu3  ;;  %v12736_v4 = vadd.f32 %v5929_v39, %v13648_v16 }
0x1183   : > { %v5798_v31 = vadd.f32 %v5797_v2, %v5748_v12  ;;  %v4436_v2 = vadd.f32 %v13654_v49, %v13653_v36  ;;  %v7827_v36 = vld [vmem:[#allocation18 + $0x60] sm:$0xf]  ;;  %v7996_v49 = vld [vmem:[#allocation18 + $0x64] sm:$0xf0] }
0x1184   : > { %5967 = vadd.xlane.f32.xlu0 %v12736_v4  ;;  %v5799_v44 = vpop.f32.mrf.mxu0 }
0x1185   : > { %v5877_v40 = vpop.f32.mrf.mxu1  ;;  %v5180_v39 = vadd.f32 %v13656_v23, %v4436_v2  ;;  %v7995_v2 = vld [vmem:[#allocation18 + $0x64] sm:$0xf]  ;;  %v7829_v23 = vld [vmem:[#allocation18 + $0x68] sm:$0xf0] }
0x1186   : > { %v5910_v20 = vadd.f32 %v5877_v40, %v5176_v32 }
0x1188   : > { %v5930_v61 = vadd.f32 %v12699_v37, %v5910_v20 }
0x118a   : > { %v5750_v59 = vpop.f32.mrf.mxu3  ;;  %v12742_v14 = vadd.f32 %v5930_v61, %v13649_v45  ;;  %v13658_v45 = vld [vmem:[#allocation41_spill] sm:$0xff] }
0x118b   : > { %v5800_v54 = vadd.f32 %v5799_v44, %v5750_v59  ;;  %v13657_v44 = vld [vmem:[#allocation62_spill] sm:$0xff] }
0x118c   : > { %5969 = vadd.xlane.f32.xlu1 %v12742_v14  ;;  %v5802_v55 = vpop.f32.mrf.mxu0 }
0x118d   : > { %v5813_v42 = vpack.c.bf16 %v5800_v54, %v5798_v31  ;;  %v5880_v25 = vpop.f32.mrf.mxu1 }
0x118e   : > { %v5911_v0 = vadd.f32 %v5880_v25, %v12450_v62  ;;  %v4431_v62 = vadd.f32 %v12305_v24, %v12264_v58  ;;  %v13652_v24 = vld [vmem:[#allocation60_spill] sm:$0xff] }
0x118f   : > { %7775 = vmatmul.msk.bf16.gmra.mxu1 %vm3017_vm0, %v5813_v42 }
0x1190   : > { %v5931_v7 = vadd.f32 %v12699_v37, %v5911_v0  ;;  %v5178_v33 = vadd.f32 %v12452_v57, %v4431_v62  ;;  %v13659_v0 = vld [vmem:[#allocation88_spill] sm:$0xff] }
0x1192   : > { %v5753_v43 = vpop.f32.mrf.mxu3  ;;  %v12749_v8 = vadd.f32 %v5931_v7, %v13650_v50 }
0x1193   : > { %v5803_v52 = vadd.f32 %v5802_v55, %v5753_v43  ;;  %v13660_v55 = vld [vmem:[#allocation90_spill] sm:$0xff]  ;;  %v13661_v43 = vld [vmem:[#allocation65_spill] sm:$0xff] }
0x1194   : > { %5971 = vadd.xlane.f32.xlu1 %v12749_v8  ;;  %v5804_v5 = vpop.f32.mrf.mxu0  ;;  %v4441_v7 = vadd.f32 %v13660_v55, %v13659_v0  ;;  %v7992_v0 = vld [vmem:[#allocation18 + $0x44] sm:$0xf0]  ;;  %v7991_v55 = vld [vmem:[#allocation18 + $0x44] sm:$0xf] }
0x1195   : > { %v5882_v34 = vpop.f32.mrf.mxu1 }
0x1196   : > { %v5912_v48 = vadd.f32 %v5882_v34, %v5178_v33  ;;  %v13663_v34 = vld [vmem:[#allocation66_spill] sm:$0xff] }
0x1198   : > { %v5932_v29 = vadd.f32 %v12699_v37, %v5912_v48 }
0x119a   : > { %v5755_v15 = vpop.f32.mrf.mxu3  ;;  %v12768_v30 = vadd.f32 %v5932_v29, %v13652_v24  ;;  %v7998_v24 = vld [vmem:[#allocation18 + $0x74] sm:$0xf0] }
0x119b   : > { %v5805_v28 = vadd.f32 %v5804_v5, %v5755_v15  ;;  %v13662_v5 = vld [vmem:[#allocation92_spill] sm:$0xff] }
0x119c   : > { %v5182_v15 = vadd.f32 %v13662_v5, %v4441_v7 }
0x119d   : > { %v5814_v38 = vpack.c.bf16 %v5805_v28, %v5803_v52 }
0x119f   : > { %7776 = vmatmul.msk.bf16.gmra.mxu1 %vm3017_vm0, %v5814_v38 }
0x11ad   : > { %v5960_v6 = vpop.xlane.xlu2 %5959 }
0x11ae   : > { %v5991_v17 = vmul.f32 %v5960_v6, %v13651_v26 }
0x11b0   : > { %v12758_v9 = vsub.f32 %v12706_v41, %v5991_v17 }
0x11b2   : > { %v6023_v46 = vmul.f32 %v12758_v9, %v12758_v9 }
0x11b4   : > { %6039 = vadd.xlane.f32.xlu2 %v6023_v46 }
0x11b5   : > { %v5962_v63 = vpop.xlane.xlu0 %5961 }
0x11b6   : > { %v5992_v60 = vmul.f32 %v5962_v63, %v13651_v26  ;;  %v13664_v63 = vld [vmem:[#allocation93_spill] sm:$0xff] }
0x11b8   : > { %v12765_v58 = vsub.f32 %v12712_v1, %v5992_v60  ;;  %v7835_v60 = vld [vmem:[#allocation18 + $0x70] sm:$0xf] }
0x11ba   : > { %v6024_v57 = vmul.f32 %v12765_v58, %v12765_v58 }
0x11bc   : > { %5973 = vadd.xlane.f32.xlu2 %v12768_v30  ;;  %6041 = vadd.xlane.f32.xlu0 %v6024_v57  ;;  %v7997_v57 = vld [vmem:[#allocation18 + $0x74] sm:$0xf] }
0x11e7   : > { %v5964_v41 = vpop.xlane.xlu1 %5963 }
0x11e8   : > { %v5993_v51 = vmul.f32 %v5964_v41, %v13651_v26  ;;  %v7836_v41 = vor.u32 %v7998_v24, %v7835_v60  ;;  %v7795_v60 = vld [vmem:[#allocation18 + $0x20] sm:$0xf]  ;;  %v7988_v24 = vld [vmem:[#allocation18 + $0x24] sm:$0xf0] }
0x11ea   : > { %v12775_v27 = vsub.f32 %v12721_v11, %v5993_v51  ;;  %v7837_v51 = vld [vmem:[#allocation18 + $0x78] sm:$0xf0]  ;;  %6427 = vmatpush.bf16.msra.mxu2 %v7836_v41  ;;  %v7796_v41 = vor.u32 %v7988_v24, %v7795_v60 }
0x11ec   : > { %v5885_v13 = vpop.f32.mrf.mxu1  ;;  %v6025_v1 = vmul.f32 %v12775_v27, %v12775_v27 }
0x11ed   : > { %v5913_v3 = vadd.f32 %v5885_v13, %v12456_v21 }
0x11ee   : > { %6043 = vadd.xlane.f32.xlu0 %v6025_v1  ;;  %v7840_v1 = vor.u32 %v7997_v57, %v7837_v51  ;;  %v7987_v57 = vld [vmem:[#allocation18 + $0x24] sm:$0xf]  ;;  %v7797_v51 = vld [vmem:[#allocation18 + $0x28] sm:$0xf0] }
0x11ef   : > { %v5933_v19 = vadd.f32 %v12699_v37, %v5913_v3  ;;  %v5966_v18 = vpop.xlane.xlu2 %5965  ;;  %v13666_v3 = vld [vmem:[#allocation91_spill] sm:$0xff] }
0x11f0   : > { %v5994_v22 = vmul.f32 %v5966_v18, %v13651_v26  ;;  %v13667_v18 = vld [vmem:[#allocation73_spill] sm:$0xff]  ;;  %6476 = vmatpush.bf16.msra.mxu3 %v7840_v1  ;;  %v7787_v1 = vld [vmem:[#allocation18 + $0x10] sm:$0xf] }
0x11f1   : > { %v12785_v35 = vadd.f32 %v5933_v19, %v13655_v10  ;;  %v7828_v10 = vor.u32 %v7996_v49, %v7827_v36 }
0x11f2   : > { %v12788_v11 = vsub.f32 %v12727_v53, %v5994_v22 }
0x11f3   : > { %5975 = vadd.xlane.f32.xlu2 %v12785_v35  ;;  %6428 = vmatpush.bf16.msra.mxu2 %v7828_v10  ;;  %v7779_v10 = vld [vmem:[#allocation18] sm:$0xf] }
0x11f4   : > { %v5887_v21 = vpop.f32.mrf.mxu1  ;;  %v6026_v47 = vmul.f32 %v12788_v11, %v12788_v11 }
0x11f5   : > { %v5914_v12 = vadd.f32 %v5887_v21, %v5180_v39  ;;  %v13668_v39 = vld [vmem:[#allocation105_spill] sm:$0xff] }
0x11f6   : > { %6045 = vadd.xlane.f32.xlu1 %v6026_v47  ;;  %v7832_v47 = vor.u32 %v7995_v2, %v7829_v23  ;;  %v7984_v23 = vld [vmem:[#allocation18 + $0x4] sm:$0xf0] }
0x11f7   : > { %v5934_v16 = vadd.f32 %v12699_v37, %v5914_v12  ;;  %v5968_v32 = vpop.xlane.xlu0 %5967 }
0x11f8   : > { %v5995_v40 = vmul.f32 %v5968_v32, %v13651_v26  ;;  %6477 = vmatpush.bf16.msra.mxu3 %v7832_v47  ;;  %v7819_v32 = vld [vmem:[#allocation18 + $0x50] sm:$0xf]  ;;  %v7780_v47 = vor.u32 %v7984_v23, %v7779_v10 }
0x11f9   : > { %v12797_v20 = vadd.f32 %v5934_v16, %v13657_v44  ;;  %v7993_v44 = vld [vmem:[#allocation18 + $0x54] sm:$0xf] }
0x11fa   : > { %v12800_v53 = vsub.f32 %v12736_v4, %v5995_v40  ;;  %v7994_v40 = vld [vmem:[#allocation18 + $0x54] sm:$0xf0] }
0x11fb   : > { %5977 = vadd.xlane.f32.xlu0 %v12797_v20 }
0x11fc   : > { %v5890_v61 = vpop.f32.mrf.mxu1  ;;  %v6027_v59 = vmul.f32 %v12800_v53, %v12800_v53 }
0x11fd   : > { %v5915_v31 = vadd.f32 %v5890_v61, %v13658_v45  ;;  %v7820_v61 = vor.u32 %v7994_v40, %v7819_v32 }
0x11fe   : > { %6047 = vadd.xlane.f32.xlu1 %v6027_v59  ;;  %v7821_v59 = vld [vmem:[#allocation18 + $0x58] sm:$0xf0] }
0x11ff   : > { %v5935_v54 = vadd.f32 %v12699_v37, %v5915_v31  ;;  %v5970_v42 = vpop.xlane.xlu1 %5969  ;;  %v7824_v31 = vor.u32 %v7993_v44, %v7821_v59  ;;  %6429 = vmatpush.bf16.msra.mxu2 %v7820_v61 }
0x1200   : > { %v5996_v25 = vmul.f32 %v5970_v42, %v13651_v26 }
0x1201   : > { %v12811_v4 = vadd.f32 %v5935_v54, %v13661_v43  ;;  %v13669_v54 = vld [vmem:[#allocation74_spill] sm:$0xff]  ;;  %6478 = vmatpush.bf16.msra.mxu3 %v7824_v31  ;;  %v7813_v43 = vld [vmem:[#allocation18 + $0x48] sm:$0xf0] }
0x1202   : > { %v12814_v50 = vsub.f32 %v12742_v14, %v5996_v25  ;;  %v7811_v25 = vld [vmem:[#allocation18 + $0x40] sm:$0xf]  ;;  %v7816_v5 = vor.u32 %v7991_v55, %v7813_v43 }
0x1203   : > { %5979 = vadd.xlane.f32.xlu0 %v12811_v4  ;;  %v7812_v7 = vor.u32 %v7992_v0, %v7811_v25 }
0x1204   : > { %v5892_v52 = vpop.f32.mrf.mxu1  ;;  %v6028_v28 = vmul.f32 %v12814_v50, %v12814_v50 }
0x1205   : > { %v5916_v38 = vadd.f32 %v5892_v52, %v5182_v15  ;;  %6430 = vmatpush.bf16.msra.mxu2 %v7812_v7  ;;  %v13670_v52 = vld [vmem:[#allocation96_spill] sm:$0xff]  ;;  %6479 = vmatpush.bf16.msra.mxu3 %v7816_v5 }
0x1206   : > { %6049 = vadd.xlane.f32.xlu2 %v6028_v28 }
0x1207   : > { %v5936_v6 = vadd.f32 %v12699_v37, %v5916_v38  ;;  %v5972_v62 = vpop.xlane.xlu1 %5971  ;;  %v7803_v38 = vld [vmem:[#allocation18 + $0x30] sm:$0xf] }
0x1208   : > { %v5997_v17 = vmul.f32 %v5972_v62, %v13651_v26  ;;  %v7989_v62 = vld [vmem:[#allocation18 + $0x34] sm:$0xf] }
0x1209   : > { %v12823_v33 = vadd.f32 %v5936_v6, %v13663_v34  ;;  %v7990_v6 = vld [vmem:[#allocation18 + $0x34] sm:$0xf0]  ;;  %v7805_v34 = vld [vmem:[#allocation18 + $0x38] sm:$0xf0] }
0x120a   : > { %v12826_v14 = vsub.f32 %v12749_v8, %v5997_v17  ;;  %v13665_v8 = vld [vmem:[#allocation85_spill] sm:$0xff]  ;;  %v7804_v17 = vor.u32 %v7990_v6, %v7803_v38  ;;  %v12862_v6 = vld [vmem:[%s13672_s3] ss:$0 sm:$0xff] }
0x120b   : > { %5981 = vadd.xlane.f32.xlu1 %v12823_v33  ;;  %v4446_v19 = vadd.f32 %v13666_v3, %v13665_v8  ;;  %v7986_v8 = vld [vmem:[#allocation18 + $0x14] sm:$0xf0]  ;;  %v7985_v3 = vld [vmem:[#allocation18 + $0x14] sm:$0xf] }
0x120c   : > { %v5895_v48 = vpop.f32.mrf.mxu1  ;;  %v6029_v46 = vmul.f32 %v12826_v14, %v12826_v14  ;;  %6431 = vmatpush.bf16.msra.mxu2 %v7804_v17 }
0x120d   : > { %v5917_v29 = vadd.f32 %v5895_v48, %v13664_v63  ;;  %v5184_v21 = vadd.f32 %v13668_v39, %v4446_v19  ;;  %v13671_v63 = vld [vmem:[#allocation76_spill] sm:$0xff]  ;;  %v7788_v19 = vor.u32 %v7986_v8, %v7787_v1  ;;  %v13675_v8 = vld [vmem:[#allocation47_spill] sm:$0xff] }
0x120e   : > { %6051 = vadd.xlane.f32.xlu2 %v6029_v46  ;;  %v7808_v46 = vor.u32 %v7989_v62, %v7805_v34  ;;  %v7983_v39 = vld [vmem:[#allocation18 + $0x4] sm:$0xf] }
0x120f   : > { %v5937_v13 = vadd.f32 %v12699_v37, %v5917_v29 }
0x1210   : > { %6480 = vmatpush.bf16.msra.mxu3 %v7808_v46  ;;  %6432 = vmatpush.bf16.msra.mxu2 %v7796_v41 }
0x1211   : > { %v12836_v22 = vadd.f32 %v5937_v13, %v13667_v18  ;;  %v7800_v13 = vor.u32 %v7987_v57, %v7797_v51  ;;  %v7789_v18 = vld [vmem:[#allocation18 + $0x18] sm:$0xf0] }
0x1212   : > { %v7792_v49 = vor.u32 %v7985_v3, %v7789_v18 }
0x1213   : > { %5983 = vadd.xlane.f32.xlu1 %v12836_v22 }
0x1214   : > { %v5897_v12 = vpop.f32.mrf.mxu1  ;;  %6481 = vmatpush.bf16.msra.mxu3 %v7800_v13  ;;  %6433 = vmatpush.bf16.msra.mxu2 %v7788_v19 }
0x1215   : > { %v5918_v16 = vadd.f32 %v5897_v12, %v5184_v21  ;;  %v7781_v12 = vld [vmem:[#allocation18 + $0x8] sm:$0xf0] }
0x1217   : > { %v5938_v45 = vadd.f32 %v12699_v37, %v5918_v16  ;;  %v7784_v16 = vor.u32 %v7983_v39, %v7781_v12 }
0x1218   : > { %6482 = vmatpush.bf16.msra.mxu3 %v7792_v49  ;;  %6434 = vmatpush.bf16.msra.mxu2 %v7780_v47 }
0x1219   : > { %v12842_v42 = vadd.f32 %v5938_v45, %v13669_v54 }
0x121b   : > { %5985 = vadd.xlane.f32.xlu2 %v12842_v42 }
0x121c   : > { %v5900_v15 = vpop.f32.mrf.mxu1  ;;  %6483 = vmatpush.bf16.msra.mxu3 %v7784_v16 }
0x121d   : > { %v5919_v28 = vadd.f32 %v5900_v15, %v13670_v52 }
0x121f   : > { %v5939_v48 = vadd.f32 %v12699_v37, %v5919_v28 }
0x1221   : > { %v12848_v29 = vadd.f32 %v5939_v48, %v13671_v63  ;;  %v12868_v48 = vld [vmem:[%s13673_s23] ss:$0 sm:$0xff] }
0x1223   : > { %5987 = vadd.xlane.f32.xlu2 %v12848_v29 }
0x1224   : > { %v5902_v18 = vpop.f32.mrf.mxu1 }
0x1227   : > { %v6040_v36 = vpop.xlane.xlu2 %6039 }
0x1228   : > { %v6071_v2 = vmul.f32 %v6040_v36, %v13651_v26 }
0x122a   : > { %v6087_v21 = vadd.f32 1e-05, %v6071_v2 }
0x122c   : > { %8767 = vrsqrt.f32 %v6087_v21  ;;  %vm6109_vm7 = vweird.f32 %v6087_v21 }
0x122f   : > { %v5974_v32 = vpop.xlane.xlu2 %5973  ;;  %v6042_v40 = vpop.xlane.xlu0 %6041 }
0x1230   : > { %v5998_v44 = vmul.f32 %v5974_v32, %v13651_v26  ;;  %v6072_v61 = vmul.f32 %v6042_v40, %v13651_v26 }
0x1232   : > { %v8768_v59 = vpop.eup %8767  ;;  %v12855_v45 = vsub.f32 %v12768_v30, %v5998_v44  ;;  %v6088_v31 = vadd.f32 1e-05, %v6072_v61 }
0x1233   : > { %v6104_v54 = vmul.f32 %v8768_v59, %v6087_v21  ;;  %vm6110_vm0 = vweird.f32 %v8768_v59 }
0x1234   : > { %8769 = vrsqrt.f32 %v6088_v31  ;;  %v6030_v25 = vmul.f32 %v12855_v45, %v12855_v45  ;;  %vm6111_vm8 = vmor %vm6109_vm7, %vm6110_vm0  ;;  %vm6119_vm10 = vweird.f32 %v6088_v31 }
0x1235   : > { %v6105_v0 = vmul.f32 %v8768_v59, %v6104_v54  ;;  %v13676_v54 = vld [vmem:[#allocation77_spill] sm:$0xff] }
0x1236   : > { %6053 = vadd.xlane.f32.xlu0 %v6030_v25 }
0x1237   : > { %v6106_v55 = vmul.f32 0.5, %v6105_v0 }
0x1239   : > { %v6107_v7 = vsub.f32 1.5, %v6106_v55 }
0x123a   : > { %v8770_v43 = vpop.eup %8769 }
0x123b   : > { %v6108_v5 = vmul.f32 %v8768_v59, %v6107_v7  ;;  %v6114_v15 = vmul.f32 %v8770_v43, %v6088_v31  ;;  %vm6120_vm9 = vweird.f32 %v8770_v43 }
0x123c   : > { %vm6121_vm11 = vmor %vm6119_vm10, %vm6120_vm9 }
0x123d   : > { %v6115_v52 = vmul.f32 %v8770_v43, %v6114_v15  ;;  %v6112_v28 = vsel %vm6111_vm8, %v8768_v59, %v6108_v5 }
0x123e   : > { %v6263_v62 = vmul.f32 %v6112_v28, %v12758_v9 }
0x123f   : > { %v6116_v30 = vmul.f32 0.5, %v6115_v52 }
0x1240   : > { %v6282_v46 = vmul.f32 %v12862_v6, %v6263_v62 }
0x1241   : > { %v6117_v38 = vsub.f32 1.5, %v6116_v30 }
0x1242   : > { %v12874_v24 = vadd.f32 %v12868_v48, %v6282_v46 }
0x1243   : > { %v6118_v17 = vmul.f32 %v8770_v43, %v6117_v38 }
0x1245   : > { %v6122_v34 = vsel %vm6121_vm11, %v8770_v43, %v6118_v17 }
0x1246   : > { %v6264_v63 = vmul.f32 %v6122_v34, %v12765_v58  ;;  %v13674_v58 = vld [vmem:[#allocation86_spill] sm:$0xff] }
0x1247   : > { %v4451_v3 = vadd.f32 %v13675_v8, %v13674_v58 }
0x1248   : > { %v6283_v60 = vmul.f32 %v12862_v6, %v6264_v63 }
0x1249   : > { %v5186_v36 = vadd.f32 %v12674_v56, %v4451_v3 }
0x124a   : > { %v12877_v9 = vadd.f32 %v12868_v48, %v6283_v60 }
0x124b   : > { %v5920_v23 = vadd.f32 %v5902_v18, %v5186_v36 }
0x124c   : > { %v6317_v57 = vpack.c.bf16 %v12877_v9, %v12874_v24 }
0x124d   : > { %v5940_v32 = vadd.f32 %v12699_v37, %v5920_v23 }
0x124e   : > { %6435 = vmatmul.bf16.vlgmr.msra.gmra.mxu2 %v6317_v57  ;;  %6484 = vmatmul.bf16.vlgmr.msra.gmra.mxu3 %v6317_v57 }
0x124f   : > { %v12899_v25 = vadd.f32 %v5940_v32, %v13676_v54 }
0x1261   : > { %v6044_v41 = vpop.xlane.xlu0 %6043 }
0x1262   : > { %v6073_v51 = vmul.f32 %v6044_v41, %v13651_v26 }
0x1264   : > { %v6089_v13 = vadd.f32 1e-05, %v6073_v51 }
0x1266   : > { %8771 = vrsqrt.f32 %v6089_v13  ;;  %v5976_v1 = vpop.xlane.xlu2 %5975  ;;  %vm6129_vm13 = vweird.f32 %v6089_v13 }
0x1267   : > { %v5999_v19 = vmul.f32 %v5976_v1, %v13651_v26 }
0x1269   : > { %v12887_v49 = vsub.f32 %v12785_v35, %v5999_v19  ;;  %v6046_v2 = vpop.xlane.xlu1 %6045 }
0x126a   : > { %v6074_v10 = vmul.f32 %v6046_v2, %v13651_v26 }
0x126b   : > { %v6031_v39 = vmul.f32 %v12887_v49, %v12887_v49 }
0x126c   : > { %v8772_v21 = vpop.eup %8771  ;;  %v6090_v47 = vadd.f32 1e-05, %v6074_v10 }
0x126d   : > { %v6124_v12 = vmul.f32 %v8772_v21, %v6089_v13  ;;  %6055 = vadd.xlane.f32.xlu0 %v6031_v39  ;;  %vm6130_vm12 = vweird.f32 %v8772_v21 }
0x126e   : > { %8773 = vrsqrt.f32 %v6090_v47  ;;  %v5978_v16 = vpop.xlane.xlu0 %5977  ;;  %vm6131_vm14 = vmor %vm6129_vm13, %vm6130_vm12  ;;  %vm6139_vm1 = vweird.f32 %v6090_v47 }
0x126f   : > { %v6125_v40 = vmul.f32 %v8772_v21, %v6124_v12  ;;  %v6000_v56 = vmul.f32 %v5978_v16, %v13651_v26 }
0x1271   : > { %v6126_v35 = vmul.f32 0.5, %v6125_v40  ;;  %v12895_v44 = vsub.f32 %v12797_v20, %v6000_v56  ;;  %v6048_v61 = vpop.xlane.xlu1 %6047 }
0x1272   : > { %v6075_v59 = vmul.f32 %v6048_v61, %v13651_v26 }
0x1273   : > { %v6127_v31 = vsub.f32 1.5, %v6126_v35  ;;  %v6032_v0 = vmul.f32 %v12895_v44, %v12895_v44 }
0x1274   : > { %v8774_v55 = vpop.eup %8773  ;;  %v6091_v7 = vadd.f32 1e-05, %v6075_v59 }
0x1275   : > { %v6128_v37 = vmul.f32 %v8772_v21, %v6127_v31  ;;  %v6134_v43 = vmul.f32 %v8774_v55, %v6090_v47  ;;  %5989 = vadd.xlane.f32.xlu0 %v12899_v25  ;;  %6057 = vadd.xlane.f32.xlu1 %v6032_v0  ;;  %vm6140_vm15 = vweird.f32 %v8774_v55 }
0x1276   : > { %8775 = vrsqrt.f32 %v6091_v7  ;;  %v5980_v20 = vpop.xlane.xlu0 %5979  ;;  %vm6141_vm2 = vmor %vm6139_vm1, %vm6140_vm15  ;;  %vm6149_vm4 = vweird.f32 %v6091_v7 }
0x1277   : > { %v6135_v5 = vmul.f32 %v8774_v55, %v6134_v43  ;;  %v6001_v15 = vmul.f32 %v5980_v20, %v13651_v26  ;;  %v6132_v52 = vsel %vm6131_vm14, %v8772_v21, %v6128_v37 }
0x1278   : > { %v6265_v63 = vmul.f32 %v6132_v52, %v12775_v27 }
0x1279   : > { %v6136_v28 = vmul.f32 0.5, %v6135_v5  ;;  %v12906_v30 = vsub.f32 %v12811_v4, %v6001_v15  ;;  %v6050_v38 = vpop.xlane.xlu2 %6049 }
0x127a   : > { %v6076_v62 = vmul.f32 %v6050_v38, %v13651_v26  ;;  %v6284_v8 = vmul.f32 %v12862_v6, %v6265_v63 }
0x127b   : > { %v6137_v17 = vsub.f32 1.5, %v6136_v28  ;;  %v6033_v34 = vmul.f32 %v12906_v30, %v12906_v30 }
0x127c   : > { %v8776_v46 = vpop.eup %8775  ;;  %v6092_v60 = vadd.f32 1e-05, %v6076_v62  ;;  %v12922_v10 = vadd.f32 %v12868_v48, %v6284_v8 }
0x127d   : > { %v6138_v57 = vmul.f32 %v8774_v55, %v6137_v17  ;;  %v6144_v41 = vmul.f32 %v8776_v46, %v6091_v7  ;;  %6059 = vadd.xlane.f32.xlu1 %v6033_v34  ;;  %vm6150_vm3 = vweird.f32 %v8776_v46 }
0x127e   : > { %8777 = vrsqrt.f32 %v6092_v60  ;;  %v5982_v4 = vpop.xlane.xlu1 %5981  ;;  %vm6151_vm5 = vmor %vm6149_vm4, %vm6150_vm3  ;;  %vm6159_vm0 = vweird.f32 %v6092_v60 }
0x127f   : > { %v6142_v51 = vsel %vm6141_vm2, %v8774_v55, %v6138_v57  ;;  %v6145_v13 = vmul.f32 %v8776_v46, %v6144_v41  ;;  %v6002_v1 = vmul.f32 %v5982_v4, %v13651_v26 }
0x1280   : > { %v6266_v58 = vmul.f32 %v6142_v51, %v12788_v11  ;;  %v8006_v51 = vld [vmem:[#allocation20 + $0x38] sm:$0xff] }
0x1281   : > { %v6146_v3 = vmul.f32 0.5, %v6145_v13  ;;  %v12916_v19 = vsub.f32 %v12823_v33, %v6002_v1  ;;  %v6052_v21 = vpop.xlane.xlu2 %6051  ;;  %v8014_v13 = vld [vmem:[#allocation20 + $0x78] sm:$0xff]  ;;  %6961 = vmatpush.bf16.msrb.mxu0 %v8006_v51 }
0x1282   : > { %v6285_v27 = vmul.f32 %v12862_v6, %v6266_v58  ;;  %v6077_v20 = vmul.f32 %v6052_v21, %v13651_v26  ;;  %7010 = vmatpush.bf16.msra.mxu1 %v8014_v13  ;;  %v8012_v21 = vld [vmem:[#allocation20 + $0x68] sm:$0xff] }
0x1283   : > { %v6147_v18 = vsub.f32 1.5, %v6146_v3  ;;  %v6034_v36 = vmul.f32 %v12916_v19, %v12916_v19  ;;  %v8005_v3 = vld [vmem:[#allocation20 + $0x30] sm:$0xff] }
0x1284   : > { %v8778_v2 = vpop.eup %8777  ;;  %v12925_v23 = vadd.f32 %v12868_v48, %v6285_v27  ;;  %v6093_v28 = vadd.f32 1e-05, %v6077_v20  ;;  %v8013_v27 = vld [vmem:[#allocation20 + $0x70] sm:$0xff]  ;;  %v7999_v20 = vld [vmem:[#allocation20] sm:$0xff] }
0x1285   : > { %v6148_v11 = vmul.f32 %v8776_v46, %v6147_v18  ;;  %v6154_v39 = vmul.f32 %v8778_v2, %v6092_v60  ;;  %6061 = vadd.xlane.f32.xlu2 %v6034_v36  ;;  %vm6160_vm6 = vweird.f32 %v8778_v2  ;;  %6962 = vmatpush.bf16.msrb.mxu0 %v8005_v3 }
0x1286   : > { %v5984_v33 = vpop.xlane.xlu1 %5983  ;;  %v6318_v47 = vpack.c.bf16 %v12925_v23, %v12922_v10  ;;  %vm6161_vm7 = vmor %vm6159_vm0, %vm6160_vm6  ;;  %8779 = vrsqrt.f32 %v6093_v28  ;;  %vm6169_vm9 = vweird.f32 %v6093_v28  ;;  %7011 = vmatpush.bf16.msra.mxu1 %v8013_v27 }
0x1287   : > { %v6155_v12 = vmul.f32 %v8778_v2, %v6154_v39  ;;  %v6003_v16 = vmul.f32 %v5984_v33, %v13651_v26  ;;  %v6152_v32 = vsel %vm6151_vm5, %v8776_v46, %v6148_v11  ;;  %v8004_v39 = vld [vmem:[#allocation20 + $0x28] sm:$0xff] }
0x1288   : > { %6440 = vmatmul.bf16.gmra.mxu2 %v6318_v47  ;;  %6489 = vmatmul.bf16.gmra.mxu3 %v6318_v47  ;;  %v6267_v59 = vmul.f32 %v6152_v32, %v12800_v53  ;;  %v8003_v32 = vld [vmem:[#allocation20 + $0x20] sm:$0xff] }
0x1289   : > { %v6156_v40 = vmul.f32 0.5, %v6155_v12  ;;  %v12931_v56 = vsub.f32 %v12836_v22, %v6003_v16  ;;  %6963 = vmatpush.bf16.msrb.mxu0 %v8004_v39 }
0x128a   : > { %v6286_v22 = vmul.f32 %v12862_v6, %v6267_v59  ;;  %7012 = vmatpush.bf16.msra.mxu1 %v8012_v21  ;;  %v8002_v59 = vld [vmem:[#allocation20 + $0x18] sm:$0xff] }
0x128b   : > { %v6157_v35 = vsub.f32 1.5, %v6156_v40  ;;  %v6035_v61 = vmul.f32 %v12931_v56, %v12931_v56  ;;  %v8011_v40 = vld [vmem:[#allocation20 + $0x60] sm:$0xff] }
0x128c   : > { %v12947_v5 = vadd.f32 %v12868_v48, %v6286_v22  ;;  %v8780_v17 = vpop.eup %8779  ;;  %v8008_v22 = vld [vmem:[#allocation20 + $0x48] sm:$0xff] }
0x128d   : > { %v6158_v31 = vmul.f32 %v8778_v2, %v6157_v35  ;;  %6063 = vadd.xlane.f32.xlu0 %v6035_v61  ;;  %v6164_v34 = vmul.f32 %v8780_v17, %v6093_v28  ;;  %vm6170_vm8 = vweird.f32 %v8780_v17  ;;  %6964 = vmatpush.bf16.msrb.mxu0 %v8003_v32 }
0x128e   : > { %v5986_v54 = vpop.xlane.xlu2 %5985  ;;  %vm6171_vm10 = vmor %vm6169_vm9, %vm6170_vm8  ;;  %7013 = vmatpush.bf16.msra.mxu1 %v8011_v40 }
0x128f   : > { %v6162_v0 = vsel %vm6161_vm7, %v8778_v2, %v6158_v31  ;;  %v6004_v55 = vmul.f32 %v5986_v54, %v13651_v26  ;;  %v6165_v46 = vmul.f32 %v8780_v17, %v6164_v34  ;;  %v8010_v31 = vld [vmem:[#allocation20 + $0x58] sm:$0xff] }
0x1290   : > { %v6268_v7 = vmul.f32 %v6162_v0, %v12814_v50  ;;  %v8009_v0 = vld [vmem:[#allocation20 + $0x50] sm:$0xff] }
0x1291   : > { %v12940_v37 = vsub.f32 %v12842_v42, %v6004_v55  ;;  %v6166_v41 = vmul.f32 0.5, %v6165_v46  ;;  %6965 = vmatpush.bf16.msrb.mxu0 %v8002_v59  ;;  %v6341_v55 = vld [vmem:[%s13677_s1] sm:$0x3]  ;;  %s13681_s1 = sld [smem:[#allocation126_spill]] }
0x1292   : > { %v6287_v43 = vmul.f32 %v12862_v6, %v6268_v7  ;;  %7014 = vmatpush.bf16.msra.mxu1 %v8010_v31  ;;  %v8000_v7 = vld [vmem:[#allocation20 + $0x8] sm:$0xff] }
0x1293   : > { %v6036_v53 = vmul.f32 %v12940_v37, %v12940_v37  ;;  %v6167_v4 = vsub.f32 1.5, %v6166_v41 }
0x1294   : > { %v12950_v15 = vadd.f32 %v12868_v48, %v6287_v43  ;;  %v12976_v43 = vperm.slane %v6341_v55, 0 }
0x1295   : > { %6065 = vadd.xlane.f32.xlu1 %v6036_v53  ;;  %v12978_v53 = vperm.slane %v6341_v55, 1 }
0x1296   : > { %v5988_v50 = vpop.xlane.xlu2 %5987  ;;  %v6319_v52 = vpack.c.bf16 %v12950_v15, %v12947_v5  ;;  %7015 = vmatpush.bf16.msra.mxu1 %v8009_v0 }
0x1297   : > { %v6005_v42 = vmul.f32 %v5988_v50, %v13651_v26  ;;  %v8007_v50 = vld [vmem:[#allocation20 + $0x40] sm:$0xff]  ;;  %s13682_s17 = smov %s13681_s1  ;;  %s7136_s4 = scalar_lea.hbm %s13681_s1, %s7907_s13 }
0x1298   : > { %6445 = vmatmul.bf16.gmra.mxu2 %v6319_v52  ;;  %6494 = vmatmul.bf16.gmra.mxu3 %v6319_v52  ;;  %s7139_s14 = sshll.u32 %s7136_s4, 4  ;;  %s9215_s27 = scalar_lea.hbm %s13682_s17, 512  ;;  %s7140_s14 = int_to_ptr.hbm [resolvable:$true] %s7139_s14 }
0x1299   : > { %v12956_v38 = vsub.f32 %v12848_v29, %v6005_v42  ;;  %v6168_v29 = vmul.f32 %v8780_v17, %v6167_v4  ;;  %s9209_s25 = sshra.s32 %s7140_s14, 4  ;;  %s9210_s25 = int_to_ptr.hbm [resolvable:$true] %s9209_s25 }
0x129a   : > { %7016 = vmatpush.bf16.msra.mxu1 %v8008_v22  ;;  %s9211_s5 = scalar_lea.hbm %s9210_s25, 128  ;;  %p9216_p5 = scmp.lt.s32.totalorder %s9210_s25, %s13682_s17 }
0x129b   : > { %v6037_v62 = vmul.f32 %v12956_v38, %v12956_v38  ;;  %v6172_v18 = vsel %vm6171_vm10, %v8780_v17, %v6168_v29  ;;  %p9212_p1 = scmp.ne.s32.totalorder %s9210_s25, %s9211_s5  ;;  %p9217_p10 = scmp.lt.s32.totalorder %s9215_s27, %s9211_s5 }
0x129c   : > { %v6269_v11 = vmul.f32 %v6172_v18, %v12826_v14 }
0x129d   : > { %6067 = vadd.xlane.f32.xlu2 %v6037_v62  ;;  %p9213_p8 = pnand %p9212_p1, %p9626_p2  ;;  %p9218_p7 = por %p9217_p10, %p9216_p5 }
0x129e   : > { %v6288_v16 = vmul.f32 %v12862_v6, %v6269_v11  ;;  %7017 = vmatpush.bf16.msra.mxu1 %v8007_v50 }
0x129f   : > { %p9214_p0 = pneg %p9213_p8 }
0x12a0   : > { %v12966_v14 = vadd.f32 %v12868_v48, %v6288_v16 }
0x12a1   : > { %p9219_p11 = pnand %p9218_p7, %p9214_p0 }
0x12a9   : > { %v6054_v63 = vpop.xlane.xlu0 %6053 }
0x12aa   : > { %v6078_v60 = vmul.f32 %v6054_v63, %v13651_v26 }
0x12ac   : > { %v6094_v57 = vadd.f32 1e-05, %v6078_v60 }
0x12ae   : > { %8781 = vrsqrt.f32 %v6094_v57  ;;  %vm6179_vm12 = vweird.f32 %v6094_v57 }
0x12b4   : > { %v8782_v1 = vpop.eup %8781 }
0x12b5   : > { %v6174_v58 = vmul.f32 %v8782_v1, %v6094_v57  ;;  %vm6180_vm11 = vweird.f32 %v8782_v1 }
0x12b6   : > { %vm6181_vm13 = vmor %vm6179_vm12, %vm6180_vm11 }
0x12b7   : > { %v6175_v8 = vmul.f32 %v8782_v1, %v6174_v58 }
0x12b9   : > { %v6176_v36 = vmul.f32 0.5, %v6175_v8 }
0x12bb   : > { %v6177_v2 = vsub.f32 1.5, %v6176_v36 }
0x12bd   : > { %v6178_v33 = vmul.f32 %v8782_v1, %v6177_v2 }
0x12bf   : > { %v6182_v47 = vsel %vm6181_vm13, %v8782_v1, %v6178_v33 }
0x12c0   : > { %v6270_v12 = vmul.f32 %v6182_v47, %v12855_v45  ;;  %v8001_v45 = vld [vmem:[#allocation20 + $0x10] sm:$0xff] }
0x12c1   : > { %6966 = vmatpush.bf16.msrb.mxu0 %v8001_v45 }
0x12c2   : > { %v6289_v35 = vmul.f32 %v12862_v6, %v6270_v12 }
0x12c4   : > { %v12969_v61 = vadd.f32 %v12868_v48, %v6289_v35 }
0x12c5   : > { %6967 = vmatpush.bf16.msrb.mxu0 %v8000_v7 }
0x12c6   : > { %v6320_v54 = vpack.c.bf16 %v12969_v61, %v12966_v14 }
0x12c8   : > { %6450 = vmatmul.bf16.gmra.mxu2 %v6320_v54  ;;  %6499 = vmatmul.bf16.gmra.mxu3 %v6320_v54 }
0x12c9   : > { %6968 = vmatpush.bf16.msrb.mxu0 %v7999_v20 }
0x12d1   : > { %v6436_v52 = vpop.f32.mrf.mxu2  ;;  %v6485_v42 = vpop.f32.mrf.mxu3 }
0x12d2   : > { %v6437_v28 = vadd.f32 %v6436_v52, %v12976_v43  ;;  %v6486_v62 = vadd.f32 %v6485_v42, %v12978_v53 }
0x12d4   : > { %v6557_v17 = vmul.f32 0.044715, %v6437_v28  ;;  %v6558_v34 = vmul.f32 0.044715, %v6486_v62 }
0x12d6   : > { %v6589_v46 = vmul.f32 %v6557_v17, %v6437_v28  ;;  %v6590_v63 = vmul.f32 %v6558_v34, %v6486_v62  ;;  %v6525_v34 = vmul.f32 0.5, %v6437_v28 }
0x12d8   : > { %v6621_v60 = vmul.f32 %v6589_v46, %v6437_v28  ;;  %v6622_v57 = vmul.f32 %v6590_v63, %v6486_v62 }
0x12d9   : > { %v6438_v41 = vpop.f32.mrf.mxu2  ;;  %v6487_v4 = vpop.f32.mrf.mxu3 }
0x12da   : > { %v6439_v51 = vadd.f32 %v6438_v41, %v12976_v43  ;;  %v6488_v13 = vadd.f32 %v6487_v4, %v12978_v53  ;;  %v6653_v1 = vadd.f32 %v6621_v60, %v6437_v28  ;;  %v6654_v29 = vadd.f32 %v6622_v57, %v6486_v62 }
0x12db   : > { %v6526_v57 = vmul.f32 0.5, %v6486_v62 }
0x12dc   : > { %v6559_v58 = vmul.f32 0.044715, %v6439_v51  ;;  %v6560_v8 = vmul.f32 0.044715, %v6488_v13  ;;  %v6685_v3 = vmul.f32 0.7978846, %v6653_v1 }
0x12dd   : > { %v6686_v36 = vmul.f32 0.7978846, %v6654_v29  ;;  %v6527_v46 = vmul.f32 0.5, %v6439_v51  ;;  %v6528_v41 = vmul.f32 0.5, %v6488_v13 }
0x12de   : > { %v6591_v27 = vmul.f32 %v6559_v58, %v6439_v51  ;;  %v6592_v18 = vmul.f32 %v6560_v8, %v6488_v13  ;;  %8783 = vtanh.f32 %v6685_v3 }
0x12df   : > { %8785 = vtanh.f32 %v6686_v36 }
0x12e0   : > { %v6056_v2 = vpop.xlane.xlu0 %6055  ;;  %v6623_v11 = vmul.f32 %v6591_v27, %v6439_v51  ;;  %v6624_v39 = vmul.f32 %v6592_v18, %v6488_v13 }
0x12e1   : > { %v6079_v21 = vmul.f32 %v6056_v2, %v13651_v26 }
0x12e2   : > { %v6655_v33 = vadd.f32 %v6623_v11, %v6439_v51  ;;  %v6656_v47 = vadd.f32 %v6624_v39, %v6488_v13 }
0x12e3   : > { %v6095_v12 = vadd.f32 1e-05, %v6079_v21 }
0x12e4   : > { %v6687_v16 = vmul.f32 0.7978846, %v6655_v33  ;;  %v6688_v32 = vmul.f32 0.7978846, %v6656_v47  ;;  %v8784_v59 = vpop.eup %8783 }
0x12e5   : > { %8787 = vrsqrt.f32 %v6095_v12  ;;  %v8786_v45 = vpop.eup %8785  ;;  %v6749_v22 = vadd.f32 1.0, %v8784_v59  ;;  %vm6189_vm15 = vweird.f32 %v6095_v12 }
0x12e6   : > { %8789 = vtanh.f32 %v6687_v16  ;;  %v6750_v52 = vadd.f32 1.0, %v8786_v45 }
0x12e7   : > { %8791 = vtanh.f32 %v6688_v32  ;;  %v6781_v29 = vmul.f32 %v6749_v22, %v6525_v34 }
0x12e8   : > { %v6058_v40 = vpop.xlane.xlu1 %6057  ;;  %v5990_v35 = vpop.xlane.xlu0 %5989  ;;  %v6782_v3 = vmul.f32 %v6750_v52, %v6526_v57 }
0x12e9   : > { %v6080_v31 = vmul.f32 %v6058_v40, %v13651_v26  ;;  %v6006_v54 = vmul.f32 %v5990_v35, %v13651_v26 }
0x12eb   : > { %v8788_v0 = vpop.eup %8787  ;;  %v6096_v55 = vadd.f32 1e-05, %v6080_v31  ;;  %v12988_v7 = vsub.f32 %v12899_v25, %v6006_v54 }
0x12ec   : > { %v6184_v20 = vmul.f32 %v8788_v0, %v6095_v12  ;;  %v8790_v50 = vpop.eup %8789  ;;  %vm6190_vm14 = vweird.f32 %v8788_v0 }
0x12ed   : > { %8793 = vrsqrt.f32 %v6096_v55  ;;  %v6038_v42 = vmul.f32 %v12988_v7, %v12988_v7  ;;  %v8792_v17 = vpop.eup %8791  ;;  %v6751_v63 = vadd.f32 1.0, %v8790_v50  ;;  %vm6191_vm1 = vmor %vm6189_vm15, %vm6190_vm14  ;;  %vm6199_vm3 = vweird.f32 %v6096_v55 }
0x12ee   : > { %v6185_v60 = vmul.f32 %v8788_v0, %v6184_v20  ;;  %v6752_v4 = vadd.f32 1.0, %v8792_v17 }
0x12ef   : > { %6069 = vadd.xlane.f32.xlu0 %v6038_v42  ;;  %v6783_v58 = vmul.f32 %v6751_v63, %v6527_v46 }
0x12f0   : > { %v6186_v1 = vmul.f32 0.5, %v6185_v60  ;;  %v6060_v25 = vpop.xlane.xlu1 %6059  ;;  %v6784_v27 = vmul.f32 %v6752_v4, %v6528_v41 }
0x12f1   : > { %v6081_v8 = vmul.f32 %v6060_v25, %v13651_v26  ;;  %v6813_v36 = vpack.c.bf16 %v6783_v58, %v6781_v29 }
0x12f2   : > { %v6187_v18 = vsub.f32 1.5, %v6186_v1  ;;  %v6814_v28 = vpack.c.bf16 %v6784_v27, %v6782_v3 }
0x12f3   : > { %v8794_v2 = vpop.eup %8793  ;;  %v6097_v11 = vadd.f32 1e-05, %v6081_v8  ;;  %6969 = vmatmul.bf16.vlgmr.msrb.gmra.mxu0 %v6813_v36 }
0x12f4   : > { %v6188_v51 = vmul.f32 %v8788_v0, %v6187_v18  ;;  %v6194_v39 = vmul.f32 %v8794_v2, %v6096_v55  ;;  %7018 = vmatmul.bf16.vlgmr.msra.gmra.mxu1 %v6814_v28  ;;  %vm6200_vm2 = vweird.f32 %v8794_v2 }
0x12f5   : > { %8795 = vrsqrt.f32 %v6097_v11  ;;  %vm6201_vm4 = vmor %vm6199_vm3, %vm6200_vm2  ;;  %vm6209_vm6 = vweird.f32 %v6097_v11 }
0x12f6   : > { %v6195_v62 = vmul.f32 %v8794_v2, %v6194_v39  ;;  %v6192_v13 = vsel %vm6191_vm1, %v8788_v0, %v6188_v51 }
0x12f7   : > { %v6271_v40 = vmul.f32 %v6192_v13, %v12887_v49 }
0x12f8   : > { %v6196_v21 = vmul.f32 0.5, %v6195_v62  ;;  %v6062_v33 = vpop.xlane.xlu2 %6061 }
0x12f9   : > { %v6082_v47 = vmul.f32 %v6062_v33, %v13651_v26  ;;  %v6290_v0 = vmul.f32 %v12862_v6, %v6271_v40 }
0x12fa   : > { %v6197_v16 = vsub.f32 1.5, %v6196_v21 }
0x12fb   : > { %v8796_v32 = vpop.eup %8795  ;;  %v6098_v35 = vadd.f32 1e-05, %v6082_v47  ;;  %v13000_v55 = vadd.f32 %v12868_v48, %v6290_v0 }
0x12fc   : > { %v6198_v59 = vmul.f32 %v8794_v2, %v6197_v16  ;;  %v6204_v31 = vmul.f32 %v8796_v32, %v6097_v11  ;;  %vm6210_vm5 = vweird.f32 %v8796_v32 }
0x12fd   : > { %8797 = vrsqrt.f32 %v6098_v35  ;;  %vm6211_vm0 = vmor %vm6209_vm6, %vm6210_vm5  ;;  %vm6219_vm8 = vweird.f32 %v6098_v35 }
0x12fe   : > { %v6202_v54 = vsel %vm6201_vm4, %v8794_v2, %v6198_v59  ;;  %v6205_v12 = vmul.f32 %v8796_v32, %v6204_v31 }
0x12ff   : > { %v6272_v45 = vmul.f32 %v6202_v54, %v12895_v44 }
0x1300   : > { %v6206_v22 = vmul.f32 0.5, %v6205_v12  ;;  %v6064_v20 = vpop.xlane.xlu0 %6063 }
0x1301   : > { %v6083_v50 = vmul.f32 %v6064_v20, %v13651_v26  ;;  %v6291_v52 = vmul.f32 %v12862_v6, %v6272_v45 }
0x1302   : > { %v6207_v42 = vsub.f32 1.5, %v6206_v22 }
0x1303   : > { %v8798_v49 = vpop.eup %8797  ;;  %v6099_v17 = vadd.f32 1e-05, %v6083_v50  ;;  %v13003_v34 = vadd.f32 %v12868_v48, %v6291_v52 }
0x1304   : > { %v6208_v46 = vmul.f32 %v8796_v32, %v6207_v42  ;;  %v6214_v44 = vmul.f32 %v8798_v49, %v6098_v35  ;;  %vm6220_vm7 = vweird.f32 %v8798_v49 }
0x1305   : > { %8799 = vrsqrt.f32 %v6099_v17  ;;  %v6321_v63 = vpack.c.bf16 %v13003_v34, %v13000_v55  ;;  %vm6221_vm9 = vmor %vm6219_vm8, %vm6220_vm7  ;;  %vm6229_vm11 = vweird.f32 %v6099_v17 }
0x1306   : > { %v6215_v60 = vmul.f32 %v8798_v49, %v6214_v44  ;;  %v6212_v57 = vsel %vm6211_vm0, %v8796_v32, %v6208_v46 }
0x1307   : > { %6455 = vmatmul.bf16.gmra.mxu2 %v6321_v63  ;;  %6504 = vmatmul.bf16.gmra.mxu3 %v6321_v63  ;;  %v6273_v58 = vmul.f32 %v6212_v57, %v12906_v30 }
0x1308   : > { %v6216_v41 = vmul.f32 0.5, %v6215_v60  ;;  %v6066_v4 = vpop.xlane.xlu1 %6065 }
0x1309   : > { %v6084_v1 = vmul.f32 %v6066_v4, %v13651_v26  ;;  %v6292_v13 = vmul.f32 %v12862_v6, %v6273_v58 }
0x130a   : > { %v6217_v25 = vsub.f32 1.5, %v6216_v41 }
0x130b   : > { %v8800_v29 = vpop.eup %8799  ;;  %v6100_v8 = vadd.f32 1e-05, %v6084_v1  ;;  %v6441_v3 = vpop.f32.mrf.mxu2  ;;  %v13023_v31 = vadd.f32 %v12868_v48, %v6292_v13 }
0x130c   : > { %v6490_v27 = vpop.f32.mrf.mxu3  ;;  %v6218_v18 = vmul.f32 %v8798_v49, %v6217_v25  ;;  %v6224_v36 = vmul.f32 %v8800_v29, %v6099_v17  ;;  %v13010_v2 = vadd.f32 %v6441_v3, %v12976_v43  ;;  %vm6230_vm10 = vweird.f32 %v8800_v29 }
0x130d   : > { %8801 = vrsqrt.f32 %v6100_v8  ;;  %v13013_v11 = vadd.f32 %v6490_v27, %v12978_v53  ;;  %vm6231_vm12 = vmor %vm6229_vm11, %vm6230_vm10  ;;  %vm6239_vm14 = vweird.f32 %v6100_v8 }
0x130e   : > { %v6222_v28 = vsel %vm6221_vm9, %v8798_v49, %v6218_v18  ;;  %v6225_v51 = vmul.f32 %v8800_v29, %v6224_v36  ;;  %v6561_v39 = vmul.f32 0.044715, %v13010_v2 }
0x130f   : > { %v6274_v30 = vmul.f32 %v6222_v28, %v12916_v19  ;;  %v6562_v62 = vmul.f32 0.044715, %v13013_v11 }
0x1310   : > { %v6226_v21 = vmul.f32 0.5, %v6225_v51  ;;  %v6593_v33 = vmul.f32 %v6561_v39, %v13010_v2 }
0x1311   : > { %v6594_v47 = vmul.f32 %v6562_v62, %v13013_v11  ;;  %v6293_v16 = vmul.f32 %v12862_v6, %v6274_v30 }
0x1312   : > { %v6227_v32 = vsub.f32 1.5, %v6226_v21  ;;  %v6625_v54 = vmul.f32 %v6593_v33, %v13010_v2 }
0x1313   : > { %v8802_v40 = vpop.eup %8801  ;;  %v6443_v35 = vpop.f32.mrf.mxu2  ;;  %v13026_v19 = vadd.f32 %v12868_v48, %v6293_v16  ;;  %v6626_v22 = vmul.f32 %v6594_v47, %v13013_v11 }
0x1314   : > { %v6492_v59 = vpop.f32.mrf.mxu3  ;;  %v6228_v12 = vmul.f32 %v8800_v29, %v6227_v32  ;;  %v6234_v45 = vmul.f32 %v8802_v40, %v6100_v8  ;;  %v13030_v0 = vadd.f32 %v6443_v35, %v12976_v43  ;;  %v6657_v44 = vadd.f32 %v6625_v54, %v13010_v2 }
0x1315   : > { %v13034_v20 = vadd.f32 %v6492_v59, %v12978_v53  ;;  %v6322_v50 = vpack.c.bf16 %v13026_v19, %v13023_v31  ;;  %v6658_v60 = vadd.f32 %v6626_v22, %v13013_v11  ;;  %vm6240_vm13 = vweird.f32 %v8802_v40 }
0x1316   : > { %v6235_v52 = vmul.f32 %v8802_v40, %v6234_v45  ;;  %v6563_v42 = vmul.f32 0.044715, %v13030_v0  ;;  %v6232_v49 = vsel %vm6231_vm12, %v8800_v29, %v6228_v12  ;;  %v6689_v41 = vmul.f32 0.7978846, %v6657_v44  ;;  %vm6241_vm15 = vmor %vm6239_vm14, %vm6240_vm13 }
0x1317   : > { %v6564_v46 = vmul.f32 0.044715, %v13034_v20  ;;  %6460 = vmatmul.bf16.gmra.mxu2 %v6322_v50  ;;  %6509 = vmatmul.bf16.gmra.mxu3 %v6322_v50  ;;  %v6275_v4 = vmul.f32 %v6232_v49, %v12931_v56  ;;  %v6690_v29 = vmul.f32 0.7978846, %v6658_v60  ;;  %v6531_v60 = vmul.f32 0.5, %v13030_v0 }
0x1318   : > { %v6236_v63 = vmul.f32 0.5, %v6235_v52  ;;  %v6595_v17 = vmul.f32 %v6563_v42, %v13030_v0  ;;  %8803 = vtanh.f32 %v6689_v41 }
0x1319   : > { %v6596_v57 = vmul.f32 %v6564_v46, %v13034_v20  ;;  %v6294_v62 = vmul.f32 %v12862_v6, %v6275_v4  ;;  %8805 = vtanh.f32 %v6690_v29 }
0x131a   : > { %v6237_v1 = vsub.f32 1.5, %v6236_v63  ;;  %v6627_v25 = vmul.f32 %v6595_v17, %v13030_v0 }
0x131b   : > { %v6446_v58 = vpop.f32.mrf.mxu2  ;;  %v6628_v27 = vmul.f32 %v6596_v57, %v13034_v20  ;;  %v13064_v12 = vadd.f32 %v12868_v48, %v6294_v62 }
0x131c   : > { %v6495_v3 = vpop.f32.mrf.mxu3  ;;  %v6238_v18 = vmul.f32 %v8802_v40, %v6237_v1  ;;  %v13048_v36 = vadd.f32 %v6446_v58, %v12976_v43  ;;  %v6659_v51 = vadd.f32 %v6627_v25, %v13030_v0  ;;  %v6530_v58 = vmul.f32 0.5, %v13013_v11 }
0x131d   : > { %v13051_v28 = vadd.f32 %v6495_v3, %v12978_v53  ;;  %v6660_v56 = vadd.f32 %v6628_v27, %v13034_v20  ;;  %v6532_v3 = vmul.f32 0.5, %v13034_v20 }
0x131e   : > { %v6242_v39 = vsel %vm6241_vm15, %v8802_v40, %v6238_v18  ;;  %v6565_v30 = vmul.f32 0.044715, %v13048_v36  ;;  %v6691_v21 = vmul.f32 0.7978846, %v6659_v51  ;;  %v8804_v35 = vpop.eup %8803 }
0x131f   : > { %v6276_v8 = vmul.f32 %v6242_v39, %v12940_v37  ;;  %v6566_v13 = vmul.f32 0.044715, %v13051_v28  ;;  %v6692_v33 = vmul.f32 0.7978846, %v6660_v56  ;;  %v8806_v22 = vpop.eup %8805  ;;  %v6753_v63 = vadd.f32 1.0, %v8804_v35 }
0x1320   : > { %v6597_v47 = vmul.f32 %v6565_v30, %v13048_v36  ;;  %8807 = vtanh.f32 %v6691_v21  ;;  %v6754_v57 = vadd.f32 1.0, %v8806_v22  ;;  %v6534_v22 = vmul.f32 0.5, %v13051_v28 }
0x1321   : > { %v6598_v16 = vmul.f32 %v6566_v13, %v13051_v28  ;;  %v6295_v32 = vmul.f32 %v12862_v6, %v6276_v8  ;;  %8809 = vtanh.f32 %v6692_v33 }
0x1322   : > { %v6629_v40 = vmul.f32 %v6597_v47, %v13048_v36  ;;  %v6786_v62 = vmul.f32 %v6754_v57, %v6530_v58 }
0x1323   : > { %v6448_v59 = vpop.f32.mrf.mxu2  ;;  %v13067_v37 = vadd.f32 %v12868_v48, %v6295_v32  ;;  %v6630_v45 = vmul.f32 %v6598_v16, %v13051_v28  ;;  %v6529_v48 = vmul.f32 0.5, %v13010_v2 }
0x1324   : > { %v6497_v54 = vpop.f32.mrf.mxu3  ;;  %v6449_v50 = vadd.f32 %v6448_v59, %v12976_v43  ;;  %v6661_v42 = vadd.f32 %v6629_v40, %v13048_v36  ;;  %v6533_v59 = vmul.f32 0.5, %v13048_v36 }
0x1325   : > { %v6498_v6 = vadd.f32 %v6497_v54, %v12978_v53  ;;  %v6323_v52 = vpack.c.bf16 %v13067_v37, %v13064_v12  ;;  %v6662_v49 = vadd.f32 %v6630_v45, %v13051_v28  ;;  %v6785_v51 = vmul.f32 %v6753_v63, %v6529_v48 }
0x1326   : > { %v6567_v46 = vmul.f32 0.044715, %v6449_v50  ;;  %v8808_v17 = vpop.eup %8807  ;;  %v6693_v29 = vmul.f32 0.7978846, %v6661_v42  ;;  %v6535_v54 = vmul.f32 0.5, %v6449_v50 }
0x1327   : > { %v6568_v44 = vmul.f32 0.044715, %v6498_v6  ;;  %6465 = vmatmul.bf16.gmra.mxu2 %v6323_v52  ;;  %6514 = vmatmul.bf16.gmra.mxu3 %v6323_v52  ;;  %v8810_v41 = vpop.eup %8809  ;;  %v6755_v25 = vadd.f32 1.0, %v8808_v17  ;;  %v6694_v18 = vmul.f32 0.7978846, %v6662_v49  ;;  %v6536_v52 = vmul.f32 0.5, %v6498_v6 }
0x1328   : > { %v6599_v4 = vmul.f32 %v6567_v46, %v6449_v50  ;;  %v6756_v27 = vadd.f32 1.0, %v8810_v41  ;;  %8811 = vtanh.f32 %v6693_v29 }
0x1329   : > { %v6600_v1 = vmul.f32 %v6568_v44, %v6498_v6  ;;  %v6787_v56 = vmul.f32 %v6755_v25, %v6531_v60  ;;  %8813 = vtanh.f32 %v6694_v18  ;;  %v6068_v60 = vpop.xlane.xlu2 %6067 }
0x132a   : > { %v6631_v39 = vmul.f32 %v6599_v4, %v6449_v50  ;;  %v6788_v2 = vmul.f32 %v6756_v27, %v6532_v3 }
0x132b   : > { %v6632_v30 = vmul.f32 %v6600_v1, %v6498_v6  ;;  %v6815_v8 = vpack.c.bf16 %v6787_v56, %v6785_v51 }
0x132c   : > { %v6663_v0 = vadd.f32 %v6631_v39, %v6449_v50  ;;  %v6816_v21 = vpack.c.bf16 %v6788_v2, %v6786_v62  ;;  %v6085_v50 = vmul.f32 %v6068_v60, %v13651_v26 }
0x132d   : > { %v6664_v13 = vadd.f32 %v6632_v30, %v6498_v6  ;;  %6974 = vmatmul.bf16.gmra.mxu0 %v6815_v8 }
0x132e   : > { %v6695_v33 = vmul.f32 0.7978846, %v6663_v0  ;;  %7023 = vmatmul.bf16.gmra.mxu1 %v6816_v21  ;;  %v8812_v11 = vpop.eup %8811  ;;  %v6101_v29 = vadd.f32 1e-05, %v6085_v50 }
0x132f   : > { %v6696_v47 = vmul.f32 0.7978846, %v6664_v13  ;;  %v8814_v20 = vpop.eup %8813  ;;  %v6757_v16 = vadd.f32 1.0, %v8812_v11 }
0x1330   : > { %8815 = vtanh.f32 %v6695_v33  ;;  %v6758_v40 = vadd.f32 1.0, %v8814_v20  ;;  %vm6249_vm2 = vweird.f32 %v6101_v29 }
0x1331   : > { %8817 = vtanh.f32 %v6696_v47  ;;  %v6789_v49 = vmul.f32 %v6757_v16, %v6533_v59 }
0x1332   : > { %v6790_v44 = vmul.f32 %v6758_v40, %v6534_v22  ;;  %8819 = vrsqrt.f32 %v6101_v29 }
0x1336   : > { %v8816_v32 = vpop.eup %8815 }
0x1337   : > { %v8818_v35 = vpop.eup %8817  ;;  %v6759_v45 = vadd.f32 1.0, %v8816_v32 }
0x1338   : > { %v6760_v42 = vadd.f32 1.0, %v8818_v35  ;;  %v8820_v11 = vpop.eup %8819 }
0x1339   : > { %v6791_v46 = vmul.f32 %v6759_v45, %v6535_v54  ;;  %v6244_v32 = vmul.f32 %v8820_v11, %v6101_v29  ;;  %vm6250_vm1 = vweird.f32 %v8820_v11 }
0x133a   : > { %v6792_v63 = vmul.f32 %v6760_v42, %v6536_v52  ;;  %vm6251_vm3 = vmor %vm6249_vm2, %vm6250_vm1 }
0x133b   : > { %v6817_v17 = vpack.c.bf16 %v6791_v46, %v6789_v49  ;;  %v6245_v54 = vmul.f32 %v8820_v11, %v6244_v32 }
0x133c   : > { %v6818_v48 = vpack.c.bf16 %v6792_v63, %v6790_v44 }
0x133d   : > { %6979 = vmatmul.bf16.gmra.mxu0 %v6817_v17  ;;  %v6246_v44 = vmul.f32 0.5, %v6245_v54 }
0x133e   : > { %7028 = vmatmul.bf16.gmra.mxu1 %v6818_v48 }
0x134b   : > { %v6451_v57 = vpop.f32.mrf.mxu2  ;;  %v6500_v41 = vpop.f32.mrf.mxu3 }
0x134c   : > { %v6452_v4 = vadd.f32 %v6451_v57, %v12976_v43  ;;  %v6501_v36 = vadd.f32 %v6500_v41, %v12978_v53 }
0x134e   : > { %v6569_v28 = vmul.f32 0.044715, %v6452_v4  ;;  %v6570_v6 = vmul.f32 0.044715, %v6501_v36  ;;  %v6537_v48 = vmul.f32 0.5, %v6452_v4  ;;  %v6538_v41 = vmul.f32 0.5, %v6501_v36 }
0x1350   : > { %v6601_v1 = vmul.f32 %v6569_v28, %v6452_v4  ;;  %v6602_v25 = vmul.f32 %v6570_v6, %v6501_v36 }
0x1352   : > { %v6633_v58 = vmul.f32 %v6601_v1, %v6452_v4  ;;  %v6634_v3 = vmul.f32 %v6602_v25, %v6501_v36  ;;  %v6247_v25 = vsub.f32 1.5, %v6246_v44 }
0x1353   : > { %v6453_v27 = vpop.f32.mrf.mxu2  ;;  %v6502_v18 = vpop.f32.mrf.mxu3 }
0x1354   : > { %v6454_v51 = vadd.f32 %v6453_v27, %v12976_v43  ;;  %v6503_v56 = vadd.f32 %v6502_v18, %v12978_v53  ;;  %v6665_v39 = vadd.f32 %v6633_v58, %v6452_v4  ;;  %v6666_v30 = vadd.f32 %v6634_v3, %v6501_v36  ;;  %v13091_v4 = vld [vmem:[%s13678_s8] ss:$0 sm:$0xff]  ;;  %s7137_s8 = sshll.u32 %s9719_s10, 4  ;;  %s7138_s8 = int_to_ptr.vmem [resolvable:$true] %s7137_s8 }
0x1356   : > { %v6571_v62 = vmul.f32 0.044715, %v6454_v51  ;;  %v6572_v2 = vmul.f32 0.044715, %v6503_v56  ;;  %v6697_v13 = vmul.f32 0.7978846, %v6665_v39  ;;  %v6248_v39 = vmul.f32 %v8820_v11, %v6247_v25 }
0x1357   : > { %v6698_v21 = vmul.f32 0.7978846, %v6666_v30  ;;  %v6539_v60 = vmul.f32 0.5, %v6454_v51  ;;  %v6540_v50 = vmul.f32 0.5, %v6503_v56 }
0x1358   : > { %v6603_v8 = vmul.f32 %v6571_v62, %v6454_v51  ;;  %v6604_v0 = vmul.f32 %v6572_v2, %v6503_v56  ;;  %8821 = vtanh.f32 %v6697_v13 }
0x1359   : > { %8823 = vtanh.f32 %v6698_v21 }
0x135a   : > { %v6635_v33 = vmul.f32 %v6603_v8, %v6454_v51  ;;  %v6636_v47 = vmul.f32 %v6604_v0, %v6503_v56 }
0x135c   : > { %v6667_v20 = vadd.f32 %v6635_v33, %v6454_v51  ;;  %v6668_v16 = vadd.f32 %v6636_v47, %v6503_v56  ;;  %v6252_v56 = vsel %vm6251_vm3, %v8820_v11, %v6248_v39  ;;  %v8863_v11 = vld [vmem:[%s13672_s3] ss:$0 sm:$0xff] }
0x135d   : > { %v6277_v21 = vmul.f32 %v6252_v56, %v12956_v38 }
0x135e   : > { %v6699_v40 = vmul.f32 0.7978846, %v6667_v20  ;;  %v6700_v35 = vmul.f32 0.7978846, %v6668_v16  ;;  %v8822_v59 = vpop.eup %8821 }
0x135f   : > { %v8824_v22 = vpop.eup %8823  ;;  %v6761_v49 = vadd.f32 1.0, %v8822_v59  ;;  %v6296_v32 = vmul.f32 %v8863_v11, %v6277_v21 }
0x1360   : > { %8825 = vtanh.f32 %v6699_v40  ;;  %v6762_v63 = vadd.f32 1.0, %v8824_v22 }
0x1361   : > { %8827 = vtanh.f32 %v6700_v35  ;;  %v6793_v6 = vmul.f32 %v6761_v49, %v6537_v48 }
0x1362   : > { %v6070_v45 = vpop.xlane.xlu0 %6069  ;;  %v6794_v58 = vmul.f32 %v6762_v63, %v6538_v41 }
0x1363   : > { %v6086_v52 = vmul.f32 %v6070_v45, %v13651_v26 }
0x1365   : > { %v6102_v42 = vadd.f32 1e-05, %v6086_v52 }
0x1366   : > { %v8826_v46 = vpop.eup %8825 }
0x1367   : > { %v8828_v17 = vpop.eup %8827  ;;  %8829 = vrsqrt.f32 %v6102_v42  ;;  %v6763_v57 = vadd.f32 1.0, %v8826_v46  ;;  %vm6259_vm5 = vweird.f32 %v6102_v42 }
0x1368   : > { %v6764_v28 = vadd.f32 1.0, %v8828_v17 }
0x1369   : > { %v6795_v1 = vmul.f32 %v6763_v57, %v6539_v60 }
0x136a   : > { %v6796_v3 = vmul.f32 %v6764_v28, %v6540_v50 }
0x136b   : > { %v6819_v27 = vpack.c.bf16 %v6795_v1, %v6793_v6 }
0x136c   : > { %v6820_v26 = vpack.c.bf16 %v6796_v3, %v6794_v58 }
0x136d   : > { %v8830_v18 = vpop.eup %8829  ;;  %6984 = vmatmul.bf16.gmra.mxu0 %v6819_v27 }
0x136e   : > { %v6254_v30 = vmul.f32 %v8830_v18, %v6102_v42  ;;  %7033 = vmatmul.bf16.gmra.mxu1 %v6820_v26  ;;  %vm6260_vm4 = vweird.f32 %v8830_v18 }
0x136f   : > { %vm6261_vm6 = vmor %vm6259_vm5, %vm6260_vm4 }
0x1370   : > { %v6255_v36 = vmul.f32 %v8830_v18, %v6254_v30  ;;  %v6970_v51 = vpop.f32.mrf.mxu0 }
0x1371   : > { %v6971_v2 = vadd.f32 %v13091_v4, %v6970_v51  ;;  %v7019_v8 = vpop.f32.mrf.mxu1 }
0x1372   : > { %v6256_v62 = vmul.f32 0.5, %v6255_v36 }
0x1373   : > { %v7020_v13 = vadd.f32 %v7019_v8, %v6971_v2 }
0x1374   : > { %v6257_v0 = vsub.f32 1.5, %v6256_v62 }
0x1375   : > { %v7059_v47 = vadd.f32 %v7020_v13, %v12874_v24  ;;  %v8864_v24 = vld [vmem:[%s13673_s23] ss:$0 sm:$0xff] }
0x1376   : > { %v6258_v33 = vmul.f32 %v8830_v18, %v6257_v0  ;;  %v13104_v54 = vadd.f32 %v8864_v24, %v6296_v32 }
0x1377   : > { %7075 = vxpose.xlu1.b32.start [1/16] %v7059_v47, 128 }
0x1378   : > { %v6262_v20 = vsel %vm6261_vm6, %v8830_v18, %v6258_v33  ;;  %v6972_v16 = vpop.f32.mrf.mxu0 }
0x1379   : > { %v6278_v29 = vmul.f32 %v6262_v20, %v12988_v7  ;;  %v6973_v40 = vadd.f32 %v13091_v4, %v6972_v16  ;;  %v7021_v35 = vpop.f32.mrf.mxu1 }
0x137b   : > { %v6297_v59 = vmul.f32 %v8863_v11, %v6278_v29  ;;  %v7022_v38 = vadd.f32 %v7021_v35, %v6973_v40 }
0x137d   : > { %v13106_v45 = vadd.f32 %v8864_v24, %v6297_v59  ;;  %v7060_v7 = vadd.f32 %v7022_v38, %v12877_v9 }
0x137f   : > { %v6324_v22 = vpack.c.bf16 %v13106_v45, %v13104_v54  ;;  %7076 = vxpose.xlu1.b32.cont [2/16] %v7060_v7, 128 }
0x1381   : > { %6470 = vmatmul.bf16.gmra.mxu2 %v6324_v22  ;;  %6519 = vmatmul.bf16.gmra.mxu3 %v6324_v22 }
0x138a   : > { %v6456_v52 = vpop.f32.mrf.mxu2  ;;  %v6505_v42 = vpop.f32.mrf.mxu3 }
0x138b   : > { %v6457_v49 = vadd.f32 %v6456_v52, %v12976_v43  ;;  %v6506_v46 = vadd.f32 %v6505_v42, %v12978_v53 }
0x138d   : > { %v6573_v44 = vmul.f32 0.044715, %v6457_v49  ;;  %v6574_v63 = vmul.f32 0.044715, %v6506_v46 }
0x138f   : > { %v6605_v17 = vmul.f32 %v6573_v44, %v6457_v49  ;;  %v6606_v48 = vmul.f32 %v6574_v63, %v6506_v46  ;;  %v6541_v63 = vmul.f32 0.5, %v6457_v49 }
0x1391   : > { %v6637_v60 = vmul.f32 %v6605_v17, %v6457_v49  ;;  %v6638_v57 = vmul.f32 %v6606_v48, %v6506_v46 }
0x1392   : > { %v6458_v41 = vpop.f32.mrf.mxu2  ;;  %v6507_v9 = vpop.f32.mrf.mxu3 }
0x1393   : > { %v6459_v50 = vadd.f32 %v6458_v41, %v12976_v43  ;;  %v6508_v28 = vadd.f32 %v6507_v9, %v12978_v53  ;;  %v6669_v6 = vadd.f32 %v6637_v60, %v6457_v49  ;;  %v6670_v1 = vadd.f32 %v6638_v57, %v6506_v46 }
0x1394   : > { %v6542_v41 = vmul.f32 0.5, %v6506_v46 }
0x1395   : > { %v6575_v25 = vmul.f32 0.044715, %v6459_v50  ;;  %v6576_v58 = vmul.f32 0.044715, %v6508_v28  ;;  %v6701_v3 = vmul.f32 0.7978846, %v6669_v6 }
0x1396   : > { %v6702_v18 = vmul.f32 0.7978846, %v6670_v1  ;;  %v6543_v60 = vmul.f32 0.5, %v6459_v50 }
0x1397   : > { %v6607_v27 = vmul.f32 %v6575_v25, %v6459_v50  ;;  %v6608_v26 = vmul.f32 %v6576_v58, %v6508_v28  ;;  %8831 = vtanh.f32 %v6701_v3  ;;  %v6544_v25 = vmul.f32 0.5, %v6508_v28 }
0x1398   : > { %8833 = vtanh.f32 %v6702_v18 }
0x1399   : > { %v6639_v39 = vmul.f32 %v6607_v27, %v6459_v50  ;;  %v6640_v30 = vmul.f32 %v6608_v26, %v6508_v28 }
0x139a   : > { %v6461_v36 = vpop.f32.mrf.mxu2  ;;  %v6510_v51 = vpop.f32.mrf.mxu3 }
0x139b   : > { %v13116_v56 = vadd.f32 %v6461_v36, %v12976_v43  ;;  %v13119_v62 = vadd.f32 %v6510_v51, %v12978_v53  ;;  %v6671_v2 = vadd.f32 %v6639_v39, %v6459_v50  ;;  %v6672_v8 = vadd.f32 %v6640_v30, %v6508_v28 }
0x139d   : > { %v6577_v0 = vmul.f32 0.044715, %v13116_v56  ;;  %v6578_v13 = vmul.f32 0.044715, %v13119_v62  ;;  %v6703_v21 = vmul.f32 0.7978846, %v6671_v2  ;;  %v8832_v29 = vpop.eup %8831 }
0x139e   : > { %v6704_v33 = vmul.f32 0.7978846, %v6672_v8  ;;  %v8834_v32 = vpop.eup %8833  ;;  %v6765_v7 = vadd.f32 1.0, %v8832_v29 }
0x139f   : > { %v6609_v47 = vmul.f32 %v6577_v0, %v13116_v56  ;;  %v6610_v20 = vmul.f32 %v6578_v13, %v13119_v62  ;;  %8835 = vtanh.f32 %v6703_v21  ;;  %v6766_v17 = vadd.f32 1.0, %v8834_v32 }
0x13a0   : > { %8837 = vtanh.f32 %v6704_v33  ;;  %v6797_v3 = vmul.f32 %v6765_v7, %v6541_v63 }
0x13a1   : > { %v6641_v16 = vmul.f32 %v6609_v47, %v13116_v56  ;;  %v6642_v11 = vmul.f32 %v6610_v20, %v13119_v62  ;;  %v6798_v18 = vmul.f32 %v6766_v17, %v6542_v41 }
0x13a2   : > { %v6463_v40 = vpop.f32.mrf.mxu2  ;;  %v6512_v35 = vpop.f32.mrf.mxu3 }
0x13a3   : > { %v13128_v59 = vadd.f32 %v6463_v40, %v12976_v43  ;;  %v13131_v38 = vadd.f32 %v6512_v35, %v12978_v53  ;;  %v6673_v24 = vadd.f32 %v6641_v16, %v13116_v56  ;;  %v6674_v22 = vadd.f32 %v6642_v11, %v13119_v62 }
0x13a5   : > { %v8836_v52 = vpop.eup %8835  ;;  %v6579_v42 = vmul.f32 0.044715, %v13128_v59  ;;  %v6580_v44 = vmul.f32 0.044715, %v13131_v38  ;;  %v6705_v9 = vmul.f32 0.7978846, %v6673_v24 }
0x13a6   : > { %v8838_v48 = vpop.eup %8837  ;;  %v6767_v57 = vadd.f32 1.0, %v8836_v52  ;;  %v6706_v26 = vmul.f32 0.7978846, %v6674_v22 }
0x13a7   : > { %v6611_v6 = vmul.f32 %v6579_v42, %v13128_v59  ;;  %v6612_v1 = vmul.f32 %v6580_v44, %v13131_v38  ;;  %v6768_v58 = vadd.f32 1.0, %v8838_v48  ;;  %8839 = vtanh.f32 %v6705_v9 }
0x13a8   : > { %v6799_v27 = vmul.f32 %v6767_v57, %v6543_v60  ;;  %8841 = vtanh.f32 %v6706_v26 }
0x13a9   : > { %v6800_v39 = vmul.f32 %v6768_v58, %v6544_v25  ;;  %v6643_v30 = vmul.f32 %v6611_v6, %v13128_v59  ;;  %v6644_v49 = vmul.f32 %v6612_v1, %v13131_v38 }
0x13aa   : > { %v6466_v36 = vpop.f32.mrf.mxu2  ;;  %v6515_v50 = vpop.f32.mrf.mxu3  ;;  %v6821_v51 = vpack.c.bf16 %v6799_v27, %v6797_v3  ;;  %v6546_v3 = vmul.f32 0.5, %v13119_v62 }
0x13ab   : > { %v13142_v46 = vadd.f32 %v6466_v36, %v12976_v43  ;;  %v13145_v2 = vadd.f32 %v6515_v50, %v12978_v53  ;;  %v6975_v28 = vpop.f32.mrf.mxu0  ;;  %v6822_v8 = vpack.c.bf16 %v6800_v39, %v6798_v18  ;;  %v6675_v0 = vadd.f32 %v6643_v30, %v13128_v59  ;;  %v7024_v21 = vpop.f32.mrf.mxu1 }
0x13ac   : > { %v6976_v13 = vadd.f32 %v13091_v4, %v6975_v28  ;;  %6989 = vmatmul.bf16.gmra.mxu0 %v6821_v51  ;;  %v6676_v33 = vadd.f32 %v6644_v49, %v13131_v38  ;;  %v6547_v39 = vmul.f32 0.5, %v13128_v59  ;;  %v6548_v49 = vmul.f32 0.5, %v13131_v38 }
0x13ad   : > { %v6581_v47 = vmul.f32 0.044715, %v13142_v46  ;;  %v6582_v20 = vmul.f32 0.044715, %v13145_v2  ;;  %7038 = vmatmul.bf16.gmra.mxu1 %v6822_v8  ;;  %v6707_v29 = vmul.f32 0.7978846, %v6675_v0  ;;  %v8840_v35 = vpop.eup %8839 }
0x13ae   : > { %v7025_v16 = vadd.f32 %v7024_v21, %v6976_v13  ;;  %v6708_v11 = vmul.f32 0.7978846, %v6676_v33  ;;  %v8842_v52 = vpop.eup %8841  ;;  %v6769_v9 = vadd.f32 1.0, %v8840_v35 }
0x13af   : > { %v6613_v32 = vmul.f32 %v6581_v47, %v13142_v46  ;;  %v6614_v40 = vmul.f32 %v6582_v20, %v13145_v2  ;;  %8843 = vtanh.f32 %v6707_v29  ;;  %v6770_v27 = vadd.f32 1.0, %v8842_v52 }
0x13b0   : > { %v7061_v24 = vadd.f32 %v7025_v16, %v12922_v10  ;;  %8845 = vtanh.f32 %v6708_v11  ;;  %v6545_v10 = vmul.f32 0.5, %v13116_v56 }
0x13b1   : > { %v6645_v7 = vmul.f32 %v6613_v32, %v13142_v46  ;;  %v6646_v22 = vmul.f32 %v6614_v40, %v13145_v2  ;;  %v6802_v21 = vmul.f32 %v6770_v27, %v6546_v3 }
0x13b2   : > { %7077 = vxpose.xlu1.b32.cont [3/16] %v7061_v24, 128  ;;  %v6468_v42 = vpop.f32.mrf.mxu2  ;;  %v6517_v44 = vpop.f32.mrf.mxu3  ;;  %v6801_v8 = vmul.f32 %v6769_v9, %v6545_v10  ;;  %v6549_v9 = vmul.f32 0.5, %v13142_v46 }
0x13b3   : > { %v6469_v63 = vadd.f32 %v6468_v42, %v12976_v43  ;;  %v6518_v17 = vadd.f32 %v6517_v44, %v12978_v53  ;;  %v6977_v48 = vpop.f32.mrf.mxu0  ;;  %v6677_v60 = vadd.f32 %v6645_v7, %v13142_v46  ;;  %v7026_v41 = vpop.f32.mrf.mxu1  ;;  %v6678_v6 = vadd.f32 %v6646_v22, %v13145_v2 }
0x13b4   : > { %v6978_v57 = vadd.f32 %v13091_v4, %v6977_v48 }
0x13b5   : > { %v8844_v1 = vpop.eup %8843  ;;  %v6583_v25 = vmul.f32 0.044715, %v6469_v63  ;;  %v6584_v58 = vmul.f32 0.044715, %v6518_v17  ;;  %v6709_v56 = vmul.f32 0.7978846, %v6677_v60 }
0x13b6   : > { %v8846_v26 = vpop.eup %8845  ;;  %v7027_v18 = vadd.f32 %v7026_v41, %v6978_v57  ;;  %v6771_v30 = vadd.f32 1.0, %v8844_v1  ;;  %v6710_v13 = vmul.f32 0.7978846, %v6678_v6  ;;  %v6551_v6 = vmul.f32 0.5, %v6469_v63 }
0x13b7   : > { %v6615_v36 = vmul.f32 %v6583_v25, %v6469_v63  ;;  %v6616_v50 = vmul.f32 %v6584_v58, %v6518_v17  ;;  %v6772_v51 = vadd.f32 1.0, %v8846_v26  ;;  %8847 = vtanh.f32 %v6709_v56 }
0x13b8   : > { %v7062_v28 = vadd.f32 %v7027_v18, %v12925_v23  ;;  %v6803_v0 = vmul.f32 %v6771_v30, %v6547_v39  ;;  %8849 = vtanh.f32 %v6710_v13  ;;  %v6550_v25 = vmul.f32 0.5, %v13145_v2 }
0x13b9   : > { %v6804_v33 = vmul.f32 %v6772_v51, %v6548_v49  ;;  %v6647_v62 = vmul.f32 %v6615_v36, %v6469_v63  ;;  %v6648_v47 = vmul.f32 %v6616_v50, %v6518_v17 }
0x13ba   : > { %7078 = vxpose.xlu1.b32.cont [4/16] %v7062_v28, 128  ;;  %v6823_v20 = vpack.c.bf16 %v6803_v0, %v6801_v8 }
0x13bb   : > { %v6980_v29 = vpop.f32.mrf.mxu0  ;;  %v6824_v59 = vpack.c.bf16 %v6804_v33, %v6802_v21  ;;  %v6679_v16 = vadd.f32 %v6647_v62, %v6469_v63  ;;  %v6680_v38 = vadd.f32 %v6648_v47, %v6518_v17  ;;  %v7029_v32 = vpop.f32.mrf.mxu1 }
0x13bc   : > { %v6981_v11 = vadd.f32 %v13091_v4, %v6980_v29  ;;  %6994 = vmatmul.bf16.gmra.mxu0 %v6823_v20 }
0x13bd   : > { %7043 = vmatmul.bf16.gmra.mxu1 %v6824_v59  ;;  %v6711_v23 = vmul.f32 0.7978846, %v6679_v16  ;;  %v6712_v40 = vmul.f32 0.7978846, %v6680_v38  ;;  %v8848_v7 = vpop.eup %8847 }
0x13be   : > { %v7030_v35 = vadd.f32 %v7029_v32, %v6981_v11  ;;  %v8850_v22 = vpop.eup %8849  ;;  %v6773_v44 = vadd.f32 1.0, %v8848_v7 }
0x13bf   : > { %8851 = vtanh.f32 %v6711_v23  ;;  %v6774_v57 = vadd.f32 1.0, %v8850_v22 }
0x13c0   : > { %v7063_v24 = vadd.f32 %v7030_v35, %v12947_v5  ;;  %8853 = vtanh.f32 %v6712_v40  ;;  %v6552_v5 = vmul.f32 0.5, %v6518_v17  ;;  %v6805_v27 = vmul.f32 %v6773_v44, %v6549_v9 }
0x13c1   : > { %v6806_v18 = vmul.f32 %v6774_v57, %v6550_v25 }
0x13c2   : > { %7079 = vxpose.xlu1.b32.cont [5/16] %v7063_v24, 128 }
0x13c3   : > { %v6982_v52 = vpop.f32.mrf.mxu0  ;;  %v7031_v60 = vpop.f32.mrf.mxu1 }
0x13c4   : > { %v6983_v42 = vadd.f32 %v13091_v4, %v6982_v52 }
0x13c5   : > { %v8852_v48 = vpop.eup %8851 }
0x13c6   : > { %v8854_v41 = vpop.eup %8853  ;;  %v7032_v10 = vadd.f32 %v7031_v60, %v6983_v42  ;;  %v6775_v1 = vadd.f32 1.0, %v8852_v48 }
0x13c7   : > { %v6776_v58 = vadd.f32 1.0, %v8854_v41 }
0x13c8   : > { %v7064_v3 = vadd.f32 %v7032_v10, %v12950_v15  ;;  %v6807_v26 = vmul.f32 %v6775_v1, %v6551_v6 }
0x13c9   : > { %v6808_v39 = vmul.f32 %v6776_v58, %v6552_v5 }
0x13ca   : > { %7080 = vxpose.xlu1.b32.cont [6/16] %v7064_v3, 128  ;;  %v6825_v30 = vpack.c.bf16 %v6807_v26, %v6805_v27 }
0x13cb   : > { %v6826_v49 = vpack.c.bf16 %v6808_v39, %v6806_v18 }
0x13cc   : > { %6999 = vmatmul.bf16.gmra.mxu0 %v6825_v30 }
0x13cd   : > { %7048 = vmatmul.bf16.gmra.mxu1 %v6826_v49 }
0x13ea   : > { %v6985_v36 = vpop.f32.mrf.mxu0 }
0x13eb   : > { %v6986_v46 = vadd.f32 %v13091_v4, %v6985_v36  ;;  %v7034_v63 = vpop.f32.mrf.mxu1 }
0x13ed   : > { %v7035_v50 = vadd.f32 %v7034_v63, %v6986_v46 }
0x13ef   : > { %v7065_v2 = vadd.f32 %v7035_v50, %v12966_v14 }
0x13f1   : > { %7081 = vxpose.xlu1.b32.cont [7/16] %v7065_v2, 128 }
0x13f2   : > { %v6987_v17 = vpop.f32.mrf.mxu0 }
0x13f3   : > { %v6988_v15 = vadd.f32 %v13091_v4, %v6987_v17  ;;  %v7036_v51 = vpop.f32.mrf.mxu1 }
0x13f5   : > { %v7037_v56 = vadd.f32 %v7036_v51, %v6988_v15 }
0x13f7   : > { %v7066_v28 = vadd.f32 %v7037_v56, %v12969_v61 }
0x13f9   : > { %7082 = vxpose.xlu1.b32.cont [8/16] %v7066_v28, 128 }
0x1404   : > { %v6471_v8 = vpop.f32.mrf.mxu2  ;;  %v6520_v0 = vpop.f32.mrf.mxu3 }
0x1405   : > { %v6472_v13 = vadd.f32 %v6471_v8, %v12976_v43  ;;  %v6521_v21 = vadd.f32 %v6520_v0, %v12978_v53 }
0x1407   : > { %v6585_v33 = vmul.f32 0.044715, %v6472_v13  ;;  %v6586_v62 = vmul.f32 0.044715, %v6521_v21  ;;  %v6553_v1 = vmul.f32 0.5, %v6472_v13  ;;  %v6554_v58 = vmul.f32 0.5, %v6521_v21 }
0x1409   : > { %v6617_v47 = vmul.f32 %v6585_v33, %v6472_v13  ;;  %v6618_v20 = vmul.f32 %v6586_v62, %v6521_v21 }
0x140b   : > { %v6649_v14 = vmul.f32 %v6617_v47, %v6472_v13  ;;  %v6650_v29 = vmul.f32 %v6618_v20, %v6521_v21 }
0x140c   : > { %v6473_v59 = vpop.f32.mrf.mxu2  ;;  %v6522_v16 = vpop.f32.mrf.mxu3 }
0x140d   : > { %v6474_v38 = vadd.f32 %v6473_v59, %v12976_v43  ;;  %v6523_v11 = vadd.f32 %v6522_v16, %v12978_v53  ;;  %v6681_v61 = vadd.f32 %v6649_v14, %v6472_v13  ;;  %v6682_v32 = vadd.f32 %v6650_v29, %v6521_v21 }
0x140f   : > { %v6587_v23 = vmul.f32 0.044715, %v6474_v38  ;;  %v6588_v40 = vmul.f32 0.044715, %v6523_v11  ;;  %v6713_v7 = vmul.f32 0.7978846, %v6681_v61 }
0x1410   : > { %v6714_v22 = vmul.f32 0.7978846, %v6682_v32  ;;  %v6555_v25 = vmul.f32 0.5, %v6474_v38  ;;  %v6556_v3 = vmul.f32 0.5, %v6523_v11 }
0x1411   : > { %v6619_v35 = vmul.f32 %v6587_v23, %v6474_v38  ;;  %v6620_v24 = vmul.f32 %v6588_v40, %v6523_v11  ;;  %8855 = vtanh.f32 %v6713_v7 }
0x1412   : > { %8857 = vtanh.f32 %v6714_v22 }
0x1413   : > { %v6651_v52 = vmul.f32 %v6619_v35, %v6474_v38  ;;  %v6652_v42 = vmul.f32 %v6620_v24, %v6523_v11 }
0x1415   : > { %v6683_v44 = vadd.f32 %v6651_v52, %v6474_v38  ;;  %v6684_v48 = vadd.f32 %v6652_v42, %v6523_v11 }
0x1417   : > { %v6715_v60 = vmul.f32 0.7978846, %v6683_v44  ;;  %v6716_v57 = vmul.f32 0.7978846, %v6684_v48  ;;  %v8856_v43 = vpop.eup %8855 }
0x1418   : > { %v8858_v53 = vpop.eup %8857  ;;  %v6777_v41 = vadd.f32 1.0, %v8856_v43 }
0x1419   : > { %8859 = vtanh.f32 %v6715_v60  ;;  %v6778_v9 = vadd.f32 1.0, %v8858_v53 }
0x141a   : > { %8861 = vtanh.f32 %v6716_v57  ;;  %v6809_v26 = vmul.f32 %v6777_v41, %v6553_v1 }
0x141b   : > { %v6810_v39 = vmul.f32 %v6778_v9, %v6554_v58 }
0x141f   : > { %v8860_v10 = vpop.eup %8859 }
0x1420   : > { %v8862_v6 = vpop.eup %8861  ;;  %v6779_v5 = vadd.f32 1.0, %v8860_v10 }
0x1421   : > { %v6780_v27 = vadd.f32 1.0, %v8862_v6 }
0x1422   : > { %v6811_v18 = vmul.f32 %v6779_v5, %v6555_v25 }
0x1423   : > { %v6812_v30 = vmul.f32 %v6780_v27, %v6556_v3 }
0x1424   : > { %v6827_v49 = vpack.c.bf16 %v6811_v18, %v6809_v26 }
0x1425   : > { %v6828_v36 = vpack.c.bf16 %v6812_v30, %v6810_v39 }
0x1426   : > { %7004 = vmatmul.bf16.gmra.mxu0 %v6827_v49 }
0x1427   : > { %7053 = vmatmul.bf16.gmra.mxu1 %v6828_v36 }
0x1429   : > { %v6990_v46 = vpop.f32.mrf.mxu0 }
0x142a   : > { %v6991_v63 = vadd.f32 %v13091_v4, %v6990_v46  ;;  %v7039_v50 = vpop.f32.mrf.mxu1 }
0x142c   : > { %v7040_v2 = vadd.f32 %v7039_v50, %v6991_v63 }
0x142e   : > { %v7067_v17 = vadd.f32 %v7040_v2, %v13000_v55 }
0x1430   : > { %7083 = vxpose.xlu1.b32.cont [9/16] %v7067_v17, 128 }
0x1431   : > { %v6992_v15 = vpop.f32.mrf.mxu0 }
0x1432   : > { %v6993_v51 = vadd.f32 %v13091_v4, %v6992_v15  ;;  %v7041_v56 = vpop.f32.mrf.mxu1 }
0x1434   : > { %v7042_v28 = vadd.f32 %v7041_v56, %v6993_v51 }
0x1436   : > { %v7068_v8 = vadd.f32 %v7042_v28, %v13003_v34 }
0x1438   : > { %7084 = vxpose.xlu1.b32.cont [10/16] %v7068_v8, 128 }
0x1439   : > { %v6995_v0 = vpop.f32.mrf.mxu0 }
0x143a   : > { %v6996_v13 = vadd.f32 %v13091_v4, %v6995_v0  ;;  %v7044_v21 = vpop.f32.mrf.mxu1 }
0x143c   : > { %v7045_v33 = vadd.f32 %v7044_v21, %v6996_v13 }
0x143e   : > { %v7069_v62 = vadd.f32 %v7045_v33, %v13023_v31 }
0x1440   : > { %7085 = vxpose.xlu1.b32.cont [11/16] %v7069_v62, 128 }
0x1441   : > { %v6997_v47 = vpop.f32.mrf.mxu0 }
0x1442   : > { %v6998_v55 = vadd.f32 %v13091_v4, %v6997_v47  ;;  %v7046_v20 = vpop.f32.mrf.mxu1 }
0x1444   : > { %v7047_v14 = vadd.f32 %v7046_v20, %v6998_v55 }
0x1446   : > { %v7070_v29 = vadd.f32 %v7047_v14, %v13026_v19 }
0x1448   : > { %7086 = vxpose.xlu1.b32.cont [12/16] %v7070_v29, 128 }
0x1449   : > { %v7000_v59 = vpop.f32.mrf.mxu0 }
0x144a   : > { %v7001_v34 = vadd.f32 %v13091_v4, %v7000_v59  ;;  %v7049_v16 = vpop.f32.mrf.mxu1 }
0x144c   : > { %v7050_v38 = vadd.f32 %v7049_v16, %v7001_v34 }
0x144e   : > { %v7071_v11 = vadd.f32 %v7050_v38, %v13064_v12 }
0x1450   : > { %7087 = vxpose.xlu1.b32.cont [13/16] %v7071_v11, 128 }
0x1451   : > { %v7002_v61 = vpop.f32.mrf.mxu0 }
0x1452   : > { %v7003_v31 = vadd.f32 %v13091_v4, %v7002_v61  ;;  %v7051_v32 = vpop.f32.mrf.mxu1 }
0x1454   : > { %v7052_v23 = vadd.f32 %v7051_v32, %v7003_v31 }
0x1456   : > { %v7072_v40 = vadd.f32 %v7052_v23, %v13067_v37 }
0x1458   : > { %7088 = vxpose.xlu1.b32.cont [14/16] %v7072_v40, 128 }
0x14a3   : > { %v7005_v19 = vpop.f32.mrf.mxu0 }
0x14a4   : > { %v7006_v35 = vadd.f32 %v13091_v4, %v7005_v19  ;;  %v7054_v24 = vpop.f32.mrf.mxu1 }
0x14a6   : > { %v7055_v7 = vadd.f32 %v7054_v24, %v7006_v35 }
0x14a8   : > { %v7073_v12 = vadd.f32 %v7055_v7, %v13104_v54 }
0x14aa   : > { %7089 = vxpose.xlu1.b32.cont [15/16] %v7073_v12, 128 }
0x14ab   : > { %v7007_v22 = vpop.f32.mrf.mxu0 }
0x14ac   : > { %v7008_v52 = vadd.f32 %v13091_v4, %v7007_v22  ;;  %v7056_v42 = vpop.f32.mrf.mxu1 }
0x14ae   : > { %v7057_v44 = vadd.f32 %v7056_v42, %v7008_v52 }
0x14b0   : > { %v7074_v37 = vadd.f32 %v7057_v44, %v13106_v45 }
0x14b2   : > { %7090 = vxpose.xlu1.b32.end [16/16] %v7074_v37, 128 }
0x14de   : > { %v7091_v48 = vpop.trf.xlu1 }
0x14df   : > { %7107 = vst [vmem:[%s9719_s10] sm:$0xff] %v7091_v48 }
0x14e6   : > { %v7092_v60 = vpop.trf.xlu1 }
0x14e7   : > { %7108 = vst [vmem:[%s9719_s10 + $0x8] sm:$0xff] %v7092_v60 }
0x14ee   : > { %v7093_v54 = vpop.trf.xlu1 }
0x14ef   : > { %7109 = vst [vmem:[%s9719_s10 + $0x10] sm:$0xff] %v7093_v54 }
0x14f6   : > { %v7094_v57 = vpop.trf.xlu1 }
0x14f7   : > { %7110 = vst [vmem:[%s9719_s10 + $0x18] sm:$0xff] %v7094_v57 }
0x14fe   : > { %v7095_v4 = vpop.trf.xlu1 }
0x14ff   : > { %7111 = vst [vmem:[%s9719_s10 + $0x20] sm:$0xff] %v7095_v4 }
0x1506   : > { %v7096_v43 = vpop.trf.xlu1 }
0x1507   : > { %7112 = vst [vmem:[%s9719_s10 + $0x28] sm:$0xff] %v7096_v43 }
0x150e   : > { %v7097_v45 = vpop.trf.xlu1 }
0x150f   : > { %7113 = vst [vmem:[%s9719_s10 + $0x30] sm:$0xff] %v7097_v45 }
0x1516   : > { %v7098_v53 = vpop.trf.xlu1 }
0x1517   : > { %7114 = vst [vmem:[%s9719_s10 + $0x38] sm:$0xff] %v7098_v53 }
0x151e   : > { %v7099_v41 = vpop.trf.xlu1 }
0x151f   : > { %7115 = vst [vmem:[%s9719_s10 + $0x40] sm:$0xff] %v7099_v41 }
0x1526   : > { %v7100_v10 = vpop.trf.xlu1 }
0x1527   : > { %7116 = vst [vmem:[%s9719_s10 + $0x48] sm:$0xff] %v7100_v10 }
0x152e   : > { %v7101_v9 = vpop.trf.xlu1 }
0x152f   : > { %7117 = vst [vmem:[%s9719_s10 + $0x50] sm:$0xff] %v7101_v9 }
0x1536   : > { %v7102_v6 = vpop.trf.xlu1 }
0x1537   : > { %7118 = vst [vmem:[%s9719_s10 + $0x58] sm:$0xff] %v7102_v6 }
0x153e   : > { %v7103_v1 = vpop.trf.xlu1 }
0x153f   : > { %7119 = vst [vmem:[%s9719_s10 + $0x60] sm:$0xff] %v7103_v1 }
0x1546   : > { %v7104_v25 = vpop.trf.xlu1 }
0x1547   : > { %7120 = vst [vmem:[%s9719_s10 + $0x68] sm:$0xff] %v7104_v25 }
0x154e   : > { %v7105_v5 = vpop.trf.xlu1 }
0x154f   : > { %7121 = vst [vmem:[%s9719_s10 + $0x70] sm:$0xff] %v7105_v5 }
0x1556   : > { %v7106_v58 = vpop.trf.xlu1 }
0x1557   : > { %7122 = vst [vmem:[%s9719_s10 + $0x78] sm:$0xff] %v7106_v58 }
0x1558   : > { %9222 = shalt.err (!%p9219_p11)
}
0x1559   : > { %s9363_s9 = smov 128   ;;  %s9364_s10 = smov 256  }
0x155a   : > { %s9365_s18 = smov 8  }
0x155b   : > { %8095 = dma.vmem_to_hbm [thread:$0]  (%p9626_p2), %s7138_s8, 2048, %s7140_s14, %s7124_s26, %s9363_s9, %s9364_s10, %s9365_s18  }
0x155c PF: > { %p8155_p12 = scmp.ge.s32.totalorder %s9341_s2, 2  ;;  %s7154_s12 = sand.u32 1, %s9313_s30  }
0x155d   : > { %s7155_s1 = scalar_lea.sflag [#allocation5], %s7154_s12 }
0x155e   : > { %p8133_p13 = pnand %p8155_p12, %p9632_p4 }
0x1560   : > { %p8134_p6 = pneg %p8133_p13 }
0x1562   : > { %9296 = dma.done.wait (%p8134_p6), %s7155_s1, 2048  }
0x1563   : > { %9298 = vsyncadd (%p8134_p6), %s7155_s1, 4294965248  ;;  %s41_s2 = sadd.s32 1, %s9341_s2   ;;  %s13683_s27 = sld [smem:[#allocation31_spill]] }
0x1564   : > { %p38_p9 = scmp.ge.s32.totalorder %s41_s2, 6   ;;  %s13684_s11 = smov %s13696_s28 }
0x1565   : > { %s13685_s4 = sld [smem:[#allocation35_spill]]  ;;  %s13686_s28 = smov %s9309_s29 }
0x1566   : > { %s13687_s29 = smov %s9655_s6  ;;  %s13688_s30 = smov %s9317_s0 }
0x1567   : > { %s13689_s0 = smov %s9321_s19  ;;  %s13690_s19 = smov %s9640_s24 }
0x1568   : > { %s13691_s1 = smov %s9333_s21  ;;  %s13692_s20 = smov %s9337_s22 }
0x1569   : > { %s13693_s21 = smov %s13684_s11  ;;  %40 = sbr.rel (!%p38_p9) target bundleno = 35 (0x23), region = 193 }
0x156b   : > { %s13694_s22 = smov %s13685_s4 }
0x156e   :  { %7161 = vsyncpa [#allocation4], 1 }
0x156f   :  { %7163 = vsyncpa [#allocation4 + $0x1], 1 }
0x1570   :  { %7164 = vsyncpa [#allocation7], 1 }
0x1571   :  { %7166 = vsyncpa [#allocation7 + $0x1], 1 }
0x1572   :  { %7167 = vsyncpa [#allocation10], 1 }
0x1573   :  { %7168 = vsyncpa [#allocation13], 1 }
0x1574   :  { %7169 = vsyncpa [#allocation16], 1 }
0x1575   :  { %7170 = vsyncpa [#allocation19], 1 }
0x1576   :  { %7171 = vsyncpa [#allocation5], 1 }
0x1577   :  { %7173 = vsyncpa [#allocation5 + $0x1], 1 }

</bundles_post_ra>
